<compile_context>
chip_gen: v7x
topology: tpu7x:2x2x1
jax: 0.10.0
libtpu: 0.0.40
codegen_flags: <defaults>
</compile_context>

<pallas_src>
import functools

import jax
import jax.numpy as jnp
from jax import lax
from jax.experimental import pallas as pl
from jax.experimental.pallas import tpu as pltpu

_EPS = 1e-5       # nn.BatchNorm2d default eps
_LANE = 128       # channel dims padded to lane width -> dense matmuls / stores
_WALIGN = 16      # output-width alignment so bf16 sublane merges are layout-preserving


def _round_up(x, m):
    return (x + m - 1) // m * m


def _vmem_capacity_bytes():
    """Physical per-core VMEM (generation aware, conservative fallback)."""
    try:
        return int(pltpu.get_tpu_info().vmem_capacity_bytes)
    except Exception:
        pass
    try:
        kind = jax.devices()[0].device_kind.lower()
    except Exception:
        kind = ""
    if any(s in kind for s in ("v4", "v5", "v6")):
        return 128 * 1024 * 1024
    return 64 * 1024 * 1024      # v7x-sized / unknown: stay safe


def _step_vmem_bytes(tile_h, win, wo, cp, pp, const_bufs):
    """Rough per-grid-step VMEM footprint (double-buffered activations)."""
    thp2 = tile_h + 2
    act_in = 2 * (tile_h * win * cp * 4) + 2 * 2 * (win * cp * 4)   # x + 2 halo rows
    act_out = 2 * (tile_h * wo * cp * 4)                            # output block
    consts = const_bufs * ((cp * pp + 9 * pp * pp + pp * cp) * 2 + 8 * cp * 4)
    scratch = thp2 * win * pp * 2                                   # y1 (bf16)
    # generous allowance for in-kernel temporaries (conv2 operand, f32 partials, y3)
    tmp = tile_h * wo * (3 * pp * 2 + 2 * pp * 4 + 2 * cp * 4) + thp2 * win * pp * 4
    return act_in + act_out + consts + scratch + tmp


def _pick_tile_h(n, h, win, wo, cp, pp, budget_bytes, const_bufs):
    divisors = [d for d in range(1, h + 1) if h % d == 0]
    fitting = [d for d in divisors
               if _step_vmem_bytes(d, win, wo, cp, pp, const_bufs) <= budget_bytes]
    if not fitting:
        fitting = [1]     # smallest tile; compiler will complain if even this is too big
    if n == 1:            # keep >= 2 grid steps so both v7x TensorCores get work
        multi = [d for d in fitting if h // d >= 2]
        if multi:
            return max(multi)
    return max(fitting)


# ------------------------------ Pallas kernel ------------------------------ #

def _bottleneck_kernel(x_ref, top_ref, bot_ref, w1_ref, w2_ref, w3_ref, sb_ref,
                       o_ref, y1_ref, *, w_img):
    """Fused Bottleneck forward.  One grid step = one image x one tile of `th` rows.

      x_ref   (1, th, WIN, cp) f32   col 0 = conv pad, cols 1..w = image, cols > w = 0,
                                     channels zero-padded to cp
      top/bot (1, 1, WIN, cp)  f32   image row just above / below the tile (zeros at edges)
      w1_ref  (cp, pp)         bf16  1x1 conv1 (ternary, exact in bf16)
      w2_ref  (3, 3*pp, pp)    bf16  3x3 conv2; [kw, kh*pp + ci, co]
      w3_ref  (pp, cp)         bf16  1x1 conv3
      sb_ref  (8, cp)          f32   rows 0..5 = s1,b1,s2,b2,s3,b3 (folded BN), rows 6,7 = 0
      o_ref   (1, th, WO, cp)  f32   output (col j = image col j; cols >= w are junk,
                                     sliced off in the wrapper)
      y1_ref  (th+2, WIN, pp)  bf16  scratch: halo'd conv1 output

    Layout invariants: WIN % 8 == 0 (f32 sublane merges) and WO % 16 == 0 (bf16 sublane
    merges), so every reshape below is layout-preserving (no VMEM relayout copies).
    """
    _, th, win, cp = x_ref.shape
    pp = w1_ref.shape[1]
    wo = o_ref.shape[2]
    thp2 = th + 2

    t = pl.program_id(1)
    n_t = pl.num_programs(1)

    s1, b1 = sb_ref[0:1, 0:pp], sb_ref[1:2, 0:pp]
    s2, b2 = sb_ref[2:3, 0:pp], sb_ref[3:4, 0:pp]
    s3, b3 = sb_ref[4:5, :], sb_ref[5:6, :]

    # ---- conv1 (1x1) + bn1 + hardtanh, written straight into the y1 scratch -------
    w1 = w1_ref[...]

    def conv1_bn_htanh(rows_f32):                    # (r, WIN, cp) f32 -> (r, WIN, pp) f32
        r = rows_f32.shape[0]
        a = rows_f32.reshape(r * win, cp).astype(jnp.bfloat16)   # reshape in f32: free
        y = jnp.dot(a, w1, preferred_element_type=jnp.float32)
        y = jnp.clip(y * s1 + b1, -1.0, 1.0)
        return y.reshape(r, win, pp)                 # f32 reshape: free

    xv = x_ref[0]                                    # (th, WIN, cp) f32; reused for residual
    # At the global top/bottom of the image conv2's padding=1 wants zero rows: scale the
    # tiny 1-row halo results by a {0,1} scalar (replaces the old full-tile iota mask).
    keep_top = jnp.where(t > 0, 1.0, 0.0)
    keep_bot = jnp.where(t < n_t - 1, 1.0, 0.0)
    y1_ref[0:1] = (keep_top * conv1_bn_htanh(top_ref[0])).astype(jnp.bfloat16)
    y1_ref[1:th + 1] = conv1_bn_htanh(xv).astype(jnp.bfloat16)
    y1_ref[th + 1:thp2] = (keep_bot * conv1_bn_htanh(bot_ref[0])).astype(jnp.bfloat16)

    # conv2's padding=1 also needs zeros in the two columns just outside the image
    # (bn1's bias makes them nonzero otherwise); zero exactly those two columns.
    zcol = jnp.zeros((thp2, 1, pp), jnp.bfloat16)
    y1_ref[:, 0:1, :] = zcol
    y1_ref[:, w_img + 1:w_img + 2, :] = zcol

    # ---- conv2 (3x3, pad=1): 3 fat MXU matmuls (3 kh taps stacked along K) ---------
    y1 = y1_ref[...]                                 # (thp2, WIN, pp) bf16
    acc = None
    for kw in range(3):
        xw = y1[:, kw:kw + wo, :]                    # one sublane shift per kw (inherent)
        op = jnp.concatenate([xw[0:th], xw[1:th + 1], xw[2:th + 2]], axis=-1)
        op = op.reshape(th * wo, 3 * pp)             # WO % 16 == 0 -> layout-preserving
        part = jnp.dot(op, w2_ref[kw], preferred_element_type=jnp.float32)
        acc = part if acc is None else acc + part
    y2 = jnp.clip(acc * s2 + b2, -1.0, 1.0).astype(jnp.bfloat16)   # (th*WO, pp)

    # ---- conv3 (1x1) + bn3 + residual (residual stays f32) -------------------------
    y3 = jnp.dot(y2, w3_ref[...], preferred_element_type=jnp.float32)   # (th*WO, cp)
    res = xv[:, 1:wo + 1, :].reshape(th * wo, cp)    # image cols 0..WO-1 of the input
    out = y3 * s3 + b3 + res
    o_ref[0] = out.reshape(th, wo, cp).astype(o_ref.dtype)


# --------------------------------- JAX glue --------------------------------- #

def ternarize(w, delta):
    # TODO(synk): exact TernarizeConv2d threshold rule; delta * max|w| used here.
    thr = delta * jnp.max(jnp.abs(w))
    return jnp.where(w > thr, 1.0, jnp.where(w < -thr, -1.0, 0.0)).astype(jnp.float32)


def _fold_bn(gamma, beta, mean, var):
    scale = gamma / jnp.sqrt(var + _EPS)
    bias = beta - mean * scale
    return scale.astype(jnp.float32), bias.astype(jnp.float32)


def _pad_vec(vec, n):
    return jnp.zeros((n,), jnp.float32).at[:vec.shape[0]].set(vec)


def bottleneck_forward(x_nchw, params, delta=0.3, tile_h=None,
                       single_buffer_consts=True, out_dtype=jnp.float32):
    """Bottleneck.forward (downsample=None, stride=1, eval-mode BN, no do_bntan).

    TODO(synk): pass out_dtype=jnp.bfloat16 to halve output HBM traffic in bf16 nets.
    """
    n, cin, h, w = x_nchw.shape

    w1 = ternarize(params["w1"], delta)              # (planes, cin, 1, 1)
    w2 = ternarize(params["w2"], delta)              # (planes, planes, 3, 3)
    w3 = ternarize(params["w3"], delta)              # (4*planes, planes, 1, 1)
    planes = w1.shape[0]
    cexp = w3.shape[0]
    assert cexp == 4 * planes
    assert cin == cexp, "residual add requires inplanes == 4*planes (downsample=None)"

    cp = _round_up(cin, _LANE)                       # padded residual / output channels
    pp = _round_up(planes, _LANE)                    # padded bottleneck channels
    wo = _round_up(w, _WALIGN)                       # conv2/conv3/output width (bf16 merges)
    win = _round_up(wo + 2, 8)                       # conv1/input width (f32 merges)

    const_bufs = 1 if single_buffer_consts else 2
    vmem_cap = _vmem_capacity_bytes()
    vmem_limit = int(vmem_cap * 0.85)
    if tile_h is None:
        tile_h = _pick_tile_h(n, h, win, wo, cp, pp, int(vmem_limit * 0.85), const_bufs)
    # TODO(synk): partial row tiles (pl.cdiv grid + row masking) for non-divisible tile_h.
    assert h % tile_h == 0, (h, tile_h)
    n_t = h // tile_h

    # NHWC; col 0 = conv2 left pad, cols 1..w = image, cols > w = 0; channels padded to cp.
    x = jnp.transpose(x_nchw, (0, 2, 3, 1)).astype(jnp.float32)
    x = jnp.pad(x, ((0, 0), (0, 0), (1, win - 1 - w), (0, cp - cin)))   # (n, h, WIN, cp)

    # 1-row halos above/below each row tile (zero rows at the global image boundary).
    # TODO(synk): a single overlapping (tile_h+2)-row window would drop two tiny DMAs/step.
    xh = jnp.pad(x, ((0, 0), (1, 1), (0, 0), (0, 0)))                   # (n, h+2, WIN, cp)
    top = xh[:, 0:h:tile_h]                                             # (n, n_t, WIN, cp)
    bot = xh[:, tile_h + 1:h + 2:tile_h]                                # (n, n_t, WIN, cp)

    # Ternary weights as zero-padded bf16 matrices ({-1,0,+1} is exact in bf16).
    w1_p = (jnp.zeros((cp, pp), jnp.float32)
            .at[:cin, :planes].set(w1.reshape(planes, cin).T)
            .astype(jnp.bfloat16))
    w2_hwio = jnp.transpose(w2, (2, 3, 1, 0))                           # (kh, kw, ci, co)
    w2_p = (jnp.zeros((3, 3, pp, pp), jnp.float32)
            .at[:, :, :planes, :planes].set(w2_hwio)
            .transpose(1, 0, 2, 3)                                      # (kw, kh, ci, co)
            .reshape(3, 3 * pp, pp).astype(jnp.bfloat16))
    w3_p = (jnp.zeros((pp, cp), jnp.float32)
            .at[:planes, :cexp].set(w3.reshape(cexp, planes).T)
            .astype(jnp.bfloat16))

    # Folded eval-mode BatchNorm, consolidated into a single (8, cp) constant (one input
    # instead of six); padded channels get scale=bias=0 so they stay exactly zero.
    s1, b1 = _fold_bn(*params["bn1"])
    s2, b2 = _fold_bn(*params["bn2"])
    s3, b3 = _fold_bn(*params["bn3"])
    zrow = jnp.zeros((cp,), jnp.float32)
    sb = jnp.stack([_pad_vec(s1, cp), _pad_vec(b1, cp),
                    _pad_vec(s2, cp), _pad_vec(b2, cp),
                    _pad_vec(s3, cp), _pad_vec(b3, cp), zrow, zrow])

    # Constant operands never change across the grid: request a single VMEM buffer
    # (no double buffering) so large weights don't eat into the activation tile budget.
    const_mode = pl.Buffered(buffer_count=1) if single_buffer_consts else None

    def _const_spec(shape):
        imap = lambda i, j: (0,) * len(shape)
        if const_mode is None:
            return pl.BlockSpec(shape, imap)
        return pl.BlockSpec(shape, imap, pipeline_mode=const_mode)

    out_itemsize = 2 if out_dtype == jnp.bfloat16 else 4
    flops = 2 * n * ((h + 2 * n_t) * win * cp * pp
                     + h * wo * 9 * pp * pp + h * wo * pp * cp)
    bytes_accessed = ((x.size + top.size + bot.size) * 4
                      + (w1_p.size + w2_p.size + w3_p.size) * 2 + sb.size * 4
                      + n * h * wo * cp * out_itemsize)

    out = pl.pallas_call(
        functools.partial(_bottleneck_kernel, w_img=w),
        out_shape=jax.ShapeDtypeStruct((n, h, wo, cp), out_dtype),
        grid=(n, n_t),
        in_specs=[
            pl.BlockSpec((1, tile_h, win, cp), lambda i, j: (i, j, 0, 0)),  # x rows
            pl.BlockSpec((1, 1, win, cp), lambda i, j: (i, j, 0, 0)),       # top halo row
            pl.BlockSpec((1, 1, win, cp), lambda i, j: (i, j, 0, 0)),       # bottom halo row
            _const_spec((cp, pp)),                                          # w1
            _const_spec((3, 3 * pp, pp)),                                   # w2
            _const_spec((pp, cp)),                                          # w3
            _const_spec((8, cp)),                                           # folded BN consts
        ],
        out_specs=pl.BlockSpec((1, tile_h, wo, cp), lambda i, j: (i, j, 0, 0)),
        scratch_shapes=[pltpu.VMEM((tile_h + 2, win, pp), jnp.bfloat16)],
        compiler_params=pltpu.CompilerParams(
            dimension_semantics=("parallel", "parallel"),
            vmem_limit_bytes=vmem_limit),
        cost_estimate=pl.CostEstimate(flops=int(flops), transcendentals=0,
                                      bytes_accessed=int(bytes_accessed)),
    )(x, top, bot, w1_p, w2_p, w3_p, sb)

    out = out[:, :, :w, :cexp]                          # drop width / channel padding
    return jnp.transpose(out, (0, 3, 1, 2)).astype(jnp.float32)      # -> NCHW


def bottleneck_reference(x_nchw, params, delta=0.3, match_kernel_precision=True):
    """Pure-JAX reference with the same bf16-operand / f32-accumulate precision."""
    op_dtype = jnp.bfloat16 if match_kernel_precision else jnp.float32
    x = jnp.transpose(x_nchw, (0, 2, 3, 1)).astype(jnp.float32)

    def conv(inp, w_oihw, pad=0):
        w_hwio = jnp.transpose(w_oihw, (2, 3, 1, 0)).astype(op_dtype)
        return lax.conv_general_dilated(
            inp.astype(op_dtype), w_hwio, (1, 1), [(pad, pad), (pad, pad)],
            dimension_numbers=("NHWC", "HWIO", "NHWC"),
            preferred_element_type=jnp.float32)

    def bn(inp, g, b, mu, var):
        return (inp - mu) / jnp.sqrt(var + _EPS) * g + b

    w1 = ternarize(params["w1"], delta)
    w2 = ternarize(params["w2"], delta)
    w3 = ternarize(params["w3"], delta)
    out = jnp.clip(bn(conv(x, w1), *params["bn1"]), -1.0, 1.0)
    out = jnp.clip(bn(conv(out, w2, pad=1), *params["bn2"]), -1.0, 1.0)
    out = bn(conv(out, w3), *params["bn3"]) + x
    return jnp.transpose(out, (0, 3, 1, 2))


# ----------------------------------- main ----------------------------------- #

if __name__ == "__main__":
    key = jax.random.PRNGKey(0)
    k_x, k1, k2, k3 = jax.random.split(key, 4)

    N, planes, H, W = 2, 4, 16, 16
    inplanes = planes * 4            # required for the residual add (no downsample)

    x = jax.random.normal(k_x, (N, inplanes, H, W), dtype=jnp.float32)

    def bn_params(c):
        return (jnp.linspace(0.9, 1.1, c, dtype=jnp.float32),     # gamma
                jnp.linspace(-0.1, 0.1, c, dtype=jnp.float32),    # beta
                jnp.linspace(-0.05, 0.05, c, dtype=jnp.float32),  # running_mean
                jnp.linspace(0.9, 1.2, c, dtype=jnp.float32))     # running_var

    params = {
        "w1": 0.1 * jax.random.normal(k1, (planes, inplanes, 1, 1), jnp.float32),
        "w2": 0.1 * jax.random.normal(k2, (planes, planes, 3, 3), jnp.float32),
        "w3": 0.1 * jax.random.normal(k3, (planes * 4, planes, 1, 1), jnp.float32),
        "bn1": bn_params(planes),
        "bn2": bn_params(planes),
        "bn3": bn_params(planes * 4),
    }

    ref = bottleneck_reference(x, params, delta=0.3)

    def run(**kw):
        f = jax.jit(functools.partial(bottleneck_forward, delta=0.3, **kw))
        return jax.block_until_ready(f(x, params))

    # Prefer single-buffered constant weights (pl.Buffered(1)); fall back to default
    # double buffering if this JAX build does not accept pipeline_mode on BlockSpec.
    try:
        out_auto = run()
        sbc = True
    except Exception:
        sbc = False
        out_auto = run(single_buffer_consts=False)

    assert out_auto.shape == (N, planes * 4, H, W), out_auto.shape
    err_auto = float(jnp.max(jnp.abs(out_auto - ref)))
    assert err_auto < 1e-2, err_auto

    # Forced 2 row-tiles: exercises the halo rows and the boundary-row masking.
    out_tiled = run(tile_h=8, single_buffer_consts=sbc)
    err_tiled = float(jnp.max(jnp.abs(out_tiled - ref)))
    assert err_tiled < 1e-2, err_tiled

    print("KERNEL_OK")
</pallas_src>

<mosaic_0001>
module attributes {stable_mosaic.version = 11 : i64} {
  func.func @_bottleneck_kernel(%arg0: i32, %arg1: i32, %arg2: memref<1x16x24x128xf32, #tpu.memory_space<vmem>>, %arg3: memref<1x1x24x128xf32, #tpu.memory_space<vmem>>, %arg4: memref<1x1x24x128xf32, #tpu.memory_space<vmem>>, %arg5: memref<128x128xbf16, #tpu.memory_space<vmem>>, %arg6: memref<3x384x128xbf16, #tpu.memory_space<vmem>>, %arg7: memref<128x128xbf16, #tpu.memory_space<vmem>>, %arg8: memref<8x128xf32, #tpu.memory_space<vmem>>, %arg9: memref<1x16x16x128xf32, #tpu.memory_space<vmem>>, %arg10: memref<18x24x128xbf16, #tpu.memory_space<vmem>>) attributes {dimension_semantics = [#tpu.dimension_semantics<parallel>, #tpu.dimension_semantics<parallel>], iteration_bounds = array<i64: 2, 1>, scalar_prefetch = 0 : i64, scratch_operands = 1 : i64, tpu.core_type = #tpu.core_type<tc>, window_params = [{transform_indices = @transform_0, window_bounds = array<i64: 1, 16, 24, 128>}, {transform_indices = @transform_1, window_bounds = array<i64: 1, 1, 24, 128>}, {transform_indices = @transform_2, window_bounds = array<i64: 1, 1, 24, 128>}, {pipeline_mode = #tpu.pipeline_mode<synchronous>, transform_indices = @transform_3, window_bounds = array<i64: 128, 128>}, {pipeline_mode = #tpu.pipeline_mode<synchronous>, transform_indices = @transform_4, window_bounds = array<i64: 3, 384, 128>}, {pipeline_mode = #tpu.pipeline_mode<synchronous>, transform_indices = @transform_5, window_bounds = array<i64: 128, 128>}, {pipeline_mode = #tpu.pipeline_mode<synchronous>, transform_indices = @transform_6, window_bounds = array<i64: 8, 128>}, {transform_indices = @transform_7, window_bounds = array<i64: 1, 16, 16, 128>}]} {
    %c0 = arith.constant 0 : index
    %c0_0 = arith.constant 0 : index
    %0 = vector.load %arg8[%c0, %c0_0] : memref<8x128xf32, #tpu.memory_space<vmem>>, vector<1x128xf32>
    %c1 = arith.constant 1 : index
    %c0_1 = arith.constant 0 : index
    %1 = vector.load %arg8[%c1, %c0_1] : memref<8x128xf32, #tpu.memory_space<vmem>>, vector<1x128xf32>
    %c2 = arith.constant 2 : index
    %c0_2 = arith.constant 0 : index
    %2 = vector.load %arg8[%c2, %c0_2] : memref<8x128xf32, #tpu.memory_space<vmem>>, vector<1x128xf32>
    %c3 = arith.constant 3 : index
    %c0_3 = arith.constant 0 : index
    %3 = vector.load %arg8[%c3, %c0_3] : memref<8x128xf32, #tpu.memory_space<vmem>>, vector<1x128xf32>
    %c4 = arith.constant 4 : index
    %c0_4 = arith.constant 0 : index
    %4 = vector.load %arg8[%c4, %c0_4] : memref<8x128xf32, #tpu.memory_space<vmem>>, vector<1x128xf32>
    %c5 = arith.constant 5 : index
    %c0_5 = arith.constant 0 : index
    %5 = vector.load %arg8[%c5, %c0_5] : memref<8x128xf32, #tpu.memory_space<vmem>>, vector<1x128xf32>
    %c0_6 = arith.constant 0 : index
    %c0_7 = arith.constant 0 : index
    %6 = vector.load %arg5[%c0_6, %c0_7] : memref<128x128xbf16, #tpu.memory_space<vmem>>, vector<128x128xbf16>
    %c0_8 = arith.constant 0 : index
    %c0_9 = arith.constant 0 : index
    %c0_10 = arith.constant 0 : index
    %c0_11 = arith.constant 0 : index
    %7 = vector.load %arg2[%c0_8, %c0_9, %c0_10, %c0_11] : memref<1x16x24x128xf32, #tpu.memory_space<vmem>>, vector<1x16x24x128xf32>
    %8 = vector.shape_cast %7 : vector<1x16x24x128xf32> to vector<16x24x128xf32>
    %c0_i32 = arith.constant 0 : i32
    %9 = arith.cmpi sgt, %arg1, %c0_i32 : i32
    %cst = arith.constant 1.000000e+00 : f32
    %cst_12 = arith.constant 0.000000e+00 : f32
    %10 = arith.select %9, %cst, %cst_12 : f32
    %c0_i32_13 = arith.constant 0 : i32
    %11 = arith.cmpi slt, %arg1, %c0_i32_13 : i32
    %cst_14 = arith.constant 1.000000e+00 : f32
    %cst_15 = arith.constant 0.000000e+00 : f32
    %12 = arith.select %11, %cst_14, %cst_15 : f32
    %c0_16 = arith.constant 0 : index
    %c0_17 = arith.constant 0 : index
    %c0_18 = arith.constant 0 : index
    %c0_19 = arith.constant 0 : index
    %13 = vector.load %arg3[%c0_16, %c0_17, %c0_18, %c0_19] : memref<1x1x24x128xf32, #tpu.memory_space<vmem>>, vector<1x1x24x128xf32>
    %14 = vector.shape_cast %13 : vector<1x1x24x128xf32> to vector<1x24x128xf32>
    %15 = vector.shape_cast %14 : vector<1x24x128xf32> to vector<24x128xf32>
    %16 = arith.truncf %15 : vector<24x128xf32> to vector<24x128xbf16>
    %cst_20 = arith.constant dense<0.000000e+00> : vector<24x128xf32>
    %17 = tpu.matmul %16, %6, %cst_20 {dimension_numbers = #tpu.dot_dimension_numbers<[1], [0], [0], [1], [0, 0, 1, 1], [], []>} : vector<24x128xbf16>, vector<128x128xbf16>, vector<24x128xf32> -> vector<24x128xf32>
    %18 = vector.broadcast %0 : vector<1x128xf32> to vector<24x128xf32>
    %19 = arith.mulf %17, %18 : vector<24x128xf32>
    %20 = vector.broadcast %1 : vector<1x128xf32> to vector<24x128xf32>
    %21 = arith.addf %19, %20 : vector<24x128xf32>
    %cst_21 = arith.constant -1.000000e+00 : f32
    %cst_22 = arith.constant 1.000000e+00 : f32
    %22 = vector.broadcast %cst_21 : f32 to vector<24x128xf32>
    %23 = arith.maximumf %22, %21 : vector<24x128xf32>
    %24 = vector.broadcast %cst_22 : f32 to vector<24x128xf32>
    %25 = arith.minimumf %24, %23 : vector<24x128xf32>
    %26 = vector.shape_cast %25 : vector<24x128xf32> to vector<1x24x128xf32>
    %27 = vector.broadcast %10 : f32 to vector<1x24x128xf32>
    %28 = arith.mulf %27, %26 : vector<1x24x128xf32>
    %29 = arith.truncf %28 : vector<1x24x128xf32> to vector<1x24x128xbf16>
    %c0_23 = arith.constant 0 : index
    %c0_24 = arith.constant 0 : index
    %c0_25 = arith.constant 0 : index
    %30 = vector.load %arg10[%c0_23, %c0_24, %c0_25] : memref<18x24x128xbf16, #tpu.memory_space<vmem>>, vector<1x24x128xbf16>
    tpu.vector_store %arg10[%c0_23, %c0_24, %c0_25], %29 {strides = array<i32>} : memref<18x24x128xbf16, #tpu.memory_space<vmem>>, vector<1x24x128xbf16>,
    %31 = vector.shape_cast %8 : vector<16x24x128xf32> to vector<384x128xf32>
    %32 = arith.truncf %31 : vector<384x128xf32> to vector<384x128xbf16>
    %cst_26 = arith.constant dense<0.000000e+00> : vector<384x128xf32>
    %33 = tpu.matmul %32, %6, %cst_26 {dimension_numbers = #tpu.dot_dimension_numbers<[1], [0], [0], [1], [0, 0, 1, 1], [], []>} : vector<384x128xbf16>, vector<128x128xbf16>, vector<384x128xf32> -> vector<384x128xf32>
    %34 = vector.broadcast %0 : vector<1x128xf32> to vector<384x128xf32>
    %35 = arith.mulf %33, %34 : vector<384x128xf32>
    %36 = vector.broadcast %1 : vector<1x128xf32> to vector<384x128xf32>
    %37 = arith.addf %35, %36 : vector<384x128xf32>
    %cst_27 = arith.constant -1.000000e+00 : f32
    %cst_28 = arith.constant 1.000000e+00 : f32
    %38 = vector.broadcast %cst_27 : f32 to vector<384x128xf32>
    %39 = arith.maximumf %38, %37 : vector<384x128xf32>
    %40 = vector.broadcast %cst_28 : f32 to vector<384x128xf32>
    %41 = arith.minimumf %40, %39 : vector<384x128xf32>
    %42 = vector.shape_cast %41 : vector<384x128xf32> to vector<16x24x128xf32>
    %43 = arith.truncf %42 : vector<16x24x128xf32> to vector<16x24x128xbf16>
    %c1_29 = arith.constant 1 : index
    %c0_30 = arith.constant 0 : index
    %c0_31 = arith.constant 0 : index
    %44 = vector.load %arg10[%c1_29, %c0_30, %c0_31] : memref<18x24x128xbf16, #tpu.memory_space<vmem>>, vector<16x24x128xbf16>
    tpu.vector_store %arg10[%c1_29, %c0_30, %c0_31], %43 {strides = array<i32>} : memref<18x24x128xbf16, #tpu.memory_space<vmem>>, vector<16x24x128xbf16>,
    %c0_32 = arith.constant 0 : index
    %c0_33 = arith.constant 0 : index
    %c0_34 = arith.constant 0 : index
    %c0_35 = arith.constant 0 : index
    %45 = vector.load %arg4[%c0_32, %c0_33, %c0_34, %c0_35] : memref<1x1x24x128xf32, #tpu.memory_space<vmem>>, vector<1x1x24x128xf32>
    %46 = vector.shape_cast %45 : vector<1x1x24x128xf32> to vector<1x24x128xf32>
    %47 = vector.shape_cast %46 : vector<1x24x128xf32> to vector<24x128xf32>
    %48 = arith.truncf %47 : vector<24x128xf32> to vector<24x128xbf16>
    %cst_36 = arith.constant dense<0.000000e+00> : vector<24x128xf32>
    %49 = tpu.matmul %48, %6, %cst_36 {dimension_numbers = #tpu.dot_dimension_numbers<[1], [0], [0], [1], [0, 0, 1, 1], [], []>} : vector<24x128xbf16>, vector<128x128xbf16>, vector<24x128xf32> -> vector<24x128xf32>
    %50 = vector.broadcast %0 : vector<1x128xf32> to vector<24x128xf32>
    %51 = arith.mulf %49, %50 : vector<24x128xf32>
    %52 = vector.broadcast %1 : vector<1x128xf32> to vector<24x128xf32>
    %53 = arith.addf %51, %52 : vector<24x128xf32>
    %cst_37 = arith.constant -1.000000e+00 : f32
    %cst_38 = arith.constant 1.000000e+00 : f32
    %54 = vector.broadcast %cst_37 : f32 to vector<24x128xf32>
    %55 = arith.maximumf %54, %53 : vector<24x128xf32>
    %56 = vector.broadcast %cst_38 : f32 to vector<24x128xf32>
    %57 = arith.minimumf %56, %55 : vector<24x128xf32>
    %58 = vector.shape_cast %57 : vector<24x128xf32> to vector<1x24x128xf32>
    %59 = vector.broadcast %12 : f32 to vector<1x24x128xf32>
    %60 = arith.mulf %59, %58 : vector<1x24x128xf32>
    %61 = arith.truncf %60 : vector<1x24x128xf32> to vector<1x24x128xbf16>
    %c17 = arith.constant 17 : index
    %c0_39 = arith.constant 0 : index
    %c0_40 = arith.constant 0 : index
    %62 = vector.load %arg10[%c17, %c0_39, %c0_40] : memref<18x24x128xbf16, #tpu.memory_space<vmem>>, vector<1x24x128xbf16>
    tpu.vector_store %arg10[%c17, %c0_39, %c0_40], %61 {strides = array<i32>} : memref<18x24x128xbf16, #tpu.memory_space<vmem>>, vector<1x24x128xbf16>,
    %cst_41 = arith.constant 0.000000e+00 : bf16
    %63 = vector.broadcast %cst_41 : bf16 to vector<18x1x128xbf16>
    %c0_42 = arith.constant 0 : index
    %c0_43 = arith.constant 0 : index
    %c0_44 = arith.constant 0 : index
    %64 = vector.load %arg10[%c0_42, %c0_43, %c0_44] : memref<18x24x128xbf16, #tpu.memory_space<vmem>>, vector<18x1x128xbf16>
    tpu.vector_store %arg10[%c0_42, %c0_43, %c0_44], %63 {strides = array<i32>} : memref<18x24x128xbf16, #tpu.memory_space<vmem>>, vector<18x1x128xbf16>,
    %c0_45 = arith.constant 0 : index
    %c17_46 = arith.constant 17 : index
    %c0_47 = arith.constant 0 : index
    %65 = vector.load %arg10[%c0_45, %c17_46, %c0_47] : memref<18x24x128xbf16, #tpu.memory_space<vmem>>, vector<18x1x128xbf16>
    tpu.vector_store %arg10[%c0_45, %c17_46, %c0_47], %63 {strides = array<i32>} : memref<18x24x128xbf16, #tpu.memory_space<vmem>>, vector<18x1x128xbf16>,
    %c0_48 = arith.constant 0 : index
    %c0_49 = arith.constant 0 : index
    %c0_50 = arith.constant 0 : index
    %66 = vector.load %arg10[%c0_48, %c0_49, %c0_50] : memref<18x24x128xbf16, #tpu.memory_space<vmem>>, vector<18x24x128xbf16>
    %67 = vector.extract_strided_slice %66 {offsets = [0, 0, 0], sizes = [18, 16, 128], strides = [1, 1, 1]} : vector<18x24x128xbf16> to vector<18x16x128xbf16>
    %68 = vector.extract_strided_slice %67 {offsets = [0, 0, 0], sizes = [16, 16, 128], strides = [1, 1, 1]} : vector<18x16x128xbf16> to vector<16x16x128xbf16>
    %69 = vector.extract_strided_slice %67 {offsets = [1, 0, 0], sizes = [16, 16, 128], strides = [1, 1, 1]} : vector<18x16x128xbf16> to vector<16x16x128xbf16>
    %70 = vector.extract_strided_slice %67 {offsets = [2, 0, 0], sizes = [16, 16, 128], strides = [1, 1, 1]} : vector<18x16x128xbf16> to vector<16x16x128xbf16>
    %71 = tpu.concatenate %68, %69, %70 in 2 : vector<16x16x128xbf16>, vector<16x16x128xbf16>, vector<16x16x128xbf16> -> vector<16x16x384xbf16>
    %72 = vector.shape_cast %71 : vector<16x16x384xbf16> to vector<256x384xbf16>
    %c0_51 = arith.constant 0 : index
    %c0_52 = arith.constant 0 : index
    %c0_53 = arith.constant 0 : index
    %73 = vector.load %arg6[%c0_51, %c0_52, %c0_53] : memref<3x384x128xbf16, #tpu.memory_space<vmem>>, vector<1x384x128xbf16>
    %74 = vector.shape_cast %73 : vector<1x384x128xbf16> to vector<384x128xbf16>
    %cst_54 = arith.constant dense<0.000000e+00> : vector<256x128xf32>
    %75 = tpu.matmul %72, %74, %cst_54 {dimension_numbers = #tpu.dot_dimension_numbers<[1], [0], [0], [1], [0, 0, 1, 1], [], []>} : vector<256x384xbf16>, vector<384x128xbf16>, vector<256x128xf32> -> vector<256x128xf32>
    %76 = vector.extract_strided_slice %66 {offsets = [0, 1, 0], sizes = [18, 16, 128], strides = [1, 1, 1]} : vector<18x24x128xbf16> to vector<18x16x128xbf16>
    %77 = vector.extract_strided_slice %76 {offsets = [0, 0, 0], sizes = [16, 16, 128], strides = [1, 1, 1]} : vector<18x16x128xbf16> to vector<16x16x128xbf16>
    %78 = vector.extract_strided_slice %76 {offsets = [1, 0, 0], sizes = [16, 16, 128], strides = [1, 1, 1]} : vector<18x16x128xbf16> to vector<16x16x128xbf16>
    %79 = vector.extract_strided_slice %76 {offsets = [2, 0, 0], sizes = [16, 16, 128], strides = [1, 1, 1]} : vector<18x16x128xbf16> to vector<16x16x128xbf16>
    %80 = tpu.concatenate %77, %78, %79 in 2 : vector<16x16x128xbf16>, vector<16x16x128xbf16>, vector<16x16x128xbf16> -> vector<16x16x384xbf16>
    %81 = vector.shape_cast %80 : vector<16x16x384xbf16> to vector<256x384xbf16>
    %c1_55 = arith.constant 1 : index
    %c0_56 = arith.constant 0 : index
    %c0_57 = arith.constant 0 : index
    %82 = vector.load %arg6[%c1_55, %c0_56, %c0_57] : memref<3x384x128xbf16, #tpu.memory_space<vmem>>, vector<1x384x128xbf16>
    %83 = vector.shape_cast %82 : vector<1x384x128xbf16> to vector<384x128xbf16>
    %cst_58 = arith.constant dense<0.000000e+00> : vector<256x128xf32>
    %84 = tpu.matmul %81, %83, %cst_58 {dimension_numbers = #tpu.dot_dimension_numbers<[1], [0], [0], [1], [0, 0, 1, 1], [], []>} : vector<256x384xbf16>, vector<384x128xbf16>, vector<256x128xf32> -> vector<256x128xf32>
    %85 = arith.addf %75, %84 : vector<256x128xf32>
    %86 = vector.extract_strided_slice %66 {offsets = [0, 2, 0], sizes = [18, 16, 128], strides = [1, 1, 1]} : vector<18x24x128xbf16> to vector<18x16x128xbf16>
    %87 = vector.extract_strided_slice %86 {offsets = [0, 0, 0], sizes = [16, 16, 128], strides = [1, 1, 1]} : vector<18x16x128xbf16> to vector<16x16x128xbf16>
    %88 = vector.extract_strided_slice %86 {offsets = [1, 0, 0], sizes = [16, 16, 128], strides = [1, 1, 1]} : vector<18x16x128xbf16> to vector<16x16x128xbf16>
    %89 = vector.extract_strided_slice %86 {offsets = [2, 0, 0], sizes = [16, 16, 128], strides = [1, 1, 1]} : vector<18x16x128xbf16> to vector<16x16x128xbf16>
    %90 = tpu.concatenate %87, %88, %89 in 2 : vector<16x16x128xbf16>, vector<16x16x128xbf16>, vector<16x16x128xbf16> -> vector<16x16x384xbf16>
    %91 = vector.shape_cast %90 : vector<16x16x384xbf16> to vector<256x384xbf16>
    %c2_59 = arith.constant 2 : index
    %c0_60 = arith.constant 0 : index
    %c0_61 = arith.constant 0 : index
    %92 = vector.load %arg6[%c2_59, %c0_60, %c0_61] : memref<3x384x128xbf16, #tpu.memory_space<vmem>>, vector<1x384x128xbf16>
    %93 = vector.shape_cast %92 : vector<1x384x128xbf16> to vector<384x128xbf16>
    %cst_62 = arith.constant dense<0.000000e+00> : vector<256x128xf32>
    %94 = tpu.matmul %91, %93, %cst_62 {dimension_numbers = #tpu.dot_dimension_numbers<[1], [0], [0], [1], [0, 0, 1, 1], [], []>} : vector<256x384xbf16>, vector<384x128xbf16>, vector<256x128xf32> -> vector<256x128xf32>
    %95 = arith.addf %85, %94 : vector<256x128xf32>
    %96 = vector.broadcast %2 : vector<1x128xf32> to vector<256x128xf32>
    %97 = arith.mulf %95, %96 : vector<256x128xf32>
    %98 = vector.broadcast %3 : vector<1x128xf32> to vector<256x128xf32>
    %99 = arith.addf %97, %98 : vector<256x128xf32>
    %cst_63 = arith.constant -1.000000e+00 : f32
    %cst_64 = arith.constant 1.000000e+00 : f32
    %100 = vector.broadcast %cst_63 : f32 to vector<256x128xf32>
    %101 = arith.maximumf %100, %99 : vector<256x128xf32>
    %102 = vector.broadcast %cst_64 : f32 to vector<256x128xf32>
    %103 = arith.minimumf %102, %101 : vector<256x128xf32>
    %104 = arith.truncf %103 : vector<256x128xf32> to vector<256x128xbf16>
    %c0_65 = arith.constant 0 : index
    %c0_66 = arith.constant 0 : index
    %105 = vector.load %arg7[%c0_65, %c0_66] : memref<128x128xbf16, #tpu.memory_space<vmem>>, vector<128x128xbf16>
    %cst_67 = arith.constant dense<0.000000e+00> : vector<256x128xf32>
    %106 = tpu.matmul %104, %105, %cst_67 {dimension_numbers = #tpu.dot_dimension_numbers<[1], [0], [0], [1], [0, 0, 1, 1], [], []>} : vector<256x128xbf16>, vector<128x128xbf16>, vector<256x128xf32> -> vector<256x128xf32>
    %107 = vector.extract_strided_slice %8 {offsets = [0, 1, 0], sizes = [16, 16, 128], strides = [1, 1, 1]} : vector<16x24x128xf32> to vector<16x16x128xf32>
    %108 = vector.shape_cast %107 : vector<16x16x128xf32> to vector<256x128xf32>
    %109 = vector.broadcast %4 : vector<1x128xf32> to vector<256x128xf32>
    %110 = arith.mulf %106, %109 : vector<256x128xf32>
    %111 = vector.broadcast %5 : vector<1x128xf32> to vector<256x128xf32>
    %112 = arith.addf %110, %111 : vector<256x128xf32>
    %113 = arith.addf %112, %108 : vector<256x128xf32>
    %114 = vector.shape_cast %113 : vector<256x128xf32> to vector<16x16x128xf32>
    %c0_68 = arith.constant 0 : index
    %c0_69 = arith.constant 0 : index
    %c0_70 = arith.constant 0 : index
    %c0_71 = arith.constant 0 : index
    %115 = vector.load %arg9[%c0_68, %c0_69, %c0_70, %c0_71] : memref<1x16x16x128xf32, #tpu.memory_space<vmem>>, vector<1x16x16x128xf32>
    %116 = vector.shape_cast %115 : vector<1x16x16x128xf32> to vector<16x16x128xf32>
    %117 = vector.shape_cast %114 : vector<16x16x128xf32> to vector<1x16x16x128xf32>
    tpu.vector_store %arg9[%c0_68, %c0_69, %c0_70, %c0_71], %117 {strides = array<i32>} : memref<1x16x16x128xf32, #tpu.memory_space<vmem>>, vector<1x16x16x128xf32>,
    return
  }
  func.func @transform_0(%arg0: i32, %arg1: i32) -> (i32, i32, i32, i32) {
    %c0_i32 = arith.constant 0 : i32
    %c0_i32_0 = arith.constant 0 : i32
    %c0_i32_1 = arith.constant 0 : i32
    return %arg0, %arg1, %c0_i32, %c0_i32_0 : i32, i32, i32, i32
  }
  func.func @transform_1(%arg0: i32, %arg1: i32) -> (i32, i32, i32, i32) {
    %c0_i32 = arith.constant 0 : i32
    %c0_i32_0 = arith.constant 0 : i32
    %c0_i32_1 = arith.constant 0 : i32
    return %arg0, %arg1, %c0_i32, %c0_i32_0 : i32, i32, i32, i32
  }
  func.func @transform_2(%arg0: i32, %arg1: i32) -> (i32, i32, i32, i32) {
    %c0_i32 = arith.constant 0 : i32
    %c0_i32_0 = arith.constant 0 : i32
    %c0_i32_1 = arith.constant 0 : i32
    return %arg0, %arg1, %c0_i32, %c0_i32_0 : i32, i32, i32, i32
  }
  func.func @transform_3(%arg0: i32, %arg1: i32) -> (i32, i32) {
    %c0_i32 = arith.constant 0 : i32
    %c0_i32_0 = arith.constant 0 : i32
    %c0_i32_1 = arith.constant 0 : i32
    return %c0_i32, %c0_i32_0 : i32, i32
  }
  func.func @transform_4(%arg0: i32, %arg1: i32) -> (i32, i32, i32) {
    %c0_i32 = arith.constant 0 : i32
    %c0_i32_0 = arith.constant 0 : i32
    %c0_i32_1 = arith.constant 0 : i32
    %c0_i32_2 = arith.constant 0 : i32
    return %c0_i32, %c0_i32_0, %c0_i32_1 : i32, i32, i32
  }
  func.func @transform_5(%arg0: i32, %arg1: i32) -> (i32, i32) {
    %c0_i32 = arith.constant 0 : i32
    %c0_i32_0 = arith.constant 0 : i32
    %c0_i32_1 = arith.constant 0 : i32
    return %c0_i32, %c0_i32_0 : i32, i32
  }
  func.func @transform_6(%arg0: i32, %arg1: i32) -> (i32, i32) {
    %c0_i32 = arith.constant 0 : i32
    %c0_i32_0 = arith.constant 0 : i32
    %c0_i32_1 = arith.constant 0 : i32
    return %c0_i32, %c0_i32_0 : i32, i32
  }
  func.func @transform_7(%arg0: i32, %arg1: i32) -> (i32, i32, i32, i32) {
    %c0_i32 = arith.constant 0 : i32
    %c0_i32_0 = arith.constant 0 : i32
    %c0_i32_1 = arith.constant 0 : i32
    return %arg0, %arg1, %c0_i32, %c0_i32_0 : i32, i32, i32, i32
  }
}

module attributes {stable_mosaic.version = 11 : i64} {
  func.func @_bottleneck_kernel(%arg0: i32, %arg1: i32, %arg2: memref<1x16x24x128xf32, #tpu.memory_space<vmem>>, %arg3: memref<1x1x24x128xf32, #tpu.memory_space<vmem>>, %arg4: memref<1x1x24x128xf32, #tpu.memory_space<vmem>>, %arg5: memref<128x128xbf16, #tpu.memory_space<vmem>>, %arg6: memref<3x384x128xbf16, #tpu.memory_space<vmem>>, %arg7: memref<128x128xbf16, #tpu.memory_space<vmem>>, %arg8: memref<8x128xf32, #tpu.memory_space<vmem>>, %arg9: memref<1x16x16x128xf32, #tpu.memory_space<vmem>>, %arg10: memref<18x24x128xbf16, #tpu.memory_space<vmem>>) attributes {dimension_semantics = [#tpu.dimension_semantics<parallel>, #tpu.dimension_semantics<parallel>], iteration_bounds = array<i64: 2, 1>, scalar_prefetch = 0 : i64, scratch_operands = 1 : i64, tpu.core_type = #tpu.core_type<tc>, window_params = [{transform_indices = @transform_0, window_bounds = array<i64: 1, 16, 24, 128>}, {transform_indices = @transform_1, window_bounds = array<i64: 1, 1, 24, 128>}, {transform_indices = @transform_2, window_bounds = array<i64: 1, 1, 24, 128>}, {pipeline_mode = #tpu.pipeline_mode<synchronous>, transform_indices = @transform_3, window_bounds = array<i64: 128, 128>}, {pipeline_mode = #tpu.pipeline_mode<synchronous>, transform_indices = @transform_4, window_bounds = array<i64: 3, 384, 128>}, {pipeline_mode = #tpu.pipeline_mode<synchronous>, transform_indices = @transform_5, window_bounds = array<i64: 128, 128>}, {pipeline_mode = #tpu.pipeline_mode<synchronous>, transform_indices = @transform_6, window_bounds = array<i64: 8, 128>}, {transform_indices = @transform_7, window_bounds = array<i64: 1, 16, 16, 128>}]} {
    %c0 = arith.constant 0 : index
    %c0_0 = arith.constant 0 : index
    %0 = vector.load %arg8[%c0, %c0_0] : memref<8x128xf32, #tpu.memory_space<vmem>>, vector<1x128xf32>
    %c1 = arith.constant 1 : index
    %c0_1 = arith.constant 0 : index
    %1 = vector.load %arg8[%c1, %c0_1] : memref<8x128xf32, #tpu.memory_space<vmem>>, vector<1x128xf32>
    %c2 = arith.constant 2 : index
    %c0_2 = arith.constant 0 : index
    %2 = vector.load %arg8[%c2, %c0_2] : memref<8x128xf32, #tpu.memory_space<vmem>>, vector<1x128xf32>
    %c3 = arith.constant 3 : index
    %c0_3 = arith.constant 0 : index
    %3 = vector.load %arg8[%c3, %c0_3] : memref<8x128xf32, #tpu.memory_space<vmem>>, vector<1x128xf32>
    %c4 = arith.constant 4 : index
    %c0_4 = arith.constant 0 : index
    %4 = vector.load %arg8[%c4, %c0_4] : memref<8x128xf32, #tpu.memory_space<vmem>>, vector<1x128xf32>
    %c5 = arith.constant 5 : index
    %c0_5 = arith.constant 0 : index
    %5 = vector.load %arg8[%c5, %c0_5] : memref<8x128xf32, #tpu.memory_space<vmem>>, vector<1x128xf32>
    %c0_6 = arith.constant 0 : index
    %c0_7 = arith.constant 0 : index
    %6 = vector.load %arg5[%c0_6, %c0_7] : memref<128x128xbf16, #tpu.memory_space<vmem>>, vector<128x128xbf16>
    %c0_8 = arith.constant 0 : index
    %c0_9 = arith.constant 0 : index
    %c0_10 = arith.constant 0 : index
    %c0_11 = arith.constant 0 : index
    %7 = vector.load %arg2[%c0_8, %c0_9, %c0_10, %c0_11] : memref<1x16x24x128xf32, #tpu.memory_space<vmem>>, vector<1x16x24x128xf32>
    %8 = vector.shape_cast %7 : vector<1x16x24x128xf32> to vector<16x24x128xf32>
    %c0_i32 = arith.constant 0 : i32
    %9 = arith.cmpi sgt, %arg1, %c0_i32 : i32
    %cst = arith.constant 1.000000e+00 : f32
    %cst_12 = arith.constant 0.000000e+00 : f32
    %10 = arith.select %9, %cst, %cst_12 : f32
    %c0_i32_13 = arith.constant 0 : i32
    %11 = arith.cmpi slt, %arg1, %c0_i32_13 : i32
    %cst_14 = arith.constant 1.000000e+00 : f32
    %cst_15 = arith.constant 0.000000e+00 : f32
    %12 = arith.select %11, %cst_14, %cst_15 : f32
    %c0_16 = arith.constant 0 : index
    %c0_17 = arith.constant 0 : index
    %c0_18 = arith.constant 0 : index
    %c0_19 = arith.constant 0 : index
    %13 = vector.load %arg3[%c0_16, %c0_17, %c0_18, %c0_19] : memref<1x1x24x128xf32, #tpu.memory_space<vmem>>, vector<1x1x24x128xf32>
    %14 = vector.shape_cast %13 : vector<1x1x24x128xf32> to vector<1x24x128xf32>
    %15 = vector.shape_cast %14 : vector<1x24x128xf32> to vector<24x128xf32>
    %16 = arith.truncf %15 : vector<24x128xf32> to vector<24x128xbf16>
    %cst_20 = arith.constant dense<0.000000e+00> : vector<24x128xf32>
    %17 = tpu.matmul %16, %6, %cst_20 {dimension_numbers = #tpu.dot_dimension_numbers<[1], [0], [0], [1], [0, 0, 1, 1], [], []>} : vector<24x128xbf16>, vector<128x128xbf16>, vector<24x128xf32> -> vector<24x128xf32>
    %18 = vector.broadcast %0 : vector<1x128xf32> to vector<24x128xf32>
    %19 = arith.mulf %17, %18 : vector<24x128xf32>
    %20 = vector.broadcast %1 : vector<1x128xf32> to vector<24x128xf32>
    %21 = arith.addf %19, %20 : vector<24x128xf32>
    %cst_21 = arith.constant -1.000000e+00 : f32
    %cst_22 = arith.constant 1.000000e+00 : f32
    %22 = vector.broadcast %cst_21 : f32 to vector<24x128xf32>
    %23 = arith.maximumf %22, %21 : vector<24x128xf32>
    %24 = vector.broadcast %cst_22 : f32 to vector<24x128xf32>
    %25 = arith.minimumf %24, %23 : vector<24x128xf32>
    %26 = vector.shape_cast %25 : vector<24x128xf32> to vector<1x24x128xf32>
    %27 = vector.broadcast %10 : f32 to vector<1x24x128xf32>
    %28 = arith.mulf %27, %26 : vector<1x24x128xf32>
    %29 = arith.truncf %28 : vector<1x24x128xf32> to vector<1x24x128xbf16>
    %c0_23 = arith.constant 0 : index
    %c0_24 = arith.constant 0 : index
    %c0_25 = arith.constant 0 : index
    %30 = vector.load %arg10[%c0_23, %c0_24, %c0_25] : memref<18x24x128xbf16, #tpu.memory_space<vmem>>, vector<1x24x128xbf16>
    tpu.vector_store %arg10[%c0_23, %c0_24, %c0_25], %29 {strides = array<i32>} : memref<18x24x128xbf16, #tpu.memory_space<vmem>>, vector<1x24x128xbf16>,
    %31 = vector.shape_cast %8 : vector<16x24x128xf32> to vector<384x128xf32>
    %32 = arith.truncf %31 : vector<384x128xf32> to vector<384x128xbf16>
    %cst_26 = arith.constant dense<0.000000e+00> : vector<384x128xf32>
    %33 = tpu.matmul %32, %6, %cst_26 {dimension_numbers = #tpu.dot_dimension_numbers<[1], [0], [0], [1], [0, 0, 1, 1], [], []>} : vector<384x128xbf16>, vector<128x128xbf16>, vector<384x128xf32> -> vector<384x128xf32>
    %34 = vector.broadcast %0 : vector<1x128xf32> to vector<384x128xf32>
    %35 = arith.mulf %33, %34 : vector<384x128xf32>
    %36 = vector.broadcast %1 : vector<1x128xf32> to vector<384x128xf32>
    %37 = arith.addf %35, %36 : vector<384x128xf32>
    %cst_27 = arith.constant -1.000000e+00 : f32
    %cst_28 = arith.constant 1.000000e+00 : f32
    %38 = vector.broadcast %cst_27 : f32 to vector<384x128xf32>
    %39 = arith.maximumf %38, %37 : vector<384x128xf32>
    %40 = vector.broadcast %cst_28 : f32 to vector<384x128xf32>
    %41 = arith.minimumf %40, %39 : vector<384x128xf32>
    %42 = vector.shape_cast %41 : vector<384x128xf32> to vector<16x24x128xf32>
    %43 = arith.truncf %42 : vector<16x24x128xf32> to vector<16x24x128xbf16>
    %c1_29 = arith.constant 1 : index
    %c0_30 = arith.constant 0 : index
    %c0_31 = arith.constant 0 : index
    %44 = vector.load %arg10[%c1_29, %c0_30, %c0_31] : memref<18x24x128xbf16, #tpu.memory_space<vmem>>, vector<16x24x128xbf16>
    tpu.vector_store %arg10[%c1_29, %c0_30, %c0_31], %43 {strides = array<i32>} : memref<18x24x128xbf16, #tpu.memory_space<vmem>>, vector<16x24x128xbf16>,
    %c0_32 = arith.constant 0 : index
    %c0_33 = arith.constant 0 : index
    %c0_34 = arith.constant 0 : index
    %c0_35 = arith.constant 0 : index
    %45 = vector.load %arg4[%c0_32, %c0_33, %c0_34, %c0_35] : memref<1x1x24x128xf32, #tpu.memory_space<vmem>>, vector<1x1x24x128xf32>
    %46 = vector.shape_cast %45 : vector<1x1x24x128xf32> to vector<1x24x128xf32>
    %47 = vector.shape_cast %46 : vector<1x24x128xf32> to vector<24x128xf32>
    %48 = arith.truncf %47 : vector<24x128xf32> to vector<24x128xbf16>
    %cst_36 = arith.constant dense<0.000000e+00> : vector<24x128xf32>
    %49 = tpu.matmul %48, %6, %cst_36 {dimension_numbers = #tpu.dot_dimension_numbers<[1], [0], [0], [1], [0, 0, 1, 1], [], []>} : vector<24x128xbf16>, vector<128x128xbf16>, vector<24x128xf32> -> vector<24x128xf32>
    %50 = vector.broadcast %0 : vector<1x128xf32> to vector<24x128xf32>
    %51 = arith.mulf %49, %50 : vector<24x128xf32>
    %52 = vector.broadcast %1 : vector<1x128xf32> to vector<24x128xf32>
    %53 = arith.addf %51, %52 : vector<24x128xf32>
    %cst_37 = arith.constant -1.000000e+00 : f32
    %cst_38 = arith.constant 1.000000e+00 : f32
    %54 = vector.broadcast %cst_37 : f32 to vector<24x128xf32>
    %55 = arith.maximumf %54, %53 : vector<24x128xf32>
    %56 = vector.broadcast %cst_38 : f32 to vector<24x128xf32>
    %57 = arith.minimumf %56, %55 : vector<24x128xf32>
    %58 = vector.shape_cast %57 : vector<24x128xf32> to vector<1x24x128xf32>
    %59 = vector.broadcast %12 : f32 to vector<1x24x128xf32>
    %60 = arith.mulf %59, %58 : vector<1x24x128xf32>
    %61 = arith.truncf %60 : vector<1x24x128xf32> to vector<1x24x128xbf16>
    %c17 = arith.constant 17 : index
    %c0_39 = arith.constant 0 : index
    %c0_40 = arith.constant 0 : index
    %62 = vector.load %arg10[%c17, %c0_39, %c0_40] : memref<18x24x128xbf16, #tpu.memory_space<vmem>>, vector<1x24x128xbf16>
    tpu.vector_store %arg10[%c17, %c0_39, %c0_40], %61 {strides = array<i32>} : memref<18x24x128xbf16, #tpu.memory_space<vmem>>, vector<1x24x128xbf16>,
    %cst_41 = arith.constant 0.000000e+00 : bf16
    %63 = vector.broadcast %cst_41 : bf16 to vector<18x1x128xbf16>
    %c0_42 = arith.constant 0 : index
    %c0_43 = arith.constant 0 : index
    %c0_44 = arith.constant 0 : index
    %64 = vector.load %arg10[%c0_42, %c0_43, %c0_44] : memref<18x24x128xbf16, #tpu.memory_space<vmem>>, vector<18x1x128xbf16>
    tpu.vector_store %arg10[%c0_42, %c0_43, %c0_44], %63 {strides = array<i32>} : memref<18x24x128xbf16, #tpu.memory_space<vmem>>, vector<18x1x128xbf16>,
    %c0_45 = arith.constant 0 : index
    %c17_46 = arith.constant 17 : index
    %c0_47 = arith.constant 0 : index
    %65 = vector.load %arg10[%c0_45, %c17_46, %c0_47] : memref<18x24x128xbf16, #tpu.memory_space<vmem>>, vector<18x1x128xbf16>
    tpu.vector_store %arg10[%c0_45, %c17_46, %c0_47], %63 {strides = array<i32>} : memref<18x24x128xbf16, #tpu.memory_space<vmem>>, vector<18x1x128xbf16>,
    %c0_48 = arith.constant 0 : index
    %c0_49 = arith.constant 0 : index
    %c0_50 = arith.constant 0 : index
    %66 = vector.load %arg10[%c0_48, %c0_49, %c0_50] : memref<18x24x128xbf16, #tpu.memory_space<vmem>>, vector<18x24x128xbf16>
    %67 = vector.extract_strided_slice %66 {offsets = [0, 0, 0], sizes = [18, 16, 128], strides = [1, 1, 1]} : vector<18x24x128xbf16> to vector<18x16x128xbf16>
    %68 = vector.extract_strided_slice %67 {offsets = [0, 0, 0], sizes = [16, 16, 128], strides = [1, 1, 1]} : vector<18x16x128xbf16> to vector<16x16x128xbf16>
    %69 = vector.extract_strided_slice %67 {offsets = [1, 0, 0], sizes = [16, 16, 128], strides = [1, 1, 1]} : vector<18x16x128xbf16> to vector<16x16x128xbf16>
    %70 = vector.extract_strided_slice %67 {offsets = [2, 0, 0], sizes = [16, 16, 128], strides = [1, 1, 1]} : vector<18x16x128xbf16> to vector<16x16x128xbf16>
    %71 = tpu.concatenate %68, %69, %70 in 2 : vector<16x16x128xbf16>, vector<16x16x128xbf16>, vector<16x16x128xbf16> -> vector<16x16x384xbf16>
    %72 = vector.shape_cast %71 : vector<16x16x384xbf16> to vector<256x384xbf16>
    %c0_51 = arith.constant 0 : index
    %c0_52 = arith.constant 0 : index
    %c0_53 = arith.constant 0 : index
    %73 = vector.load %arg6[%c0_51, %c0_52, %c0_53] : memref<3x384x128xbf16, #tpu.memory_space<vmem>>, vector<1x384x128xbf16>
    %74 = vector.shape_cast %73 : vector<1x384x128xbf16> to vector<384x128xbf16>
    %cst_54 = arith.constant dense<0.000000e+00> : vector<256x128xf32>
    %75 = tpu.matmul %72, %74, %cst_54 {dimension_numbers = #tpu.dot_dimension_numbers<[1], [0], [0], [1], [0, 0, 1, 1], [], []>} : vector<256x384xbf16>, vector<384x128xbf16>, vector<256x128xf32> -> vector<256x128xf32>
    %76 = vector.extract_strided_slice %66 {offsets = [0, 1, 0], sizes = [18, 16, 128], strides = [1, 1, 1]} : vector<18x24x128xbf16> to vector<18x16x128xbf16>
    %77 = vector.extract_strided_slice %76 {offsets = [0, 0, 0], sizes = [16, 16, 128], strides = [1, 1, 1]} : vector<18x16x128xbf16> to vector<16x16x128xbf16>
    %78 = vector.extract_strided_slice %76 {offsets = [1, 0, 0], sizes = [16, 16, 128], strides = [1, 1, 1]} : vector<18x16x128xbf16> to vector<16x16x128xbf16>
    %79 = vector.extract_strided_slice %76 {offsets = [2, 0, 0], sizes = [16, 16, 128], strides = [1, 1, 1]} : vector<18x16x128xbf16> to vector<16x16x128xbf16>
    %80 = tpu.concatenate %77, %78, %79 in 2 : vector<16x16x128xbf16>, vector<16x16x128xbf16>, vector<16x16x128xbf16> -> vector<16x16x384xbf16>
    %81 = vector.shape_cast %80 : vector<16x16x384xbf16> to vector<256x384xbf16>
    %c1_55 = arith.constant 1 : index
    %c0_56 = arith.constant 0 : index
    %c0_57 = arith.constant 0 : index
    %82 = vector.load %arg6[%c1_55, %c0_56, %c0_57] : memref<3x384x128xbf16, #tpu.memory_space<vmem>>, vector<1x384x128xbf16>
    %83 = vector.shape_cast %82 : vector<1x384x128xbf16> to vector<384x128xbf16>
    %cst_58 = arith.constant dense<0.000000e+00> : vector<256x128xf32>
    %84 = tpu.matmul %81, %83, %cst_58 {dimension_numbers = #tpu.dot_dimension_numbers<[1], [0], [0], [1], [0, 0, 1, 1], [], []>} : vector<256x384xbf16>, vector<384x128xbf16>, vector<256x128xf32> -> vector<256x128xf32>
    %85 = arith.addf %75, %84 : vector<256x128xf32>
    %86 = vector.extract_strided_slice %66 {offsets = [0, 2, 0], sizes = [18, 16, 128], strides = [1, 1, 1]} : vector<18x24x128xbf16> to vector<18x16x128xbf16>
    %87 = vector.extract_strided_slice %86 {offsets = [0, 0, 0], sizes = [16, 16, 128], strides = [1, 1, 1]} : vector<18x16x128xbf16> to vector<16x16x128xbf16>
    %88 = vector.extract_strided_slice %86 {offsets = [1, 0, 0], sizes = [16, 16, 128], strides = [1, 1, 1]} : vector<18x16x128xbf16> to vector<16x16x128xbf16>
    %89 = vector.extract_strided_slice %86 {offsets = [2, 0, 0], sizes = [16, 16, 128], strides = [1, 1, 1]} : vector<18x16x128xbf16> to vector<16x16x128xbf16>
    %90 = tpu.concatenate %87, %88, %89 in 2 : vector<16x16x128xbf16>, vector<16x16x128xbf16>, vector<16x16x128xbf16> -> vector<16x16x384xbf16>
    %91 = vector.shape_cast %90 : vector<16x16x384xbf16> to vector<256x384xbf16>
    %c2_59 = arith.constant 2 : index
    %c0_60 = arith.constant 0 : index
    %c0_61 = arith.constant 0 : index
    %92 = vector.load %arg6[%c2_59, %c0_60, %c0_61] : memref<3x384x128xbf16, #tpu.memory_space<vmem>>, vector<1x384x128xbf16>
    %93 = vector.shape_cast %92 : vector<1x384x128xbf16> to vector<384x128xbf16>
    %cst_62 = arith.constant dense<0.000000e+00> : vector<256x128xf32>
    %94 = tpu.matmul %91, %93, %cst_62 {dimension_numbers = #tpu.dot_dimension_numbers<[1], [0], [0], [1], [0, 0, 1, 1], [], []>} : vector<256x384xbf16>, vector<384x128xbf16>, vector<256x128xf32> -> vector<256x128xf32>
    %95 = arith.addf %85, %94 : vector<256x128xf32>
    %96 = vector.broadcast %2 : vector<1x128xf32> to vector<256x128xf32>
    %97 = arith.mulf %95, %96 : vector<256x128xf32>
    %98 = vector.broadcast %3 : vector<1x128xf32> to vector<256x128xf32>
    %99 = arith.addf %97, %98 : vector<256x128xf32>
    %cst_63 = arith.constant -1.000000e+00 : f32
    %cst_64 = arith.constant 1.000000e+00 : f32
    %100 = vector.broadcast %cst_63 : f32 to vector<256x128xf32>
    %101 = arith.maximumf %100, %99 : vector<256x128xf32>
    %102 = vector.broadcast %cst_64 : f32 to vector<256x128xf32>
    %103 = arith.minimumf %102, %101 : vector<256x128xf32>
    %104 = arith.truncf %103 : vector<256x128xf32> to vector<256x128xbf16>
    %c0_65 = arith.constant 0 : index
    %c0_66 = arith.constant 0 : index
    %105 = vector.load %arg7[%c0_65, %c0_66] : memref<128x128xbf16, #tpu.memory_space<vmem>>, vector<128x128xbf16>
    %cst_67 = arith.constant dense<0.000000e+00> : vector<256x128xf32>
    %106 = tpu.matmul %104, %105, %cst_67 {dimension_numbers = #tpu.dot_dimension_numbers<[1], [0], [0], [1], [0, 0, 1, 1], [], []>} : vector<256x128xbf16>, vector<128x128xbf16>, vector<256x128xf32> -> vector<256x128xf32>
    %107 = vector.extract_strided_slice %8 {offsets = [0, 1, 0], sizes = [16, 16, 128], strides = [1, 1, 1]} : vector<16x24x128xf32> to vector<16x16x128xf32>
    %108 = vector.shape_cast %107 : vector<16x16x128xf32> to vector<256x128xf32>
    %109 = vector.broadcast %4 : vector<1x128xf32> to vector<256x128xf32>
    %110 = arith.mulf %106, %109 : vector<256x128xf32>
    %111 = vector.broadcast %5 : vector<1x128xf32> to vector<256x128xf32>
    %112 = arith.addf %110, %111 : vector<256x128xf32>
    %113 = arith.addf %112, %108 : vector<256x128xf32>
    %114 = vector.shape_cast %113 : vector<256x128xf32> to vector<16x16x128xf32>
    %c0_68 = arith.constant 0 : index
    %c0_69 = arith.constant 0 : index
    %c0_70 = arith.constant 0 : index
    %c0_71 = arith.constant 0 : index
    %115 = vector.load %arg9[%c0_68, %c0_69, %c0_70, %c0_71] : memref<1x16x16x128xf32, #tpu.memory_space<vmem>>, vector<1x16x16x128xf32>
    %116 = vector.shape_cast %115 : vector<1x16x16x128xf32> to vector<16x16x128xf32>
    %117 = vector.shape_cast %114 : vector<16x16x128xf32> to vector<1x16x16x128xf32>
    tpu.vector_store %arg9[%c0_68, %c0_69, %c0_70, %c0_71], %117 {strides = array<i32>} : memref<1x16x16x128xf32, #tpu.memory_space<vmem>>, vector<1x16x16x128xf32>,
    return
  }
  func.func @transform_0(%arg0: i32, %arg1: i32) -> (i32, i32, i32, i32) {
    %c0_i32 = arith.constant 0 : i32
    %c0_i32_0 = arith.constant 0 : i32
    %c0_i32_1 = arith.constant 0 : i32
    return %arg0, %arg1, %c0_i32, %c0_i32_0 : i32, i32, i32, i32
  }
  func.func @transform_1(%arg0: i32, %arg1: i32) -> (i32, i32, i32, i32) {
    %c0_i32 = arith.constant 0 : i32
    %c0_i32_0 = arith.constant 0 : i32
    %c0_i32_1 = arith.constant 0 : i32
    return %arg0, %arg1, %c0_i32, %c0_i32_0 : i32, i32, i32, i32
  }
  func.func @transform_2(%arg0: i32, %arg1: i32) -> (i32, i32, i32, i32) {
    %c0_i32 = arith.constant 0 : i32
    %c0_i32_0 = arith.constant 0 : i32
    %c0_i32_1 = arith.constant 0 : i32
    return %arg0, %arg1, %c0_i32, %c0_i32_0 : i32, i32, i32, i32
  }
  func.func @transform_3(%arg0: i32, %arg1: i32) -> (i32, i32) {
    %c0_i32 = arith.constant 0 : i32
    %c0_i32_0 = arith.constant 0 : i32
    %c0_i32_1 = arith.constant 0 : i32
    return %c0_i32, %c0_i32_0 : i32, i32
  }
  func.func @transform_4(%arg0: i32, %arg1: i32) -> (i32, i32, i32) {
    %c0_i32 = arith.constant 0 : i32
    %c0_i32_0 = arith.constant 0 : i32
    %c0_i32_1 = arith.constant 0 : i32
    %c0_i32_2 = arith.constant 0 : i32
    return %c0_i32, %c0_i32_0, %c0_i32_1 : i32, i32, i32
  }
  func.func @transform_5(%arg0: i32, %arg1: i32) -> (i32, i32) {
    %c0_i32 = arith.constant 0 : i32
    %c0_i32_0 = arith.constant 0 : i32
    %c0_i32_1 = arith.constant 0 : i32
    return %c0_i32, %c0_i32_0 : i32, i32
  }
  func.func @transform_6(%arg0: i32, %arg1: i32) -> (i32, i32) {
    %c0_i32 = arith.constant 0 : i32
    %c0_i32_0 = arith.constant 0 : i32
    %c0_i32_1 = arith.constant 0 : i32
    return %c0_i32, %c0_i32_0 : i32, i32
  }
  func.func @transform_7(%arg0: i32, %arg1: i32) -> (i32, i32, i32, i32) {
    %c0_i32 = arith.constant 0 : i32
    %c0_i32_0 = arith.constant 0 : i32
    %c0_i32_1 = arith.constant 0 : i32
    return %arg0, %arg1, %c0_i32, %c0_i32_0 : i32, i32, i32, i32
  }
}

</mosaic_0001>

<bundles_post_ra>
// kernel: bottleneck_forward.1
= control target key start
LH: loop header
LB: loop body
LE: loop exit
PB: predicated region body
PF: predicated region fallthrough
CT: control target
= control target key end

     0   :  { %s6214_s24 = smov 0   ;;  %s6216_s25 = smov 0   ;;  %s7864_s0 = inlined_call_operand.vmem [shape: f32[2,16,24,128], index: 0, kind: input, shape index: {}]   ;;  %s7865_s1 = inlined_call_operand.vmem [shape: f32[2,1,24,128], index: 1, kind: input, shape index: {}, may-alias: {1,2}]   ;;  %s7866_s2 = inlined_call_operand.vmem [shape: f32[2,1,24,128], index: 2, kind: input, shape index: {}, may-alias: {1,2}]   ;;  %s7867_s3 = inlined_call_operand.vmem [shape: bf16[128,128], index: 3, kind: input, shape index: {}]   ;;  %s7868_s4 = inlined_call_operand.vmem [shape: bf16[3,384,128], index: 4, kind: input, shape index: {}]   ;;  %s7869_s5 = inlined_call_operand.vmem [shape: bf16[128,128], index: 5, kind: input, shape index: {}]   ;;  %s7870_s6 = inlined_call_operand.vmem [shape: f32[8,128], index: 6, kind: input, shape index: {}]   ;;  %s7871_s7 = inlined_call_operand.vmem [shape: f32[2,16,16,128], index: 7, kind: output, shape index: {}]  }
   0x1   :  { %s6218_s26 = smov 0  }
   0x2 LB: > { %s29_s27 = sadd.s32 1, %s6168_s25  ;;  %p4420_p0 = scmp.ge.s32.totalorder %s6172_s26, 1  ;;  %s6172_s26 = sphi %s6218_s26, %s17_s26   ;;  %s6168_s25 = sphi %s6216_s25, %s7877_s25   ;;  %s6164_s24 = sphi %s6214_s24, %s7876_s24  }
   0x3   : > { %p31_p1 = scmp.ge.s32.totalorder %s29_s27, 2  ;;  %p291_p2 = scmp.lt.s32.totalorder %s6172_s26, 3 }
   0x5   : > { %s7879_s27 = smov (%p31_p1, %s29_s27), 0  ;;  %p292_p3 = pnand %p4420_p0, %p291_p2 }
   0x6   : > { %v6235_v0 = vld [vmem:[%s7867_s3] sm:$0xff] (!%p292_p3)   ;;  %p352_p4 = scmp.lt.s32.totalorder (!%p292_p3), %s6164_s24, 1  ;;  %v6240_v1 = vld [vmem:[%s7867_s3 + $0x8] sm:$0xff] (!%p292_p3)   ;;  %v6253_v2 = vld [vmem:[%s7867_s3 + $0x10] sm:$0xff] (!%p292_p3)   ;;  %vm1391_vm0 = vcmask (!%p292_p3), 1040384   ;;  %vm2984_vm6 = vcmask (!%p292_p3), 1046528  }
   0x7   : > { %295 = sbr.rel (%p292_p3) target bundleno = 1082 (0x43a), region = 48  ;;  %5482 = vmatprep.subr.bf16.mxu0 (!%p292_p3), %v6235_v0  ;;  %5502 = vmatprep.subr.bf16.mxu1 (!%p292_p3), %v6235_v0  ;;  %v6267_v3 = vld [vmem:[%s7867_s3 + $0x18] sm:$0xff] (!%p292_p3)   ;;  %v6289_v10 = vld [vmem:[%s7867_s3 + $0x20] sm:$0xff] (!%p292_p3)   ;;  %v6298_v11 = vld [vmem:[%s7867_s3 + $0x28] sm:$0xff] (!%p292_p3)   ;;  %vm1392_vm1 = vsmask.f32 (!%p292_p3), 256 }
   0x8   : > { %5483 = vmatpush3.bf16.msra.mxu0 (!%p292_p3), %v6235_v0  ;;  %5503 = vmatpush3.bf16.msra.mxu1 (!%p292_p3), %v6235_v0  ;;  %v6307_v12 = vld [vmem:[%s7867_s3 + $0x30] sm:$0xff] (!%p292_p3)   ;;  %v6316_v13 = vld [vmem:[%s7867_s3 + $0x38] sm:$0xff] (!%p292_p3)   ;;  %v5972_v20 = vld [vmem:[%s7868_s4 + $0x140] sm:$0xff] (!%p292_p3)   ;;  %vm1448_vm2 = vsmask.f32 (!%p292_p3), 7938 }
   0x9   : > { %5484 = vmatprep.subr.bf16.mxu0 (!%p292_p3), %v6240_v1  ;;  %5504 = vmatprep.subr.bf16.mxu1 (!%p292_p3), %v6240_v1  ;;  %v5973_v26 = vld [vmem:[%s7868_s4 + $0x148] sm:$0xff] (!%p292_p3)   ;;  %vm6507_vm3 = vmand (!%p292_p3), %vm1391_vm0, %vm1392_vm1  ;;  %vm1768_vm5 = vsmask.f32 (!%p292_p3), 7424 }
   0xa   : > { %vm6512_vm4 = vmand (!%p292_p3), %vm1391_vm0, %vm1448_vm2 }
   0xc   : > { %5485 = vmatpush3.bf16.msra.mxu0 (!%p292_p3), %v6240_v1  ;;  %5505 = vmatpush3.bf16.msra.mxu1 (!%p292_p3), %v6240_v1 }
   0xd   : > { %5486 = vmatprep.subr.bf16.mxu0 (!%p292_p3), %v6253_v2  ;;  %5506 = vmatprep.subr.bf16.mxu1 (!%p292_p3), %v6253_v2 }
   0xe   : > { %s7881_s24 = smov (!%p352_p4, %s6164_s24), 1 }
   0xf   : > { %s5938_s11 = smul.u32 384, %s7881_s24 }
  0x10   : > { %s5939_s12 = smul.u32 24, %s7881_s24  ;;  %5487 = vmatpush3.bf16.msra.mxu0 %v6253_v2  ;;  %5507 = vmatpush3.bf16.msra.mxu1 %v6253_v2 }
  0x11   : > { %s6260_s15 = scalar_lea.vmem %s7864_s0, %s5938_s11  ;;  %5488 = vmatprep.subr.bf16.mxu0 %v6267_v3  ;;  %5508 = vmatprep.subr.bf16.mxu1 %v6267_v3 }
  0x12   : > { %s6274_s20 = scalar_lea.vmem %s7865_s1, %s5939_s12  ;;  %v414_v6 = vld [vmem:[%s6260_s15] sm:$0xff]  ;;  %v415_v8 = vld [vmem:[%s6260_s15 + $0x8] sm:$0xff]  ;;  %v416_v15 = vld [vmem:[%s6260_s15 + $0x10] sm:$0xff]  ;;  %s6325_s13 = scalar_lea.vmem %s7866_s2, %s5939_s12 }
  0x13   : > { %v466_v4 = vld [vmem:[%s6274_s20] sm:$0xff]  ;;  %v467_v5 = vld [vmem:[%s6274_s20 + $0x8] sm:$0xff]  ;;  %v607_v9 = vpack.c.bf16 %v415_v8, %v414_v6  ;;  %v468_v14 = vld [vmem:[%s6274_s20 + $0x10] sm:$0xff] }
  0x14   : > { %v469_v7 = vpack.c.bf16 %v467_v5, %v466_v4  ;;  %5489 = vmatpush3.bf16.msra.mxu0 %v6267_v3  ;;  %5509 = vmatpush3.bf16.msra.mxu1 %v6267_v3  ;;  %v417_v16 = vld [vmem:[%s6260_s15 + $0x18] sm:$0xff]  ;;  %v418_v17 = vld [vmem:[%s6260_s15 + $0x20] sm:$0xff]  ;;  %v419_v18 = vld [vmem:[%s6260_s15 + $0x28] sm:$0xff]  ;;  %v470_v22 = vpack.c.bf16 %v468_v14, %v468_v14 }
  0x15   : > { %5518 = vmatprep.mubr.bf16.mxu1 %v607_v9  ;;  %5490 = vmatprep.subr.bf16.mxu0 %v6289_v10  ;;  %v1305_v19 = vld [vmem:[%s6325_s13] sm:$0xff]  ;;  %v1306_v21 = vld [vmem:[%s6325_s13 + $0x8] sm:$0xff]  ;;  %v608_v23 = vpack.c.bf16 %v417_v16, %v416_v15  ;;  %v609_v24 = vpack.c.bf16 %v419_v18, %v418_v17  ;;  %v420_v27 = vld [vmem:[%s6260_s15 + $0x30] sm:$0xff] }
  0x16   : > { %5498 = vmatprep.mubr.bf16.mxu0 %v469_v7  ;;  %5510 = vmatprep.subr.bf16.mxu1 %v6289_v10  ;;  %v1308_v25 = vpack.c.bf16 %v1306_v21, %v1305_v19  ;;  %v421_v28 = vld [vmem:[%s6260_s15 + $0x38] sm:$0xff]  ;;  %v422_v29 = vld [vmem:[%s6260_s15 + $0x40] sm:$0xff]  ;;  %v423_v30 = vld [vmem:[%s6260_s15 + $0x48] sm:$0xff] }
  0x17   : > { %v610_v31 = vpack.c.bf16 %v421_v28, %v420_v27  ;;  %v611_v32 = vpack.c.bf16 %v423_v30, %v422_v29  ;;  %v424_v33 = vld [vmem:[%s6260_s15 + $0x50] sm:$0xff]  ;;  %v425_v34 = vld [vmem:[%s6260_s15 + $0x58] sm:$0xff]  ;;  %v426_v35 = vld [vmem:[%s6260_s15 + $0x60] sm:$0xff] }
  0x18   : > { %5491 = vmatpush3.bf16.msra.mxu0 %v6289_v10  ;;  %5511 = vmatpush3.bf16.msra.mxu1 %v6289_v10  ;;  %v427_v36 = vld [vmem:[%s6260_s15 + $0x68] sm:$0xff]  ;;  %v612_v37 = vpack.c.bf16 %v425_v34, %v424_v33  ;;  %v428_v39 = vld [vmem:[%s6260_s15 + $0x70] sm:$0xff]  ;;  %v429_v40 = vld [vmem:[%s6260_s15 + $0x78] sm:$0xff] }
  0x19   : > { %5492 = vmatprep.subr.bf16.mxu0 %v6298_v11  ;;  %5512 = vmatprep.subr.bf16.mxu1 %v6298_v11  ;;  %v613_v38 = vpack.c.bf16 %v427_v36, %v426_v35  ;;  %v430_v41 = vld [vmem:[%s6260_s15 + $0x80] sm:$0xff]  ;;  %v431_v42 = vld [vmem:[%s6260_s15 + $0x88] sm:$0xff]  ;;  %v614_v43 = vpack.c.bf16 %v429_v40, %v428_v39  ;;  %v432_v45 = vld [vmem:[%s6260_s15 + $0x90] sm:$0xff] }
  0x1a   : > { %v615_v44 = vpack.c.bf16 %v431_v42, %v430_v41  ;;  %v433_v46 = vld [vmem:[%s6260_s15 + $0x98] sm:$0xff]  ;;  %v1307_v47 = vld [vmem:[%s6325_s13 + $0x10] sm:$0xff]  ;;  %v434_v48 = vld [vmem:[%s6260_s15 + $0xa0] sm:$0xff] }
  0x1b   : > { %v435_v49 = vld [vmem:[%s6260_s15 + $0xa8] sm:$0xff]  ;;  %v616_v50 = vpack.c.bf16 %v433_v46, %v432_v45  ;;  %v1309_v51 = vpack.c.bf16 %v1307_v47, %v1307_v47  ;;  %v436_v53 = vld [vmem:[%s6260_s15 + $0xb0] sm:$0xff]  ;;  %v437_v54 = vld [vmem:[%s6260_s15 + $0xb8] sm:$0xff] }
  0x1c   : > { %5493 = vmatpush3.bf16.msra.mxu0 %v6298_v11  ;;  %5513 = vmatpush3.bf16.msra.mxu1 %v6298_v11  ;;  %v617_v52 = vpack.c.bf16 %v435_v49, %v434_v48  ;;  %v438_v55 = vld [vmem:[%s6260_s15 + $0xc0] sm:$0xff]  ;;  %v439_v56 = vld [vmem:[%s6260_s15 + $0xc8] sm:$0xff]  ;;  %v618_v57 = vpack.c.bf16 %v437_v54, %v436_v53  ;;  %v440_v59 = vld [vmem:[%s6260_s15 + $0xd0] sm:$0xff] }
  0x1d   : > { %5494 = vmatprep.subr.bf16.mxu0 %v6307_v12  ;;  %5514 = vmatprep.subr.bf16.mxu1 %v6307_v12  ;;  %v619_v58 = vpack.c.bf16 %v439_v56, %v438_v55  ;;  %v441_v60 = vld [vmem:[%s6260_s15 + $0xd8] sm:$0xff]  ;;  %v442_v61 = vld [vmem:[%s6260_s15 + $0xe0] sm:$0xff]  ;;  %v443_v62 = vld [vmem:[%s6260_s15 + $0xe8] sm:$0xff] }
  0x1e   : > { %v620_v63 = vpack.c.bf16 %v441_v60, %v440_v59  ;;  %v447_v4 = vld [vmem:[%s6260_s15 + $0x108] sm:$0xff]  ;;  %v448_v7 = vld [vmem:[%s6260_s15 + $0x110] sm:$0xff]  ;;  %v449_v8 = vld [vmem:[%s6260_s15 + $0x118] sm:$0xff] }
  0x1f   : > { %v450_v9 = vld [vmem:[%s6260_s15 + $0x120] sm:$0xff]  ;;  %v453_v14 = vld [vmem:[%s6260_s15 + $0x138] sm:$0xff]  ;;  %v455_v16 = vld [vmem:[%s6260_s15 + $0x148] sm:$0xff] }
  0x20   : > { %5495 = vmatpush3.bf16.msra.mxu0 %v6307_v12  ;;  %5515 = vmatpush3.bf16.msra.mxu1 %v6307_v12  ;;  %v454_v15 = vld [vmem:[%s6260_s15 + $0x140] sm:$0xff]  ;;  %v456_v19 = vld [vmem:[%s6260_s15 + $0x150] sm:$0xff]  ;;  %v5977_v30 = vld [vmem:[%s7868_s4 + $0x108] sm:$0xff]  }
  0x21   : > { %5496 = vmatprep.subr.bf16.mxu0 %v6316_v13  ;;  %5516 = vmatprep.subr.bf16.mxu1 %v6316_v13  ;;  %v627_v18 = vpack.c.bf16 %v455_v16, %v454_v15  ;;  %v458_v21 = vld [vmem:[%s6260_s15 + $0x160] sm:$0xff]  ;;  %v5981_v33 = vld [vmem:[%s7868_s4 + $0xd0] sm:$0xff]   ;;  %v5982_v34 = vld [vmem:[%s7868_s4 + $0x118] sm:$0xff]  }
  0x22   : > { %v5975_v28 = vld [vmem:[%s7868_s4 + $0x100] sm:$0xff]   ;;  %v5983_v35 = vld [vmem:[%s7868_s4 + $0xd8] sm:$0xff]   ;;  %v5974_v36 = vld [vmem:[%s7868_s4 + $0x150] sm:$0xff]  }
  0x23   : > { %v5976_v29 = vld [vmem:[%s7868_s4 + $0xc0] sm:$0xff]   ;;  %v5987_v39 = vld [vmem:[%s7868_s4 + $0x128] sm:$0xff]   ;;  %v5979_v41 = vld [vmem:[%s7868_s4 + $0x158] sm:$0xff]  }
  0x24   : > { %5497 = vmatpush3.bf16.msra.mxu0 %v6316_v13  ;;  %5517 = vmatpush3.bf16.msra.mxu1 %v6316_v13  ;;  %v5988_v40 = vld [vmem:[%s7868_s4 + $0xe8] sm:$0xff]   ;;  %v5989_v42 = vld [vmem:[%s7868_s4 + $0x130] sm:$0xff]   ;;  %v5991_v45 = vld [vmem:[%s7868_s4 + $0x138] sm:$0xff]  }
  0x25   : > { %5566 = vmatprep.subr.bf16.mxu0 %v6235_v0  ;;  %5586 = vmatprep.subr.bf16.mxu1 %v5972_v20  ;;  %v5994_v46 = vld [vmem:[%s7868_s4 + $0xf8] sm:$0xff]   ;;  %v5995_v47 = vld [vmem:[%s7868_s4 + $0x168] sm:$0xff]   ;;  %v5998_v48 = vld [vmem:[%s7868_s4 + $0x170] sm:$0xff]  }
  0x26   : > { %v6001_v49 = vld [vmem:[%s7868_s4 + $0x178] sm:$0xff]  }
  0x27   : > { %5499 = vmatmul.mubr.bf16.vlgmr.msra.gmra.mrb[0].mxu0 %v470_v22  ;;  %5519 = vmatmul.mubr.bf16.vlgmr.msra.gmra.mrb[0].mxu1 %v608_v23  ;;  %v459_v22 = vld [vmem:[%s6260_s15 + $0x168] sm:$0xff] }
  0x28   : > { %5522 = vmatprep.mubr.bf16.mxu1 %v609_v24  ;;  %5567 = vmatpush3.bf16.msra.mxu0 %v6235_v0  ;;  %v621_v0 = vpack.c.bf16 %v443_v62, %v442_v61  ;;  %v629_v24 = vpack.c.bf16 %v459_v22, %v458_v21 }
  0x29   : > { %5568 = vmatprep.subr.bf16.mxu0 %v6240_v1  ;;  %5582 = vmatprep.mubr.bf16.mxu0 %v1308_v25  ;;  %v460_v25 = vld [vmem:[%s6260_s15 + $0x170] sm:$0xff] }
  0x2a   : > { %5587 = vmatpush3.bf16.msra.mxu1 %v5972_v20  ;;  %v457_v20 = vld [vmem:[%s6260_s15 + $0x158] sm:$0xff] }
  0x2b   : > { %5588 = vmatprep.subr.bf16.mxu1 %v5973_v26  ;;  %v628_v23 = vpack.c.bf16 %v457_v20, %v456_v19 }
  0x2c   : > { %5569 = vmatpush3.bf16.msra.mxu0 %v6240_v1  ;;  %v444_v1 = vld [vmem:[%s6260_s15 + $0xf0] sm:$0xff] }
  0x2d   : > { %5570 = vmatprep.subr.bf16.mxu0 %v6253_v2 }
  0x2e   : > { %5589 = vmatpush3.bf16.msra.mxu1 %v5973_v26  ;;  %v461_v26 = vld [vmem:[%s6260_s15 + $0x178] sm:$0xff] }
  0x2f   : > { %5523 = vmatmul.mubr.bf16.gmra.mrb[4].mxu1 %v610_v31  ;;  %v630_v27 = vpack.c.bf16 %v461_v26, %v460_v25  ;;  %v5978_v31 = vld [vmem:[%s7868_s4 + $0xc8] sm:$0xff]   ;;  %5590 = vmatprep.subr.bf16.mxu1 %v5974_v36 }
  0x30   : > { %5526 = vmatprep.mubr.bf16.mxu1 %v611_v32  ;;  %5571 = vmatpush3.bf16.msra.mxu0 %v6253_v2  ;;  %v445_v2 = vld [vmem:[%s6260_s15 + $0xf8] sm:$0xff]  ;;  %v5980_v32 = vld [vmem:[%s7868_s4 + $0x110] sm:$0xff]  }
  0x31   : > { %5572 = vmatprep.subr.bf16.mxu0 %v6267_v3  ;;  %v622_v5 = vpack.c.bf16 %v445_v2, %v444_v1 }
  0x32   : > { %5591 = vmatpush3.bf16.msra.mxu1 %v5974_v36 }
  0x33   : > { %5592 = vmatprep.subr.bf16.mxu1 %v5979_v41 }
  0x34   : > { %5573 = vmatpush3.bf16.msra.mxu0 %v6267_v3  ;;  %v446_v3 = vld [vmem:[%s6260_s15 + $0x100] sm:$0xff] }
  0x35   : > { %5574 = vmatprep.subr.bf16.mxu0 %v6289_v10  ;;  %v623_v6 = vpack.c.bf16 %v447_v4, %v446_v3 }
  0x36   : > { %5593 = vmatpush3.bf16.msra.mxu1 %v5979_v41 }
  0x37   : > { %5527 = vmatmul.mubr.bf16.gmra.mrb[8].mxu1 %v612_v37  ;;  %v5984_v37 = vld [vmem:[%s7868_s4 + $0x120] sm:$0xff]  }
  0x38   : > { %5530 = vmatprep.mubr.bf16.mxu1 %v613_v38  ;;  %5575 = vmatpush3.bf16.msra.mxu0 %v6289_v10  ;;  %v451_v10 = vld [vmem:[%s6260_s15 + $0x128] sm:$0xff]  ;;  %v5985_v38 = vld [vmem:[%s7868_s4 + $0xe0] sm:$0xff]  }
  0x39   : > { %5576 = vmatprep.subr.bf16.mxu0 %v6298_v11 }
  0x3c   : > { %5577 = vmatpush3.bf16.msra.mxu0 %v6298_v11  ;;  %v624_v11 = vpack.c.bf16 %v449_v8, %v448_v7 }
  0x3d   : > { %5578 = vmatprep.subr.bf16.mxu0 %v6307_v12 }
  0x3f   : > { %5531 = vmatmul.mubr.bf16.gmra.mrb[12].mxu1 %v614_v43  ;;  %v5990_v43 = vld [vmem:[%s7868_s4 + $0xf0] sm:$0xff]  }
  0x40   : > { %5534 = vmatprep.mubr.bf16.mxu1 %v615_v44  ;;  %5579 = vmatpush3.bf16.msra.mxu0 %v6307_v12  ;;  %v625_v12 = vpack.c.bf16 %v451_v10, %v450_v9  ;;  %v5986_v44 = vld [vmem:[%s7868_s4 + $0x160] sm:$0xff]  }
  0x41   : > { %5580 = vmatprep.subr.bf16.mxu0 %v6316_v13  ;;  %5594 = vmatprep.subr.bf16.mxu1 %v5986_v44 }
  0x42   : > { %5595 = vmatpush3.bf16.msra.mxu1 %v5986_v44 }
  0x43   : > { %5596 = vmatprep.subr.bf16.mxu1 %v5995_v47 }
  0x44   : > { %5581 = vmatpush3.bf16.msra.mxu0 %v6316_v13  ;;  %v452_v13 = vld [vmem:[%s6260_s15 + $0x130] sm:$0xff] }
  0x45   : > { %v626_v17 = vpack.c.bf16 %v453_v14, %v452_v13  ;;  %5050 = vmatprep.subr.bf16.mxu0 %v5975_v28 }
  0x46   : > { %5597 = vmatpush3.bf16.msra.mxu1 %v5995_v47 }
  0x47   : > { %5535 = vmatmul.mubr.bf16.gmra.mrb[16].mxu1 %v616_v50  ;;  %5583 = vmatmul.mubr.bf16.vlgmr.msra.gmra.mrb[4].mxu0 %v1309_v51  ;;  %v6010_v50 = vld [vmem:[%s7868_s4 + $0x40] sm:$0xff]  }
  0x48   : > { %5538 = vmatprep.mubr.bf16.mxu1 %v617_v52  ;;  %5051 = vmatpush3.bf16.msra.mxu0 %v5976_v29  ;;  %v6475_v51 = vld [vmem:[%s7870_s6] ss:$0 sm:$0xff]  ;;  %v6480_v52 = vld [vmem:[%s7870_s6 + $0x1] ss:$0 sm:$0xff] }
  0x49   : > { %5052 = vmatprep.subr.bf16.mxu0 %v5977_v30  ;;  %5598 = vmatprep.subr.bf16.mxu1 %v5998_v48 }
  0x4a   : > { %5599 = vmatpush3.bf16.msra.mxu1 %v5998_v48 }
  0x4b   : > { %5600 = vmatprep.subr.bf16.mxu1 %v6001_v49 }
  0x4c   : > { %5053 = vmatpush3.bf16.msra.mxu0 %v5978_v31 }
  0x4d   : > { %5054 = vmatprep.subr.bf16.mxu0 %v5980_v32 }
  0x4e   : > { %5601 = vmatpush3.bf16.msra.mxu1 %v6001_v49 }
  0x4f   : > { %5539 = vmatmul.mubr.bf16.gmra.mrb[20].mxu1 %v618_v57  ;;  %5186 = vmatprep.subr.bf16.mxu1 %v6010_v50 }
  0x50   : > { %5542 = vmatprep.mubr.bf16.mxu1 %v619_v58  ;;  %5055 = vmatpush3.bf16.msra.mxu0 %v5981_v33 }
  0x51   : > { %5056 = vmatprep.subr.bf16.mxu0 %v5982_v34 }
  0x54   : > { %5057 = vmatpush3.bf16.msra.mxu0 %v5983_v35 }
  0x55   : > { %5058 = vmatprep.subr.bf16.mxu0 %v5984_v37 }
  0x57   : > { %5543 = vmatmul.mubr.bf16.gmra.mrb[24].mxu1 %v620_v63  ;;  %v6048_v63 = vld [vmem:[%s7868_s4 + $0x1c0] sm:$0xff]  }
  0x58   : > { %5546 = vmatprep.mubr.bf16.mxu1 %v621_v0  ;;  %5059 = vmatpush3.bf16.msra.mxu0 %v5985_v38 }
  0x59   : > { %5060 = vmatprep.subr.bf16.mxu0 %v5987_v39 }
  0x5c   : > { %5061 = vmatpush3.bf16.msra.mxu0 %v5988_v40 }
  0x5d   : > { %5062 = vmatprep.subr.bf16.mxu0 %v5989_v42 }
  0x5f   : > { %5547 = vmatmul.mubr.bf16.gmra.mrb[28].mxu1 %v622_v5 }
  0x60   : > { %5550 = vmatprep.mubr.bf16.mxu1 %v623_v6  ;;  %5063 = vmatpush3.bf16.msra.mxu0 %v5990_v43 }
  0x61   : > { %5064 = vmatprep.subr.bf16.mxu0 %v5991_v45 }
  0x64   : > { %5065 = vmatpush3.bf16.msra.mxu0 %v5994_v46 }
  0x65   : > { %5322 = vmatprep.subr.bf16.mxu0 %v6048_v63 }
  0x67   : > { %5551 = vmatmul.mubr.bf16.gmra.mrb[32].mxu1 %v624_v11 }
  0x68   : > { %5554 = vmatprep.mubr.bf16.mxu1 %v625_v12 }
  0x6f   : > { %5555 = vmatmul.mubr.bf16.gmra.mrb[36].mxu1 %v626_v17 }
  0x70   : > { %5558 = vmatprep.mubr.bf16.mxu1 %v627_v18 }
  0x77   : > { %5559 = vmatmul.mubr.bf16.gmra.mrb[40].mxu1 %v628_v23 }
  0x78   : > { %5562 = vmatprep.mubr.bf16.mxu1 %v629_v24 }
  0x7f   : > { %5563 = vmatmul.mubr.bf16.gmra.mrb[44].mxu1 %v630_v27 }
  0xfa   : > { %v5500_v53 = vpop.f32.mrb[0].mxu0  ;;  %v5520_v54 = vpop.f32.mrb[0].mxu1 }
  0xfb   : > { %v573_v55 = vmul.f32 %v5500_v53, %v6475_v51  ;;  %v858_v56 = vmul.f32 %v5520_v54, %v6475_v51  ;;  %v553_v57 = vpop.f32.mrb[1].mxu0  ;;  %v665_v58 = vpop.f32.mrb[1].mxu1 }
  0xfc   : > { %v571_v59 = vmul.f32 %v6475_v51, %v553_v57  ;;  %v856_v60 = vmul.f32 %v6475_v51, %v665_v58  ;;  %v5501_v61 = vpop.f32.mrb[2].mxu0  ;;  %v5521_v62 = vpop.f32.mrb[2].mxu1 }
  0xfd   : > { %v580_v0 = vadd.f32 %v6480_v52, %v573_v55  ;;  %v906_v1 = vadd.f32 %v6480_v52, %v858_v56  ;;  %v556_v2 = vpop.f32.mrb[3].mxu0  ;;  %v668_v3 = vpop.f32.mrb[3].mxu1  ;;  %v859_v9 = vmul.f32 %v5521_v62, %v6475_v51 }
  0xfe   : > { %v578_v4 = vadd.f32 %v6480_v52, %v571_v59  ;;  %v904_v5 = vadd.f32 %v6480_v52, %v856_v60  ;;  %v572_v6 = vmul.f32 %v6475_v51, %v556_v2  ;;  %v857_v7 = vmul.f32 %v6475_v51, %v668_v3 }
  0xff   : > { %v4438_v8 = vclamps-f32 %v580_v0, 1.0  ;;  %v4444_v15 = vclamps-f32 %v906_v1, 1.0  ;;  %v907_v24 = vadd.f32 %v6480_v52, %v859_v9 }
 0x100   : > { %v4436_v10 = vclamps-f32 %v578_v4, 1.0  ;;  %v4442_v11 = vclamps-f32 %v904_v5, 1.0  ;;  %v579_v12 = vadd.f32 %v6480_v52, %v572_v6  ;;  %v905_v13 = vadd.f32 %v6480_v52, %v857_v7 }
 0x101   : > { %v590_v14 = vmul.f32 0.0, %v4438_v8  ;;  %v4445_v35 = vclamps-f32 %v907_v24, 1.0 }
 0x102   : > { %v588_v16 = vmul.f32 0.0, %v4436_v10  ;;  %v4798_v17 = vpack.c.bf16 %v4442_v11, %v4442_v11  ;;  %v4437_v18 = vclamps-f32 %v579_v12, 1.0  ;;  %v4443_v19 = vclamps-f32 %v905_v13, 1.0  ;;  %v5524_v20 = vpop.f32.mrb[4].mxu1 }
 0x103   : > { %v4797_v21 = vpack.c.bf16 %v590_v14, %v590_v14  ;;  %v862_v22 = vmul.f32 %v5524_v20, %v6475_v51  ;;  %v681_v23 = vpop.f32.mrb[5].mxu1 }
 0x104   : > { %1257 = vst [vmem:[#allocation2 + $0xc] sm:$0xf] %v4798_v17  ;;  %v589_v25 = vmul.f32 0.0, %v4437_v18  ;;  %v4857_v26 = vpack.c.bf16 %v4444_v15, %v4443_v19  ;;  %v860_v27 = vmul.f32 %v6475_v51, %v681_v23  ;;  %v5525_v28 = vpop.f32.mrb[6].mxu1 }
 0x105   : > { %606 = vst [vmem:[#allocation2 + $0x8] sm:$0xf] %v4797_v21  ;;  %v684_v29 = vpop.f32.mrb[7].mxu1  ;;  %v910_v31 = vadd.f32 %v6480_v52, %v862_v22  ;;  %v863_v34 = vmul.f32 %v5525_v28, %v6475_v51 }
 0x106   : > { %v4852_v30 = vpack.c.bf16 %v589_v25, %v588_v16  ;;  %4974 = vst [vmem:[#allocation2 + $0x10] sm:$0xff] %v4857_v26   ;;  %v908_v32 = vadd.f32 %v6480_v52, %v860_v27  ;;  %v861_v33 = vmul.f32 %v6475_v51, %v684_v29 }
 0x107   : > { %v4448_v39 = vclamps-f32 %v910_v31, 1.0  ;;  %v911_v45 = vadd.f32 %v6480_v52, %v863_v34 }
 0x108   : > { %4853 = vst [vmem:[#allocation2] sm:$0xff] %v4852_v30   ;;  %v4446_v36 = vclamps-f32 %v908_v32, 1.0  ;;  %v909_v37 = vadd.f32 %v6480_v52, %v861_v33 }
 0x109   : > { %v4449_v63 = vclamps-f32 %v911_v45, 1.0 }
 0x10a   : > { %v4862_v40 = vpack.c.bf16 %v4446_v36, %v4445_v35  ;;  %v4447_v41 = vclamps-f32 %v909_v37, 1.0  ;;  %v5528_v42 = vpop.f32.mrb[8].mxu1 }
 0x10b   : > { %v1397_v44 = vld [vmem:[#allocation2 + $0xc] sm:$0x1]  ;;  %v866_v46 = vmul.f32 %v5528_v42, %v6475_v51  ;;  %v697_v47 = vpop.f32.mrb[9].mxu1 }
 0x10c   : > { %v1450_v48 = vld [vmem:[#allocation2 + $0x8] sm:$0x1]  ;;  %v1398_v49 = vsel %vm6507_vm3, 0, %v1397_v44  ;;  %4975 = vst [vmem:[#allocation2 + $0x18] sm:$0xff] %v4862_v40   ;;  %v4867_v50 = vpack.c.bf16 %v4448_v39, %v4447_v41  ;;  %v864_v53 = vmul.f32 %v6475_v51, %v697_v47  ;;  %v5529_v54 = vpop.f32.mrb[10].mxu1 }
 0x10d   : > { %v1451_v55 = vsel %vm6512_vm4, 0, %v1450_v48  ;;  %1399 = vst [vmem:[#allocation2 + $0xc] sm:$0x1] %v1398_v49  ;;  %v1453_v56 = vld [vmem:[#allocation2 + $0x14] sm:$0x1]  ;;  %v700_v57 = vpop.f32.mrb[11].mxu1  ;;  %v914_v59 = vadd.f32 %v6480_v52, %v866_v46  ;;  %v867_v2 = vmul.f32 %v5529_v54, %v6475_v51 }
 0x10e   : > { %1452 = vst [vmem:[#allocation2 + $0x8] sm:$0x1] %v1451_v55  ;;  %v1454_v58 = vsel %vm6512_vm4, 0, %v1453_v56  ;;  %4976 = vst [vmem:[#allocation2 + $0x20] sm:$0xff] %v4867_v50   ;;  %v912_v60 = vadd.f32 %v6480_v52, %v864_v53  ;;  %v865_v61 = vmul.f32 %v6475_v51, %v700_v57 }
 0x10f   : > { %v1394_v62 = vld [vmem:[#allocation2] sm:$0x1]  ;;  %1455 = vst [vmem:[#allocation2 + $0x14] sm:$0x1] %v1454_v58  ;;  %v4452_v4 = vclamps-f32 %v914_v59, 1.0  ;;  %v915_v12 = vadd.f32 %v6480_v52, %v867_v2 }
 0x110   : > { %v1395_v0 = vsel %vm6507_vm3, 0, %v1394_v62  ;;  %v4450_v1 = vclamps-f32 %v912_v60, 1.0  ;;  %v913_v3 = vadd.f32 %v6480_v52, %v865_v61 }
 0x111   : > { %1396 = vst [vmem:[#allocation2] sm:$0x1] %v1395_v0  ;;  %v4453_v29 = vclamps-f32 %v915_v12, 1.0 }
 0x112   : > { %v4872_v5 = vpack.c.bf16 %v4450_v1, %v4449_v63  ;;  %v4451_v6 = vclamps-f32 %v913_v3, 1.0  ;;  %v5532_v7 = vpop.f32.mrb[12].mxu1 }
 0x113   : > { %v1400_v8 = vld [vmem:[#allocation2 + $0x18] sm:$0x1]  ;;  %v870_v9 = vmul.f32 %v5532_v7, %v6475_v51  ;;  %v713_v10 = vpop.f32.mrb[13].mxu1 }
 0x114   : > { %v1401_v11 = vsel %vm6507_vm3, 0, %v1400_v8  ;;  %4977 = vst [vmem:[#allocation2 + $0x28] sm:$0xff] %v4872_v5   ;;  %v4877_v13 = vpack.c.bf16 %v4452_v4, %v4451_v6  ;;  %v868_v14 = vmul.f32 %v6475_v51, %v713_v10  ;;  %v5533_v15 = vpop.f32.mrb[14].mxu1  ;;  %v5992_v16 = vld [vmem:[#allocation2 + $0xc] sm:$0xff]   ;;  %v6049_v5 = vld [vmem:[%s7868_s4 + $0x180] sm:$0xff]  }
 0x115   : > { %1402 = vst [vmem:[#allocation2 + $0x18] sm:$0x1] %v1401_v11  ;;  %v1403_v17 = vld [vmem:[#allocation2 + $0x24] sm:$0x1]  ;;  %v1456_v18 = vld [vmem:[#allocation2 + $0x20] sm:$0x1]  ;;  %v918_v19 = vadd.f32 %v6480_v52, %v870_v9  ;;  %v871_v20 = vmul.f32 %v5533_v15, %v6475_v51 }
 0x116   : > { %v716_v21 = vpop.f32.mrb[15].mxu1  ;;  %v1404_v22 = vsel %vm6507_vm3, 0, %v1403_v17  ;;  %v1457_v23 = vsel %vm6512_vm4, 0, %v1456_v18  ;;  %4978 = vst [vmem:[#allocation2 + $0x30] sm:$0xff] %v4877_v13   ;;  %v916_v24 = vadd.f32 %v6480_v52, %v868_v14  ;;  %v5993_v26 = vld [vmem:[#allocation2 + $0x14] ss:$0 sps:$4 sm:$0xff]  }
 0x117   : > { %v869_v25 = vmul.f32 %v6475_v51, %v716_v21  ;;  %1405 = vst [vmem:[#allocation2 + $0x24] sm:$0x1] %v1404_v22  ;;  %1458 = vst [vmem:[#allocation2 + $0x20] sm:$0x1] %v1457_v23  ;;  %v6546_v27 = vadd.f32 %v6480_v52, %v871_v20  ;;  %v1784_v28 = vshll.u32 %v5992_v16, 16  ;;  %v1789_v32 = vshll.u32 %v5993_v26, 16 }
 0x118   : > { %v4454_v30 = vclamps-f32 %v916_v24, 1.0  ;;  %v5996_v33 = vld [vmem:[#allocation2] sm:$0xff]   ;;  %v4456_v34 = vclamps-f32 %v918_v19, 1.0  ;;  %v1782_v36 = vshrl.u32 %v5992_v16, 16  ;;  %v5997_v39 = vld [vmem:[#allocation2 + $0x8] ss:$0 sps:$4 sm:$0xff]  }
 0x119   : > { %v917_v31 = vadd.f32 %v6480_v52, %v869_v25  ;;  %v4457_v35 = vclamps-f32 %v6546_v27, 1.0  ;;  %v1786_v37 = vrot.slane %v1784_v28, 1  ;;  %v1791_v44 = vrot.slane %v1789_v32, 1  ;;  %v6051_v21 = vld [vmem:[%s7868_s4 + $0x1c8] sm:$0xff]  }
 0x11a   : > { %v4882_v40 = vpack.c.bf16 %v4454_v30, %v4453_v29  ;;  %v5536_v42 = vpop.f32.mrb[16].mxu1  ;;  %v1770_v45 = vshrl.u32 %v5996_v33, 16  ;;  %v5584_v46 = vpop.f32.mrb[4].mxu0  ;;  %v1772_v53 = vshll.u32 %v5996_v33, 16  ;;  %v1777_v54 = vshll.u32 %v5997_v39, 16 }
 0x11b   : > { %v4455_v41 = vclamps-f32 %v917_v31, 1.0  ;;  %v1459_v47 = vld [vmem:[#allocation2 + $0x2c] sm:$0x1]  ;;  %v874_v48 = vmul.f32 %v5536_v42, %v6475_v51  ;;  %v729_v49 = vpop.f32.mrb[17].mxu1  ;;  %v1787_v50 = vor.u32 %v1786_v37, %v1782_v36  ;;  %v1344_v55 = vpop.f32.mrb[5].mxu0  ;;  %v1360_v61 = vmul.f32 %v5584_v46, %v6475_v51 }
 0x11c   : > { %v1460_v56 = vsel %vm6512_vm4, 0, %v1459_v47  ;;  %4979 = vst [vmem:[#allocation2 + $0x38] sm:$0xff] %v4882_v40   ;;  %v872_v58 = vmul.f32 %v6475_v51, %v729_v49  ;;  %v5537_v59 = vpop.f32.mrb[18].mxu1  ;;  %v6554_v60 = vld [vmem:[#allocation2 + $0x18] sm:$0xff]   ;;  %v5585_v62 = vpop.f32.mrb[6].mxu0  ;;  %v1774_v4 = vrot.slane %v1772_v53, 1  ;;  %v1358_v40 = vmul.f32 %v6475_v51, %v1344_v55 }
 0x11d   : > { %v4887_v57 = vpack.c.bf16 %v4456_v34, %v4455_v41  ;;  %1461 = vst [vmem:[#allocation2 + $0x2c] sm:$0x1] %v1460_v56  ;;  %v1406_v63 = vld [vmem:[#allocation2 + $0x30] sm:$0x1]  ;;  %v922_v0 = vadd.f32 %v6480_v52, %v874_v48  ;;  %v875_v1 = vmul.f32 %v5537_v59, %v6475_v51  ;;  %v732_v2 = vpop.f32.mrb[19].mxu1  ;;  %v6560_v3 = vsel %vm1768_vm5, %v1787_v50, %v1791_v44  ;;  %v6574_v16 = vpop.f32.mrb[7].mxu0 }
 0x11e   : > { %v1407_v6 = vsel %vm6507_vm3, 0, %v1406_v63  ;;  %v920_v7 = vadd.f32 %v6480_v52, %v872_v58  ;;  %v873_v8 = vmul.f32 %v6475_v51, %v732_v2  ;;  %2228 = vmatprep.mubr.bf16.mxu0 %v6560_v3  ;;  %v1779_v9 = vrot.slane %v1777_v54, 1  ;;  %v6000_v10 = vld [vmem:[#allocation2 + $0x20] ss:$0 sps:$4 sm:$0xff]   ;;  %v6002_v15 = vld [vmem:[#allocation2 + $0x24] sm:$0xff]   ;;  %v6053_v55 = vld [vmem:[%s7868_s4 + $0x1d0] sm:$0xff]  }
 0x11f   : > { %4980 = vst [vmem:[#allocation2 + $0x40] sm:$0xff] %v4887_v57   ;;  %1408 = vst [vmem:[#allocation2 + $0x30] sm:$0x1] %v1407_v6  ;;  %v4460_v11 = vclamps-f32 %v922_v0, 1.0  ;;  %v6571_v12 = vadd.f32 %v6480_v52, %v875_v1  ;;  %v1775_v13 = vor.u32 %v1774_v4, %v1770_v45  ;;  %v1794_v14 = vshrl.u32 %v6554_v60, 16  ;;  %v6052_v31 = vld [vmem:[%s7868_s4 + $0x188] sm:$0xff]  }
 0x120   : > { %v4458_v17 = vclamps-f32 %v920_v7, 1.0  ;;  %v921_v18 = vadd.f32 %v6480_v52, %v873_v8  ;;  %v1796_v19 = vshll.u32 %v6554_v60, 16  ;;  %v1801_v20 = vshll.u32 %v6000_v10, 16  ;;  %v6054_v1 = vld [vmem:[%s7868_s4 + $0x190] sm:$0xff]  }
 0x121   : > { %v4461_v22 = vclamps-f32 %v6571_v12, 1.0  ;;  %v1780_v23 = vsel %vm1768_vm5, %v1775_v13, %v1779_v9  ;;  %v1806_v24 = vshrl.u32 %v6002_v15, 16  ;;  %v1808_v25 = vshll.u32 %v6002_v15, 16  ;;  %v6013_v9 = vld [vmem:[%s7868_s4] sm:$0xff]   ;;  %v6055_v12 = vld [vmem:[%s7868_s4 + $0x1d8] sm:$0xff]  }
 0x122   : > { %v4892_v26 = vpack.c.bf16 %v4458_v17, %v4457_v35  ;;  %v4459_v27 = vclamps-f32 %v921_v18, 1.0  ;;  %v5540_v28 = vpop.f32.mrb[20].mxu1  ;;  %2229 = vmatmul.mubr.bf16.vlgmr.msra.gmra.mrb[8].mxu0 %v1780_v23  ;;  %v1798_v29 = vrot.slane %v1796_v19, 1  ;;  %v1803_v30 = vrot.slane %v1801_v20, 1  ;;  %v6014_v18 = vld [vmem:[%s7868_s4 + $0x48] sm:$0xff]   ;;  %v6056_v20 = vld [vmem:[%s7868_s4 + $0x198] sm:$0xff]  }
 0x123   : > { %v1409_v32 = vld [vmem:[#allocation2 + $0x3c] sm:$0x1]  ;;  %v1462_v33 = vld [vmem:[#allocation2 + $0x38] sm:$0x1]  ;;  %v878_v34 = vmul.f32 %v5540_v28, %v6475_v51  ;;  %v745_v36 = vpop.f32.mrb[21].mxu1  ;;  %v1810_v37 = vrot.slane %v1808_v25, 1  ;;  %v1363_v39 = vadd.f32 %v6480_v52, %v1360_v61  ;;  %5323 = vmatpush3.bf16.msra.mxu0 %v6049_v5  ;;  %v6606_v60 = vadd.f32 %v6480_v52, %v1358_v40 }
 0x124   : > { %v1410_v35 = vsel %vm6507_vm3, 0, %v1409_v32  ;;  %v1463_v41 = vsel %vm6512_vm4, 0, %v1462_v33  ;;  %4981 = vst [vmem:[#allocation2 + $0x48] sm:$0xff] %v4892_v26   ;;  %v4897_v42 = vpack.c.bf16 %v4460_v11, %v4459_v27  ;;  %v876_v44 = vmul.f32 %v6475_v51, %v745_v36  ;;  %v5541_v45 = vpop.f32.mrb[22].mxu1  ;;  %5324 = vmatprep.subr.bf16.mxu0 %v6051_v21  ;;  %v6003_v53 = vld [vmem:[#allocation2 + $0x2c] ss:$0 sps:$4 sm:$0xff]  }
 0x125   : > { %1411 = vst [vmem:[#allocation2 + $0x3c] sm:$0x1] %v1410_v35  ;;  %1464 = vst [vmem:[#allocation2 + $0x38] sm:$0x1] %v1463_v41  ;;  %v926_v47 = vadd.f32 %v6480_v52, %v878_v34  ;;  %v879_v48 = vmul.f32 %v5541_v45, %v6475_v51  ;;  %v748_v49 = vpop.f32.mrb[23].mxu1  ;;  %v1799_v50 = vor.u32 %v1798_v29, %v1794_v14  ;;  %v1813_v0 = vshll.u32 %v6003_v53, 16 }
 0x126   : > { %v1465_v46 = vld [vmem:[#allocation2 + $0x44] sm:$0x1]  ;;  %v1811_v54 = vor.u32 %v1810_v37, %v1806_v24  ;;  %4982 = vst [vmem:[#allocation2 + $0x50] sm:$0xff] %v4897_v42   ;;  %v924_v57 = vadd.f32 %v6480_v52, %v876_v44  ;;  %v877_v58 = vmul.f32 %v6475_v51, %v748_v49  ;;  %v6603_v59 = vld [vmem:[#allocation2 + $0x30] sm:$0xff]   ;;  %v4540_v10 = vclamps-f32 %v1363_v39, 1.0 }
 0x127   : > { %v1466_v56 = vsel %vm6512_vm4, 0, %v1465_v46  ;;  %v4464_v61 = vclamps-f32 %v926_v47, 1.0  ;;  %v6609_v62 = vadd.f32 %v6480_v52, %v879_v48  ;;  %v6612_v63 = vsel %vm1768_vm5, %v1799_v50, %v1803_v30  ;;  %5325 = vmatpush3.bf16.msra.mxu0 %v6052_v31  ;;  %v6057_v21 = vld [vmem:[%s7868_s4 + $0x1e0] sm:$0xff]   ;;  %v6020_v31 = vld [vmem:[%s7868_s4 + $0x50] sm:$0xff]  }
 0x128   : > { %1467 = vst [vmem:[#allocation2 + $0x44] sm:$0x1] %v1466_v56  ;;  %v4462_v2 = vclamps-f32 %v924_v57, 1.0  ;;  %v925_v4 = vadd.f32 %v6480_v52, %v877_v58  ;;  %2236 = vmatprep.mubr.bf16.mxu0 %v6612_v63  ;;  %5602 = vmatprep.mubr.bf16.mxu1 %v6612_v63  ;;  %v1818_v5 = vshrl.u32 %v6603_v59, 16  ;;  %v1820_v6 = vshll.u32 %v6603_v59, 16  ;;  %v6059_v49 = vld [vmem:[%s7868_s4 + $0x1a0] sm:$0xff]  }
 0x129   : > { %v4465_v7 = vclamps-f32 %v6609_v62, 1.0  ;;  %v1815_v8 = vrot.slane %v1813_v0, 1  ;;  %v4538_v11 = vclamps-f32 %v6606_v60, 1.0  ;;  %5326 = vmatprep.subr.bf16.mxu0 %v6053_v55  ;;  %v1359_v19 = vmul.f32 %v6475_v51, %v6574_v16  ;;  %v6017_v16 = vld [vmem:[%s7868_s4 + $0x8] sm:$0xff]  }
 0x12a   : > { %v4902_v13 = vpack.c.bf16 %v4462_v2, %v4461_v22  ;;  %v4463_v14 = vclamps-f32 %v925_v4, 1.0  ;;  %v5544_v15 = vpop.f32.mrb[24].mxu1  ;;  %2237 = vmatmul.mubr.bf16.gmra.mrb[12].mxu0 %v6560_v3  ;;  %v1822_v17 = vrot.slane %v1820_v6, 1  ;;  %v6646_v25 = vmul.f32 0.0, %v4540_v10  ;;  %v6060_v0 = vld [vmem:[%s7868_s4 + $0x1e8] sm:$0xff]  }
 0x12b   : > { %v1412_v22 = vld [vmem:[#allocation2 + $0x48] sm:$0x1]  ;;  %v882_v23 = vmul.f32 %v5544_v15, %v6475_v51  ;;  %v761_v3 = vpop.f32.mrb[25].mxu1  ;;  %v6644_v24 = vsel %vm1768_vm5, %v1811_v54, %v1815_v8  ;;  %5327 = vmatpush3.bf16.msra.mxu0 %v6054_v1  ;;  %v1362_v39 = vadd.f32 %v6480_v52, %v1359_v19  ;;  %v1371_v55 = vmul.f32 0.0, %v4538_v11  ;;  %v6024_v8 = vld [vmem:[%s7868_s4 + $0x58] sm:$0xff]  }
 0x12c   : > { %v1413_v26 = vsel %vm6507_vm3, 0, %v1412_v22  ;;  %4983 = vst [vmem:[#allocation2 + $0x58] sm:$0xff] %v4902_v13   ;;  %v4907_v27 = vpack.c.bf16 %v4464_v61, %v4463_v14  ;;  %v880_v28 = vmul.f32 %v6475_v51, %v761_v3  ;;  %v5545_v29 = vpop.f32.mrb[26].mxu1  ;;  %2244 = vmatprep.mubr.bf16.mxu0 %v6644_v24  ;;  %5603 = vmatmul.mubr.bf16.vlgmr.msra.gmra.mrb[48].mxu1 %v6644_v24  ;;  %v6656_v30 = vld [vmem:[#allocation2 + $0x38] ss:$0 sps:$4 sm:$0xff]   ;;  %v6662_v37 = vld [vmem:[#allocation2 + $0x3c] sm:$0xff]  }
 0x12d   : > { %1414 = vst [vmem:[#allocation2 + $0x48] sm:$0x1] %v1413_v26  ;;  %v1415_v32 = vld [vmem:[#allocation2 + $0x54] sm:$0x1]  ;;  %v1468_v33 = vld [vmem:[#allocation2 + $0x50] sm:$0x1]  ;;  %v930_v34 = vadd.f32 %v6480_v52, %v882_v23  ;;  %5187 = vmatpush3.bf16.msra.mxu1 %v6013_v9  ;;  %5328 = vmatprep.subr.bf16.mxu0 %v6055_v12  ;;  %v883_v45 = vmul.f32 %v5545_v29, %v6475_v51 }
 0x12e   : > { %v764_v36 = vpop.f32.mrb[27].mxu1  ;;  %v1416_v40 = vsel %vm6507_vm3, 0, %v1415_v32  ;;  %v1469_v35 = vsel %vm6512_vm4, 0, %v1468_v33  ;;  %4984 = vst [vmem:[#allocation2 + $0x60] sm:$0xff] %v4907_v27   ;;  %v928_v41 = vadd.f32 %v6480_v52, %v880_v28  ;;  %5188 = vmatprep.subr.bf16.mxu1 %v6014_v18  ;;  %v1823_v46 = vor.u32 %v1822_v17, %v1818_v5  ;;  %v6021_v61 = vld [vmem:[%s7868_s4 + $0x10] sm:$0xff]   ;;  %v6061_v9 = vld [vmem:[%s7868_s4 + $0x1a8] sm:$0xff]  }
 0x12f   : > { %v881_v42 = vmul.f32 %v6475_v51, %v764_v36  ;;  %1417 = vst [vmem:[#allocation2 + $0x54] sm:$0x1] %v1416_v40  ;;  %1470 = vst [vmem:[#allocation2 + $0x50] sm:$0x1] %v1469_v35  ;;  %v4468_v44 = vclamps-f32 %v930_v34, 1.0  ;;  %v1825_v47 = vshll.u32 %v6656_v30, 16  ;;  %5329 = vmatpush3.bf16.msra.mxu0 %v6056_v20  ;;  %v4846_v6 = vpack.c.bf16 %v1371_v55, %v1371_v55 }
 0x130   : > { %v6673_v48 = vld [vmem:[#allocation2 + $0x44] ss:$0 sps:$4 sm:$0xff]   ;;  %v4466_v50 = vclamps-f32 %v928_v41, 1.0  ;;  %v1832_v54 = vshll.u32 %v6662_v37, 16  ;;  %5330 = vmatprep.subr.bf16.mxu0 %v6057_v21  ;;  %v1830_v57 = vshrl.u32 %v6662_v37, 16  ;;  %v4539_v60 = vclamps-f32 %v1362_v39, 1.0 }
 0x131   : > { %v929_v53 = vadd.f32 %v6480_v52, %v881_v42  ;;  %v1827_v56 = vrot.slane %v1825_v47, 1  ;;  %v1837_v58 = vshll.u32 %v6673_v48, 16  ;;  %5189 = vmatpush3.bf16.msra.mxu1 %v6017_v16  ;;  %v931_v11 = vadd.f32 %v6480_v52, %v883_v45  ;;  %v6027_v13 = vld [vmem:[%s7868_s4 + $0x18] sm:$0xff]   ;;  %1388 = vst [vmem:[#allocation2 + $0xcc] sm:$0xf] %v4846_v6  ;;  %v6028_v21 = vld [vmem:[%s7868_s4 + $0x60] sm:$0xff]  }
 0x132   : > { %v4912_v1 = vpack.c.bf16 %v4466_v50, %v4465_v7  ;;  %v5548_v4 = vpop.f32.mrb[28].mxu1  ;;  %2245 = vmatmul.mubr.bf16.gmra.mrb[16].mxu0 %v6612_v63  ;;  %v1834_v5 = vrot.slane %v1832_v54, 1  ;;  %5190 = vmatprep.subr.bf16.mxu1 %v6020_v31  ;;  %v6062_v22 = vld [vmem:[%s7868_s4 + $0x1f0] sm:$0xff]   ;;  %v1372_v26 = vmul.f32 0.0, %v4539_v60  ;;  %v6031_v50 = vld [vmem:[%s7868_s4 + $0x20] sm:$0xff]  }
 0x133   : > { %v4467_v2 = vclamps-f32 %v929_v53, 1.0  ;;  %v1471_v10 = vld [vmem:[#allocation2 + $0x5c] sm:$0x1]  ;;  %v886_v62 = vmul.f32 %v5548_v4, %v6475_v51  ;;  %v777_v7 = vpop.f32.mrb[29].mxu1  ;;  %v6700_v12 = vsel %vm1768_vm5, %v1823_v46, %v1827_v56  ;;  %v1839_v63 = vrot.slane %v1837_v58, 1  ;;  %5331 = vmatpush3.bf16.msra.mxu0 %v6059_v49  ;;  %v6063_v39 = vld [vmem:[%s7868_s4 + $0x1b0] sm:$0xff]  }
 0x134   : > { %v1472_v14 = vsel %vm6512_vm4, 0, %v1471_v10  ;;  %4985 = vst [vmem:[#allocation2 + $0x68] sm:$0xff] %v4912_v1   ;;  %v884_v17 = vmul.f32 %v6475_v51, %v777_v7  ;;  %v5549_v18 = vpop.f32.mrb[30].mxu1  ;;  %2252 = vmatprep.mubr.bf16.mxu0 %v6700_v12  ;;  %5606 = vmatprep.mubr.bf16.mxu1 %v6700_v12  ;;  %v1835_v19 = vor.u32 %v1834_v5, %v1830_v57  ;;  %v6710_v20 = vld [vmem:[#allocation2 + $0x48] sm:$0xff]   ;;  %v4469_v40 = vclamps-f32 %v931_v11, 1.0  ;;  %v6065_v4 = vld [vmem:[%s7868_s4 + $0x1b8] sm:$0xff]  }
 0x135   : > { %v4917_v15 = vpack.c.bf16 %v4468_v44, %v4467_v2  ;;  %1473 = vst [vmem:[#allocation2 + $0x5c] sm:$0x1] %v1472_v14  ;;  %v1418_v23 = vld [vmem:[#allocation2 + $0x60] sm:$0x1]  ;;  %v934_v3 = vadd.f32 %v6480_v52, %v886_v62  ;;  %v780_v16 = vpop.f32.mrb[31].mxu1  ;;  %5191 = vmatpush3.bf16.msra.mxu1 %v6021_v61  ;;  %5332 = vmatprep.subr.bf16.mxu0 %v6060_v0  ;;  %v1844_v36 = vshll.u32 %v6710_v20, 16 }
 0x136   : > { %v1419_v27 = vsel %vm6507_vm3, 0, %v1418_v23  ;;  %v932_v28 = vadd.f32 %v6480_v52, %v884_v17  ;;  %v885_v29 = vmul.f32 %v6475_v51, %v780_v16  ;;  %v6724_v31 = vsel %vm1768_vm5, %v1835_v19, %v1839_v63  ;;  %v6726_v32 = vld [vmem:[#allocation2 + $0x50] ss:$0 sps:$4 sm:$0xff]   ;;  %v6728_v33 = vld [vmem:[#allocation2 + $0x54] sm:$0xff]   ;;  %5192 = vmatprep.subr.bf16.mxu1 %v6024_v8  ;;  %v6034_v58 = vld [vmem:[%s7868_s4 + $0x68] sm:$0xff]  }
 0x137   : > { %4986 = vst [vmem:[#allocation2 + $0x70] sm:$0xff] %v4917_v15   ;;  %1420 = vst [vmem:[#allocation2 + $0x60] sm:$0x1] %v1419_v27  ;;  %v887_v34 = vmul.f32 %v5549_v18, %v6475_v51  ;;  %5607 = vmatmul.mubr.bf16.gmra.mrb[52].mxu1 %v6724_v31  ;;  %5333 = vmatpush3.bf16.msra.mxu0 %v6061_v9  ;;  %v1849_v42 = vshll.u32 %v6726_v32, 16  ;;  %v6064_v44 = vld [vmem:[%s7868_s4 + $0x1f8] sm:$0xff]   ;;  %v1842_v45 = vshrl.u32 %v6710_v20, 16 }
 0x138   : > { %v4470_v35 = vclamps-f32 %v932_v28, 1.0  ;;  %v933_v41 = vadd.f32 %v6480_v52, %v885_v29  ;;  %5334 = vmatprep.subr.bf16.mxu0 %v6062_v22  ;;  %v1846_v46 = vrot.slane %v1844_v36, 1  ;;  %v1856_v47 = vshll.u32 %v6728_v33, 16  ;;  %v6038_v11 = vld [vmem:[%s7868_s4 + $0x70] sm:$0xff]  }
 0x139   : > { %v4972_v49 = vpack.c.bf16 %v6646_v25, %v1372_v26  ;;  %5193 = vmatpush3.bf16.msra.mxu1 %v6027_v13  ;;  %v4472_v53 = vclamps-f32 %v934_v3, 1.0  ;;  %v1851_v57 = vrot.slane %v1849_v42, 1  ;;  %v935_v25 = vadd.f32 %v6480_v52, %v887_v34 }
 0x13a   : > { %v4922_v54 = vpack.c.bf16 %v4470_v35, %v4469_v40  ;;  %v4471_v55 = vclamps-f32 %v933_v41, 1.0  ;;  %v5552_v56 = vpop.f32.mrb[32].mxu1  ;;  %2253 = vmatmul.mubr.bf16.gmra.mrb[20].mxu0 %v6644_v24  ;;  %5194 = vmatprep.subr.bf16.mxu1 %v6028_v21  ;;  %v1847_v2 = vor.u32 %v1846_v46, %v1842_v45  ;;  %v6035_v24 = vld [vmem:[%s7868_s4 + $0x28] sm:$0xff]   ;;  %v1858_v14 = vrot.slane %v1856_v47, 1  ;;  %v6041_v40 = vld [vmem:[%s7868_s4 + $0x30] sm:$0xff]   ;;  %v6044_v35 = vld [vmem:[%s7868_s4 + $0x78] sm:$0xff]  }
 0x13b   : > { %v1421_v60 = vld [vmem:[#allocation2 + $0x6c] sm:$0x1]  ;;  %v1474_v61 = vld [vmem:[#allocation2 + $0x68] sm:$0x1]  ;;  %v890_v0 = vmul.f32 %v5552_v56, %v6475_v51  ;;  %v793_v1 = vpop.f32.mrb[33].mxu1  ;;  %2260 = vmatprep.mubr.bf16.mxu0 %v6724_v31  ;;  %4997 = vst [vmem:[#allocation2 + $0xd0] sm:$0xff] %v4972_v49   ;;  %5335 = vmatpush3.bf16.msra.mxu0 %v6063_v39 }
 0x13c   : > { %v1422_v5 = vsel %vm6507_vm3, 0, %v1421_v60  ;;  %v1475_v6 = vsel %vm6512_vm4, 0, %v1474_v61  ;;  %4987 = vst [vmem:[#allocation2 + $0x78] sm:$0xff] %v4922_v54   ;;  %v4927_v8 = vpack.c.bf16 %v4472_v53, %v4471_v55  ;;  %v888_v9 = vmul.f32 %v6475_v51, %v793_v1  ;;  %v5553_v10 = vpop.f32.mrb[34].mxu1  ;;  %5336 = vmatprep.subr.bf16.mxu0 %v6064_v44  ;;  %v6771_v13 = vld [vmem:[#allocation2 + $0x5c] ss:$0 sps:$4 sm:$0xff]  }
 0x13d   : > { %1423 = vst [vmem:[#allocation2 + $0x6c] sm:$0x1] %v1422_v5  ;;  %1476 = vst [vmem:[#allocation2 + $0x68] sm:$0x1] %v1475_v6  ;;  %v796_v7 = vpop.f32.mrb[35].mxu1  ;;  %v6769_v63 = vsel %vm1768_vm5, %v1847_v2, %v1851_v57  ;;  %5195 = vmatpush3.bf16.msra.mxu1 %v6031_v50  ;;  %v938_v17 = vadd.f32 %v6480_v52, %v890_v0  ;;  %v891_v23 = vmul.f32 %v5553_v10, %v6475_v51  ;;  %v6815_v0 = vld [vmem:[%s7868_s4 + $0x80] sm:$0xff]  }
 0x13e   : > { %v1477_v62 = vld [vmem:[#allocation2 + $0x74] sm:$0x1]  ;;  %4988 = vst [vmem:[#allocation2 + $0x80] sm:$0xff] %v4927_v8   ;;  %v936_v18 = vadd.f32 %v6480_v52, %v888_v9  ;;  %v889_v19 = vmul.f32 %v6475_v51, %v796_v7  ;;  %5610 = vmatprep.mubr.bf16.mxu1 %v6769_v63  ;;  %v1445_v21 = vld [vmem:[#allocation2 + $0xcc] sm:$0x1]  ;;  %v6779_v22 = vld [vmem:[#allocation2 + $0x60] sm:$0xff]   ;;  %5196 = vmatprep.subr.bf16.mxu1 %v6034_v58 }
 0x13f   : > { %v1478_v15 = vsel %vm6512_vm4, 0, %v1477_v62  ;;  %v1854_v3 = vshrl.u32 %v6728_v33, 16  ;;  %v1861_v16 = vshll.u32 %v6771_v13, 16  ;;  %v1446_v26 = vsel %vm6507_vm3, 0, %v1445_v21  ;;  %5337 = vmatpush3.bf16.msra.mxu0 %v6065_v4 }
 0x140   : > { %1479 = vst [vmem:[#allocation2 + $0x74] sm:$0x1] %v1478_v15  ;;  %v4473_v27 = vclamps-f32 %v935_v25, 1.0  ;;  %v4474_v28 = vclamps-f32 %v936_v18, 1.0  ;;  %v937_v29 = vadd.f32 %v6480_v52, %v889_v19  ;;  %1447 = vst [vmem:[#allocation2 + $0xcc] sm:$0x1] %v1446_v26  ;;  %v939_v50 = vadd.f32 %v6480_v52, %v891_v23 }
 0x141   : > { %v1868_v34 = vshll.u32 %v6779_v22, 16  ;;  %v1859_v36 = vor.u32 %v1858_v14, %v1854_v3  ;;  %v1863_v39 = vrot.slane %v1861_v16, 1  ;;  %5197 = vmatpush3.bf16.msra.mxu1 %v6035_v24  ;;  %v4476_v41 = vclamps-f32 %v938_v17, 1.0 }
 0x142   : > { %v4932_v42 = vpack.c.bf16 %v4474_v28, %v4473_v27  ;;  %v4475_v44 = vclamps-f32 %v937_v29, 1.0  ;;  %v5556_v45 = vpop.f32.mrb[36].mxu1  ;;  %2261 = vmatmul.mubr.bf16.gmra.mrb[24].mxu0 %v6700_v12  ;;  %v1501_v47 = vld [vmem:[#allocation2 + $0xd4] sm:$0x1]  ;;  %5198 = vmatprep.subr.bf16.mxu1 %v6038_v11  ;;  %v6047_v12 = vld [vmem:[%s7868_s4 + $0x38] sm:$0xff]   ;;  %v4477_v11 = vclamps-f32 %v939_v50, 1.0 }
 0x143   : > { %v1870_v46 = vrot.slane %v1868_v34, 1  ;;  %v1424_v49 = vld [vmem:[#allocation2 + $0x78] sm:$0x1]  ;;  %v894_v53 = vmul.f32 %v5556_v45, %v6475_v51  ;;  %v809_v54 = vpop.f32.mrb[37].mxu1  ;;  %2268 = vmatprep.mubr.bf16.mxu0 %v6769_v63  ;;  %v6799_v55 = vsel %vm1768_vm5, %v1859_v36, %v1863_v39  ;;  %v1502_v56 = vsel %vm6512_vm4, 0, %v1501_v47 }
 0x144   : > { %v1425_v57 = vsel %vm6507_vm3, 0, %v1424_v49  ;;  %4989 = vst [vmem:[#allocation2 + $0x88] sm:$0xff] %v4932_v42   ;;  %v4937_v58 = vpack.c.bf16 %v4476_v41, %v4475_v44  ;;  %v892_v60 = vmul.f32 %v6475_v51, %v809_v54  ;;  %v5557_v61 = vpop.f32.mrb[38].mxu1  ;;  %5611 = vmatmul.mubr.bf16.gmra.mrb[56].mxu1 %v6799_v55  ;;  %v6810_v25 = vld [vmem:[#allocation2 + $0x68] ss:$0 sps:$4 sm:$0xff]   ;;  %v6818_v5 = vld [vmem:[#allocation2 + $0x6c] sm:$0xff]  }
 0x145   : > { %1503 = vst [vmem:[#allocation2 + $0xd4] sm:$0x1] %v1502_v56  ;;  %1426 = vst [vmem:[#allocation2 + $0x78] sm:$0x1] %v1425_v57  ;;  %v1427_v1 = vld [vmem:[#allocation2 + $0x84] sm:$0x1]  ;;  %v942_v24 = vadd.f32 %v6480_v52, %v894_v53  ;;  %5199 = vmatpush3.bf16.msra.mxu1 %v6041_v40  ;;  %v895_v62 = vmul.f32 %v5557_v61, %v6475_v51 }
 0x146   : > { %v1480_v2 = vld [vmem:[#allocation2 + $0x80] sm:$0x1]  ;;  %v812_v4 = vpop.f32.mrb[39].mxu1  ;;  %v1428_v6 = vsel %vm6507_vm3, 0, %v1427_v1  ;;  %4990 = vst [vmem:[#allocation2 + $0x90] sm:$0xff] %v4937_v58   ;;  %v940_v9 = vadd.f32 %v6480_v52, %v892_v60  ;;  %5200 = vmatprep.subr.bf16.mxu1 %v6044_v35  ;;  %v1866_v7 = vshrl.u32 %v6779_v22, 16 }
 0x147   : > { %v1481_v8 = vsel %vm6512_vm4, 0, %v1480_v2  ;;  %v893_v10 = vmul.f32 %v6475_v51, %v812_v4  ;;  %1429 = vst [vmem:[#allocation2 + $0x84] sm:$0x1] %v1428_v6  ;;  %v1873_v14 = vshll.u32 %v6810_v25, 16  ;;  %v6829_v15 = vld [vmem:[#allocation2 + $0x74] ss:$0 sps:$4 sm:$0xff]  }
 0x148   : > { %1482 = vst [vmem:[#allocation2 + $0x80] sm:$0x1] %v1481_v8  ;;  %v4478_v17 = vclamps-f32 %v940_v9, 1.0  ;;  %v1880_v19 = vshll.u32 %v6818_v5, 16  ;;  %v4480_v21 = vclamps-f32 %v942_v24, 1.0  ;;  %v1871_v23 = vor.u32 %v1870_v46, %v1866_v7 }
 0x149   : > { %v941_v18 = vadd.f32 %v6480_v52, %v893_v10  ;;  %v1875_v3 = vrot.slane %v1873_v14, 1  ;;  %v1885_v16 = vshll.u32 %v6829_v15, 16  ;;  %5201 = vmatpush3.bf16.msra.mxu1 %v6047_v12  ;;  %v1878_v28 = vshrl.u32 %v6818_v5, 16  ;;  %v6840_v52 = vld [vmem:[%s7870_s6 + $0x1] ss:$0 sm:$0xff] }
 0x14a   : > { %v4942_v26 = vpack.c.bf16 %v4478_v17, %v4477_v11  ;;  %v5560_v51 = vpop.f32.mrb[40].mxu1  ;;  %2269 = vmatmul.mubr.bf16.gmra.mrb[28].mxu0 %v6724_v31  ;;  %v1882_v29 = vrot.slane %v1880_v19, 1  ;;  %5634 = vmatprep.subr.bf16.mxu1 %v6815_v0  ;;  %v943_v36 = vadd.f32 %v6840_v52, %v895_v62  ;;  %v6846_v39 = vld [vmem:[%s7870_s6] ss:$0 sm:$0xff] }
 0x14b   : > { %v4479_v27 = vclamps-f32 %v941_v18, 1.0  ;;  %v1483_v34 = vld [vmem:[#allocation2 + $0x8c] sm:$0x1]  ;;  %v898_v31 = vmul.f32 %v6846_v39, %v5560_v51  ;;  %v825_v40 = vpop.f32.mrb[41].mxu1  ;;  %2276 = vmatprep.mubr.bf16.mxu0 %v6799_v55  ;;  %v6851_v35 = vsel %vm1768_vm5, %v1871_v23, %v1875_v3  ;;  %v1887_v41 = vrot.slane %v1885_v16, 1 }
 0x14c   : > { %v1484_v42 = vsel %vm6512_vm4, 0, %v1483_v34  ;;  %4991 = vst [vmem:[#allocation2 + $0x98] sm:$0xff] %v4942_v26   ;;  %v896_v45 = vmul.f32 %v6846_v39, %v825_v40  ;;  %v5561_v46 = vpop.f32.mrb[42].mxu1  ;;  %5614 = vmatprep.mubr.bf16.mxu1 %v6851_v35  ;;  %v1883_v47 = vor.u32 %v1882_v29, %v1878_v28  ;;  %v6857_v49 = vld [vmem:[#allocation2 + $0x78] sm:$0xff]   ;;  %v4481_v24 = vclamps-f32 %v943_v36, 1.0 }
 0x14d   : > { %v4947_v44 = vpack.c.bf16 %v4480_v21, %v4479_v27  ;;  %1485 = vst [vmem:[#allocation2 + $0x8c] sm:$0x1] %v1484_v42  ;;  %v1430_v50 = vld [vmem:[#allocation2 + $0x90] sm:$0x1]  ;;  %v946_v53 = vadd.f32 %v6840_v52, %v898_v31  ;;  %v828_v54 = vpop.f32.mrb[43].mxu1  ;;  %v899_v1 = vmul.f32 %v6846_v39, %v5561_v46  ;;  %v1892_v2 = vshll.u32 %v6857_v49, 16 }
 0x14e   : > { %v1431_v56 = vsel %vm6507_vm3, 0, %v1430_v50  ;;  %v944_v12 = vadd.f32 %v6840_v52, %v896_v45  ;;  %v897_v57 = vmul.f32 %v6846_v39, %v828_v54  ;;  %v6865_v58 = vsel %vm1768_vm5, %v1883_v47, %v1887_v41  ;;  %v6869_v61 = vld [vmem:[#allocation2 + $0x84] sm:$0xff]  }
 0x14f   : > { %4992 = vst [vmem:[#allocation2 + $0xa0] sm:$0xff] %v4947_v44   ;;  %v6867_v60 = vld [vmem:[#allocation2 + $0x80] ss:$0 sps:$4 sm:$0xff]   ;;  %1432 = vst [vmem:[#allocation2 + $0x90] sm:$0x1] %v1431_v56  ;;  %5615 = vmatmul.mubr.bf16.gmra.mrb[60].mxu1 %v6865_v58  ;;  %v1890_v9 = vshrl.u32 %v6857_v49, 16  ;;  %v947_v23 = vadd.f32 %v6840_v52, %v899_v1 }
 0x150   : > { %v4482_v4 = vclamps-f32 %v944_v12, 1.0  ;;  %v945_v6 = vadd.f32 %v6840_v52, %v897_v57  ;;  %v1897_v8 = vshll.u32 %v6867_v60, 16  ;;  %v1894_v10 = vrot.slane %v1892_v2, 1 }
 0x151   : > { %v1904_v11 = vshll.u32 %v6869_v61, 16  ;;  %v4484_v62 = vclamps-f32 %v946_v53, 1.0  ;;  %v1902_v54 = vshrl.u32 %v6869_v61, 16  ;;  %v4485_v12 = vclamps-f32 %v947_v23, 1.0 }
 0x152   : > { %v4952_v7 = vpack.c.bf16 %v4482_v4, %v4481_v24  ;;  %v4483_v14 = vclamps-f32 %v945_v6, 1.0  ;;  %v5564_v17 = vpop.f32.mrb[44].mxu1  ;;  %2277 = vmatmul.mubr.bf16.gmra.mrb[32].mxu0 %v6769_v63  ;;  %v1899_v18 = vrot.slane %v1897_v8, 1  ;;  %v1895_v26 = vor.u32 %v1894_v10, %v1890_v9 }
 0x153   : > { %v1433_v19 = vld [vmem:[#allocation2 + $0x9c] sm:$0x1]  ;;  %v1486_v21 = vld [vmem:[#allocation2 + $0x98] sm:$0x1]  ;;  %v902_v3 = vmul.f32 %v6846_v39, %v5564_v17  ;;  %v841_v16 = vpop.f32.mrb[45].mxu1  ;;  %2284 = vmatprep.mubr.bf16.mxu0 %v6851_v35  ;;  %v1906_v42 = vrot.slane %v1904_v11, 1 }
 0x154   : > { %v1434_v27 = vsel %vm6507_vm3, 0, %v1433_v19  ;;  %v1487_v51 = vsel %vm6512_vm4, 0, %v1486_v21  ;;  %4993 = vst [vmem:[#allocation2 + $0xa8] sm:$0xff] %v4952_v7   ;;  %v4957_v28 = vpack.c.bf16 %v4484_v62, %v4483_v14  ;;  %v900_v63 = vmul.f32 %v6846_v39, %v841_v16  ;;  %v5565_v29 = vpop.f32.mrb[46].mxu1  ;;  %v6891_v41 = vld [vmem:[#allocation2 + $0x8c] ss:$0 sps:$4 sm:$0xff]  }
 0x155   : > { %1435 = vst [vmem:[#allocation2 + $0x9c] sm:$0x1] %v1434_v27  ;;  %1488 = vst [vmem:[#allocation2 + $0x98] sm:$0x1] %v1487_v51  ;;  %v903_v36 = vmul.f32 %v6846_v39, %v5565_v29  ;;  %v844_v31 = vpop.f32.mrb[47].mxu1  ;;  %v6889_v40 = vsel %vm1768_vm5, %v1895_v26, %v1899_v18  ;;  %v950_v45 = vadd.f32 %v6840_v52, %v902_v3  ;;  %v1909_v56 = vshll.u32 %v6891_v41, 16 }
 0x156   : > { %v1489_v34 = vld [vmem:[#allocation2 + $0xa4] sm:$0x1]  ;;  %4994 = vst [vmem:[#allocation2 + $0xb0] sm:$0xff] %v4957_v28   ;;  %v948_v46 = vadd.f32 %v6840_v52, %v900_v63  ;;  %v901_v47 = vmul.f32 %v6846_v39, %v844_v31  ;;  %5618 = vmatprep.mubr.bf16.mxu1 %v6889_v40  ;;  %v6899_v50 = vld [vmem:[#allocation2 + $0x90] sm:$0xff]   ;;  %v1907_v4 = vor.u32 %v1906_v42, %v1902_v54 }
 0x157   : > { %v1490_v44 = vsel %vm6512_vm4, 0, %v1489_v34  ;;  %v951_v53 = vadd.f32 %v6840_v52, %v903_v36  ;;  %v1916_v2 = vshll.u32 %v6899_v50, 16  ;;  %v1911_v39 = vrot.slane %v1909_v56, 1 }
 0x158   : > { %1491 = vst [vmem:[#allocation2 + $0xa4] sm:$0x1] %v1490_v44  ;;  %v4486_v57 = vclamps-f32 %v948_v46, 1.0  ;;  %v949_v1 = vadd.f32 %v6840_v52, %v901_v47  ;;  %v4488_v6 = vclamps-f32 %v950_v45, 1.0  ;;  %v1914_v3 = vshrl.u32 %v6899_v50, 16 }
 0x159   : > { %v4489_v24 = vclamps-f32 %v951_v53, 1.0  ;;  %v6909_v62 = vsel %vm1768_vm5, %v1907_v4, %v1911_v39  ;;  %v1918_v7 = vrot.slane %v1916_v2, 1  ;;  %v6953_v2 = vld [vmem:[#allocation2 + $0xcc] sm:$0xff]  }
 0x15a   : > { %v4962_v8 = vpack.c.bf16 %v4486_v57, %v4485_v12  ;;  %v4487_v9 = vclamps-f32 %v949_v1, 1.0  ;;  %2285 = vmatmul.mubr.bf16.gmra.mrb[36].mxu0 %v6799_v55  ;;  %5619 = vmatmul.mubr.bf16.gmra.mrb[64].mxu1 %v6909_v62 }
 0x15b   : > { %v1436_v10 = vld [vmem:[#allocation2 + $0xa8] sm:$0x1]  ;;  %v4845_v11 = vpack.c.bf16 %v4489_v24, %v4489_v24  ;;  %2292 = vmatprep.mubr.bf16.mxu0 %v6865_v58  ;;  %v1919_v51 = vor.u32 %v1918_v7, %v1914_v3 }
 0x15c   : > { %v1437_v52 = vsel %vm6507_vm3, 0, %v1436_v10  ;;  %4995 = vst [vmem:[#allocation2 + $0xb8] sm:$0xff] %v4962_v8   ;;  %v4967_v14 = vpack.c.bf16 %v4488_v6, %v4487_v9  ;;  %v6914_v17 = vld [vmem:[#allocation2 + $0x98] ss:$0 sps:$4 sm:$0xff]   ;;  %v6916_v18 = vld [vmem:[#allocation2 + $0x9c] sm:$0xff]   ;;  %v1976_v10 = vshll.u32 %v6953_v2, 16 }
 0x15d   : > { %1438 = vst [vmem:[#allocation2 + $0xa8] sm:$0x1] %v1437_v52  ;;  %v1439_v55 = vld [vmem:[#allocation2 + $0xb4] sm:$0x1]  ;;  %v1492_v19 = vld [vmem:[#allocation2 + $0xb0] sm:$0x1] }
 0x15e   : > { %1304 = vst [vmem:[#allocation2 + $0xc8] sm:$0xf] %v4845_v11  ;;  %v1440_v21 = vsel %vm6507_vm3, 0, %v1439_v55  ;;  %v1493_v23 = vsel %vm6512_vm4, 0, %v1492_v19  ;;  %4996 = vst [vmem:[#allocation2 + $0xc0] sm:$0xff] %v4967_v14   ;;  %v1921_v16 = vshll.u32 %v6914_v17, 16 }
 0x15f   : > { %1441 = vst [vmem:[#allocation2 + $0xb4] sm:$0x1] %v1440_v21  ;;  %1494 = vst [vmem:[#allocation2 + $0xb0] sm:$0x1] %v1493_v23  ;;  %v6924_v26 = vld [vmem:[#allocation2 + $0xa4] ss:$0 sps:$4 sm:$0xff]  }
 0x160   : > { %v1928_v27 = vshll.u32 %v6916_v18, 16  ;;  %v1923_v28 = vrot.slane %v1921_v16, 1  ;;  %v1926_v63 = vshrl.u32 %v6916_v18, 16  ;;  %v1933_v34 = vshll.u32 %v6924_v26, 16  ;;  %v6965_v52 = vld [vmem:[#allocation2 + $0xd4] ss:$0 sps:$4 sm:$0xff]  }
 0x161   : > { %v1974_v16 = vshrl.u32 %v6953_v2, 16 }
 0x162   : > { %v1930_v29 = vrot.slane %v1928_v27, 1  ;;  %2293 = vmatmul.mubr.bf16.gmra.mrb[40].mxu0 %v6851_v35  ;;  %v6931_v36 = vsel %vm1768_vm5, %v1919_v51, %v1923_v28  ;;  %v1935_v44 = vrot.slane %v1933_v34, 1  ;;  %v1978_v27 = vrot.slane %v1976_v10, 1 }
 0x163   : > { %v1495_v31 = vld [vmem:[#allocation2 + $0xbc] sm:$0x1]  ;;  %2300 = vmatprep.mubr.bf16.mxu0 %v6889_v40  ;;  %5622 = vmatprep.mubr.bf16.mxu1 %v6931_v36 }
 0x164   : > { %v1931_v42 = vor.u32 %v1930_v29, %v1926_v63  ;;  %v1496_v45 = vsel %vm6512_vm4, 0, %v1495_v31  ;;  %v6937_v47 = vld [vmem:[#allocation2 + $0xa8] sm:$0xff]   ;;  %v1981_v29 = vshll.u32 %v6965_v52, 16 }
 0x165   : > { %v1498_v46 = vld [vmem:[#allocation2 + $0xc8] sm:$0x1]  ;;  %1497 = vst [vmem:[#allocation2 + $0xbc] sm:$0x1] %v1496_v45  ;;  %v1442_v53 = vld [vmem:[#allocation2 + $0xc0] sm:$0x1] }
 0x166   : > { %v1499_v35 = vsel %vm6512_vm4, 0, %v1498_v46  ;;  %v6942_v54 = vsel %vm1768_vm5, %v1931_v42, %v1935_v44  ;;  %v1443_v56 = vsel %vm6507_vm3, 0, %v1442_v53  ;;  %v6947_v12 = vld [vmem:[#allocation2 + $0xb0] ss:$0 sps:$4 sm:$0xff]   ;;  %v1940_v57 = vshll.u32 %v6937_v47, 16  ;;  %v6950_v1 = vld [vmem:[#allocation2 + $0xb4] sm:$0xff]  }
 0x167   : > { %1500 = vst [vmem:[#allocation2 + $0xc8] sm:$0x1] %v1499_v35  ;;  %5623 = vmatmul.mubr.bf16.gmra.mrb[68].mxu1 %v6942_v54  ;;  %1444 = vst [vmem:[#allocation2 + $0xc0] sm:$0x1] %v1443_v56  ;;  %v1945_v43 = vshll.u32 %v6947_v12, 16  ;;  %v1938_v24 = vshrl.u32 %v6937_v47, 16  ;;  %v1979_v44 = vor.u32 %v1978_v27, %v1974_v16 }
 0x168   : > { %v1942_v4 = vrot.slane %v1940_v57, 1  ;;  %v1952_v39 = vshll.u32 %v6950_v1, 16  ;;  %v1950_v14 = vshrl.u32 %v6950_v1, 16  ;;  %v1983_v45 = vrot.slane %v1981_v29, 1  ;;  %v6090_v46 = vld [vmem:[#allocation2 + $0xc] sm:$0xff]   ;;  %v6091_v53 = vld [vmem:[#allocation2] sm:$0xff]  }
 0x169   : > { %v1947_v38 = vrot.slane %v1945_v43, 1  ;;  %v6058_v35 = vld [vmem:[%s7868_s4 + $0x88] sm:$0xff]   ;;  %v6988_v56 = vld [vmem:[#allocation2 + $0x18] sm:$0xff]   ;;  %v6068_v57 = vld [vmem:[%s7868_s4 + $0xa0] sm:$0xff]  }
 0x16a   : > { %2301 = vmatmul.mubr.bf16.gmra.mrb[44].mxu0 %v6865_v58  ;;  %v1943_v6 = vor.u32 %v1942_v4, %v1938_v24  ;;  %v1954_v9 = vrot.slane %v1952_v39, 1  ;;  %v6069_v43 = vld [vmem:[%s7868_s4 + $0xa8] sm:$0xff]   ;;  %v6094_v24 = vld [vmem:[#allocation2 + $0x14] ss:$0 sps:$4 sm:$0xff]   ;;  %v2988_v39 = vrot.slane %v6090_v46, 1 }
 0x16b   : > { %2308 = vmatprep.mubr.bf16.mxu0 %v6909_v62  ;;  %v2989_v4 = vrot.slane %v6094_v24, 1  ;;  %v6098_v16 = vld [vmem:[#allocation2 + $0x2c] ss:$0 sps:$4 sm:$0xff]  }
 0x16c   : > { %v6959_v8 = vld [vmem:[#allocation2 + $0xbc] ss:$0 sps:$4 sm:$0xff]   ;;  %v1948_v11 = vsel %vm1768_vm5, %v1943_v6, %v1947_v38  ;;  %v1955_v19 = vor.u32 %v1954_v9, %v1950_v14  ;;  %v6095_v9 = vld [vmem:[#allocation2 + $0x8] ss:$0 sps:$4 sm:$0xff]   ;;  %v6096_v14 = vld [vmem:[#allocation2 + $0x20] ss:$0 sps:$4 sm:$0xff]  }
 0x16d   : > { %5626 = vmatprep.mubr.bf16.mxu1 %v1948_v11  ;;  %v1957_v58 = vshll.u32 %v6959_v8, 16  ;;  %v6071_v38 = vld [vmem:[%s7868_s4 + $0xb8] sm:$0xff]   ;;  %v2990_v6 = vsel %vm2984_vm6, %v2988_v39, %v2989_v4  ;;  %v2986_v10 = vrot.slane %v6095_v9, 1  ;;  %v2995_v27 = vrot.slane %v6098_v16, 1 }
 0x16e   : > { %v6963_v7 = vld [vmem:[#allocation2 + $0xc8] ss:$0 sps:$4 sm:$0xff]   ;;  %v6969_v55 = vld [vmem:[#allocation2 + $0xc0] sm:$0xff]   ;;  %v3025_v39 = vrot.slane %v6924_v26, 1 }
 0x16f   : > { %v1959_v21 = vrot.slane %v1957_v58, 1  ;;  %v1964_v23 = vshll.u32 %v6969_v55, 16  ;;  %v1969_v3 = vshll.u32 %v6963_v7, 16  ;;  %v1962_v28 = vshrl.u32 %v6969_v55, 16 }
 0x170   : > { %v2992_v58 = vrot.slane %v6096_v14, 1 }
 0x171   : > { %v1960_v51 = vsel %vm1768_vm5, %v1955_v19, %v1959_v21  ;;  %v1966_v63 = vrot.slane %v1964_v23, 1  ;;  %v1971_v31 = vrot.slane %v1969_v3, 1  ;;  %v2991_v19 = vrot.slane %v6988_v56, 1  ;;  %v7030_v3 = vld [vmem:[#allocation2 + $0x30] sm:$0xff]  }
 0x172   : > { %2309 = vmatmul.mubr.bf16.gmra.mrb[48].mxu0 %v6889_v40  ;;  %5627 = vmatmul.mubr.bf16.gmra.mrb[72].mxu1 %v1960_v51  ;;  %v1984_v40 = vsel %vm1768_vm5, %v1979_v44, %v1983_v45  ;;  %v2997_v29 = vrot.slane %v7030_v3, 1  ;;  %v3004_v44 = vrot.slane %v6726_v32, 1  ;;  %v3003_v45 = vrot.slane %v6710_v20, 1 }
 0x173   : > { %2316 = vmatprep.mubr.bf16.mxu0 %v6931_v36  ;;  %v1967_v34 = vor.u32 %v1966_v63, %v1962_v28  ;;  %v7027_v23 = vsel %vm2984_vm6, %v2991_v19, %v2992_v58  ;;  %v2998_v63 = vrot.slane %v6656_v30, 1  ;;  %v3028_v58 = vrot.slane %v6947_v12, 1 }
 0x175   : > { %v1972_v42 = vsel %vm1768_vm5, %v1967_v34, %v1971_v31  ;;  %v7045_v34 = vsel %vm2984_vm6, %v2997_v29, %v2998_v63  ;;  %v3001_v31 = vrot.slane %v6673_v48, 1  ;;  %v7063_v48 = vsel %vm2984_vm6, %v3003_v45, %v3004_v44  ;;  %v6073_v63 = vld [vmem:[%s7868_s4 + $0x208] sm:$0xff]   ;;  %v6074_v29 = vld [vmem:[%s7868_s4 + $0x210] sm:$0xff]  }
 0x176   : > { %5630 = vmatprep.mubr.bf16.mxu1 %v1972_v42 }
 0x17a   : > { %2317 = vmatmul.mubr.bf16.gmra.mrb[52].mxu0 %v6909_v62  ;;  %5631 = vmatmul.mubr.bf16.gmra.mrb[76].mxu1 %v1984_v40  ;;  %v6066_v62 = vld [vmem:[%s7868_s4 + $0x90] sm:$0xff]   ;;  %v3006_v40 = vrot.slane %v6728_v33, 1 }
 0x17b   : > { %2324 = vmatprep.mubr.bf16.mxu0 %v6942_v54  ;;  %2694 = vmatprep.mubr.bf16.mxu1 %v6090_v46 }
 0x182   : > { %2325 = vmatmul.mubr.bf16.gmra.mrb[56].mxu0 %v6931_v36  ;;  %2695 = vmatmul.mubr.bf16.vlgmr.msra.gmra.mrb[80].mxu1 %v6091_v53  ;;  %v6067_v36 = vld [vmem:[%s7868_s4 + $0x98] sm:$0xff]  }
 0x183   : > { %2332 = vmatprep.mubr.bf16.mxu0 %v1948_v11  ;;  %5635 = vmatpush3.bf16.msra.mxu1 %v6815_v0  ;;  %v6998_v0 = vld [vmem:[#allocation2 + $0x24] sm:$0xff]  }
 0x184   : > { %2702 = vmatprep.mubr.bf16.mxu1 %v6988_v56  ;;  %5636 = vmatprep.subr.bf16.mxu1 %v6058_v35 }
 0x187   : > { %5637 = vmatpush3.bf16.msra.mxu1 %v6058_v35  ;;  %v3012_v35 = vrot.slane %v6818_v5, 1 }
 0x188   : > { %5638 = vmatprep.subr.bf16.mxu1 %v6066_v62 }
 0x18a   : > { %2333 = vmatmul.mubr.bf16.gmra.mrb[60].mxu0 %v6942_v54  ;;  %2703 = vmatmul.mubr.bf16.gmra.mrb[84].mxu1 %v6090_v46  ;;  %v6070_v54 = vld [vmem:[%s7868_s4 + $0xb0] sm:$0xff]   ;;  %v3009_v46 = vrot.slane %v6779_v22, 1 }
 0x18b   : > { %2340 = vmatprep.mubr.bf16.mxu0 %v1960_v51  ;;  %2710 = vmatprep.mubr.bf16.mxu1 %v6998_v0 }
 0x18c   : > { %5639 = vmatpush3.bf16.msra.mxu1 %v6066_v62  ;;  %v3015_v62 = vrot.slane %v6857_v49, 1 }
 0x18d   : > { %5640 = vmatprep.subr.bf16.mxu1 %v6067_v36 }
 0x190   : > { %5641 = vmatpush3.bf16.msra.mxu1 %v6067_v36  ;;  %v3019_v36 = vrot.slane %v6891_v41, 1 }
 0x191   : > { %5642 = vmatprep.subr.bf16.mxu1 %v6068_v57 }
 0x192   : > { %2341 = vmatmul.mubr.bf16.gmra.mrb[64].mxu0 %v1948_v11  ;;  %2711 = vmatmul.mubr.bf16.gmra.mrb[88].mxu1 %v6988_v56  ;;  %v7021_v11 = vld [vmem:[%s7868_s4 + $0x200] sm:$0xff]  }
 0x193   : > { %2348 = vmatprep.mubr.bf16.mxu0 %v1972_v42  ;;  %2718 = vmatprep.mubr.bf16.mxu1 %v6603_v59  ;;  %v2985_v59 = vrot.slane %v6091_v53, 1  ;;  %v3000_v42 = vrot.slane %v6662_v37, 1  ;;  %v3016_v53 = vrot.slane %v6867_v60, 1 }
 0x194   : > { %5643 = vmatpush3.bf16.msra.mxu1 %v6068_v57  ;;  %v3018_v57 = vrot.slane %v6869_v61, 1 }
 0x195   : > { %5644 = vmatprep.subr.bf16.mxu1 %v6069_v43  ;;  %v2987_v21 = vsel %vm2984_vm6, %v2985_v59, %v2986_v10  ;;  %v7054_v30 = vsel %vm2984_vm6, %v3000_v42, %v3001_v31  ;;  %v3031_v42 = vrot.slane %v6959_v8, 1  ;;  %v6099_v8 = vld [vmem:[#allocation2 + $0x3c] sm:$0xff]  }
 0x196   : > { %v7108_v60 = vsel %vm2984_vm6, %v3018_v57, %v3019_v36 }
 0x198   : > { %5645 = vmatpush3.bf16.msra.mxu1 %v6069_v43  ;;  %v3022_v43 = vrot.slane %v6914_v17, 1 }
 0x199   : > { %5646 = vmatprep.subr.bf16.mxu1 %v6070_v54 }
 0x19a   : > { %2349 = vmatmul.mubr.bf16.gmra.mrb[68].mxu0 %v1960_v51  ;;  %2719 = vmatmul.mubr.bf16.gmra.mrb[92].mxu1 %v6998_v0  ;;  %v2994_v51 = vrot.slane %v6998_v0, 1 }
 0x19b   : > { %3282 = vmatprep.mubr.bf16.mxu0 %v2990_v6  ;;  %2726 = vmatprep.mubr.bf16.mxu1 %v6662_v37 }
 0x19c   : > { %5647 = vmatpush3.bf16.msra.mxu1 %v6070_v54  ;;  %v7036_v28 = vsel %vm2984_vm6, %v2994_v51, %v2995_v27  ;;  %v3021_v54 = vrot.slane %v6899_v50, 1  ;;  %v3027_v27 = vrot.slane %v6937_v47, 1 }
 0x19d   : > { %5648 = vmatprep.subr.bf16.mxu1 %v6071_v38 }
 0x19e   : > { %v7117_v41 = vsel %vm2984_vm6, %v3021_v54, %v3022_v43 }
 0x1a0   : > { %5649 = vmatpush3.bf16.msra.mxu1 %v6071_v38 }
 0x1a1   : > { %5682 = vmatprep.subr.bf16.mxu1 %v7021_v11 }
 0x1a2   : > { %3283 = vmatmul.mubr.bf16.vlgmr.msra.gmra.mrb[72].mxu0 %v2987_v21  ;;  %2727 = vmatmul.mubr.bf16.gmra.mrb[96].mxu1 %v7030_v3 }
 0x1a3   : > { %3290 = vmatprep.mubr.bf16.mxu0 %v7027_v23  ;;  %2734 = vmatprep.mubr.bf16.mxu1 %v6710_v20 }
 0x1aa   : > { %3291 = vmatmul.mubr.bf16.gmra.mrb[76].mxu0 %v2990_v6  ;;  %2735 = vmatmul.mubr.bf16.gmra.mrb[100].mxu1 %v6662_v37  ;;  %v3007_v37 = vrot.slane %v6771_v13, 1  ;;  %v3024_v6 = vrot.slane %v6916_v18, 1 }
 0x1ab   : > { %3298 = vmatprep.mubr.bf16.mxu0 %v7036_v28  ;;  %2742 = vmatprep.mubr.bf16.mxu1 %v6728_v33 }
 0x1ac   : > { %v7072_v32 = vsel %vm2984_vm6, %v3006_v40, %v3007_v37  ;;  %v7130_v10 = vsel %vm2984_vm6, %v3024_v6, %v3025_v39  ;;  %v3030_v40 = vrot.slane %v6950_v1, 1 }
 0x1b2   : > { %3299 = vmatmul.mubr.bf16.gmra.mrb[80].mxu0 %v7027_v23  ;;  %2743 = vmatmul.mubr.bf16.gmra.mrb[104].mxu1 %v6710_v20  ;;  %v3010_v20 = vrot.slane %v6810_v25, 1 }
 0x1b3   : > { %3306 = vmatprep.mubr.bf16.mxu0 %v7045_v34  ;;  %2750 = vmatprep.mubr.bf16.mxu1 %v6779_v22 }
 0x1b4   : > { %v7081_v13 = vsel %vm2984_vm6, %v3009_v46, %v3010_v20  ;;  %v6100_v20 = vld [vmem:[#allocation2 + $0x48] sm:$0xff]  }
 0x1ba   : > { %3307 = vmatmul.mubr.bf16.gmra.mrb[84].mxu0 %v7036_v28  ;;  %2751 = vmatmul.mubr.bf16.gmra.mrb[108].mxu1 %v6728_v33  ;;  %v3013_v33 = vrot.slane %v6829_v15, 1  ;;  %v7099_v15 = vsel %vm2984_vm6, %v3015_v62, %v3016_v53  ;;  %v3033_v53 = vrot.slane %v6969_v55, 1  ;;  %v3034_v62 = vrot.slane %v6963_v7, 1  ;;  %v6101_v7 = vld [vmem:[#allocation2 + $0x54] sm:$0xff]  }
 0x1bb   : > { %3314 = vmatprep.mubr.bf16.mxu0 %v7054_v30  ;;  %2758 = vmatprep.mubr.bf16.mxu1 %v6818_v5 }
 0x1bc   : > { %v7090_v25 = vsel %vm2984_vm6, %v3012_v35, %v3013_v33  ;;  %v6076_v33 = vld [vmem:[%s7868_s4 + $0x220] sm:$0xff]  }
 0x1c2   : > { %3315 = vmatmul.mubr.bf16.gmra.mrb[88].mxu0 %v7045_v34  ;;  %2759 = vmatmul.mubr.bf16.gmra.mrb[112].mxu1 %v6779_v22 }
 0x1c3   : > { %3322 = vmatprep.mubr.bf16.mxu0 %v7063_v48  ;;  %2766 = vmatprep.mubr.bf16.mxu1 %v6857_v49 }
 0x1ca   : > { %3323 = vmatmul.mubr.bf16.gmra.mrb[92].mxu0 %v7054_v30  ;;  %2767 = vmatmul.mubr.bf16.gmra.mrb[116].mxu1 %v6818_v5 }
 0x1cb   : > { %3330 = vmatprep.mubr.bf16.mxu0 %v7072_v32  ;;  %2774 = vmatprep.mubr.bf16.mxu1 %v6869_v61 }
 0x1d2   : > { %3331 = vmatmul.mubr.bf16.gmra.mrb[96].mxu0 %v7063_v48  ;;  %2775 = vmatmul.mubr.bf16.gmra.mrb[120].mxu1 %v6857_v49 }
 0x1d3   : > { %3338 = vmatprep.mubr.bf16.mxu0 %v7081_v13  ;;  %2782 = vmatprep.mubr.bf16.mxu1 %v6899_v50 }
 0x1da   : > { %3339 = vmatmul.mubr.bf16.gmra.mrb[100].mxu0 %v7072_v32  ;;  %2783 = vmatmul.mubr.bf16.gmra.mrb[124].mxu1 %v6869_v61 }
 0x1db   : > { %3346 = vmatprep.mubr.bf16.mxu0 %v7090_v25  ;;  %2790 = vmatprep.mubr.bf16.mxu1 %v6916_v18 }
 0x1e2   : > { %3347 = vmatmul.mubr.bf16.gmra.mrb[104].mxu0 %v7081_v13  ;;  %2791 = vmatmul.mubr.bf16.gmra.mrb[128].mxu1 %v6899_v50 }
 0x1e3   : > { %3354 = vmatprep.mubr.bf16.mxu0 %v7099_v15  ;;  %2798 = vmatprep.mubr.bf16.mxu1 %v6937_v47 }
 0x1ea   : > { %3355 = vmatmul.mubr.bf16.gmra.mrb[108].mxu0 %v7090_v25  ;;  %2799 = vmatmul.mubr.bf16.gmra.mrb[132].mxu1 %v6916_v18 }
 0x1eb   : > { %3362 = vmatprep.mubr.bf16.mxu0 %v7108_v60  ;;  %2806 = vmatprep.mubr.bf16.mxu1 %v6950_v1 }
 0x1f2   : > { %3363 = vmatmul.mubr.bf16.gmra.mrb[112].mxu0 %v7099_v15  ;;  %2807 = vmatmul.mubr.bf16.gmra.mrb[136].mxu1 %v6937_v47 }
 0x1f3   : > { %3370 = vmatprep.mubr.bf16.mxu0 %v7117_v41  ;;  %2814 = vmatprep.mubr.bf16.mxu1 %v6969_v55 }
 0x1f5   : > { %v5066_v24 = vpop.f32.mrb[8].mxu0 }
 0x1f6   : > { %v5067_v4 = vpop.f32.mrb[9].mxu0 }
 0x1f7   : > { %v7123_v38 = vadd.f32 %v5067_v4, %v5066_v24  ;;  %v5069_v17 = vpop.f32.mrb[10].mxu0  ;;  %v6077_v24 = vld [vmem:[%s7868_s4 + $0x228] sm:$0xff]   ;;  %v7183_v4 = vsel %vm2984_vm6, %v3033_v53, %v3034_v62 }
 0x1f8   : > { %v5070_v59 = vpop.f32.mrb[11].mxu0 }
 0x1f9   : > { %v7126_v9 = vadd.f32 %v5070_v59, %v5069_v17  ;;  %v6078_v17 = vld [vmem:[%s7868_s4 + $0x230] sm:$0xff]  }
 0x1fa   : > { %3371 = vmatmul.mubr.bf16.gmra.mrb[116].mxu0 %v7108_v60  ;;  %2815 = vmatmul.mubr.bf16.gmra.mrb[140].mxu1 %v6950_v1 }
 0x1fb   : > { %3378 = vmatprep.mubr.bf16.mxu0 %v7130_v10  ;;  %5650 = vmatprep.mubr.bf16.mxu1 %v6988_v56  ;;  %v7146_v56 = vsel %vm2984_vm6, %v3027_v27, %v3028_v58 }
 0x1fd   : > { %v5072_v26 = vpop.f32.mrb[12].mxu0 }
 0x1fe   : > { %v5073_v14 = vpop.f32.mrb[13].mxu0 }
 0x1ff   : > { %v7136_v19 = vadd.f32 %v5073_v14, %v5072_v26  ;;  %v5075_v21 = vpop.f32.mrb[14].mxu0 }
 0x200   : > { %v5076_v16 = vpop.f32.mrb[15].mxu0 }
 0x201   : > { %v7139_v51 = vadd.f32 %v5076_v16, %v5075_v21 }
 0x202   : > { %3379 = vmatmul.mubr.bf16.gmra.mrb[120].mxu0 %v7117_v41  ;;  %5651 = vmatmul.mubr.bf16.vlgmr.msra.gmra.mrb[48].mxu1 %v6998_v0 }
 0x203   : > { %3386 = vmatprep.mubr.bf16.mxu0 %v7146_v56  ;;  %5683 = vmatpush3.bf16.msra.mxu1 %v7021_v11  ;;  %v6075_v11 = vld [vmem:[%s7868_s4 + $0x218] sm:$0xff]  }
 0x204   : > { %5654 = vmatprep.mubr.bf16.mxu1 %v7030_v3  ;;  %5684 = vmatprep.subr.bf16.mxu1 %v6073_v63  ;;  %v7166_v3 = vsel %vm2984_vm6, %v3030_v40, %v3031_v42 }
 0x205   : > { %v5078_v12 = vpop.f32.mrb[16].mxu0 }
 0x206   : > { %v5079_v31 = vpop.f32.mrb[17].mxu0 }
 0x207   : > { %v7156_v44 = vadd.f32 %v5079_v31, %v5078_v12  ;;  %v5081_v45 = vpop.f32.mrb[18].mxu0  ;;  %5685 = vmatpush3.bf16.msra.mxu1 %v6073_v63 }
 0x208   : > { %v5082_v37 = vpop.f32.mrb[19].mxu0  ;;  %5686 = vmatprep.subr.bf16.mxu1 %v6074_v29 }
 0x209   : > { %v7159_v0 = vadd.f32 %v5082_v37, %v5081_v45 }
 0x20a   : > { %3387 = vmatmul.mubr.bf16.gmra.mrb[124].mxu0 %v7130_v10  ;;  %5655 = vmatmul.mubr.bf16.gmra.mrb[52].mxu1 %v6099_v8 }
 0x20b   : > { %3394 = vmatprep.mubr.bf16.mxu0 %v7166_v3  ;;  %5658 = vmatprep.mubr.bf16.mxu1 %v6100_v20 }
 0x20c   : > { %5687 = vmatpush3.bf16.msra.mxu1 %v6074_v29 }
 0x20d   : > { %v5084_v46 = vpop.f32.mrb[20].mxu0  ;;  %5688 = vmatprep.subr.bf16.mxu1 %v6075_v11 }
 0x20e   : > { %v5085_v35 = vpop.f32.mrb[21].mxu0 }
 0x20f   : > { %v7174_v36 = vadd.f32 %v5085_v35, %v5084_v46  ;;  %v5087_v57 = vpop.f32.mrb[22].mxu0  ;;  %v6081_v35 = vld [vmem:[%s7869_s5 + $0x8] sm:$0xff]  }
 0x210   : > { %v5088_v43 = vpop.f32.mrb[23].mxu0  ;;  %5689 = vmatpush3.bf16.msra.mxu1 %v6075_v11 }
 0x211   : > { %v7176_v54 = vadd.f32 %v5088_v43, %v5087_v57  ;;  %5690 = vmatprep.subr.bf16.mxu1 %v6076_v33 }
 0x212   : > { %3395 = vmatmul.mubr.bf16.gmra.mrb[128].mxu0 %v7146_v56  ;;  %5659 = vmatmul.mubr.bf16.gmra.mrb[56].mxu1 %v6101_v7 }
 0x213   : > { %3402 = vmatprep.mubr.bf16.mxu0 %v7183_v4  ;;  %5662 = vmatprep.mubr.bf16.mxu1 %v6779_v22  ;;  %v6079_v22 = vld [vmem:[%s7868_s4 + $0x238] sm:$0xff]  }
 0x214   : > { %5691 = vmatpush3.bf16.msra.mxu1 %v6076_v33 }
 0x215   : > { %v5090_v39 = vpop.f32.mrb[24].mxu0  ;;  %5692 = vmatprep.subr.bf16.mxu1 %v6077_v24 }
 0x216   : > { %v5091_v6 = vpop.f32.mrb[25].mxu0 }
 0x217   : > { %v7190_v59 = vadd.f32 %v5091_v6, %v5090_v39  ;;  %v5093_v26 = vpop.f32.mrb[26].mxu0  ;;  %v6082_v6 = vld [vmem:[%s7869_s5 + $0x10] sm:$0xff]  }
 0x218   : > { %v5094_v14 = vpop.f32.mrb[27].mxu0  ;;  %5693 = vmatpush3.bf16.msra.mxu1 %v6077_v24 }
 0x219   : > { %v7192_v58 = vadd.f32 %v5094_v14, %v5093_v26  ;;  %5694 = vmatprep.subr.bf16.mxu1 %v6078_v17 }
 0x21a   : > { %3403 = vmatmul.mubr.bf16.gmra.mrb[132].mxu0 %v7166_v3  ;;  %5663 = vmatmul.mubr.bf16.gmra.mrb[60].mxu1 %v6818_v5  ;;  %v6080_v5 = vld [vmem:[%s7869_s5] sm:$0xff]  }
 0x21b   : > { %5666 = vmatprep.mubr.bf16.mxu1 %v6857_v49  ;;  %5730 = vmatprep.subr.bf16.mxu0 %v6080_v5 }
 0x21c   : > { %5695 = vmatpush3.bf16.msra.mxu1 %v6078_v17  ;;  %5731 = vmatpush3.bf16.msra.mxu0 %v6080_v5 }
 0x21d   : > { %v5096_v21 = vpop.f32.mrb[28].mxu0  ;;  %5696 = vmatprep.subr.bf16.mxu1 %v6079_v22  ;;  %5732 = vmatprep.subr.bf16.mxu0 %v6081_v35 }
 0x21e   : > { %v5097_v16 = vpop.f32.mrb[29].mxu0 }
 0x21f   : > { %v7200_v27 = vadd.f32 %v5097_v16, %v5096_v21  ;;  %v5099_v63 = vpop.f32.mrb[30].mxu0 }
 0x220   : > { %v5100_v12 = vpop.f32.mrb[31].mxu0  ;;  %5697 = vmatpush3.bf16.msra.mxu1 %v6079_v22  ;;  %5733 = vmatpush3.bf16.msra.mxu0 %v6081_v35 }
 0x221   : > { %v7202_v29 = vadd.f32 %v5100_v12, %v5099_v63  ;;  %5734 = vmatprep.subr.bf16.mxu0 %v6082_v6 }
 0x222   : > { %5667 = vmatmul.mubr.bf16.gmra.mrb[64].mxu1 %v6869_v61 }
 0x223   : > { %5670 = vmatprep.mubr.bf16.mxu1 %v6899_v50 }
 0x224   : > { %5735 = vmatpush3.bf16.msra.mxu0 %v6082_v6 }
 0x225   : > { %v5102_v31 = vpop.f32.mrb[32].mxu0 }
 0x226   : > { %v5103_v49 = vpop.f32.mrb[33].mxu0 }
 0x227   : > { %v7209_v42 = vadd.f32 %v5103_v49, %v5102_v31  ;;  %v5105_v45 = vpop.f32.mrb[34].mxu0  ;;  %v6083_v49 = vld [vmem:[%s7869_s5 + $0x18] sm:$0xff]  }
 0x228   : > { %v5106_v37 = vpop.f32.mrb[35].mxu0  ;;  %5736 = vmatprep.subr.bf16.mxu0 %v6083_v49 }
 0x229   : > { %v7211_v40 = vadd.f32 %v5106_v37, %v5105_v45  ;;  %5737 = vmatpush3.bf16.msra.mxu0 %v6083_v49 }
 0x22a   : > { %5671 = vmatmul.mubr.bf16.gmra.mrb[68].mxu1 %v6916_v18 }
 0x22b   : > { %5674 = vmatprep.mubr.bf16.mxu1 %v6937_v47 }
 0x22d   : > { %v5108_v61 = vpop.f32.mrb[36].mxu0 }
 0x22e   : > { %v5109_v50 = vpop.f32.mrb[37].mxu0 }
 0x22f   : > { %v7215_v11 = vadd.f32 %v5109_v50, %v5108_v61  ;;  %v5111_v8 = vpop.f32.mrb[38].mxu0 }
 0x230   : > { %v5112_v20 = vpop.f32.mrb[39].mxu0 }
 0x231   : > { %v7217_v46 = vadd.f32 %v5112_v20, %v5111_v8 }
 0x232   : > { %5675 = vmatmul.mubr.bf16.gmra.mrb[72].mxu1 %v6950_v1 }
 0x233   : > { %5678 = vmatprep.mubr.bf16.mxu1 %v6969_v55 }
 0x235   : > { %v5114_v33 = vpop.f32.mrb[40].mxu0 }
 0x236   : > { %v5115_v18 = vpop.f32.mrb[41].mxu0 }
 0x237   : > { %v7224_v53 = vadd.f32 %v5115_v18, %v5114_v33  ;;  %v5117_v47 = vpop.f32.mrb[42].mxu0 }
 0x238   : > { %v5118_v62 = vpop.f32.mrb[43].mxu0 }
 0x239   : > { %v7226_v57 = vadd.f32 %v5118_v62, %v5117_v47 }
 0x23a   : > { %5679 = vmatmul.mubr.bf16.gmra.mrb[76].mxu1 %v6953_v2 }
 0x23b   : > { %5698 = vmatprep.mubr.bf16.mxu1 %v7027_v23 }
 0x23d   : > { %v5120_v1 = vpop.f32.mrb[44].mxu0 }
 0x23e   : > { %v5121_v55 = vpop.f32.mrb[45].mxu0 }
 0x23f   : > { %v7230_v43 = vadd.f32 %v5121_v55, %v5120_v1  ;;  %v5123_v24 = vpop.f32.mrb[46].mxu0 }
 0x240   : > { %v5124_v7 = vpop.f32.mrb[47].mxu0 }
 0x241   : > { %v7232_v39 = vadd.f32 %v5124_v7, %v5123_v24 }
 0x242   : > { %5699 = vmatmul.mubr.bf16.vlgmr.msra.gmra.mrb[48].mxu1 %v7036_v28 }
 0x243   : > { %5702 = vmatprep.mubr.bf16.mxu1 %v7045_v34 }
 0x245   : > { %v5126_v17 = vpop.f32.mrb[48].mxu0 }
 0x246   : > { %v5127_v26 = vpop.f32.mrb[49].mxu0 }
 0x247   : > { %v7239_v14 = vadd.f32 %v5127_v26, %v5126_v17  ;;  %v5129_v23 = vpop.f32.mrb[50].mxu0 }
 0x248   : > { %v5130_v22 = vpop.f32.mrb[51].mxu0 }
 0x249   : > { %v7241_v21 = vadd.f32 %v5130_v22, %v5129_v23 }
 0x24a   : > { %5703 = vmatmul.mubr.bf16.gmra.mrb[52].mxu1 %v7054_v30 }
 0x24b   : > { %5706 = vmatprep.mubr.bf16.mxu1 %v7063_v48 }
 0x24d   : > { %v5132_v28 = vpop.f32.mrb[52].mxu0 }
 0x24e   : > { %v5133_v34 = vpop.f32.mrb[53].mxu0 }
 0x24f   : > { %v7245_v16 = vadd.f32 %v5133_v34, %v5132_v28  ;;  %v5135_v63 = vpop.f32.mrb[54].mxu0  ;;  %v6084_v28 = vld [vmem:[%s7869_s5 + $0x20] sm:$0xff]  }
 0x250   : > { %v5136_v12 = vpop.f32.mrb[55].mxu0  ;;  %5738 = vmatprep.subr.bf16.mxu0 %v6084_v28 }
 0x251   : > { %v7247_v31 = vadd.f32 %v5136_v12, %v5135_v63  ;;  %5739 = vmatpush3.bf16.msra.mxu0 %v6084_v28  ;;  %v3037_v28 = vrot.slane %v6965_v52, 1 }
 0x252   : > { %5707 = vmatmul.mubr.bf16.gmra.mrb[56].mxu1 %v7072_v32 }
 0x253   : > { %5710 = vmatprep.mubr.bf16.mxu1 %v7081_v13 }
 0x255   : > { %v5138_v5 = vpop.f32.mrb[56].mxu0  ;;  %v5202_v45 = vpop.f32.mrb[80].mxu1 }
 0x256   : > { %v5139_v30 = vpop.f32.mrb[57].mxu0  ;;  %v5203_v61 = vpop.f32.mrb[81].mxu1 }
 0x257   : > { %v7254_v48 = vadd.f32 %v5139_v30, %v5138_v5  ;;  %v5141_v37 = vpop.f32.mrb[58].mxu0  ;;  %v5204_v8 = vadd.f32 %v5203_v61, %v5202_v45  ;;  %v5205_v20 = vpop.f32.mrb[82].mxu1 }
 0x258   : > { %v5142_v50 = vpop.f32.mrb[59].mxu0  ;;  %v5206_v32 = vpop.f32.mrb[83].mxu1 }
 0x259   : > { %v7256_v33 = vadd.f32 %v5142_v50, %v5141_v37  ;;  %v7259_v13 = vadd.f32 %v5204_v8, %v7123_v38  ;;  %v5207_v35 = vadd.f32 %v5206_v32, %v5205_v20 }
 0x25a   : > { %5711 = vmatmul.mubr.bf16.gmra.mrb[60].mxu1 %v7090_v25 }
 0x25b   : > { %v7263_v18 = vadd.f32 %v5207_v35, %v7126_v9  ;;  %5714 = vmatprep.mubr.bf16.mxu1 %v7099_v15 }
 0x25d   : > { %v5144_v47 = vpop.f32.mrb[60].mxu0  ;;  %v5208_v1 = vpop.f32.mrb[84].mxu1 }
 0x25e   : > { %v5145_v62 = vpop.f32.mrb[61].mxu0  ;;  %v5209_v7 = vpop.f32.mrb[85].mxu1 }
 0x25f   : > { %v7266_v55 = vadd.f32 %v5145_v62, %v5144_v47  ;;  %v5147_v24 = vpop.f32.mrb[62].mxu0  ;;  %v5210_v6 = vadd.f32 %v5209_v7, %v5208_v1  ;;  %v5211_v26 = vpop.f32.mrb[86].mxu1 }
 0x260   : > { %v5148_v17 = vpop.f32.mrb[63].mxu0  ;;  %v5212_v23 = vpop.f32.mrb[87].mxu1 }
 0x261   : > { %v7268_v38 = vadd.f32 %v5148_v17, %v5147_v24  ;;  %v7271_v25 = vadd.f32 %v5210_v6, %v7136_v19  ;;  %v5213_v9 = vadd.f32 %v5212_v23, %v5211_v26  ;;  %v6087_v23 = vld [vmem:[%s7869_s5 + $0x38] sm:$0xff]  }
 0x262   : > { %5715 = vmatmul.mubr.bf16.gmra.mrb[64].mxu1 %v7108_v60 }
 0x263   : > { %v7275_v15 = vadd.f32 %v5213_v9, %v7139_v51  ;;  %5718 = vmatprep.mubr.bf16.mxu1 %v7117_v41 }
 0x265   : > { %v5150_v22 = vpop.f32.mrb[64].mxu0  ;;  %v5214_v63 = vpop.f32.mrb[88].mxu1 }
 0x266   : > { %v5151_v34 = vpop.f32.mrb[65].mxu0  ;;  %v5215_v19 = vpop.f32.mrb[89].mxu1 }
 0x267   : > { %v7281_v12 = vadd.f32 %v5151_v34, %v5150_v22  ;;  %v5153_v5 = vpop.f32.mrb[66].mxu0  ;;  %v5216_v30 = vadd.f32 %v5215_v19, %v5214_v63  ;;  %v5217_v60 = vpop.f32.mrb[90].mxu1 }
 0x268   : > { %v5154_v49 = vpop.f32.mrb[67].mxu0  ;;  %v5218_v45 = vpop.f32.mrb[91].mxu1 }
 0x269   : > { %v7283_v51 = vadd.f32 %v5154_v49, %v5153_v5  ;;  %v7286_v41 = vadd.f32 %v5216_v30, %v7156_v44  ;;  %v5219_v37 = vadd.f32 %v5218_v45, %v5217_v60 }
 0x26a   : > { %5719 = vmatmul.mubr.bf16.gmra.mrb[68].mxu1 %v7130_v10  ;;  %v6085_v10 = vld [vmem:[%s7869_s5 + $0x28] sm:$0xff]  }
 0x26b   : > { %v7290_v61 = vadd.f32 %v5219_v37, %v7159_v0  ;;  %5722 = vmatprep.mubr.bf16.mxu1 %v7146_v56  ;;  %v6086_v56 = vld [vmem:[%s7869_s5 + $0x30] sm:$0xff]   ;;  %5740 = vmatprep.subr.bf16.mxu0 %v6085_v10 }
 0x26c   : > { %5741 = vmatpush3.bf16.msra.mxu0 %v6085_v10 }
 0x26d   : > { %v5156_v50 = vpop.f32.mrb[68].mxu0  ;;  %v5220_v20 = vpop.f32.mrb[92].mxu1  ;;  %5742 = vmatprep.subr.bf16.mxu0 %v6086_v56 }
 0x26e   : > { %v5157_v8 = vpop.f32.mrb[69].mxu0  ;;  %v5221_v47 = vpop.f32.mrb[93].mxu1 }
 0x26f   : > { %v7293_v32 = vadd.f32 %v5157_v8, %v5156_v50  ;;  %v5159_v35 = vpop.f32.mrb[70].mxu0  ;;  %v5222_v1 = vadd.f32 %v5221_v47, %v5220_v20  ;;  %v5223_v24 = vpop.f32.mrb[94].mxu1 }
 0x270   : > { %v5160_v62 = vpop.f32.mrb[71].mxu0  ;;  %v5224_v7 = vpop.f32.mrb[95].mxu1  ;;  %5743 = vmatpush3.bf16.msra.mxu0 %v6086_v56 }
 0x271   : > { %v7295_v44 = vadd.f32 %v5160_v62, %v5159_v35  ;;  %v7304_v0 = vadd.f32 %v5222_v1, %v7174_v36  ;;  %v5225_v17 = vadd.f32 %v5224_v7, %v5223_v24  ;;  %v3036_v36 = vrot.slane %v6953_v2, 1  ;;  %5744 = vmatprep.subr.bf16.mxu0 %v6087_v23 }
 0x272   : > { %5723 = vmatmul.mubr.bf16.gmra.mrb[72].mxu1 %v7166_v3 }
 0x273   : > { %v7308_v6 = vadd.f32 %v5225_v17, %v7176_v54  ;;  %5726 = vmatprep.mubr.bf16.mxu1 %v7183_v4  ;;  %v3038_v2 = vsel %vm2984_vm6, %v3036_v36, %v3037_v28 }
 0x274   : > { %5745 = vmatpush3.bf16.msra.mxu0 %v6087_v23 }
 0x275   : > { %v5338_v26 = vpop.f32.mrb[72].mxu0  ;;  %v5226_v22 = vpop.f32.mrb[96].mxu1 }
 0x276   : > { %v5339_v9 = vpop.f32.mrb[73].mxu0  ;;  %v5227_v63 = vpop.f32.mrb[97].mxu1 }
 0x277   : > { %v5340_v3 = vadd.f32 %v5339_v9, %v5338_v26  ;;  %v5341_v34 = vpop.f32.mrb[74].mxu0  ;;  %v5228_v54 = vadd.f32 %v5227_v63, %v5226_v22  ;;  %v5229_v19 = vpop.f32.mrb[98].mxu1 }
 0x278   : > { %v5342_v5 = vpop.f32.mrb[75].mxu0  ;;  %v5230_v49 = vpop.f32.mrb[99].mxu1 }
 0x279   : > { %v5343_v4 = vadd.f32 %v5342_v5, %v5341_v34  ;;  %v7317_v30 = vadd.f32 %v7259_v13, %v5340_v3  ;;  %v7320_v60 = vadd.f32 %v5228_v54, %v7190_v59  ;;  %v5231_v45 = vadd.f32 %v5230_v49, %v5229_v19 }
 0x27a   : > { %5727 = vmatmul.mubr.bf16.gmra.mrb[76].mxu1 %v3038_v2 }
 0x27b   : > { %v7324_v52 = vadd.f32 %v7263_v18, %v5343_v4  ;;  %v7327_v37 = vadd.f32 %v5231_v45, %v7192_v58 }
 0x27d   : > { %v5344_v50 = vpop.f32.mrb[76].mxu0  ;;  %v5232_v20 = vpop.f32.mrb[100].mxu1 }
 0x27e   : > { %v5345_v8 = vpop.f32.mrb[77].mxu0  ;;  %v5233_v47 = vpop.f32.mrb[101].mxu1 }
 0x27f   : > { %v5346_v35 = vadd.f32 %v5345_v8, %v5344_v50  ;;  %v5347_v13 = vpop.f32.mrb[78].mxu0  ;;  %v5234_v62 = vadd.f32 %v5233_v47, %v5232_v20  ;;  %v5235_v1 = vpop.f32.mrb[102].mxu1 }
 0x280   : > { %v5348_v59 = vpop.f32.mrb[79].mxu0  ;;  %v5236_v7 = vpop.f32.mrb[103].mxu1 }
 0x281   : > { %v5349_v24 = vadd.f32 %v5348_v59, %v5347_v13  ;;  %v7330_v10 = vadd.f32 %v7271_v25, %v5346_v35  ;;  %v7333_v18 = vadd.f32 %v5234_v62, %v7200_v27  ;;  %v5237_v58 = vadd.f32 %v5236_v7, %v5235_v1 }
 0x283   : > { %v7336_v56 = vadd.f32 %v7275_v15, %v5349_v24  ;;  %v7339_v17 = vadd.f32 %v5237_v58, %v7202_v29 }
 0x285   : > { %v5350_v26 = vpop.f32.mrb[80].mxu0  ;;  %v5238_v9 = vpop.f32.mrb[104].mxu1 }
 0x286   : > { %v5351_v23 = vpop.f32.mrb[81].mxu0  ;;  %v5239_v28 = vpop.f32.mrb[105].mxu1 }
 0x287   : > { %v5352_v22 = vadd.f32 %v5351_v23, %v5350_v26  ;;  %v5353_v36 = vpop.f32.mrb[82].mxu0  ;;  %v5240_v3 = vadd.f32 %v5239_v28, %v5238_v9  ;;  %v5241_v25 = vpop.f32.mrb[106].mxu1 }
 0x288   : > { %v5354_v34 = vpop.f32.mrb[83].mxu0  ;;  %v5242_v54 = vpop.f32.mrb[107].mxu1 }
 0x289   : > { %v5355_v63 = vadd.f32 %v5354_v34, %v5353_v36  ;;  %v7342_v27 = vadd.f32 %v7286_v41, %v5352_v22  ;;  %v7345_v15 = vadd.f32 %v5240_v3, %v7209_v42  ;;  %v5243_v5 = vadd.f32 %v5242_v54, %v5241_v25 }
 0x28b   : > { %v7348_v29 = vadd.f32 %v7290_v61, %v5355_v63  ;;  %v7351_v19 = vadd.f32 %v5243_v5, %v7211_v40 }
 0x28d   : > { %v5356_v4 = vpop.f32.mrb[84].mxu0  ;;  %v5244_v45 = vpop.f32.mrb[108].mxu1 }
 0x28e   : > { %v5357_v49 = vpop.f32.mrb[85].mxu0  ;;  %v5245_v8 = vpop.f32.mrb[109].mxu1 }
 0x28f   : > { %v5358_v2 = vadd.f32 %v5357_v49, %v5356_v4  ;;  %v5359_v50 = vpop.f32.mrb[86].mxu0  ;;  %v5246_v20 = vadd.f32 %v5245_v8, %v5244_v45  ;;  %v5247_v41 = vpop.f32.mrb[110].mxu1 }
 0x290   : > { %v5360_v35 = vpop.f32.mrb[87].mxu0  ;;  %v5248_v47 = vpop.f32.mrb[111].mxu1 }
 0x291   : > { %v5361_v13 = vadd.f32 %v5360_v35, %v5359_v50  ;;  %v7354_v42 = vadd.f32 %v7304_v0, %v5358_v2  ;;  %v7357_v61 = vadd.f32 %v5246_v20, %v7215_v11  ;;  %v5249_v62 = vadd.f32 %v5248_v47, %v5247_v41 }
 0x293   : > { %v7360_v40 = vadd.f32 %v7308_v6, %v5361_v13  ;;  %v7363_v59 = vadd.f32 %v5249_v62, %v7217_v46 }
 0x295   : > { %v5362_v1 = vpop.f32.mrb[88].mxu0  ;;  %v5250_v7 = vpop.f32.mrb[112].mxu1 }
 0x296   : > { %v5363_v24 = vpop.f32.mrb[89].mxu0  ;;  %v5251_v23 = vpop.f32.mrb[113].mxu1 }
 0x297   : > { %v5364_v58 = vadd.f32 %v5363_v24, %v5362_v1  ;;  %v5365_v26 = vpop.f32.mrb[90].mxu0  ;;  %v5252_v9 = vadd.f32 %v5251_v23, %v5250_v7  ;;  %v5253_v0 = vpop.f32.mrb[114].mxu1 }
 0x298   : > { %v5366_v22 = vpop.f32.mrb[91].mxu0  ;;  %v5254_v28 = vpop.f32.mrb[115].mxu1 }
 0x299   : > { %v5367_v36 = vadd.f32 %v5366_v22, %v5365_v26  ;;  %v7366_v11 = vadd.f32 %v7320_v60, %v5364_v58  ;;  %v7369_v6 = vadd.f32 %v5252_v9, %v7224_v53  ;;  %v5255_v3 = vadd.f32 %v5254_v28, %v5253_v0 }
 0x29b   : > { %v7372_v46 = vadd.f32 %v7327_v37, %v5367_v36  ;;  %v7375_v34 = vadd.f32 %v5255_v3, %v7226_v57 }
 0x29d   : > { %v5368_v25 = vpop.f32.mrb[92].mxu0  ;;  %v5256_v54 = vpop.f32.mrb[116].mxu1 }
 0x29e   : > { %v5369_v63 = vpop.f32.mrb[93].mxu0  ;;  %v5257_v49 = vpop.f32.mrb[117].mxu1 }
 0x29f   : > { %v5370_v5 = vadd.f32 %v5369_v63, %v5368_v25  ;;  %v5371_v4 = vpop.f32.mrb[94].mxu0  ;;  %v5258_v45 = vadd.f32 %v5257_v49, %v5256_v54  ;;  %v5259_v60 = vpop.f32.mrb[118].mxu1 }
 0x2a0   : > { %v5372_v2 = vpop.f32.mrb[95].mxu0  ;;  %v5260_v8 = vpop.f32.mrb[119].mxu1 }
 0x2a1   : > { %v5373_v50 = vadd.f32 %v5372_v2, %v5371_v4  ;;  %v7378_v53 = vadd.f32 %v7333_v18, %v5370_v5  ;;  %v7381_v37 = vadd.f32 %v5258_v45, %v7230_v43  ;;  %v5261_v20 = vadd.f32 %v5260_v8, %v5259_v60 }
 0x2a3   : > { %v7384_v57 = vadd.f32 %v7339_v17, %v5373_v50  ;;  %v7387_v35 = vadd.f32 %v5261_v20, %v7232_v39 }
 0x2a5   : > { %v5374_v41 = vpop.f32.mrb[96].mxu0  ;;  %v5262_v47 = vpop.f32.mrb[120].mxu1 }
 0x2a6   : > { %v5375_v13 = vpop.f32.mrb[97].mxu0  ;;  %v5263_v24 = vpop.f32.mrb[121].mxu1 }
 0x2a7   : > { %v5376_v62 = vadd.f32 %v5375_v13, %v5374_v41  ;;  %v5377_v1 = vpop.f32.mrb[98].mxu0  ;;  %v5264_v7 = vadd.f32 %v5263_v24, %v5262_v47  ;;  %v5265_v18 = vpop.f32.mrb[122].mxu1 }
 0x2a8   : > { %v5378_v58 = vpop.f32.mrb[99].mxu0  ;;  %v5266_v23 = vpop.f32.mrb[123].mxu1 }
 0x2a9   : > { %v5379_v26 = vadd.f32 %v5378_v58, %v5377_v1  ;;  %v7390_v43 = vadd.f32 %v7345_v15, %v5376_v62  ;;  %v7393_v17 = vadd.f32 %v5264_v7, %v7239_v14  ;;  %v5267_v9 = vadd.f32 %v5266_v23, %v5265_v18 }
 0x2ab   : > { %v7396_v39 = vadd.f32 %v7351_v19, %v5379_v26  ;;  %v7399_v22 = vadd.f32 %v5267_v9, %v7241_v21 }
 0x2ad   : > { %v5380_v0 = vpop.f32.mrb[100].mxu0  ;;  %v5268_v28 = vpop.f32.mrb[124].mxu1 }
 0x2ae   : > { %v5381_v36 = vpop.f32.mrb[101].mxu0  ;;  %v5269_v63 = vpop.f32.mrb[125].mxu1 }
 0x2af   : > { %v5382_v3 = vadd.f32 %v5381_v36, %v5380_v0  ;;  %v5383_v25 = vpop.f32.mrb[102].mxu0  ;;  %v5270_v54 = vadd.f32 %v5269_v63, %v5268_v28  ;;  %v5271_v15 = vpop.f32.mrb[126].mxu1 }
 0x2b0   : > { %v5384_v5 = vpop.f32.mrb[103].mxu0  ;;  %v5272_v49 = vpop.f32.mrb[127].mxu1 }
 0x2b1   : > { %v5385_v4 = vadd.f32 %v5384_v5, %v5383_v25  ;;  %v7402_v14 = vadd.f32 %v7357_v61, %v5382_v3  ;;  %v7405_v19 = vadd.f32 %v5270_v54, %v7245_v16  ;;  %v5273_v45 = vadd.f32 %v5272_v49, %v5271_v15 }
 0x2b3   : > { %v7408_v21 = vadd.f32 %v7363_v59, %v5385_v4  ;;  %v7411_v2 = vadd.f32 %v5273_v45, %v7247_v31 }
 0x2b5   : > { %v5386_v60 = vpop.f32.mrb[104].mxu0  ;;  %v5274_v8 = vpop.f32.mrb[128].mxu1 }
 0x2b6   : > { %v5387_v50 = vpop.f32.mrb[105].mxu0  ;;  %v5275_v13 = vpop.f32.mrb[129].mxu1 }
 0x2b7   : > { %v5388_v20 = vadd.f32 %v5387_v50, %v5386_v60  ;;  %v5389_v41 = vpop.f32.mrb[106].mxu0  ;;  %v5276_v47 = vadd.f32 %v5275_v13, %v5274_v8  ;;  %v5277_v61 = vpop.f32.mrb[130].mxu1 }
 0x2b8   : > { %v5390_v62 = vpop.f32.mrb[107].mxu0  ;;  %v5278_v24 = vpop.f32.mrb[131].mxu1 }
 0x2b9   : > { %v5391_v1 = vadd.f32 %v5390_v62, %v5389_v41  ;;  %v7414_v16 = vadd.f32 %v7369_v6, %v5388_v20  ;;  %v5853_v59 = vadd.f32 %v5276_v47, %v7254_v48  ;;  %v5279_v7 = vadd.f32 %v5278_v24, %v5277_v61 }
 0x2bb   : > { %v7418_v31 = vadd.f32 %v7375_v34, %v5391_v1  ;;  %v5859_v58 = vadd.f32 %v5279_v7, %v7256_v33 }
 0x2bd   : > { %v5392_v18 = vpop.f32.mrb[108].mxu0  ;;  %v5280_v23 = vpop.f32.mrb[132].mxu1 }
 0x2be   : > { %v5393_v26 = vpop.f32.mrb[109].mxu0  ;;  %v5281_v36 = vpop.f32.mrb[133].mxu1 }
 0x2bf   : > { %v5394_v9 = vadd.f32 %v5393_v26, %v5392_v18  ;;  %v5395_v0 = vpop.f32.mrb[110].mxu0  ;;  %v5282_v28 = vadd.f32 %v5281_v36, %v5280_v23  ;;  %v5283_v25 = vpop.f32.mrb[134].mxu1 }
 0x2c0   : > { %v5396_v3 = vpop.f32.mrb[111].mxu0  ;;  %v5284_v6 = vpop.f32.mrb[135].mxu1 }
 0x2c1   : > { %v5397_v63 = vadd.f32 %v5396_v3, %v5395_v0  ;;  %v7422_v54 = vadd.f32 %v7381_v37, %v5394_v9  ;;  %v5850_v48 = vadd.f32 %v5282_v28, %v7266_v55  ;;  %v5285_v34 = vadd.f32 %v5284_v6, %v5283_v25 }
 0x2c3   : > { %v7426_v5 = vadd.f32 %v7387_v35, %v5397_v63  ;;  %v5856_v33 = vadd.f32 %v5285_v34, %v7268_v38 }
 0x2c5   : > { %v5398_v15 = vpop.f32.mrb[112].mxu0  ;;  %v5286_v49 = vpop.f32.mrb[136].mxu1 }
 0x2c6   : > { %v5399_v4 = vpop.f32.mrb[113].mxu0  ;;  %v5287_v50 = vpop.f32.mrb[137].mxu1 }
 0x2c7   : > { %v5400_v45 = vadd.f32 %v5399_v4, %v5398_v15  ;;  %v5401_v60 = vpop.f32.mrb[114].mxu0  ;;  %v5288_v8 = vadd.f32 %v5287_v50, %v5286_v49  ;;  %v5289_v41 = vpop.f32.mrb[138].mxu1 }
 0x2c8   : > { %v5402_v20 = vpop.f32.mrb[115].mxu0  ;;  %v5290_v37 = vpop.f32.mrb[139].mxu1 }
 0x2c9   : > { %v5403_v13 = vadd.f32 %v5402_v20, %v5401_v60  ;;  %v7430_v47 = vadd.f32 %v7393_v17, %v5400_v45  ;;  %v5865_v55 = vadd.f32 %v5288_v8, %v7281_v12  ;;  %v5291_v35 = vadd.f32 %v5290_v37, %v5289_v41 }
 0x2cb   : > { %v7434_v62 = vadd.f32 %v7399_v22, %v5403_v13  ;;  %v5871_v38 = vadd.f32 %v5291_v35, %v7283_v51 }
 0x2cd   : > { %v5404_v61 = vpop.f32.mrb[116].mxu0  ;;  %v5292_v24 = vpop.f32.mrb[140].mxu1 }
 0x2ce   : > { %v5405_v1 = vpop.f32.mrb[117].mxu0  ;;  %v5293_v26 = vpop.f32.mrb[141].mxu1 }
 0x2cf   : > { %v5406_v7 = vadd.f32 %v5405_v1, %v5404_v61  ;;  %v5407_v18 = vpop.f32.mrb[118].mxu0  ;;  %v5294_v23 = vadd.f32 %v5293_v26, %v5292_v24  ;;  %v5295_v0 = vpop.f32.mrb[142].mxu1 }
 0x2d0   : > { %v5408_v9 = vpop.f32.mrb[119].mxu0  ;;  %v5296_v17 = vpop.f32.mrb[143].mxu1 }
 0x2d1   : > { %v5409_v36 = vadd.f32 %v5408_v9, %v5407_v18  ;;  %v7438_v28 = vadd.f32 %v7405_v19, %v5406_v7  ;;  %v5862_v12 = vadd.f32 %v5294_v23, %v7293_v32  ;;  %v5297_v22 = vadd.f32 %v5296_v17, %v5295_v0  ;;  %v7464_v0 = vld [vmem:[%s7870_s6 + $0x2] ss:$0 sm:$0xff]  ;;  %v7470_v17 = vld [vmem:[%s7870_s6 + $0x3] ss:$0 sm:$0xff] }
 0x2d3   : > { %v7442_v3 = vadd.f32 %v7411_v2, %v5409_v36  ;;  %v5868_v51 = vadd.f32 %v5297_v22, %v7295_v44 }
 0x2d5   : > { %v5410_v25 = vpop.f32.mrb[120].mxu0 }
 0x2d6   : > { %v5411_v63 = vpop.f32.mrb[121].mxu0 }
 0x2d7   : > { %v5412_v6 = vadd.f32 %v5411_v63, %v5410_v25  ;;  %v5413_v34 = vpop.f32.mrb[122].mxu0 }
 0x2d8   : > { %v5414_v15 = vpop.f32.mrb[123].mxu0 }
 0x2d9   : > { %v5415_v4 = vadd.f32 %v5414_v15, %v5413_v34  ;;  %v7445_v49 = vadd.f32 %v5853_v59, %v5412_v6 }
 0x2db   : > { %v7447_v45 = vadd.f32 %v5859_v58, %v5415_v4 }
 0x2dd   : > { %v5416_v19 = vpop.f32.mrb[124].mxu0 }
 0x2de   : > { %v5417_v60 = vpop.f32.mrb[125].mxu0 }
 0x2df   : > { %v5418_v50 = vadd.f32 %v5417_v60, %v5416_v19  ;;  %v5419_v32 = vpop.f32.mrb[126].mxu0 }
 0x2e0   : > { %v5420_v8 = vpop.f32.mrb[127].mxu0 }
 0x2e1   : > { %v5421_v20 = vadd.f32 %v5420_v8, %v5419_v32  ;;  %v7449_v2 = vadd.f32 %v5850_v48, %v5418_v50 }
 0x2e3   : > { %v7451_v41 = vadd.f32 %v5856_v33, %v5421_v20 }
 0x2e5   : > { %v5422_v44 = vpop.f32.mrb[128].mxu0 }
 0x2e6   : > { %v5423_v13 = vpop.f32.mrb[129].mxu0 }
 0x2e7   : > { %v5424_v37 = vadd.f32 %v5423_v13, %v5422_v44  ;;  %v5425_v35 = vpop.f32.mrb[130].mxu0 }
 0x2e8   : > { %v5426_v61 = vpop.f32.mrb[131].mxu0 }
 0x2e9   : > { %v5427_v1 = vadd.f32 %v5426_v61, %v5425_v35  ;;  %v7453_v59 = vadd.f32 %v5865_v55, %v5424_v37 }
 0x2eb   : > { %v7455_v58 = vadd.f32 %v5871_v38, %v5427_v1 }
 0x2ed   : > { %v5428_v24 = vpop.f32.mrb[132].mxu0 }
 0x2ee   : > { %v5429_v7 = vpop.f32.mrb[133].mxu0 }
 0x2ef   : > { %v5430_v18 = vadd.f32 %v5429_v7, %v5428_v24  ;;  %v5431_v26 = vpop.f32.mrb[134].mxu0 }
 0x2f0   : > { %v5432_v23 = vpop.f32.mrb[135].mxu0 }
 0x2f1   : > { %v5433_v9 = vadd.f32 %v5432_v23, %v5431_v26  ;;  %v7457_v48 = vadd.f32 %v5862_v12, %v5430_v18 }
 0x2f3   : > { %v7459_v33 = vadd.f32 %v5868_v51, %v5433_v9 }
 0x315   : > { %v5700_v36 = vpop.f32.mrb[48].mxu1 }
 0x316   : > { %v5780_v55 = vadd.f32 %v7330_v10, %v5700_v36  ;;  %v3445_v38 = vpop.f32.mrb[49].mxu1 }
 0x317   : > { %v5783_v22 = vadd.f32 %v7317_v30, %v3445_v38  ;;  %v5701_v12 = vpop.f32.mrb[50].mxu1 }
 0x318   : > { %v3610_v51 = vmul.f32 %v5780_v55, %v7464_v0  ;;  %v5786_v25 = vadd.f32 %v7336_v56, %v5701_v12  ;;  %v3448_v63 = vpop.f32.mrb[51].mxu1 }
 0x319   : > { %v3608_v6 = vmul.f32 %v5783_v22, %v7464_v0  ;;  %v5789_v34 = vadd.f32 %v7324_v52, %v3448_v63 }
 0x31a   : > { %v3646_v10 = vadd.f32 %v7470_v17, %v3610_v51  ;;  %v3611_v15 = vmul.f32 %v5786_v25, %v7464_v0 }
 0x31b   : > { %v3644_v4 = vadd.f32 %v7470_v17, %v3608_v6  ;;  %v3609_v19 = vmul.f32 %v5789_v34, %v7464_v0 }
 0x31c   : > { %v3647_v30 = vadd.f32 %v7470_v17, %v3611_v15  ;;  %v4752_v32 = vclamps-f32 %v3646_v10, 1.0 }
 0x31d   : > { %v3645_v60 = vadd.f32 %v7470_v17, %v3609_v19  ;;  %v5704_v50 = vpop.f32.mrb[52].mxu1  ;;  %v4750_v44 = vclamps-f32 %v3644_v4, 1.0 }
 0x31e   : > { %v4753_v56 = vclamps-f32 %v3647_v30, 1.0  ;;  %v5792_v8 = vadd.f32 %v7354_v42, %v5704_v50  ;;  %v3461_v20 = vpop.f32.mrb[53].mxu1 }
 0x31f   : > { %v4751_v52 = vclamps-f32 %v3645_v60, 1.0  ;;  %v5795_v13 = vadd.f32 %v7342_v27, %v3461_v20  ;;  %v5705_v37 = vpop.f32.mrb[54].mxu1 }
 0x320   : > { %v3741_v35 = vpack.c.bf16 %v4753_v56, %v4752_v32  ;;  %v3614_v61 = vmul.f32 %v5792_v8, %v7464_v0  ;;  %v5798_v1 = vadd.f32 %v7360_v40, %v5705_v37  ;;  %v3464_v24 = vpop.f32.mrb[55].mxu1 }
 0x321   : > { %v3612_v7 = vmul.f32 %v5795_v13, %v7464_v0  ;;  %v5801_v18 = vadd.f32 %v7348_v29, %v3464_v24  ;;  %v3740_v26 = vpack.c.bf16 %v4751_v52, %v4750_v44 }
 0x322   : > { %v3650_v23 = vadd.f32 %v7470_v17, %v3614_v61  ;;  %v3615_v42 = vmul.f32 %v5798_v1, %v7464_v0 }
 0x323   : > { %v3648_v9 = vadd.f32 %v7470_v17, %v3612_v7  ;;  %v3613_v27 = vmul.f32 %v5801_v18, %v7464_v0  ;;  %5746 = vmatprep.mubr.bf16.mxu0 %v3740_v26 }
 0x324   : > { %v3651_v36 = vadd.f32 %v7470_v17, %v3615_v42  ;;  %5747 = vmatmul.mubr.bf16.vlgmr.msra.gmra.mrb[136].mxu0 %v3741_v35  ;;  %v4756_v38 = vclamps-f32 %v3650_v23, 1.0 }
 0x325   : > { %v3649_v40 = vadd.f32 %v7470_v17, %v3613_v27  ;;  %v5708_v55 = vpop.f32.mrb[56].mxu1  ;;  %v4754_v51 = vclamps-f32 %v3648_v9, 1.0 }
 0x326   : > { %v4757_v22 = vclamps-f32 %v3651_v36, 1.0  ;;  %v5804_v29 = vadd.f32 %v7378_v53, %v5708_v55  ;;  %v3477_v12 = vpop.f32.mrb[57].mxu1 }
 0x327   : > { %v4755_v25 = vclamps-f32 %v3649_v40, 1.0  ;;  %v5807_v63 = vadd.f32 %v7366_v11, %v3477_v12  ;;  %v5709_v6 = vpop.f32.mrb[58].mxu1 }
 0x328   : > { %v3618_v34 = vmul.f32 %v5804_v29, %v7464_v0  ;;  %v5810_v10 = vadd.f32 %v7384_v57, %v5709_v6  ;;  %v3480_v15 = vpop.f32.mrb[59].mxu1  ;;  %v3743_v4 = vpack.c.bf16 %v4757_v22, %v4756_v38 }
 0x329   : > { %v3616_v19 = vmul.f32 %v5807_v63, %v7464_v0  ;;  %v5813_v30 = vadd.f32 %v7372_v46, %v3480_v15  ;;  %v3742_v60 = vpack.c.bf16 %v4755_v25, %v4754_v51 }
 0x32a   : > { %v3654_v50 = vadd.f32 %v7470_v17, %v3618_v34  ;;  %v3619_v53 = vmul.f32 %v5810_v10, %v7464_v0 }
 0x32b   : > { %v3652_v32 = vadd.f32 %v7470_v17, %v3616_v19  ;;  %v3617_v11 = vmul.f32 %v5813_v30, %v7464_v0  ;;  %5750 = vmatprep.mubr.bf16.mxu0 %v3742_v60 }
 0x32c   : > { %v3655_v56 = vadd.f32 %v7470_v17, %v3619_v53  ;;  %5751 = vmatmul.mubr.bf16.gmra.mrb[140].mxu0 %v3743_v4  ;;  %v4760_v20 = vclamps-f32 %v3654_v50, 1.0 }
 0x32d   : > { %v3653_v57 = vadd.f32 %v7470_v17, %v3617_v11  ;;  %v5712_v8 = vpop.f32.mrb[60].mxu1  ;;  %v4758_v13 = vclamps-f32 %v3652_v32, 1.0 }
 0x32e   : > { %v4761_v44 = vclamps-f32 %v3655_v56, 1.0  ;;  %v5816_v46 = vadd.f32 %v7402_v14, %v5712_v8  ;;  %v3493_v52 = vpop.f32.mrb[61].mxu1 }
 0x32f   : > { %v4759_v37 = vclamps-f32 %v3653_v57, 1.0  ;;  %v5819_v35 = vadd.f32 %v7390_v43, %v3493_v52  ;;  %v5713_v61 = vpop.f32.mrb[62].mxu1 }
 0x330   : > { %v3622_v1 = vmul.f32 %v5816_v46, %v7464_v0  ;;  %v5822_v24 = vadd.f32 %v7408_v21, %v5713_v61  ;;  %v3496_v7 = vpop.f32.mrb[63].mxu1  ;;  %v3745_v18 = vpack.c.bf16 %v4761_v44, %v4760_v20 }
 0x331   : > { %v3620_v26 = vmul.f32 %v5819_v35, %v7464_v0  ;;  %v5825_v23 = vadd.f32 %v7396_v39, %v3496_v7  ;;  %v3744_v42 = vpack.c.bf16 %v4759_v37, %v4758_v13 }
 0x332   : > { %v3658_v9 = vadd.f32 %v7470_v17, %v3622_v1  ;;  %v3623_v14 = vmul.f32 %v5822_v24, %v7464_v0 }
 0x333   : > { %v3656_v27 = vadd.f32 %v7470_v17, %v3620_v26  ;;  %v3621_v43 = vmul.f32 %v5825_v23, %v7464_v0  ;;  %5754 = vmatprep.mubr.bf16.mxu0 %v3744_v42 }
 0x334   : > { %v3659_v36 = vadd.f32 %v7470_v17, %v3623_v14  ;;  %5755 = vmatmul.mubr.bf16.gmra.mrb[144].mxu0 %v3745_v18  ;;  %v4764_v55 = vclamps-f32 %v3658_v9, 1.0 }
 0x335   : > { %v3657_v21 = vadd.f32 %v7470_v17, %v3621_v43  ;;  %v5716_v40 = vpop.f32.mrb[64].mxu1  ;;  %v4762_v29 = vclamps-f32 %v3656_v27, 1.0 }
 0x336   : > { %v4765_v38 = vclamps-f32 %v3659_v36, 1.0  ;;  %v5828_v39 = vadd.f32 %v7422_v54, %v5716_v40  ;;  %v3509_v22 = vpop.f32.mrb[65].mxu1 }
 0x337   : > { %v4763_v12 = vclamps-f32 %v3657_v21, 1.0  ;;  %v5831_v51 = vadd.f32 %v7414_v16, %v3509_v22  ;;  %v5717_v25 = vpop.f32.mrb[66].mxu1 }
 0x338   : > { %v3626_v63 = vmul.f32 %v5828_v39, %v7464_v0  ;;  %v5834_v6 = vadd.f32 %v7426_v5, %v5717_v25  ;;  %v3512_v34 = vpop.f32.mrb[67].mxu1  ;;  %v3747_v10 = vpack.c.bf16 %v4765_v38, %v4764_v55 }
 0x339   : > { %v3624_v15 = vmul.f32 %v5831_v51, %v7464_v0  ;;  %v5837_v4 = vadd.f32 %v7418_v31, %v3512_v34  ;;  %v3746_v19 = vpack.c.bf16 %v4763_v12, %v4762_v29 }
 0x33a   : > { %v3662_v30 = vadd.f32 %v7470_v17, %v3626_v63  ;;  %v3627_v54 = vmul.f32 %v5834_v6, %v7464_v0 }
 0x33b   : > { %v3660_v60 = vadd.f32 %v7470_v17, %v3624_v15  ;;  %v3625_v16 = vmul.f32 %v5837_v4, %v7464_v0  ;;  %5758 = vmatprep.mubr.bf16.mxu0 %v3746_v19 }
 0x33c   : > { %v3663_v50 = vadd.f32 %v7470_v17, %v3627_v54  ;;  %5759 = vmatmul.mubr.bf16.gmra.mrb[148].mxu0 %v3747_v10  ;;  %v4768_v32 = vclamps-f32 %v3662_v30, 1.0 }
 0x33d   : > { %v3661_v5 = vadd.f32 %v7470_v17, %v3625_v16  ;;  %v5720_v53 = vpop.f32.mrb[68].mxu1  ;;  %v4766_v57 = vclamps-f32 %v3660_v60, 1.0 }
 0x33e   : > { %v4769_v11 = vclamps-f32 %v3663_v50, 1.0  ;;  %v5840_v31 = vadd.f32 %v7438_v28, %v5720_v53  ;;  %v3525_v56 = vpop.f32.mrb[69].mxu1 }
 0x33f   : > { %v4767_v8 = vclamps-f32 %v3661_v5, 1.0  ;;  %v5843_v20 = vadd.f32 %v7430_v47, %v3525_v56  ;;  %v5721_v44 = vpop.f32.mrb[70].mxu1 }
 0x340   : > { %v3630_v46 = vmul.f32 %v5840_v31, %v7464_v0  ;;  %v5846_v52 = vadd.f32 %v7442_v3, %v5721_v44  ;;  %v3528_v13 = vpop.f32.mrb[71].mxu1  ;;  %v3749_v37 = vpack.c.bf16 %v4769_v11, %v4768_v32 }
 0x341   : > { %v3628_v35 = vmul.f32 %v5843_v20, %v7464_v0  ;;  %v5849_v61 = vadd.f32 %v7434_v62, %v3528_v13  ;;  %v3748_v1 = vpack.c.bf16 %v4767_v8, %v4766_v57  ;;  %v6103_v13 = vld [vmem:[%s6260_s15 + $0x20] sm:$0xff] }
 0x342   : > { %v3666_v24 = vadd.f32 %v7470_v17, %v3630_v46  ;;  %v3631_v28 = vmul.f32 %v5846_v52, %v7464_v0 }
 0x343   : > { %v3664_v7 = vadd.f32 %v7470_v17, %v3628_v35  ;;  %v3629_v47 = vmul.f32 %v5849_v61, %v7464_v0  ;;  %5762 = vmatprep.mubr.bf16.mxu0 %v3748_v1  ;;  %v6105_v1 = vld [vmem:[%s6260_s15 + $0x8] sm:$0xff] }
 0x344   : > { %v3667_v18 = vadd.f32 %v7470_v17, %v3631_v28  ;;  %5763 = vmatmul.mubr.bf16.gmra.mrb[152].mxu0 %v3749_v37  ;;  %v4772_v23 = vclamps-f32 %v3666_v24, 1.0  ;;  %v4036_v37 = vrot.slane %v6103_v13, 1  ;;  %v4031_v24 = vrot.slane %v6105_v1, 1  ;;  %v6106_v28 = vld [vmem:[%s6260_s15 + $0x28] sm:$0xff] }
 0x345   : > { %v3665_v3 = vadd.f32 %v7470_v17, %v3629_v47  ;;  %v5724_v26 = vpop.f32.mrb[72].mxu1  ;;  %v4770_v14 = vclamps-f32 %v3664_v7, 1.0  ;;  %v4038_v7 = vrot.slane %v6106_v28, 1  ;;  %v6107_v47 = vld [vmem:[%s6260_s15 + $0x10] sm:$0xff] }
 0x346   : > { %v4773_v42 = vclamps-f32 %v3667_v18, 1.0  ;;  %v5852_v62 = vadd.f32 %v7449_v2, %v5724_v26  ;;  %v3541_v9 = vpop.f32.mrb[73].mxu1  ;;  %v4033_v18 = vrot.slane %v6107_v47, 1 }
 0x347   : > { %v4771_v27 = vclamps-f32 %v3665_v3, 1.0  ;;  %v5855_v43 = vadd.f32 %v7445_v49, %v3541_v9  ;;  %v5725_v36 = vpop.f32.mrb[74].mxu1  ;;  %v6108_v3 = vld [vmem:[%s6260_s15 + $0x48] sm:$0xff]  ;;  %v7582_v9 = vsel %vm2984_vm6, %v4036_v37, %v4038_v7 }
 0x348   : > { %v3634_v21 = vmul.f32 %v5852_v62, %v7464_v0  ;;  %v5858_v40 = vadd.f32 %v7451_v41, %v5725_v36  ;;  %v3544_v55 = vpop.f32.mrb[75].mxu1  ;;  %v3751_v38 = vpack.c.bf16 %v4773_v42, %v4772_v23  ;;  %v4045_v26 = vrot.slane %v6108_v3, 1  ;;  %v6109_v23 = vld [vmem:[%s6260_s15 + $0x50] sm:$0xff]  ;;  %v6130_v7 = vld [vmem:[%s6260_s15 + $0xe8] sm:$0xff] }
 0x349   : > { %v3632_v39 = vmul.f32 %v5855_v43, %v7464_v0  ;;  %v5861_v22 = vadd.f32 %v7447_v45, %v3544_v55  ;;  %v3750_v29 = vpack.c.bf16 %v4771_v27, %v4770_v14  ;;  %v4046_v42 = vrot.slane %v6109_v23, 1  ;;  %v6110_v43 = vld [vmem:[%s6260_s15 + $0x30] sm:$0xff]  ;;  %v6112_v55 = vld [vmem:[%s6260_s15 + $0x58] sm:$0xff] }
 0x34a   : > { %v3670_v12 = vadd.f32 %v7470_v17, %v3634_v21  ;;  %v3635_v2 = vmul.f32 %v5858_v40, %v7464_v0  ;;  %v7585_v14 = vsel %vm2984_vm6, %v4031_v24, %v4033_v18  ;;  %v4040_v36 = vrot.slane %v6110_v43, 1  ;;  %v6111_v21 = vld [vmem:[%s6260_s15 + $0x38] sm:$0xff]  ;;  %v6131_v18 = vld [vmem:[%s6260_s15 + $0xd0] sm:$0xff] }
 0x34b   : > { %v3668_v51 = vadd.f32 %v7470_v17, %v3632_v39  ;;  %v3633_v49 = vmul.f32 %v5861_v22, %v7464_v0  ;;  %5766 = vmatprep.mubr.bf16.mxu0 %v3750_v29  ;;  %v7588_v27 = vsel %vm2984_vm6, %v4045_v26, %v4046_v42  ;;  %v4041_v40 = vrot.slane %v6111_v21, 1  ;;  %v6113_v39 = vld [vmem:[%s6260_s15 + $0x40] sm:$0xff]  ;;  %v6114_v29 = vld [vmem:[%s6260_s15 + $0x78] sm:$0xff]  ;;  %v6132_v26 = vld [vmem:[%s6260_s15 + $0x108] sm:$0xff] }
 0x34c   : > { %v3671_v25 = vadd.f32 %v7470_v17, %v3635_v2  ;;  %5767 = vmatmul.mubr.bf16.gmra.mrb[156].mxu0 %v3751_v38  ;;  %v4776_v6 = vclamps-f32 %v3670_v12, 1.0  ;;  %v4048_v38 = vrot.slane %v6112_v55, 1  ;;  %v4043_v22 = vrot.slane %v6113_v39, 1  ;;  %v6115_v2 = vld [vmem:[%s6260_s15 + $0x80] sm:$0xff] }
 0x34d   : > { %v3669_v41 = vadd.f32 %v7470_v17, %v3633_v49  ;;  %v5728_v63 = vpop.f32.mrb[76].mxu1  ;;  %v4774_v15 = vclamps-f32 %v3668_v51, 1.0  ;;  %v4055_v12 = vrot.slane %v6114_v29, 1  ;;  %v4056_v51 = vrot.slane %v6115_v2, 1 }
 0x34e   : > { %v4777_v34 = vclamps-f32 %v3671_v25, 1.0  ;;  %v5864_v45 = vadd.f32 %v7457_v48, %v5728_v63  ;;  %v3557_v10 = vpop.f32.mrb[77].mxu1  ;;  %v7597_v49 = vsel %vm2984_vm6, %v4040_v36, %v4041_v40  ;;  %v7600_v25 = vsel %vm2984_vm6, %v4046_v42, %v4048_v38  ;;  %v6133_v42 = vld [vmem:[%s6260_s15 + $0x110] sm:$0xff] }
 0x34f   : > { %v4775_v4 = vclamps-f32 %v3669_v41, 1.0  ;;  %v5867_v19 = vadd.f32 %v7453_v59, %v3557_v10  ;;  %v5729_v30 = vpop.f32.mrb[78].mxu1  ;;  %v7603_v41 = vsel %vm2984_vm6, %v4041_v40, %v4043_v22  ;;  %v7606_v63 = vsel %vm2984_vm6, %v4055_v12, %v4056_v51  ;;  %v6134_v38 = vld [vmem:[%s6260_s15 + $0xf0] sm:$0xff]  ;;  %v6135_v22 = vld [vmem:[%s6260_s15 + $0xf8] sm:$0xff] }
 0x350   : > { %v3638_v54 = vmul.f32 %v5864_v45, %v7464_v0  ;;  %v5870_v60 = vadd.f32 %v7459_v33, %v5729_v30  ;;  %v3560_v16 = vpop.f32.mrb[79].mxu1  ;;  %v3753_v50 = vpack.c.bf16 %v4777_v34, %v4776_v6  ;;  %v6116_v6 = vld [vmem:[%s6260_s15 + $0x60] sm:$0xff]  ;;  %v6117_v45 = vld [vmem:[%s6260_s15 + $0x68] sm:$0xff]  ;;  %v4078_v47 = vrot.slane %v6130_v7, 1  ;;  %v6136_v12 = vld [vmem:[%s6260_s15 + $0x118] sm:$0xff] }
 0x351   : > { %v3636_v5 = vmul.f32 %v5867_v19, %v7464_v0  ;;  %v5873_v53 = vadd.f32 %v7455_v58, %v3560_v16  ;;  %v3752_v32 = vpack.c.bf16 %v4775_v4, %v4774_v15  ;;  %v4050_v34 = vrot.slane %v6116_v6, 1  ;;  %v6118_v15 = vld [vmem:[%s6260_s15 + $0x88] sm:$0xff]  ;;  %v6119_v19 = vld [vmem:[%s6260_s15 + $0x70] sm:$0xff] }
 0x352   : > { %v3674_v11 = vadd.f32 %v7470_v17, %v3638_v54  ;;  %v3639_v48 = vmul.f32 %v5870_v60, %v7464_v0  ;;  %v4051_v10 = vrot.slane %v6117_v45, 1  ;;  %v4058_v4 = vrot.slane %v6118_v15, 1  ;;  %v6120_v54 = vld [vmem:[%s6260_s15 + $0xa8] sm:$0xff]  ;;  %v6121_v16 = vld [vmem:[%s6260_s15 + $0xb0] sm:$0xff] }
 0x353   : > { %v3672_v31 = vadd.f32 %v7470_v17, %v3636_v5  ;;  %v3637_v59 = vmul.f32 %v5873_v53, %v7464_v0  ;;  %5770 = vmatprep.mubr.bf16.mxu0 %v3752_v32  ;;  %v6102_v0 = vld [vmem:[%s6260_s15 + $0x18] sm:$0xff]  ;;  %v4053_v30 = vrot.slane %v6119_v19, 1  ;;  %v4065_v60 = vrot.slane %v6120_v54, 1 }
 0x354   : > { %v3675_v33 = vadd.f32 %v7470_v17, %v3639_v48  ;;  %5771 = vmatmul.mubr.bf16.gmra.mrb[160].mxu0 %v3753_v50  ;;  %v4780_v58 = vclamps-f32 %v3674_v11, 1.0  ;;  %v4035_v52 = vrot.slane %v6102_v0, 1  ;;  %v4066_v50 = vrot.slane %v6121_v16, 1  ;;  %v6122_v48 = vld [vmem:[%s6260_s15 + $0x90] sm:$0xff] }
 0x355   : > { %v3673_v56 = vadd.f32 %v7470_v17, %v3637_v59  ;;  %v4778_v8 = vclamps-f32 %v3672_v31, 1.0  ;;  %v6104_v17 = vld [vmem:[%s6260_s15] sm:$0xff]  ;;  %v7615_v5 = vsel %vm2984_vm6, %v4050_v34, %v4051_v10  ;;  %v7618_v53 = vsel %vm2984_vm6, %v4056_v51, %v4058_v4  ;;  %v6123_v59 = vld [vmem:[%s6260_s15 + $0x98] sm:$0xff] }
 0x356   : > { %v4781_v57 = vclamps-f32 %v3675_v33, 1.0  ;;  %v7570_v35 = vsel %vm2984_vm6, %v4035_v52, %v4036_v37  ;;  %v4030_v61 = vrot.slane %v6104_v17, 1  ;;  %v7621_v32 = vsel %vm2984_vm6, %v4051_v10, %v4053_v30  ;;  %v6137_v51 = vld [vmem:[%s6260_s15 + $0x100] sm:$0xff]  ;;  %v6138_v34 = vld [vmem:[%s6260_s15 + $0x138] sm:$0xff] }
 0x357   : > { %v4779_v20 = vclamps-f32 %v3673_v56, 1.0  ;;  %v7624_v11 = vsel %vm2984_vm6, %v4065_v60, %v4066_v50  ;;  %v4060_v31 = vrot.slane %v6122_v48, 1  ;;  %v4061_v33 = vrot.slane %v6123_v59, 1  ;;  %v6124_v56 = vld [vmem:[%s6260_s15 + $0xb8] sm:$0xff]  ;;  %v6139_v10 = vld [vmem:[%s6260_s15 + $0x140] sm:$0xff] }
 0x358   : > { %v3755_v44 = vpack.c.bf16 %v4781_v57, %v4780_v58  ;;  %v7579_v62 = vsel %vm2984_vm6, %v4030_v61, %v4031_v24  ;;  %v4068_v58 = vrot.slane %v6124_v56, 1  ;;  %v6125_v57 = vld [vmem:[%s6260_s15 + $0xa0] sm:$0xff]  ;;  %v6129_v24 = vld [vmem:[%s6260_s15 + $0xc8] sm:$0xff]  ;;  %v4073_v3 = vrot.slane %v6131_v18, 1 }
 0x359   : > { %v3754_v46 = vpack.c.bf16 %v4779_v20, %v4778_v8  ;;  %v4063_v8 = vrot.slane %v6125_v57, 1  ;;  %v6126_v20 = vld [vmem:[%s6260_s15 + $0xd8] sm:$0xff]  ;;  %v7633_v52 = vsel %vm2984_vm6, %v4060_v31, %v4061_v33  ;;  %v6128_v61 = vld [vmem:[%s6260_s15 + $0xc0] sm:$0xff]  ;;  %v4071_v28 = vrot.slane %v6129_v24, 1  ;;  %v6142_v31 = vld [vmem:[%s6260_s15 + $0x148] sm:$0xff] }
 0x35a   : > { %v7636_v13 = vsel %vm2984_vm6, %v4066_v50, %v4068_v58  ;;  %v4070_v1 = vrot.slane %v6128_v61, 1  ;;  %v4085_v23 = vrot.slane %v6132_v26, 1  ;;  %v4086_v43 = vrot.slane %v6133_v42, 1  ;;  %v6140_v60 = vld [vmem:[%s6260_s15 + $0x120] sm:$0xff]  ;;  %v6141_v50 = vld [vmem:[%s6260_s15 + $0x128] sm:$0xff] }
 0x35b   : > { %5774 = vmatprep.mubr.bf16.mxu0 %v3754_v46  ;;  %v6127_v46 = vld [vmem:[%s6260_s15 + $0xe0] sm:$0xff]  ;;  %v7639_v37 = vsel %vm2984_vm6, %v4061_v33, %v4063_v8  ;;  %v7657_v40 = vsel %vm2984_vm6, %v4071_v28, %v4073_v3  ;;  %v4080_v39 = vrot.slane %v6134_v38, 1  ;;  %v4081_v29 = vrot.slane %v6135_v22, 1  ;;  %v6143_v33 = vld [vmem:[%s6260_s15 + $0x130] sm:$0xff]  ;;  %v6144_v58 = vld [vmem:[%s6260_s15 + $0x168] sm:$0xff] }
 0x35c   : > { %5775 = vmatmul.mubr.bf16.gmra.mrb[164].mxu0 %v3755_v44  ;;  %v4075_v44 = vrot.slane %v6126_v20, 1  ;;  %v4076_v0 = vrot.slane %v6127_v46, 1  ;;  %v7651_v36 = vsel %vm2984_vm6, %v4070_v1, %v4071_v28  ;;  %v7660_v55 = vsel %vm2984_vm6, %v4085_v23, %v4086_v43  ;;  %v6145_v8 = vld [vmem:[%s6260_s15 + $0x170] sm:$0xff]  ;;  %v6147_v28 = vld [vmem:[%s6260_s15 + $0x158] sm:$0xff]  ;;  %v6149_v3 = vld [vmem:[%s6260_s15 + $0x160] sm:$0xff] }
 0x35d   : > { %v4088_v2 = vrot.slane %v6136_v12, 1  ;;  %v4083_v6 = vrot.slane %v6137_v51, 1  ;;  %v4095_v45 = vrot.slane %v6138_v34, 1  ;;  %v4096_v15 = vrot.slane %v6139_v10, 1  ;;  %v6146_v1 = vld [vmem:[%s6260_s15 + $0x150] sm:$0xff] }
 0x35e   : > { %v7642_v17 = vsel %vm2984_vm6, %v4075_v44, %v4076_v0  ;;  %v7654_v21 = vsel %vm2984_vm6, %v4076_v0, %v4078_v47  ;;  %v7669_v4 = vsel %vm2984_vm6, %v4080_v39, %v4081_v29  ;;  %v4090_v16 = vrot.slane %v6140_v60, 1  ;;  %v6148_v47 = vld [vmem:[%s6260_s15 + $0x178] sm:$0xff]  ;;  %v7714_v38 = vld [vmem:[%s7870_s6 + $0x4] ss:$0 sm:$0xff]  ;;  %v7719_v39 = vld [vmem:[%s7870_s6 + $0x5] ss:$0 sm:$0xff] }
 0x35f   : > { %v7672_v19 = vsel %vm2984_vm6, %v4086_v43, %v4088_v2  ;;  %v7675_v30 = vsel %vm2984_vm6, %v4081_v29, %v4083_v6  ;;  %v7678_v54 = vsel %vm2984_vm6, %v4095_v45, %v4096_v15  ;;  %v4091_v48 = vrot.slane %v6141_v50, 1  ;;  %s4794_s15 = sshll.u32 %s7881_s24, 8 }
 0x360   : > { %v4098_v59 = vrot.slane %v6142_v31, 1  ;;  %v4093_v56 = vrot.slane %v6143_v33, 1  ;;  %v4105_v57 = vrot.slane %v6144_v58, 1  ;;  %v4106_v20 = vrot.slane %v6145_v8, 1  ;;  %s7729_s11 = scalar_lea.vmem %s7871_s7, %s4794_s15 }
 0x361   : > { %v7687_v44 = vsel %vm2984_vm6, %v4090_v16, %v4091_v48  ;;  %v4100_v24 = vrot.slane %v6146_v1, 1  ;;  %v4101_v7 = vrot.slane %v6147_v28, 1  ;;  %v4108_v18 = vrot.slane %v6148_v47, 1 }
 0x362   : > { %v7690_v46 = vsel %vm2984_vm6, %v4096_v15, %v4098_v59  ;;  %v7693_v0 = vsel %vm2984_vm6, %v4091_v48, %v4093_v56  ;;  %v7696_v61 = vsel %vm2984_vm6, %v4105_v57, %v4106_v20  ;;  %v4103_v26 = vrot.slane %v6149_v3, 1 }
 0x363   : > { %v7703_v23 = vsel %vm2984_vm6, %v4100_v24, %v4101_v7  ;;  %v7706_v42 = vsel %vm2984_vm6, %v4106_v20, %v4108_v18 }
 0x364   : > { %v7709_v43 = vsel %vm2984_vm6, %v4101_v7, %v4103_v26 }
 0x3f7   : > { %v5748_v22 = vpop.f32.mrb[136].mxu0 }
 0x3f8   : > { %v4148_v29 = vmul.f32 %v5748_v22, %v7714_v38  ;;  %v3854_v12 = vpop.f32.mrb[137].mxu0 }
 0x3f9   : > { %v4146_v2 = vmul.f32 %v7714_v38, %v3854_v12  ;;  %v5749_v51 = vpop.f32.mrb[138].mxu0 }
 0x3fa   : > { %v4184_v6 = vadd.f32 %v7719_v39, %v4148_v29  ;;  %v4149_v34 = vmul.f32 %v5749_v51, %v7714_v38  ;;  %v3857_v45 = vpop.f32.mrb[139].mxu0 }
 0x3fb   : > { %v4182_v10 = vadd.f32 %v7719_v39, %v4146_v2  ;;  %v4147_v15 = vmul.f32 %v7714_v38, %v3857_v45 }
 0x3fc   : > { %v4216_v60 = vadd.f32 %v4184_v6, %v7570_v35  ;;  %v4185_v16 = vadd.f32 %v7719_v39, %v4149_v34 }
 0x3fd   : > { %v4214_v50 = vadd.f32 %v4182_v10, %v7579_v62  ;;  %v4183_v48 = vadd.f32 %v7719_v39, %v4147_v15 }
 0x3fe   : > { %4248 = vst [vmem:[%s7729_s11 + $0x10] sm:$0xff] %v4216_v60  ;;  %v4217_v31 = vadd.f32 %v4185_v16, %v7582_v9 }
 0x3ff   : > { %4246 = vst [vmem:[%s7729_s11] sm:$0xff] %v4214_v50  ;;  %v4215_v59 = vadd.f32 %v4183_v48, %v7585_v14  ;;  %v5752_v33 = vpop.f32.mrb[140].mxu0 }
 0x400   : > { %4249 = vst [vmem:[%s7729_s11 + $0x18] sm:$0xff] %v4217_v31  ;;  %v4152_v56 = vmul.f32 %v5752_v33, %v7714_v38  ;;  %v3870_v58 = vpop.f32.mrb[141].mxu0 }
 0x401   : > { %4247 = vst [vmem:[%s7729_s11 + $0x8] sm:$0xff] %v4215_v59  ;;  %v4150_v35 = vmul.f32 %v7714_v38, %v3870_v58  ;;  %v5753_v62 = vpop.f32.mrb[142].mxu0 }
 0x402   : > { %v4188_v57 = vadd.f32 %v7719_v39, %v4152_v56  ;;  %v4153_v8 = vmul.f32 %v5753_v62, %v7714_v38  ;;  %v3873_v9 = vpop.f32.mrb[143].mxu0 }
 0x403   : > { %v4186_v14 = vadd.f32 %v7719_v39, %v4150_v35  ;;  %v4151_v20 = vmul.f32 %v7714_v38, %v3873_v9 }
 0x404   : > { %v4220_v1 = vadd.f32 %v4188_v57, %v7588_v27  ;;  %v4189_v24 = vadd.f32 %v7719_v39, %v4153_v8 }
 0x405   : > { %v4218_v28 = vadd.f32 %v4186_v14, %v7597_v49  ;;  %v4187_v7 = vadd.f32 %v7719_v39, %v4151_v20 }
 0x406   : > { %4252 = vst [vmem:[%s7729_s11 + $0x30] sm:$0xff] %v4220_v1  ;;  %v4221_v47 = vadd.f32 %v4189_v24, %v7600_v25 }
 0x407   : > { %4250 = vst [vmem:[%s7729_s11 + $0x20] sm:$0xff] %v4218_v28  ;;  %v4219_v18 = vadd.f32 %v4187_v7, %v7603_v41  ;;  %v5756_v3 = vpop.f32.mrb[144].mxu0 }
 0x408   : > { %4253 = vst [vmem:[%s7729_s11 + $0x38] sm:$0xff] %v4221_v47  ;;  %v4156_v26 = vmul.f32 %v5756_v3, %v7714_v38  ;;  %v3886_v22 = vpop.f32.mrb[145].mxu0 }
 0x409   : > { %4251 = vst [vmem:[%s7729_s11 + $0x28] sm:$0xff] %v4219_v18  ;;  %v4154_v27 = vmul.f32 %v7714_v38, %v3886_v22  ;;  %v5757_v49 = vpop.f32.mrb[146].mxu0 }
 0x40a   : > { %v4192_v29 = vadd.f32 %v7719_v39, %v4156_v26  ;;  %v4157_v12 = vmul.f32 %v5757_v49, %v7714_v38  ;;  %v3889_v25 = vpop.f32.mrb[147].mxu0 }
 0x40b   : > { %v4190_v41 = vadd.f32 %v7719_v39, %v4154_v27  ;;  %v4155_v2 = vmul.f32 %v7714_v38, %v3889_v25 }
 0x40c   : > { %v4224_v51 = vadd.f32 %v4192_v29, %v7606_v63  ;;  %v4193_v6 = vadd.f32 %v7719_v39, %v4157_v12 }
 0x40d   : > { %v4222_v34 = vadd.f32 %v4190_v41, %v7615_v5  ;;  %v4191_v45 = vadd.f32 %v7719_v39, %v4155_v2 }
 0x40e   : > { %4256 = vst [vmem:[%s7729_s11 + $0x50] sm:$0xff] %v4224_v51  ;;  %v4225_v10 = vadd.f32 %v4193_v6, %v7618_v53 }
 0x40f   : > { %4254 = vst [vmem:[%s7729_s11 + $0x40] sm:$0xff] %v4222_v34  ;;  %v4223_v15 = vadd.f32 %v4191_v45, %v7621_v32  ;;  %v5760_v60 = vpop.f32.mrb[148].mxu0 }
 0x410   : > { %4257 = vst [vmem:[%s7729_s11 + $0x58] sm:$0xff] %v4225_v10  ;;  %v4160_v16 = vmul.f32 %v5760_v60, %v7714_v38  ;;  %v3902_v50 = vpop.f32.mrb[149].mxu0 }
 0x411   : > { %4255 = vst [vmem:[%s7729_s11 + $0x48] sm:$0xff] %v4223_v15  ;;  %v4158_v63 = vmul.f32 %v7714_v38, %v3902_v50  ;;  %v5761_v5 = vpop.f32.mrb[150].mxu0 }
 0x412   : > { %v4196_v48 = vadd.f32 %v7719_v39, %v4160_v16  ;;  %v4161_v31 = vmul.f32 %v5761_v5, %v7714_v38  ;;  %v3905_v53 = vpop.f32.mrb[151].mxu0 }
 0x413   : > { %v4194_v32 = vadd.f32 %v7719_v39, %v4158_v63  ;;  %v4159_v59 = vmul.f32 %v7714_v38, %v3905_v53 }
 0x414   : > { %v4228_v33 = vadd.f32 %v4196_v48, %v7624_v11  ;;  %v4197_v56 = vadd.f32 %v7719_v39, %v4161_v31 }
 0x415   : > { %v4226_v58 = vadd.f32 %v4194_v32, %v7633_v52  ;;  %v4195_v35 = vadd.f32 %v7719_v39, %v4159_v59 }
 0x416   : > { %4260 = vst [vmem:[%s7729_s11 + $0x70] sm:$0xff] %v4228_v33  ;;  %v4229_v62 = vadd.f32 %v4197_v56, %v7636_v13 }
 0x417   : > { %4258 = vst [vmem:[%s7729_s11 + $0x60] sm:$0xff] %v4226_v58  ;;  %v4227_v57 = vadd.f32 %v4195_v35, %v7639_v37  ;;  %v5764_v8 = vpop.f32.mrb[152].mxu0 }
 0x418   : > { %4261 = vst [vmem:[%s7729_s11 + $0x78] sm:$0xff] %v4229_v62  ;;  %v4164_v9 = vmul.f32 %v5764_v8, %v7714_v38  ;;  %v3918_v14 = vpop.f32.mrb[153].mxu0 }
 0x419   : > { %4259 = vst [vmem:[%s7729_s11 + $0x68] sm:$0xff] %v4227_v57  ;;  %v4162_v11 = vmul.f32 %v7714_v38, %v3918_v14  ;;  %v5765_v52 = vpop.f32.mrb[154].mxu0 }
 0x41a   : > { %v4200_v20 = vadd.f32 %v7719_v39, %v4164_v9  ;;  %v4165_v1 = vmul.f32 %v5765_v52, %v7714_v38  ;;  %v3921_v13 = vpop.f32.mrb[155].mxu0 }
 0x41b   : > { %v4198_v37 = vadd.f32 %v7719_v39, %v4162_v11  ;;  %v4163_v24 = vmul.f32 %v7714_v38, %v3921_v13 }
 0x41c   : > { %v4232_v28 = vadd.f32 %v4200_v20, %v7642_v17  ;;  %v4201_v7 = vadd.f32 %v7719_v39, %v4165_v1 }
 0x41d   : > { %v4230_v47 = vadd.f32 %v4198_v37, %v7651_v36  ;;  %v4199_v18 = vadd.f32 %v7719_v39, %v4163_v24 }
 0x41e   : > { %4264 = vst [vmem:[%s7729_s11 + $0x90] sm:$0xff] %v4232_v28  ;;  %v4233_v3 = vadd.f32 %v4201_v7, %v7654_v21 }
 0x41f   : > { %4262 = vst [vmem:[%s7729_s11 + $0x80] sm:$0xff] %v4230_v47  ;;  %v4231_v26 = vadd.f32 %v4199_v18, %v7657_v40  ;;  %v5768_v22 = vpop.f32.mrb[156].mxu0 }
 0x420   : > { %4265 = vst [vmem:[%s7729_s11 + $0x98] sm:$0xff] %v4233_v3  ;;  %v4168_v27 = vmul.f32 %v5768_v22, %v7714_v38  ;;  %v3934_v49 = vpop.f32.mrb[157].mxu0 }
 0x421   : > { %4263 = vst [vmem:[%s7729_s11 + $0x88] sm:$0xff] %v4231_v26  ;;  %v4166_v17 = vmul.f32 %v7714_v38, %v3934_v49  ;;  %v5769_v36 = vpop.f32.mrb[158].mxu0 }
 0x422   : > { %v4204_v29 = vadd.f32 %v7719_v39, %v4168_v27  ;;  %v4169_v12 = vmul.f32 %v5769_v36, %v7714_v38  ;;  %v3937_v21 = vpop.f32.mrb[159].mxu0 }
 0x423   : > { %v4202_v40 = vadd.f32 %v7719_v39, %v4166_v17  ;;  %v4167_v25 = vmul.f32 %v7714_v38, %v3937_v21 }
 0x424   : > { %v4236_v41 = vadd.f32 %v4204_v29, %v7660_v55  ;;  %v4205_v2 = vadd.f32 %v7719_v39, %v4169_v12 }
 0x425   : > { %v4234_v51 = vadd.f32 %v4202_v40, %v7669_v4  ;;  %v4203_v6 = vadd.f32 %v7719_v39, %v4167_v25 }
 0x426   : > { %4268 = vst [vmem:[%s7729_s11 + $0xb0] sm:$0xff] %v4236_v41  ;;  %v4237_v34 = vadd.f32 %v4205_v2, %v7672_v19 }
 0x427   : > { %4266 = vst [vmem:[%s7729_s11 + $0xa0] sm:$0xff] %v4234_v51  ;;  %v4235_v45 = vadd.f32 %v4203_v6, %v7675_v30  ;;  %v5772_v10 = vpop.f32.mrb[160].mxu0 }
 0x428   : > { %4269 = vst [vmem:[%s7729_s11 + $0xb8] sm:$0xff] %v4237_v34  ;;  %v4172_v15 = vmul.f32 %v5772_v10, %v7714_v38  ;;  %v3950_v60 = vpop.f32.mrb[161].mxu0 }
 0x429   : > { %4267 = vst [vmem:[%s7729_s11 + $0xa8] sm:$0xff] %v4235_v45  ;;  %v4170_v55 = vmul.f32 %v7714_v38, %v3950_v60  ;;  %v5773_v4 = vpop.f32.mrb[162].mxu0 }
 0x42a   : > { %v4208_v16 = vadd.f32 %v7719_v39, %v4172_v15  ;;  %v4173_v50 = vmul.f32 %v5773_v4, %v7714_v38  ;;  %v3953_v19 = vpop.f32.mrb[163].mxu0 }
 0x42b   : > { %v4206_v30 = vadd.f32 %v7719_v39, %v4170_v55  ;;  %v4171_v63 = vmul.f32 %v7714_v38, %v3953_v19 }
 0x42c   : > { %v4240_v5 = vadd.f32 %v4208_v16, %v7678_v54  ;;  %v4209_v48 = vadd.f32 %v7719_v39, %v4173_v50 }
 0x42d   : > { %v4238_v31 = vadd.f32 %v4206_v30, %v7687_v44  ;;  %v4207_v53 = vadd.f32 %v7719_v39, %v4171_v63 }
 0x42e   : > { %4272 = vst [vmem:[%s7729_s11 + $0xd0] sm:$0xff] %v4240_v5  ;;  %v4241_v32 = vadd.f32 %v4209_v48, %v7690_v46 }
 0x42f   : > { %4270 = vst [vmem:[%s7729_s11 + $0xc0] sm:$0xff] %v4238_v31  ;;  %v4239_v59 = vadd.f32 %v4207_v53, %v7693_v0  ;;  %v5776_v33 = vpop.f32.mrb[164].mxu0 }
 0x430   : > { %4273 = vst [vmem:[%s7729_s11 + $0xd8] sm:$0xff] %v4241_v32  ;;  %v4176_v56 = vmul.f32 %v5776_v33, %v7714_v38  ;;  %v3966_v58 = vpop.f32.mrb[165].mxu0 }
 0x431   : > { %4271 = vst [vmem:[%s7729_s11 + $0xc8] sm:$0xff] %v4239_v59  ;;  %v4174_v54 = vmul.f32 %v7714_v38, %v3966_v58  ;;  %v5777_v44 = vpop.f32.mrb[166].mxu0 }
 0x432   : > { %v4212_v35 = vadd.f32 %v7719_v39, %v4176_v56  ;;  %v4177_v46 = vmul.f32 %v5777_v44, %v7714_v38  ;;  %v3969_v62 = vpop.f32.mrb[167].mxu0 }
 0x433   : > { %v4210_v0 = vadd.f32 %v7719_v39, %v4174_v54  ;;  %v4175_v57 = vmul.f32 %v7714_v38, %v3969_v62 }
 0x434   : > { %v4244_v8 = vadd.f32 %v4212_v35, %v7696_v61  ;;  %v4213_v9 = vadd.f32 %v7719_v39, %v4177_v46 }
 0x435   : > { %v4242_v14 = vadd.f32 %v4210_v0, %v7703_v23  ;;  %v4211_v11 = vadd.f32 %v7719_v39, %v4175_v57 }
 0x436   : > { %4276 = vst [vmem:[%s7729_s11 + $0xf0] sm:$0xff] %v4244_v8  ;;  %v4245_v52 = vadd.f32 %v4213_v9, %v7706_v42 }
 0x437   : > { %4274 = vst [vmem:[%s7729_s11 + $0xe0] sm:$0xff] %v4242_v14  ;;  %v4243_v20 = vadd.f32 %v4211_v11, %v7709_v43 }
 0x438   : > { %4277 = vst [vmem:[%s7729_s11 + $0xf8] sm:$0xff] %v4245_v52 }
 0x439   : > { %4275 = vst [vmem:[%s7729_s11 + $0xe8] sm:$0xff] %v4243_v20 }
 0x43a PF: > { %s17_s26 = sadd.s32 1, %s6172_s26   ;;  %s7876_s24 = smov %s6168_s25 }
 0x43b   : > { %p14_p5 = scmp.ge.s32.totalorder %s17_s26, 4   ;;  %s7877_s25 = smov %s7879_s27 }
 0x43d   :  { %16 = sbr.rel (!%p14_p5) target bundleno = 2 (0x2), region = 88 }

// kernel: bottleneck_forward.1
= control target key start
LH: loop header
LB: loop body
LE: loop exit
PB: predicated region body
PF: predicated region fallthrough
CT: control target
= control target key end

     0   :  { %s6214_s24 = smov 0   ;;  %s6216_s25 = smov 0   ;;  %s7864_s0 = inlined_call_operand.vmem [shape: f32[2,16,24,128], index: 0, kind: input, shape index: {}]   ;;  %s7865_s1 = inlined_call_operand.vmem [shape: f32[2,1,24,128], index: 1, kind: input, shape index: {}, may-alias: {1,2}]   ;;  %s7866_s2 = inlined_call_operand.vmem [shape: f32[2,1,24,128], index: 2, kind: input, shape index: {}, may-alias: {1,2}]   ;;  %s7867_s3 = inlined_call_operand.vmem [shape: bf16[128,128], index: 3, kind: input, shape index: {}]   ;;  %s7868_s4 = inlined_call_operand.vmem [shape: bf16[3,384,128], index: 4, kind: input, shape index: {}]   ;;  %s7869_s5 = inlined_call_operand.vmem [shape: bf16[128,128], index: 5, kind: input, shape index: {}]   ;;  %s7870_s6 = inlined_call_operand.vmem [shape: f32[8,128], index: 6, kind: input, shape index: {}]   ;;  %s7871_s7 = inlined_call_operand.vmem [shape: f32[2,16,16,128], index: 7, kind: output, shape index: {}]  }
   0x1   :  { %s6218_s26 = smov 0  }
   0x2 LB: > { %s29_s27 = sadd.s32 1, %s6168_s25  ;;  %p4420_p0 = scmp.ge.s32.totalorder %s6172_s26, 1  ;;  %s6172_s26 = sphi %s6218_s26, %s17_s26   ;;  %s6168_s25 = sphi %s6216_s25, %s7877_s25   ;;  %s6164_s24 = sphi %s6214_s24, %s7876_s24  }
   0x3   : > { %p31_p1 = scmp.ge.s32.totalorder %s29_s27, 2  ;;  %p291_p2 = scmp.lt.s32.totalorder %s6172_s26, 3 }
   0x5   : > { %s7879_s27 = smov (%p31_p1, %s29_s27), 0  ;;  %p292_p3 = pnand %p4420_p0, %p291_p2 }
   0x6   : > { %v6235_v0 = vld [vmem:[%s7867_s3] sm:$0xff] (!%p292_p3)   ;;  %p352_p4 = scmp.lt.s32.totalorder (!%p292_p3), %s6164_s24, 1  ;;  %v6240_v1 = vld [vmem:[%s7867_s3 + $0x8] sm:$0xff] (!%p292_p3)   ;;  %v6253_v2 = vld [vmem:[%s7867_s3 + $0x10] sm:$0xff] (!%p292_p3)   ;;  %vm1391_vm0 = vcmask (!%p292_p3), 1040384   ;;  %vm2984_vm6 = vcmask (!%p292_p3), 1046528  }
   0x7   : > { %295 = sbr.rel (%p292_p3) target bundleno = 1082 (0x43a), region = 48  ;;  %5482 = vmatprep.subr.bf16.mxu0 (!%p292_p3), %v6235_v0  ;;  %5502 = vmatprep.subr.bf16.mxu1 (!%p292_p3), %v6235_v0  ;;  %v6267_v3 = vld [vmem:[%s7867_s3 + $0x18] sm:$0xff] (!%p292_p3)   ;;  %v6289_v10 = vld [vmem:[%s7867_s3 + $0x20] sm:$0xff] (!%p292_p3)   ;;  %v6298_v11 = vld [vmem:[%s7867_s3 + $0x28] sm:$0xff] (!%p292_p3)   ;;  %vm1392_vm1 = vsmask.f32 (!%p292_p3), 256 }
   0x8   : > { %5483 = vmatpush3.bf16.msra.mxu0 (!%p292_p3), %v6235_v0  ;;  %5503 = vmatpush3.bf16.msra.mxu1 (!%p292_p3), %v6235_v0  ;;  %v6307_v12 = vld [vmem:[%s7867_s3 + $0x30] sm:$0xff] (!%p292_p3)   ;;  %v6316_v13 = vld [vmem:[%s7867_s3 + $0x38] sm:$0xff] (!%p292_p3)   ;;  %v5972_v20 = vld [vmem:[%s7868_s4 + $0x140] sm:$0xff] (!%p292_p3)   ;;  %vm1448_vm2 = vsmask.f32 (!%p292_p3), 7938 }
   0x9   : > { %5484 = vmatprep.subr.bf16.mxu0 (!%p292_p3), %v6240_v1  ;;  %5504 = vmatprep.subr.bf16.mxu1 (!%p292_p3), %v6240_v1  ;;  %v5973_v26 = vld [vmem:[%s7868_s4 + $0x148] sm:$0xff] (!%p292_p3)   ;;  %vm6507_vm3 = vmand (!%p292_p3), %vm1391_vm0, %vm1392_vm1  ;;  %vm1768_vm5 = vsmask.f32 (!%p292_p3), 7424 }
   0xa   : > { %vm6512_vm4 = vmand (!%p292_p3), %vm1391_vm0, %vm1448_vm2 }
   0xc   : > { %5485 = vmatpush3.bf16.msra.mxu0 (!%p292_p3), %v6240_v1  ;;  %5505 = vmatpush3.bf16.msra.mxu1 (!%p292_p3), %v6240_v1 }
   0xd   : > { %5486 = vmatprep.subr.bf16.mxu0 (!%p292_p3), %v6253_v2  ;;  %5506 = vmatprep.subr.bf16.mxu1 (!%p292_p3), %v6253_v2 }
   0xe   : > { %s7881_s24 = smov (!%p352_p4, %s6164_s24), 1 }
   0xf   : > { %s5938_s11 = smul.u32 384, %s7881_s24 }
  0x10   : > { %s5939_s12 = smul.u32 24, %s7881_s24  ;;  %5487 = vmatpush3.bf16.msra.mxu0 %v6253_v2  ;;  %5507 = vmatpush3.bf16.msra.mxu1 %v6253_v2 }
  0x11   : > { %s6260_s15 = scalar_lea.vmem %s7864_s0, %s5938_s11  ;;  %5488 = vmatprep.subr.bf16.mxu0 %v6267_v3  ;;  %5508 = vmatprep.subr.bf16.mxu1 %v6267_v3 }
  0x12   : > { %s6274_s20 = scalar_lea.vmem %s7865_s1, %s5939_s12  ;;  %v414_v6 = vld [vmem:[%s6260_s15] sm:$0xff]  ;;  %v415_v8 = vld [vmem:[%s6260_s15 + $0x8] sm:$0xff]  ;;  %v416_v15 = vld [vmem:[%s6260_s15 + $0x10] sm:$0xff]  ;;  %s6325_s13 = scalar_lea.vmem %s7866_s2, %s5939_s12 }
  0x13   : > { %v466_v4 = vld [vmem:[%s6274_s20] sm:$0xff]  ;;  %v467_v5 = vld [vmem:[%s6274_s20 + $0x8] sm:$0xff]  ;;  %v607_v9 = vpack.c.bf16 %v415_v8, %v414_v6  ;;  %v468_v14 = vld [vmem:[%s6274_s20 + $0x10] sm:$0xff] }
  0x14   : > { %v469_v7 = vpack.c.bf16 %v467_v5, %v466_v4  ;;  %5489 = vmatpush3.bf16.msra.mxu0 %v6267_v3  ;;  %5509 = vmatpush3.bf16.msra.mxu1 %v6267_v3  ;;  %v417_v16 = vld [vmem:[%s6260_s15 + $0x18] sm:$0xff]  ;;  %v418_v17 = vld [vmem:[%s6260_s15 + $0x20] sm:$0xff]  ;;  %v419_v18 = vld [vmem:[%s6260_s15 + $0x28] sm:$0xff]  ;;  %v470_v22 = vpack.c.bf16 %v468_v14, %v468_v14 }
  0x15   : > { %5518 = vmatprep.mubr.bf16.mxu1 %v607_v9  ;;  %5490 = vmatprep.subr.bf16.mxu0 %v6289_v10  ;;  %v1305_v19 = vld [vmem:[%s6325_s13] sm:$0xff]  ;;  %v1306_v21 = vld [vmem:[%s6325_s13 + $0x8] sm:$0xff]  ;;  %v608_v23 = vpack.c.bf16 %v417_v16, %v416_v15  ;;  %v609_v24 = vpack.c.bf16 %v419_v18, %v418_v17  ;;  %v420_v27 = vld [vmem:[%s6260_s15 + $0x30] sm:$0xff] }
  0x16   : > { %5498 = vmatprep.mubr.bf16.mxu0 %v469_v7  ;;  %5510 = vmatprep.subr.bf16.mxu1 %v6289_v10  ;;  %v1308_v25 = vpack.c.bf16 %v1306_v21, %v1305_v19  ;;  %v421_v28 = vld [vmem:[%s6260_s15 + $0x38] sm:$0xff]  ;;  %v422_v29 = vld [vmem:[%s6260_s15 + $0x40] sm:$0xff]  ;;  %v423_v30 = vld [vmem:[%s6260_s15 + $0x48] sm:$0xff] }
  0x17   : > { %v610_v31 = vpack.c.bf16 %v421_v28, %v420_v27  ;;  %v611_v32 = vpack.c.bf16 %v423_v30, %v422_v29  ;;  %v424_v33 = vld [vmem:[%s6260_s15 + $0x50] sm:$0xff]  ;;  %v425_v34 = vld [vmem:[%s6260_s15 + $0x58] sm:$0xff]  ;;  %v426_v35 = vld [vmem:[%s6260_s15 + $0x60] sm:$0xff] }
  0x18   : > { %5491 = vmatpush3.bf16.msra.mxu0 %v6289_v10  ;;  %5511 = vmatpush3.bf16.msra.mxu1 %v6289_v10  ;;  %v427_v36 = vld [vmem:[%s6260_s15 + $0x68] sm:$0xff]  ;;  %v612_v37 = vpack.c.bf16 %v425_v34, %v424_v33  ;;  %v428_v39 = vld [vmem:[%s6260_s15 + $0x70] sm:$0xff]  ;;  %v429_v40 = vld [vmem:[%s6260_s15 + $0x78] sm:$0xff] }
  0x19   : > { %5492 = vmatprep.subr.bf16.mxu0 %v6298_v11  ;;  %5512 = vmatprep.subr.bf16.mxu1 %v6298_v11  ;;  %v613_v38 = vpack.c.bf16 %v427_v36, %v426_v35  ;;  %v430_v41 = vld [vmem:[%s6260_s15 + $0x80] sm:$0xff]  ;;  %v431_v42 = vld [vmem:[%s6260_s15 + $0x88] sm:$0xff]  ;;  %v614_v43 = vpack.c.bf16 %v429_v40, %v428_v39  ;;  %v432_v45 = vld [vmem:[%s6260_s15 + $0x90] sm:$0xff] }
  0x1a   : > { %v615_v44 = vpack.c.bf16 %v431_v42, %v430_v41  ;;  %v433_v46 = vld [vmem:[%s6260_s15 + $0x98] sm:$0xff]  ;;  %v1307_v47 = vld [vmem:[%s6325_s13 + $0x10] sm:$0xff]  ;;  %v434_v48 = vld [vmem:[%s6260_s15 + $0xa0] sm:$0xff] }
  0x1b   : > { %v435_v49 = vld [vmem:[%s6260_s15 + $0xa8] sm:$0xff]  ;;  %v616_v50 = vpack.c.bf16 %v433_v46, %v432_v45  ;;  %v1309_v51 = vpack.c.bf16 %v1307_v47, %v1307_v47  ;;  %v436_v53 = vld [vmem:[%s6260_s15 + $0xb0] sm:$0xff]  ;;  %v437_v54 = vld [vmem:[%s6260_s15 + $0xb8] sm:$0xff] }
  0x1c   : > { %5493 = vmatpush3.bf16.msra.mxu0 %v6298_v11  ;;  %5513 = vmatpush3.bf16.msra.mxu1 %v6298_v11  ;;  %v617_v52 = vpack.c.bf16 %v435_v49, %v434_v48  ;;  %v438_v55 = vld [vmem:[%s6260_s15 + $0xc0] sm:$0xff]  ;;  %v439_v56 = vld [vmem:[%s6260_s15 + $0xc8] sm:$0xff]  ;;  %v618_v57 = vpack.c.bf16 %v437_v54, %v436_v53  ;;  %v440_v59 = vld [vmem:[%s6260_s15 + $0xd0] sm:$0xff] }
  0x1d   : > { %5494 = vmatprep.subr.bf16.mxu0 %v6307_v12  ;;  %5514 = vmatprep.subr.bf16.mxu1 %v6307_v12  ;;  %v619_v58 = vpack.c.bf16 %v439_v56, %v438_v55  ;;  %v441_v60 = vld [vmem:[%s6260_s15 + $0xd8] sm:$0xff]  ;;  %v442_v61 = vld [vmem:[%s6260_s15 + $0xe0] sm:$0xff]  ;;  %v443_v62 = vld [vmem:[%s6260_s15 + $0xe8] sm:$0xff] }
  0x1e   : > { %v620_v63 = vpack.c.bf16 %v441_v60, %v440_v59  ;;  %v447_v4 = vld [vmem:[%s6260_s15 + $0x108] sm:$0xff]  ;;  %v448_v7 = vld [vmem:[%s6260_s15 + $0x110] sm:$0xff]  ;;  %v449_v8 = vld [vmem:[%s6260_s15 + $0x118] sm:$0xff] }
  0x1f   : > { %v450_v9 = vld [vmem:[%s6260_s15 + $0x120] sm:$0xff]  ;;  %v453_v14 = vld [vmem:[%s6260_s15 + $0x138] sm:$0xff]  ;;  %v455_v16 = vld [vmem:[%s6260_s15 + $0x148] sm:$0xff] }
  0x20   : > { %5495 = vmatpush3.bf16.msra.mxu0 %v6307_v12  ;;  %5515 = vmatpush3.bf16.msra.mxu1 %v6307_v12  ;;  %v454_v15 = vld [vmem:[%s6260_s15 + $0x140] sm:$0xff]  ;;  %v456_v19 = vld [vmem:[%s6260_s15 + $0x150] sm:$0xff]  ;;  %v5977_v30 = vld [vmem:[%s7868_s4 + $0x108] sm:$0xff]  }
  0x21   : > { %5496 = vmatprep.subr.bf16.mxu0 %v6316_v13  ;;  %5516 = vmatprep.subr.bf16.mxu1 %v6316_v13  ;;  %v627_v18 = vpack.c.bf16 %v455_v16, %v454_v15  ;;  %v458_v21 = vld [vmem:[%s6260_s15 + $0x160] sm:$0xff]  ;;  %v5981_v33 = vld [vmem:[%s7868_s4 + $0xd0] sm:$0xff]   ;;  %v5982_v34 = vld [vmem:[%s7868_s4 + $0x118] sm:$0xff]  }
  0x22   : > { %v5975_v28 = vld [vmem:[%s7868_s4 + $0x100] sm:$0xff]   ;;  %v5983_v35 = vld [vmem:[%s7868_s4 + $0xd8] sm:$0xff]   ;;  %v5974_v36 = vld [vmem:[%s7868_s4 + $0x150] sm:$0xff]  }
  0x23   : > { %v5976_v29 = vld [vmem:[%s7868_s4 + $0xc0] sm:$0xff]   ;;  %v5987_v39 = vld [vmem:[%s7868_s4 + $0x128] sm:$0xff]   ;;  %v5979_v41 = vld [vmem:[%s7868_s4 + $0x158] sm:$0xff]  }
  0x24   : > { %5497 = vmatpush3.bf16.msra.mxu0 %v6316_v13  ;;  %5517 = vmatpush3.bf16.msra.mxu1 %v6316_v13  ;;  %v5988_v40 = vld [vmem:[%s7868_s4 + $0xe8] sm:$0xff]   ;;  %v5989_v42 = vld [vmem:[%s7868_s4 + $0x130] sm:$0xff]   ;;  %v5991_v45 = vld [vmem:[%s7868_s4 + $0x138] sm:$0xff]  }
  0x25   : > { %5566 = vmatprep.subr.bf16.mxu0 %v6235_v0  ;;  %5586 = vmatprep.subr.bf16.mxu1 %v5972_v20  ;;  %v5994_v46 = vld [vmem:[%s7868_s4 + $0xf8] sm:$0xff]   ;;  %v5995_v47 = vld [vmem:[%s7868_s4 + $0x168] sm:$0xff]   ;;  %v5998_v48 = vld [vmem:[%s7868_s4 + $0x170] sm:$0xff]  }
  0x26   : > { %v6001_v49 = vld [vmem:[%s7868_s4 + $0x178] sm:$0xff]  }
  0x27   : > { %5499 = vmatmul.mubr.bf16.vlgmr.msra.gmra.mrb[0].mxu0 %v470_v22  ;;  %5519 = vmatmul.mubr.bf16.vlgmr.msra.gmra.mrb[0].mxu1 %v608_v23  ;;  %v459_v22 = vld [vmem:[%s6260_s15 + $0x168] sm:$0xff] }
  0x28   : > { %5522 = vmatprep.mubr.bf16.mxu1 %v609_v24  ;;  %5567 = vmatpush3.bf16.msra.mxu0 %v6235_v0  ;;  %v621_v0 = vpack.c.bf16 %v443_v62, %v442_v61  ;;  %v629_v24 = vpack.c.bf16 %v459_v22, %v458_v21 }
  0x29   : > { %5568 = vmatprep.subr.bf16.mxu0 %v6240_v1  ;;  %5582 = vmatprep.mubr.bf16.mxu0 %v1308_v25  ;;  %v460_v25 = vld [vmem:[%s6260_s15 + $0x170] sm:$0xff] }
  0x2a   : > { %5587 = vmatpush3.bf16.msra.mxu1 %v5972_v20  ;;  %v457_v20 = vld [vmem:[%s6260_s15 + $0x158] sm:$0xff] }
  0x2b   : > { %5588 = vmatprep.subr.bf16.mxu1 %v5973_v26  ;;  %v628_v23 = vpack.c.bf16 %v457_v20, %v456_v19 }
  0x2c   : > { %5569 = vmatpush3.bf16.msra.mxu0 %v6240_v1  ;;  %v444_v1 = vld [vmem:[%s6260_s15 + $0xf0] sm:$0xff] }
  0x2d   : > { %5570 = vmatprep.subr.bf16.mxu0 %v6253_v2 }
  0x2e   : > { %5589 = vmatpush3.bf16.msra.mxu1 %v5973_v26  ;;  %v461_v26 = vld [vmem:[%s6260_s15 + $0x178] sm:$0xff] }
  0x2f   : > { %5523 = vmatmul.mubr.bf16.gmra.mrb[4].mxu1 %v610_v31  ;;  %v630_v27 = vpack.c.bf16 %v461_v26, %v460_v25  ;;  %v5978_v31 = vld [vmem:[%s7868_s4 + $0xc8] sm:$0xff]   ;;  %5590 = vmatprep.subr.bf16.mxu1 %v5974_v36 }
  0x30   : > { %5526 = vmatprep.mubr.bf16.mxu1 %v611_v32  ;;  %5571 = vmatpush3.bf16.msra.mxu0 %v6253_v2  ;;  %v445_v2 = vld [vmem:[%s6260_s15 + $0xf8] sm:$0xff]  ;;  %v5980_v32 = vld [vmem:[%s7868_s4 + $0x110] sm:$0xff]  }
  0x31   : > { %5572 = vmatprep.subr.bf16.mxu0 %v6267_v3  ;;  %v622_v5 = vpack.c.bf16 %v445_v2, %v444_v1 }
  0x32   : > { %5591 = vmatpush3.bf16.msra.mxu1 %v5974_v36 }
  0x33   : > { %5592 = vmatprep.subr.bf16.mxu1 %v5979_v41 }
  0x34   : > { %5573 = vmatpush3.bf16.msra.mxu0 %v6267_v3  ;;  %v446_v3 = vld [vmem:[%s6260_s15 + $0x100] sm:$0xff] }
  0x35   : > { %5574 = vmatprep.subr.bf16.mxu0 %v6289_v10  ;;  %v623_v6 = vpack.c.bf16 %v447_v4, %v446_v3 }
  0x36   : > { %5593 = vmatpush3.bf16.msra.mxu1 %v5979_v41 }
  0x37   : > { %5527 = vmatmul.mubr.bf16.gmra.mrb[8].mxu1 %v612_v37  ;;  %v5984_v37 = vld [vmem:[%s7868_s4 + $0x120] sm:$0xff]  }
  0x38   : > { %5530 = vmatprep.mubr.bf16.mxu1 %v613_v38  ;;  %5575 = vmatpush3.bf16.msra.mxu0 %v6289_v10  ;;  %v451_v10 = vld [vmem:[%s6260_s15 + $0x128] sm:$0xff]  ;;  %v5985_v38 = vld [vmem:[%s7868_s4 + $0xe0] sm:$0xff]  }
  0x39   : > { %5576 = vmatprep.subr.bf16.mxu0 %v6298_v11 }
  0x3c   : > { %5577 = vmatpush3.bf16.msra.mxu0 %v6298_v11  ;;  %v624_v11 = vpack.c.bf16 %v449_v8, %v448_v7 }
  0x3d   : > { %5578 = vmatprep.subr.bf16.mxu0 %v6307_v12 }
  0x3f   : > { %5531 = vmatmul.mubr.bf16.gmra.mrb[12].mxu1 %v614_v43  ;;  %v5990_v43 = vld [vmem:[%s7868_s4 + $0xf0] sm:$0xff]  }
  0x40   : > { %5534 = vmatprep.mubr.bf16.mxu1 %v615_v44  ;;  %5579 = vmatpush3.bf16.msra.mxu0 %v6307_v12  ;;  %v625_v12 = vpack.c.bf16 %v451_v10, %v450_v9  ;;  %v5986_v44 = vld [vmem:[%s7868_s4 + $0x160] sm:$0xff]  }
  0x41   : > { %5580 = vmatprep.subr.bf16.mxu0 %v6316_v13  ;;  %5594 = vmatprep.subr.bf16.mxu1 %v5986_v44 }
  0x42   : > { %5595 = vmatpush3.bf16.msra.mxu1 %v5986_v44 }
  0x43   : > { %5596 = vmatprep.subr.bf16.mxu1 %v5995_v47 }
  0x44   : > { %5581 = vmatpush3.bf16.msra.mxu0 %v6316_v13  ;;  %v452_v13 = vld [vmem:[%s6260_s15 + $0x130] sm:$0xff] }
  0x45   : > { %v626_v17 = vpack.c.bf16 %v453_v14, %v452_v13  ;;  %5050 = vmatprep.subr.bf16.mxu0 %v5975_v28 }
  0x46   : > { %5597 = vmatpush3.bf16.msra.mxu1 %v5995_v47 }
  0x47   : > { %5535 = vmatmul.mubr.bf16.gmra.mrb[16].mxu1 %v616_v50  ;;  %5583 = vmatmul.mubr.bf16.vlgmr.msra.gmra.mrb[4].mxu0 %v1309_v51  ;;  %v6010_v50 = vld [vmem:[%s7868_s4 + $0x40] sm:$0xff]  }
  0x48   : > { %5538 = vmatprep.mubr.bf16.mxu1 %v617_v52  ;;  %5051 = vmatpush3.bf16.msra.mxu0 %v5976_v29  ;;  %v6475_v51 = vld [vmem:[%s7870_s6] ss:$0 sm:$0xff]  ;;  %v6480_v52 = vld [vmem:[%s7870_s6 + $0x1] ss:$0 sm:$0xff] }
  0x49   : > { %5052 = vmatprep.subr.bf16.mxu0 %v5977_v30  ;;  %5598 = vmatprep.subr.bf16.mxu1 %v5998_v48 }
  0x4a   : > { %5599 = vmatpush3.bf16.msra.mxu1 %v5998_v48 }
  0x4b   : > { %5600 = vmatprep.subr.bf16.mxu1 %v6001_v49 }
  0x4c   : > { %5053 = vmatpush3.bf16.msra.mxu0 %v5978_v31 }
  0x4d   : > { %5054 = vmatprep.subr.bf16.mxu0 %v5980_v32 }
  0x4e   : > { %5601 = vmatpush3.bf16.msra.mxu1 %v6001_v49 }
  0x4f   : > { %5539 = vmatmul.mubr.bf16.gmra.mrb[20].mxu1 %v618_v57  ;;  %5186 = vmatprep.subr.bf16.mxu1 %v6010_v50 }
  0x50   : > { %5542 = vmatprep.mubr.bf16.mxu1 %v619_v58  ;;  %5055 = vmatpush3.bf16.msra.mxu0 %v5981_v33 }
  0x51   : > { %5056 = vmatprep.subr.bf16.mxu0 %v5982_v34 }
  0x54   : > { %5057 = vmatpush3.bf16.msra.mxu0 %v5983_v35 }
  0x55   : > { %5058 = vmatprep.subr.bf16.mxu0 %v5984_v37 }
  0x57   : > { %5543 = vmatmul.mubr.bf16.gmra.mrb[24].mxu1 %v620_v63  ;;  %v6048_v63 = vld [vmem:[%s7868_s4 + $0x1c0] sm:$0xff]  }
  0x58   : > { %5546 = vmatprep.mubr.bf16.mxu1 %v621_v0  ;;  %5059 = vmatpush3.bf16.msra.mxu0 %v5985_v38 }
  0x59   : > { %5060 = vmatprep.subr.bf16.mxu0 %v5987_v39 }
  0x5c   : > { %5061 = vmatpush3.bf16.msra.mxu0 %v5988_v40 }
  0x5d   : > { %5062 = vmatprep.subr.bf16.mxu0 %v5989_v42 }
  0x5f   : > { %5547 = vmatmul.mubr.bf16.gmra.mrb[28].mxu1 %v622_v5 }
  0x60   : > { %5550 = vmatprep.mubr.bf16.mxu1 %v623_v6  ;;  %5063 = vmatpush3.bf16.msra.mxu0 %v5990_v43 }
  0x61   : > { %5064 = vmatprep.subr.bf16.mxu0 %v5991_v45 }
  0x64   : > { %5065 = vmatpush3.bf16.msra.mxu0 %v5994_v46 }
  0x65   : > { %5322 = vmatprep.subr.bf16.mxu0 %v6048_v63 }
  0x67   : > { %5551 = vmatmul.mubr.bf16.gmra.mrb[32].mxu1 %v624_v11 }
  0x68   : > { %5554 = vmatprep.mubr.bf16.mxu1 %v625_v12 }
  0x6f   : > { %5555 = vmatmul.mubr.bf16.gmra.mrb[36].mxu1 %v626_v17 }
  0x70   : > { %5558 = vmatprep.mubr.bf16.mxu1 %v627_v18 }
  0x77   : > { %5559 = vmatmul.mubr.bf16.gmra.mrb[40].mxu1 %v628_v23 }
  0x78   : > { %5562 = vmatprep.mubr.bf16.mxu1 %v629_v24 }
  0x7f   : > { %5563 = vmatmul.mubr.bf16.gmra.mrb[44].mxu1 %v630_v27 }
  0xfa   : > { %v5500_v53 = vpop.f32.mrb[0].mxu0  ;;  %v5520_v54 = vpop.f32.mrb[0].mxu1 }
  0xfb   : > { %v573_v55 = vmul.f32 %v5500_v53, %v6475_v51  ;;  %v858_v56 = vmul.f32 %v5520_v54, %v6475_v51  ;;  %v553_v57 = vpop.f32.mrb[1].mxu0  ;;  %v665_v58 = vpop.f32.mrb[1].mxu1 }
  0xfc   : > { %v571_v59 = vmul.f32 %v6475_v51, %v553_v57  ;;  %v856_v60 = vmul.f32 %v6475_v51, %v665_v58  ;;  %v5501_v61 = vpop.f32.mrb[2].mxu0  ;;  %v5521_v62 = vpop.f32.mrb[2].mxu1 }
  0xfd   : > { %v580_v0 = vadd.f32 %v6480_v52, %v573_v55  ;;  %v906_v1 = vadd.f32 %v6480_v52, %v858_v56  ;;  %v556_v2 = vpop.f32.mrb[3].mxu0  ;;  %v668_v3 = vpop.f32.mrb[3].mxu1  ;;  %v859_v9 = vmul.f32 %v5521_v62, %v6475_v51 }
  0xfe   : > { %v578_v4 = vadd.f32 %v6480_v52, %v571_v59  ;;  %v904_v5 = vadd.f32 %v6480_v52, %v856_v60  ;;  %v572_v6 = vmul.f32 %v6475_v51, %v556_v2  ;;  %v857_v7 = vmul.f32 %v6475_v51, %v668_v3 }
  0xff   : > { %v4438_v8 = vclamps-f32 %v580_v0, 1.0  ;;  %v4444_v15 = vclamps-f32 %v906_v1, 1.0  ;;  %v907_v24 = vadd.f32 %v6480_v52, %v859_v9 }
 0x100   : > { %v4436_v10 = vclamps-f32 %v578_v4, 1.0  ;;  %v4442_v11 = vclamps-f32 %v904_v5, 1.0  ;;  %v579_v12 = vadd.f32 %v6480_v52, %v572_v6  ;;  %v905_v13 = vadd.f32 %v6480_v52, %v857_v7 }
 0x101   : > { %v590_v14 = vmul.f32 0.0, %v4438_v8  ;;  %v4445_v35 = vclamps-f32 %v907_v24, 1.0 }
 0x102   : > { %v588_v16 = vmul.f32 0.0, %v4436_v10  ;;  %v4798_v17 = vpack.c.bf16 %v4442_v11, %v4442_v11  ;;  %v4437_v18 = vclamps-f32 %v579_v12, 1.0  ;;  %v4443_v19 = vclamps-f32 %v905_v13, 1.0  ;;  %v5524_v20 = vpop.f32.mrb[4].mxu1 }
 0x103   : > { %v4797_v21 = vpack.c.bf16 %v590_v14, %v590_v14  ;;  %v862_v22 = vmul.f32 %v5524_v20, %v6475_v51  ;;  %v681_v23 = vpop.f32.mrb[5].mxu1 }
 0x104   : > { %1257 = vst [vmem:[#allocation2 + $0xc] sm:$0xf] %v4798_v17  ;;  %v589_v25 = vmul.f32 0.0, %v4437_v18  ;;  %v4857_v26 = vpack.c.bf16 %v4444_v15, %v4443_v19  ;;  %v860_v27 = vmul.f32 %v6475_v51, %v681_v23  ;;  %v5525_v28 = vpop.f32.mrb[6].mxu1 }
 0x105   : > { %606 = vst [vmem:[#allocation2 + $0x8] sm:$0xf] %v4797_v21  ;;  %v684_v29 = vpop.f32.mrb[7].mxu1  ;;  %v910_v31 = vadd.f32 %v6480_v52, %v862_v22  ;;  %v863_v34 = vmul.f32 %v5525_v28, %v6475_v51 }
 0x106   : > { %v4852_v30 = vpack.c.bf16 %v589_v25, %v588_v16  ;;  %4974 = vst [vmem:[#allocation2 + $0x10] sm:$0xff] %v4857_v26   ;;  %v908_v32 = vadd.f32 %v6480_v52, %v860_v27  ;;  %v861_v33 = vmul.f32 %v6475_v51, %v684_v29 }
 0x107   : > { %v4448_v39 = vclamps-f32 %v910_v31, 1.0  ;;  %v911_v45 = vadd.f32 %v6480_v52, %v863_v34 }
 0x108   : > { %4853 = vst [vmem:[#allocation2] sm:$0xff] %v4852_v30   ;;  %v4446_v36 = vclamps-f32 %v908_v32, 1.0  ;;  %v909_v37 = vadd.f32 %v6480_v52, %v861_v33 }
 0x109   : > { %v4449_v63 = vclamps-f32 %v911_v45, 1.0 }
 0x10a   : > { %v4862_v40 = vpack.c.bf16 %v4446_v36, %v4445_v35  ;;  %v4447_v41 = vclamps-f32 %v909_v37, 1.0  ;;  %v5528_v42 = vpop.f32.mrb[8].mxu1 }
 0x10b   : > { %v1397_v44 = vld [vmem:[#allocation2 + $0xc] sm:$0x1]  ;;  %v866_v46 = vmul.f32 %v5528_v42, %v6475_v51  ;;  %v697_v47 = vpop.f32.mrb[9].mxu1 }
 0x10c   : > { %v1450_v48 = vld [vmem:[#allocation2 + $0x8] sm:$0x1]  ;;  %v1398_v49 = vsel %vm6507_vm3, 0, %v1397_v44  ;;  %4975 = vst [vmem:[#allocation2 + $0x18] sm:$0xff] %v4862_v40   ;;  %v4867_v50 = vpack.c.bf16 %v4448_v39, %v4447_v41  ;;  %v864_v53 = vmul.f32 %v6475_v51, %v697_v47  ;;  %v5529_v54 = vpop.f32.mrb[10].mxu1 }
 0x10d   : > { %v1451_v55 = vsel %vm6512_vm4, 0, %v1450_v48  ;;  %1399 = vst [vmem:[#allocation2 + $0xc] sm:$0x1] %v1398_v49  ;;  %v1453_v56 = vld [vmem:[#allocation2 + $0x14] sm:$0x1]  ;;  %v700_v57 = vpop.f32.mrb[11].mxu1  ;;  %v914_v59 = vadd.f32 %v6480_v52, %v866_v46  ;;  %v867_v2 = vmul.f32 %v5529_v54, %v6475_v51 }
 0x10e   : > { %1452 = vst [vmem:[#allocation2 + $0x8] sm:$0x1] %v1451_v55  ;;  %v1454_v58 = vsel %vm6512_vm4, 0, %v1453_v56  ;;  %4976 = vst [vmem:[#allocation2 + $0x20] sm:$0xff] %v4867_v50   ;;  %v912_v60 = vadd.f32 %v6480_v52, %v864_v53  ;;  %v865_v61 = vmul.f32 %v6475_v51, %v700_v57 }
 0x10f   : > { %v1394_v62 = vld [vmem:[#allocation2] sm:$0x1]  ;;  %1455 = vst [vmem:[#allocation2 + $0x14] sm:$0x1] %v1454_v58  ;;  %v4452_v4 = vclamps-f32 %v914_v59, 1.0  ;;  %v915_v12 = vadd.f32 %v6480_v52, %v867_v2 }
 0x110   : > { %v1395_v0 = vsel %vm6507_vm3, 0, %v1394_v62  ;;  %v4450_v1 = vclamps-f32 %v912_v60, 1.0  ;;  %v913_v3 = vadd.f32 %v6480_v52, %v865_v61 }
 0x111   : > { %1396 = vst [vmem:[#allocation2] sm:$0x1] %v1395_v0  ;;  %v4453_v29 = vclamps-f32 %v915_v12, 1.0 }
 0x112   : > { %v4872_v5 = vpack.c.bf16 %v4450_v1, %v4449_v63  ;;  %v4451_v6 = vclamps-f32 %v913_v3, 1.0  ;;  %v5532_v7 = vpop.f32.mrb[12].mxu1 }
 0x113   : > { %v1400_v8 = vld [vmem:[#allocation2 + $0x18] sm:$0x1]  ;;  %v870_v9 = vmul.f32 %v5532_v7, %v6475_v51  ;;  %v713_v10 = vpop.f32.mrb[13].mxu1 }
 0x114   : > { %v1401_v11 = vsel %vm6507_vm3, 0, %v1400_v8  ;;  %4977 = vst [vmem:[#allocation2 + $0x28] sm:$0xff] %v4872_v5   ;;  %v4877_v13 = vpack.c.bf16 %v4452_v4, %v4451_v6  ;;  %v868_v14 = vmul.f32 %v6475_v51, %v713_v10  ;;  %v5533_v15 = vpop.f32.mrb[14].mxu1  ;;  %v5992_v16 = vld [vmem:[#allocation2 + $0xc] sm:$0xff]   ;;  %v6049_v5 = vld [vmem:[%s7868_s4 + $0x180] sm:$0xff]  }
 0x115   : > { %1402 = vst [vmem:[#allocation2 + $0x18] sm:$0x1] %v1401_v11  ;;  %v1403_v17 = vld [vmem:[#allocation2 + $0x24] sm:$0x1]  ;;  %v1456_v18 = vld [vmem:[#allocation2 + $0x20] sm:$0x1]  ;;  %v918_v19 = vadd.f32 %v6480_v52, %v870_v9  ;;  %v871_v20 = vmul.f32 %v5533_v15, %v6475_v51 }
 0x116   : > { %v716_v21 = vpop.f32.mrb[15].mxu1  ;;  %v1404_v22 = vsel %vm6507_vm3, 0, %v1403_v17  ;;  %v1457_v23 = vsel %vm6512_vm4, 0, %v1456_v18  ;;  %4978 = vst [vmem:[#allocation2 + $0x30] sm:$0xff] %v4877_v13   ;;  %v916_v24 = vadd.f32 %v6480_v52, %v868_v14  ;;  %v5993_v26 = vld [vmem:[#allocation2 + $0x14] ss:$0 sps:$4 sm:$0xff]  }
 0x117   : > { %v869_v25 = vmul.f32 %v6475_v51, %v716_v21  ;;  %1405 = vst [vmem:[#allocation2 + $0x24] sm:$0x1] %v1404_v22  ;;  %1458 = vst [vmem:[#allocation2 + $0x20] sm:$0x1] %v1457_v23  ;;  %v6546_v27 = vadd.f32 %v6480_v52, %v871_v20  ;;  %v1784_v28 = vshll.u32 %v5992_v16, 16  ;;  %v1789_v32 = vshll.u32 %v5993_v26, 16 }
 0x118   : > { %v4454_v30 = vclamps-f32 %v916_v24, 1.0  ;;  %v5996_v33 = vld [vmem:[#allocation2] sm:$0xff]   ;;  %v4456_v34 = vclamps-f32 %v918_v19, 1.0  ;;  %v1782_v36 = vshrl.u32 %v5992_v16, 16  ;;  %v5997_v39 = vld [vmem:[#allocation2 + $0x8] ss:$0 sps:$4 sm:$0xff]  }
 0x119   : > { %v917_v31 = vadd.f32 %v6480_v52, %v869_v25  ;;  %v4457_v35 = vclamps-f32 %v6546_v27, 1.0  ;;  %v1786_v37 = vrot.slane %v1784_v28, 1  ;;  %v1791_v44 = vrot.slane %v1789_v32, 1  ;;  %v6051_v21 = vld [vmem:[%s7868_s4 + $0x1c8] sm:$0xff]  }
 0x11a   : > { %v4882_v40 = vpack.c.bf16 %v4454_v30, %v4453_v29  ;;  %v5536_v42 = vpop.f32.mrb[16].mxu1  ;;  %v1770_v45 = vshrl.u32 %v5996_v33, 16  ;;  %v5584_v46 = vpop.f32.mrb[4].mxu0  ;;  %v1772_v53 = vshll.u32 %v5996_v33, 16  ;;  %v1777_v54 = vshll.u32 %v5997_v39, 16 }
 0x11b   : > { %v4455_v41 = vclamps-f32 %v917_v31, 1.0  ;;  %v1459_v47 = vld [vmem:[#allocation2 + $0x2c] sm:$0x1]  ;;  %v874_v48 = vmul.f32 %v5536_v42, %v6475_v51  ;;  %v729_v49 = vpop.f32.mrb[17].mxu1  ;;  %v1787_v50 = vor.u32 %v1786_v37, %v1782_v36  ;;  %v1344_v55 = vpop.f32.mrb[5].mxu0  ;;  %v1360_v61 = vmul.f32 %v5584_v46, %v6475_v51 }
 0x11c   : > { %v1460_v56 = vsel %vm6512_vm4, 0, %v1459_v47  ;;  %4979 = vst [vmem:[#allocation2 + $0x38] sm:$0xff] %v4882_v40   ;;  %v872_v58 = vmul.f32 %v6475_v51, %v729_v49  ;;  %v5537_v59 = vpop.f32.mrb[18].mxu1  ;;  %v6554_v60 = vld [vmem:[#allocation2 + $0x18] sm:$0xff]   ;;  %v5585_v62 = vpop.f32.mrb[6].mxu0  ;;  %v1774_v4 = vrot.slane %v1772_v53, 1  ;;  %v1358_v40 = vmul.f32 %v6475_v51, %v1344_v55 }
 0x11d   : > { %v4887_v57 = vpack.c.bf16 %v4456_v34, %v4455_v41  ;;  %1461 = vst [vmem:[#allocation2 + $0x2c] sm:$0x1] %v1460_v56  ;;  %v1406_v63 = vld [vmem:[#allocation2 + $0x30] sm:$0x1]  ;;  %v922_v0 = vadd.f32 %v6480_v52, %v874_v48  ;;  %v875_v1 = vmul.f32 %v5537_v59, %v6475_v51  ;;  %v732_v2 = vpop.f32.mrb[19].mxu1  ;;  %v6560_v3 = vsel %vm1768_vm5, %v1787_v50, %v1791_v44  ;;  %v6574_v16 = vpop.f32.mrb[7].mxu0 }
 0x11e   : > { %v1407_v6 = vsel %vm6507_vm3, 0, %v1406_v63  ;;  %v920_v7 = vadd.f32 %v6480_v52, %v872_v58  ;;  %v873_v8 = vmul.f32 %v6475_v51, %v732_v2  ;;  %2228 = vmatprep.mubr.bf16.mxu0 %v6560_v3  ;;  %v1779_v9 = vrot.slane %v1777_v54, 1  ;;  %v6000_v10 = vld [vmem:[#allocation2 + $0x20] ss:$0 sps:$4 sm:$0xff]   ;;  %v6002_v15 = vld [vmem:[#allocation2 + $0x24] sm:$0xff]   ;;  %v6053_v55 = vld [vmem:[%s7868_s4 + $0x1d0] sm:$0xff]  }
 0x11f   : > { %4980 = vst [vmem:[#allocation2 + $0x40] sm:$0xff] %v4887_v57   ;;  %1408 = vst [vmem:[#allocation2 + $0x30] sm:$0x1] %v1407_v6  ;;  %v4460_v11 = vclamps-f32 %v922_v0, 1.0  ;;  %v6571_v12 = vadd.f32 %v6480_v52, %v875_v1  ;;  %v1775_v13 = vor.u32 %v1774_v4, %v1770_v45  ;;  %v1794_v14 = vshrl.u32 %v6554_v60, 16  ;;  %v6052_v31 = vld [vmem:[%s7868_s4 + $0x188] sm:$0xff]  }
 0x120   : > { %v4458_v17 = vclamps-f32 %v920_v7, 1.0  ;;  %v921_v18 = vadd.f32 %v6480_v52, %v873_v8  ;;  %v1796_v19 = vshll.u32 %v6554_v60, 16  ;;  %v1801_v20 = vshll.u32 %v6000_v10, 16  ;;  %v6054_v1 = vld [vmem:[%s7868_s4 + $0x190] sm:$0xff]  }
 0x121   : > { %v4461_v22 = vclamps-f32 %v6571_v12, 1.0  ;;  %v1780_v23 = vsel %vm1768_vm5, %v1775_v13, %v1779_v9  ;;  %v1806_v24 = vshrl.u32 %v6002_v15, 16  ;;  %v1808_v25 = vshll.u32 %v6002_v15, 16  ;;  %v6013_v9 = vld [vmem:[%s7868_s4] sm:$0xff]   ;;  %v6055_v12 = vld [vmem:[%s7868_s4 + $0x1d8] sm:$0xff]  }
 0x122   : > { %v4892_v26 = vpack.c.bf16 %v4458_v17, %v4457_v35  ;;  %v4459_v27 = vclamps-f32 %v921_v18, 1.0  ;;  %v5540_v28 = vpop.f32.mrb[20].mxu1  ;;  %2229 = vmatmul.mubr.bf16.vlgmr.msra.gmra.mrb[8].mxu0 %v1780_v23  ;;  %v1798_v29 = vrot.slane %v1796_v19, 1  ;;  %v1803_v30 = vrot.slane %v1801_v20, 1  ;;  %v6014_v18 = vld [vmem:[%s7868_s4 + $0x48] sm:$0xff]   ;;  %v6056_v20 = vld [vmem:[%s7868_s4 + $0x198] sm:$0xff]  }
 0x123   : > { %v1409_v32 = vld [vmem:[#allocation2 + $0x3c] sm:$0x1]  ;;  %v1462_v33 = vld [vmem:[#allocation2 + $0x38] sm:$0x1]  ;;  %v878_v34 = vmul.f32 %v5540_v28, %v6475_v51  ;;  %v745_v36 = vpop.f32.mrb[21].mxu1  ;;  %v1810_v37 = vrot.slane %v1808_v25, 1  ;;  %v1363_v39 = vadd.f32 %v6480_v52, %v1360_v61  ;;  %5323 = vmatpush3.bf16.msra.mxu0 %v6049_v5  ;;  %v6606_v60 = vadd.f32 %v6480_v52, %v1358_v40 }
 0x124   : > { %v1410_v35 = vsel %vm6507_vm3, 0, %v1409_v32  ;;  %v1463_v41 = vsel %vm6512_vm4, 0, %v1462_v33  ;;  %4981 = vst [vmem:[#allocation2 + $0x48] sm:$0xff] %v4892_v26   ;;  %v4897_v42 = vpack.c.bf16 %v4460_v11, %v4459_v27  ;;  %v876_v44 = vmul.f32 %v6475_v51, %v745_v36  ;;  %v5541_v45 = vpop.f32.mrb[22].mxu1  ;;  %5324 = vmatprep.subr.bf16.mxu0 %v6051_v21  ;;  %v6003_v53 = vld [vmem:[#allocation2 + $0x2c] ss:$0 sps:$4 sm:$0xff]  }
 0x125   : > { %1411 = vst [vmem:[#allocation2 + $0x3c] sm:$0x1] %v1410_v35  ;;  %1464 = vst [vmem:[#allocation2 + $0x38] sm:$0x1] %v1463_v41  ;;  %v926_v47 = vadd.f32 %v6480_v52, %v878_v34  ;;  %v879_v48 = vmul.f32 %v5541_v45, %v6475_v51  ;;  %v748_v49 = vpop.f32.mrb[23].mxu1  ;;  %v1799_v50 = vor.u32 %v1798_v29, %v1794_v14  ;;  %v1813_v0 = vshll.u32 %v6003_v53, 16 }
 0x126   : > { %v1465_v46 = vld [vmem:[#allocation2 + $0x44] sm:$0x1]  ;;  %v1811_v54 = vor.u32 %v1810_v37, %v1806_v24  ;;  %4982 = vst [vmem:[#allocation2 + $0x50] sm:$0xff] %v4897_v42   ;;  %v924_v57 = vadd.f32 %v6480_v52, %v876_v44  ;;  %v877_v58 = vmul.f32 %v6475_v51, %v748_v49  ;;  %v6603_v59 = vld [vmem:[#allocation2 + $0x30] sm:$0xff]   ;;  %v4540_v10 = vclamps-f32 %v1363_v39, 1.0 }
 0x127   : > { %v1466_v56 = vsel %vm6512_vm4, 0, %v1465_v46  ;;  %v4464_v61 = vclamps-f32 %v926_v47, 1.0  ;;  %v6609_v62 = vadd.f32 %v6480_v52, %v879_v48  ;;  %v6612_v63 = vsel %vm1768_vm5, %v1799_v50, %v1803_v30  ;;  %5325 = vmatpush3.bf16.msra.mxu0 %v6052_v31  ;;  %v6057_v21 = vld [vmem:[%s7868_s4 + $0x1e0] sm:$0xff]   ;;  %v6020_v31 = vld [vmem:[%s7868_s4 + $0x50] sm:$0xff]  }
 0x128   : > { %1467 = vst [vmem:[#allocation2 + $0x44] sm:$0x1] %v1466_v56  ;;  %v4462_v2 = vclamps-f32 %v924_v57, 1.0  ;;  %v925_v4 = vadd.f32 %v6480_v52, %v877_v58  ;;  %2236 = vmatprep.mubr.bf16.mxu0 %v6612_v63  ;;  %5602 = vmatprep.mubr.bf16.mxu1 %v6612_v63  ;;  %v1818_v5 = vshrl.u32 %v6603_v59, 16  ;;  %v1820_v6 = vshll.u32 %v6603_v59, 16  ;;  %v6059_v49 = vld [vmem:[%s7868_s4 + $0x1a0] sm:$0xff]  }
 0x129   : > { %v4465_v7 = vclamps-f32 %v6609_v62, 1.0  ;;  %v1815_v8 = vrot.slane %v1813_v0, 1  ;;  %v4538_v11 = vclamps-f32 %v6606_v60, 1.0  ;;  %5326 = vmatprep.subr.bf16.mxu0 %v6053_v55  ;;  %v1359_v19 = vmul.f32 %v6475_v51, %v6574_v16  ;;  %v6017_v16 = vld [vmem:[%s7868_s4 + $0x8] sm:$0xff]  }
 0x12a   : > { %v4902_v13 = vpack.c.bf16 %v4462_v2, %v4461_v22  ;;  %v4463_v14 = vclamps-f32 %v925_v4, 1.0  ;;  %v5544_v15 = vpop.f32.mrb[24].mxu1  ;;  %2237 = vmatmul.mubr.bf16.gmra.mrb[12].mxu0 %v6560_v3  ;;  %v1822_v17 = vrot.slane %v1820_v6, 1  ;;  %v6646_v25 = vmul.f32 0.0, %v4540_v10  ;;  %v6060_v0 = vld [vmem:[%s7868_s4 + $0x1e8] sm:$0xff]  }
 0x12b   : > { %v1412_v22 = vld [vmem:[#allocation2 + $0x48] sm:$0x1]  ;;  %v882_v23 = vmul.f32 %v5544_v15, %v6475_v51  ;;  %v761_v3 = vpop.f32.mrb[25].mxu1  ;;  %v6644_v24 = vsel %vm1768_vm5, %v1811_v54, %v1815_v8  ;;  %5327 = vmatpush3.bf16.msra.mxu0 %v6054_v1  ;;  %v1362_v39 = vadd.f32 %v6480_v52, %v1359_v19  ;;  %v1371_v55 = vmul.f32 0.0, %v4538_v11  ;;  %v6024_v8 = vld [vmem:[%s7868_s4 + $0x58] sm:$0xff]  }
 0x12c   : > { %v1413_v26 = vsel %vm6507_vm3, 0, %v1412_v22  ;;  %4983 = vst [vmem:[#allocation2 + $0x58] sm:$0xff] %v4902_v13   ;;  %v4907_v27 = vpack.c.bf16 %v4464_v61, %v4463_v14  ;;  %v880_v28 = vmul.f32 %v6475_v51, %v761_v3  ;;  %v5545_v29 = vpop.f32.mrb[26].mxu1  ;;  %2244 = vmatprep.mubr.bf16.mxu0 %v6644_v24  ;;  %5603 = vmatmul.mubr.bf16.vlgmr.msra.gmra.mrb[48].mxu1 %v6644_v24  ;;  %v6656_v30 = vld [vmem:[#allocation2 + $0x38] ss:$0 sps:$4 sm:$0xff]   ;;  %v6662_v37 = vld [vmem:[#allocation2 + $0x3c] sm:$0xff]  }
 0x12d   : > { %1414 = vst [vmem:[#allocation2 + $0x48] sm:$0x1] %v1413_v26  ;;  %v1415_v32 = vld [vmem:[#allocation2 + $0x54] sm:$0x1]  ;;  %v1468_v33 = vld [vmem:[#allocation2 + $0x50] sm:$0x1]  ;;  %v930_v34 = vadd.f32 %v6480_v52, %v882_v23  ;;  %5187 = vmatpush3.bf16.msra.mxu1 %v6013_v9  ;;  %5328 = vmatprep.subr.bf16.mxu0 %v6055_v12  ;;  %v883_v45 = vmul.f32 %v5545_v29, %v6475_v51 }
 0x12e   : > { %v764_v36 = vpop.f32.mrb[27].mxu1  ;;  %v1416_v40 = vsel %vm6507_vm3, 0, %v1415_v32  ;;  %v1469_v35 = vsel %vm6512_vm4, 0, %v1468_v33  ;;  %4984 = vst [vmem:[#allocation2 + $0x60] sm:$0xff] %v4907_v27   ;;  %v928_v41 = vadd.f32 %v6480_v52, %v880_v28  ;;  %5188 = vmatprep.subr.bf16.mxu1 %v6014_v18  ;;  %v1823_v46 = vor.u32 %v1822_v17, %v1818_v5  ;;  %v6021_v61 = vld [vmem:[%s7868_s4 + $0x10] sm:$0xff]   ;;  %v6061_v9 = vld [vmem:[%s7868_s4 + $0x1a8] sm:$0xff]  }
 0x12f   : > { %v881_v42 = vmul.f32 %v6475_v51, %v764_v36  ;;  %1417 = vst [vmem:[#allocation2 + $0x54] sm:$0x1] %v1416_v40  ;;  %1470 = vst [vmem:[#allocation2 + $0x50] sm:$0x1] %v1469_v35  ;;  %v4468_v44 = vclamps-f32 %v930_v34, 1.0  ;;  %v1825_v47 = vshll.u32 %v6656_v30, 16  ;;  %5329 = vmatpush3.bf16.msra.mxu0 %v6056_v20  ;;  %v4846_v6 = vpack.c.bf16 %v1371_v55, %v1371_v55 }
 0x130   : > { %v6673_v48 = vld [vmem:[#allocation2 + $0x44] ss:$0 sps:$4 sm:$0xff]   ;;  %v4466_v50 = vclamps-f32 %v928_v41, 1.0  ;;  %v1832_v54 = vshll.u32 %v6662_v37, 16  ;;  %5330 = vmatprep.subr.bf16.mxu0 %v6057_v21  ;;  %v1830_v57 = vshrl.u32 %v6662_v37, 16  ;;  %v4539_v60 = vclamps-f32 %v1362_v39, 1.0 }
 0x131   : > { %v929_v53 = vadd.f32 %v6480_v52, %v881_v42  ;;  %v1827_v56 = vrot.slane %v1825_v47, 1  ;;  %v1837_v58 = vshll.u32 %v6673_v48, 16  ;;  %5189 = vmatpush3.bf16.msra.mxu1 %v6017_v16  ;;  %v931_v11 = vadd.f32 %v6480_v52, %v883_v45  ;;  %v6027_v13 = vld [vmem:[%s7868_s4 + $0x18] sm:$0xff]   ;;  %1388 = vst [vmem:[#allocation2 + $0xcc] sm:$0xf] %v4846_v6  ;;  %v6028_v21 = vld [vmem:[%s7868_s4 + $0x60] sm:$0xff]  }
 0x132   : > { %v4912_v1 = vpack.c.bf16 %v4466_v50, %v4465_v7  ;;  %v5548_v4 = vpop.f32.mrb[28].mxu1  ;;  %2245 = vmatmul.mubr.bf16.gmra.mrb[16].mxu0 %v6612_v63  ;;  %v1834_v5 = vrot.slane %v1832_v54, 1  ;;  %5190 = vmatprep.subr.bf16.mxu1 %v6020_v31  ;;  %v6062_v22 = vld [vmem:[%s7868_s4 + $0x1f0] sm:$0xff]   ;;  %v1372_v26 = vmul.f32 0.0, %v4539_v60  ;;  %v6031_v50 = vld [vmem:[%s7868_s4 + $0x20] sm:$0xff]  }
 0x133   : > { %v4467_v2 = vclamps-f32 %v929_v53, 1.0  ;;  %v1471_v10 = vld [vmem:[#allocation2 + $0x5c] sm:$0x1]  ;;  %v886_v62 = vmul.f32 %v5548_v4, %v6475_v51  ;;  %v777_v7 = vpop.f32.mrb[29].mxu1  ;;  %v6700_v12 = vsel %vm1768_vm5, %v1823_v46, %v1827_v56  ;;  %v1839_v63 = vrot.slane %v1837_v58, 1  ;;  %5331 = vmatpush3.bf16.msra.mxu0 %v6059_v49  ;;  %v6063_v39 = vld [vmem:[%s7868_s4 + $0x1b0] sm:$0xff]  }
 0x134   : > { %v1472_v14 = vsel %vm6512_vm4, 0, %v1471_v10  ;;  %4985 = vst [vmem:[#allocation2 + $0x68] sm:$0xff] %v4912_v1   ;;  %v884_v17 = vmul.f32 %v6475_v51, %v777_v7  ;;  %v5549_v18 = vpop.f32.mrb[30].mxu1  ;;  %2252 = vmatprep.mubr.bf16.mxu0 %v6700_v12  ;;  %5606 = vmatprep.mubr.bf16.mxu1 %v6700_v12  ;;  %v1835_v19 = vor.u32 %v1834_v5, %v1830_v57  ;;  %v6710_v20 = vld [vmem:[#allocation2 + $0x48] sm:$0xff]   ;;  %v4469_v40 = vclamps-f32 %v931_v11, 1.0  ;;  %v6065_v4 = vld [vmem:[%s7868_s4 + $0x1b8] sm:$0xff]  }
 0x135   : > { %v4917_v15 = vpack.c.bf16 %v4468_v44, %v4467_v2  ;;  %1473 = vst [vmem:[#allocation2 + $0x5c] sm:$0x1] %v1472_v14  ;;  %v1418_v23 = vld [vmem:[#allocation2 + $0x60] sm:$0x1]  ;;  %v934_v3 = vadd.f32 %v6480_v52, %v886_v62  ;;  %v780_v16 = vpop.f32.mrb[31].mxu1  ;;  %5191 = vmatpush3.bf16.msra.mxu1 %v6021_v61  ;;  %5332 = vmatprep.subr.bf16.mxu0 %v6060_v0  ;;  %v1844_v36 = vshll.u32 %v6710_v20, 16 }
 0x136   : > { %v1419_v27 = vsel %vm6507_vm3, 0, %v1418_v23  ;;  %v932_v28 = vadd.f32 %v6480_v52, %v884_v17  ;;  %v885_v29 = vmul.f32 %v6475_v51, %v780_v16  ;;  %v6724_v31 = vsel %vm1768_vm5, %v1835_v19, %v1839_v63  ;;  %v6726_v32 = vld [vmem:[#allocation2 + $0x50] ss:$0 sps:$4 sm:$0xff]   ;;  %v6728_v33 = vld [vmem:[#allocation2 + $0x54] sm:$0xff]   ;;  %5192 = vmatprep.subr.bf16.mxu1 %v6024_v8  ;;  %v6034_v58 = vld [vmem:[%s7868_s4 + $0x68] sm:$0xff]  }
 0x137   : > { %4986 = vst [vmem:[#allocation2 + $0x70] sm:$0xff] %v4917_v15   ;;  %1420 = vst [vmem:[#allocation2 + $0x60] sm:$0x1] %v1419_v27  ;;  %v887_v34 = vmul.f32 %v5549_v18, %v6475_v51  ;;  %5607 = vmatmul.mubr.bf16.gmra.mrb[52].mxu1 %v6724_v31  ;;  %5333 = vmatpush3.bf16.msra.mxu0 %v6061_v9  ;;  %v1849_v42 = vshll.u32 %v6726_v32, 16  ;;  %v6064_v44 = vld [vmem:[%s7868_s4 + $0x1f8] sm:$0xff]   ;;  %v1842_v45 = vshrl.u32 %v6710_v20, 16 }
 0x138   : > { %v4470_v35 = vclamps-f32 %v932_v28, 1.0  ;;  %v933_v41 = vadd.f32 %v6480_v52, %v885_v29  ;;  %5334 = vmatprep.subr.bf16.mxu0 %v6062_v22  ;;  %v1846_v46 = vrot.slane %v1844_v36, 1  ;;  %v1856_v47 = vshll.u32 %v6728_v33, 16  ;;  %v6038_v11 = vld [vmem:[%s7868_s4 + $0x70] sm:$0xff]  }
 0x139   : > { %v4972_v49 = vpack.c.bf16 %v6646_v25, %v1372_v26  ;;  %5193 = vmatpush3.bf16.msra.mxu1 %v6027_v13  ;;  %v4472_v53 = vclamps-f32 %v934_v3, 1.0  ;;  %v1851_v57 = vrot.slane %v1849_v42, 1  ;;  %v935_v25 = vadd.f32 %v6480_v52, %v887_v34 }
 0x13a   : > { %v4922_v54 = vpack.c.bf16 %v4470_v35, %v4469_v40  ;;  %v4471_v55 = vclamps-f32 %v933_v41, 1.0  ;;  %v5552_v56 = vpop.f32.mrb[32].mxu1  ;;  %2253 = vmatmul.mubr.bf16.gmra.mrb[20].mxu0 %v6644_v24  ;;  %5194 = vmatprep.subr.bf16.mxu1 %v6028_v21  ;;  %v1847_v2 = vor.u32 %v1846_v46, %v1842_v45  ;;  %v6035_v24 = vld [vmem:[%s7868_s4 + $0x28] sm:$0xff]   ;;  %v1858_v14 = vrot.slane %v1856_v47, 1  ;;  %v6041_v40 = vld [vmem:[%s7868_s4 + $0x30] sm:$0xff]   ;;  %v6044_v35 = vld [vmem:[%s7868_s4 + $0x78] sm:$0xff]  }
 0x13b   : > { %v1421_v60 = vld [vmem:[#allocation2 + $0x6c] sm:$0x1]  ;;  %v1474_v61 = vld [vmem:[#allocation2 + $0x68] sm:$0x1]  ;;  %v890_v0 = vmul.f32 %v5552_v56, %v6475_v51  ;;  %v793_v1 = vpop.f32.mrb[33].mxu1  ;;  %2260 = vmatprep.mubr.bf16.mxu0 %v6724_v31  ;;  %4997 = vst [vmem:[#allocation2 + $0xd0] sm:$0xff] %v4972_v49   ;;  %5335 = vmatpush3.bf16.msra.mxu0 %v6063_v39 }
 0x13c   : > { %v1422_v5 = vsel %vm6507_vm3, 0, %v1421_v60  ;;  %v1475_v6 = vsel %vm6512_vm4, 0, %v1474_v61  ;;  %4987 = vst [vmem:[#allocation2 + $0x78] sm:$0xff] %v4922_v54   ;;  %v4927_v8 = vpack.c.bf16 %v4472_v53, %v4471_v55  ;;  %v888_v9 = vmul.f32 %v6475_v51, %v793_v1  ;;  %v5553_v10 = vpop.f32.mrb[34].mxu1  ;;  %5336 = vmatprep.subr.bf16.mxu0 %v6064_v44  ;;  %v6771_v13 = vld [vmem:[#allocation2 + $0x5c] ss:$0 sps:$4 sm:$0xff]  }
 0x13d   : > { %1423 = vst [vmem:[#allocation2 + $0x6c] sm:$0x1] %v1422_v5  ;;  %1476 = vst [vmem:[#allocation2 + $0x68] sm:$0x1] %v1475_v6  ;;  %v796_v7 = vpop.f32.mrb[35].mxu1  ;;  %v6769_v63 = vsel %vm1768_vm5, %v1847_v2, %v1851_v57  ;;  %5195 = vmatpush3.bf16.msra.mxu1 %v6031_v50  ;;  %v938_v17 = vadd.f32 %v6480_v52, %v890_v0  ;;  %v891_v23 = vmul.f32 %v5553_v10, %v6475_v51  ;;  %v6815_v0 = vld [vmem:[%s7868_s4 + $0x80] sm:$0xff]  }
 0x13e   : > { %v1477_v62 = vld [vmem:[#allocation2 + $0x74] sm:$0x1]  ;;  %4988 = vst [vmem:[#allocation2 + $0x80] sm:$0xff] %v4927_v8   ;;  %v936_v18 = vadd.f32 %v6480_v52, %v888_v9  ;;  %v889_v19 = vmul.f32 %v6475_v51, %v796_v7  ;;  %5610 = vmatprep.mubr.bf16.mxu1 %v6769_v63  ;;  %v1445_v21 = vld [vmem:[#allocation2 + $0xcc] sm:$0x1]  ;;  %v6779_v22 = vld [vmem:[#allocation2 + $0x60] sm:$0xff]   ;;  %5196 = vmatprep.subr.bf16.mxu1 %v6034_v58 }
 0x13f   : > { %v1478_v15 = vsel %vm6512_vm4, 0, %v1477_v62  ;;  %v1854_v3 = vshrl.u32 %v6728_v33, 16  ;;  %v1861_v16 = vshll.u32 %v6771_v13, 16  ;;  %v1446_v26 = vsel %vm6507_vm3, 0, %v1445_v21  ;;  %5337 = vmatpush3.bf16.msra.mxu0 %v6065_v4 }
 0x140   : > { %1479 = vst [vmem:[#allocation2 + $0x74] sm:$0x1] %v1478_v15  ;;  %v4473_v27 = vclamps-f32 %v935_v25, 1.0  ;;  %v4474_v28 = vclamps-f32 %v936_v18, 1.0  ;;  %v937_v29 = vadd.f32 %v6480_v52, %v889_v19  ;;  %1447 = vst [vmem:[#allocation2 + $0xcc] sm:$0x1] %v1446_v26  ;;  %v939_v50 = vadd.f32 %v6480_v52, %v891_v23 }
 0x141   : > { %v1868_v34 = vshll.u32 %v6779_v22, 16  ;;  %v1859_v36 = vor.u32 %v1858_v14, %v1854_v3  ;;  %v1863_v39 = vrot.slane %v1861_v16, 1  ;;  %5197 = vmatpush3.bf16.msra.mxu1 %v6035_v24  ;;  %v4476_v41 = vclamps-f32 %v938_v17, 1.0 }
 0x142   : > { %v4932_v42 = vpack.c.bf16 %v4474_v28, %v4473_v27  ;;  %v4475_v44 = vclamps-f32 %v937_v29, 1.0  ;;  %v5556_v45 = vpop.f32.mrb[36].mxu1  ;;  %2261 = vmatmul.mubr.bf16.gmra.mrb[24].mxu0 %v6700_v12  ;;  %v1501_v47 = vld [vmem:[#allocation2 + $0xd4] sm:$0x1]  ;;  %5198 = vmatprep.subr.bf16.mxu1 %v6038_v11  ;;  %v6047_v12 = vld [vmem:[%s7868_s4 + $0x38] sm:$0xff]   ;;  %v4477_v11 = vclamps-f32 %v939_v50, 1.0 }
 0x143   : > { %v1870_v46 = vrot.slane %v1868_v34, 1  ;;  %v1424_v49 = vld [vmem:[#allocation2 + $0x78] sm:$0x1]  ;;  %v894_v53 = vmul.f32 %v5556_v45, %v6475_v51  ;;  %v809_v54 = vpop.f32.mrb[37].mxu1  ;;  %2268 = vmatprep.mubr.bf16.mxu0 %v6769_v63  ;;  %v6799_v55 = vsel %vm1768_vm5, %v1859_v36, %v1863_v39  ;;  %v1502_v56 = vsel %vm6512_vm4, 0, %v1501_v47 }
 0x144   : > { %v1425_v57 = vsel %vm6507_vm3, 0, %v1424_v49  ;;  %4989 = vst [vmem:[#allocation2 + $0x88] sm:$0xff] %v4932_v42   ;;  %v4937_v58 = vpack.c.bf16 %v4476_v41, %v4475_v44  ;;  %v892_v60 = vmul.f32 %v6475_v51, %v809_v54  ;;  %v5557_v61 = vpop.f32.mrb[38].mxu1  ;;  %5611 = vmatmul.mubr.bf16.gmra.mrb[56].mxu1 %v6799_v55  ;;  %v6810_v25 = vld [vmem:[#allocation2 + $0x68] ss:$0 sps:$4 sm:$0xff]   ;;  %v6818_v5 = vld [vmem:[#allocation2 + $0x6c] sm:$0xff]  }
 0x145   : > { %1503 = vst [vmem:[#allocation2 + $0xd4] sm:$0x1] %v1502_v56  ;;  %1426 = vst [vmem:[#allocation2 + $0x78] sm:$0x1] %v1425_v57  ;;  %v1427_v1 = vld [vmem:[#allocation2 + $0x84] sm:$0x1]  ;;  %v942_v24 = vadd.f32 %v6480_v52, %v894_v53  ;;  %5199 = vmatpush3.bf16.msra.mxu1 %v6041_v40  ;;  %v895_v62 = vmul.f32 %v5557_v61, %v6475_v51 }
 0x146   : > { %v1480_v2 = vld [vmem:[#allocation2 + $0x80] sm:$0x1]  ;;  %v812_v4 = vpop.f32.mrb[39].mxu1  ;;  %v1428_v6 = vsel %vm6507_vm3, 0, %v1427_v1  ;;  %4990 = vst [vmem:[#allocation2 + $0x90] sm:$0xff] %v4937_v58   ;;  %v940_v9 = vadd.f32 %v6480_v52, %v892_v60  ;;  %5200 = vmatprep.subr.bf16.mxu1 %v6044_v35  ;;  %v1866_v7 = vshrl.u32 %v6779_v22, 16 }
 0x147   : > { %v1481_v8 = vsel %vm6512_vm4, 0, %v1480_v2  ;;  %v893_v10 = vmul.f32 %v6475_v51, %v812_v4  ;;  %1429 = vst [vmem:[#allocation2 + $0x84] sm:$0x1] %v1428_v6  ;;  %v1873_v14 = vshll.u32 %v6810_v25, 16  ;;  %v6829_v15 = vld [vmem:[#allocation2 + $0x74] ss:$0 sps:$4 sm:$0xff]  }
 0x148   : > { %1482 = vst [vmem:[#allocation2 + $0x80] sm:$0x1] %v1481_v8  ;;  %v4478_v17 = vclamps-f32 %v940_v9, 1.0  ;;  %v1880_v19 = vshll.u32 %v6818_v5, 16  ;;  %v4480_v21 = vclamps-f32 %v942_v24, 1.0  ;;  %v1871_v23 = vor.u32 %v1870_v46, %v1866_v7 }
 0x149   : > { %v941_v18 = vadd.f32 %v6480_v52, %v893_v10  ;;  %v1875_v3 = vrot.slane %v1873_v14, 1  ;;  %v1885_v16 = vshll.u32 %v6829_v15, 16  ;;  %5201 = vmatpush3.bf16.msra.mxu1 %v6047_v12  ;;  %v1878_v28 = vshrl.u32 %v6818_v5, 16  ;;  %v6840_v52 = vld [vmem:[%s7870_s6 + $0x1] ss:$0 sm:$0xff] }
 0x14a   : > { %v4942_v26 = vpack.c.bf16 %v4478_v17, %v4477_v11  ;;  %v5560_v51 = vpop.f32.mrb[40].mxu1  ;;  %2269 = vmatmul.mubr.bf16.gmra.mrb[28].mxu0 %v6724_v31  ;;  %v1882_v29 = vrot.slane %v1880_v19, 1  ;;  %5634 = vmatprep.subr.bf16.mxu1 %v6815_v0  ;;  %v943_v36 = vadd.f32 %v6840_v52, %v895_v62  ;;  %v6846_v39 = vld [vmem:[%s7870_s6] ss:$0 sm:$0xff] }
 0x14b   : > { %v4479_v27 = vclamps-f32 %v941_v18, 1.0  ;;  %v1483_v34 = vld [vmem:[#allocation2 + $0x8c] sm:$0x1]  ;;  %v898_v31 = vmul.f32 %v6846_v39, %v5560_v51  ;;  %v825_v40 = vpop.f32.mrb[41].mxu1  ;;  %2276 = vmatprep.mubr.bf16.mxu0 %v6799_v55  ;;  %v6851_v35 = vsel %vm1768_vm5, %v1871_v23, %v1875_v3  ;;  %v1887_v41 = vrot.slane %v1885_v16, 1 }
 0x14c   : > { %v1484_v42 = vsel %vm6512_vm4, 0, %v1483_v34  ;;  %4991 = vst [vmem:[#allocation2 + $0x98] sm:$0xff] %v4942_v26   ;;  %v896_v45 = vmul.f32 %v6846_v39, %v825_v40  ;;  %v5561_v46 = vpop.f32.mrb[42].mxu1  ;;  %5614 = vmatprep.mubr.bf16.mxu1 %v6851_v35  ;;  %v1883_v47 = vor.u32 %v1882_v29, %v1878_v28  ;;  %v6857_v49 = vld [vmem:[#allocation2 + $0x78] sm:$0xff]   ;;  %v4481_v24 = vclamps-f32 %v943_v36, 1.0 }
 0x14d   : > { %v4947_v44 = vpack.c.bf16 %v4480_v21, %v4479_v27  ;;  %1485 = vst [vmem:[#allocation2 + $0x8c] sm:$0x1] %v1484_v42  ;;  %v1430_v50 = vld [vmem:[#allocation2 + $0x90] sm:$0x1]  ;;  %v946_v53 = vadd.f32 %v6840_v52, %v898_v31  ;;  %v828_v54 = vpop.f32.mrb[43].mxu1  ;;  %v899_v1 = vmul.f32 %v6846_v39, %v5561_v46  ;;  %v1892_v2 = vshll.u32 %v6857_v49, 16 }
 0x14e   : > { %v1431_v56 = vsel %vm6507_vm3, 0, %v1430_v50  ;;  %v944_v12 = vadd.f32 %v6840_v52, %v896_v45  ;;  %v897_v57 = vmul.f32 %v6846_v39, %v828_v54  ;;  %v6865_v58 = vsel %vm1768_vm5, %v1883_v47, %v1887_v41  ;;  %v6869_v61 = vld [vmem:[#allocation2 + $0x84] sm:$0xff]  }
 0x14f   : > { %4992 = vst [vmem:[#allocation2 + $0xa0] sm:$0xff] %v4947_v44   ;;  %v6867_v60 = vld [vmem:[#allocation2 + $0x80] ss:$0 sps:$4 sm:$0xff]   ;;  %1432 = vst [vmem:[#allocation2 + $0x90] sm:$0x1] %v1431_v56  ;;  %5615 = vmatmul.mubr.bf16.gmra.mrb[60].mxu1 %v6865_v58  ;;  %v1890_v9 = vshrl.u32 %v6857_v49, 16  ;;  %v947_v23 = vadd.f32 %v6840_v52, %v899_v1 }
 0x150   : > { %v4482_v4 = vclamps-f32 %v944_v12, 1.0  ;;  %v945_v6 = vadd.f32 %v6840_v52, %v897_v57  ;;  %v1897_v8 = vshll.u32 %v6867_v60, 16  ;;  %v1894_v10 = vrot.slane %v1892_v2, 1 }
 0x151   : > { %v1904_v11 = vshll.u32 %v6869_v61, 16  ;;  %v4484_v62 = vclamps-f32 %v946_v53, 1.0  ;;  %v1902_v54 = vshrl.u32 %v6869_v61, 16  ;;  %v4485_v12 = vclamps-f32 %v947_v23, 1.0 }
 0x152   : > { %v4952_v7 = vpack.c.bf16 %v4482_v4, %v4481_v24  ;;  %v4483_v14 = vclamps-f32 %v945_v6, 1.0  ;;  %v5564_v17 = vpop.f32.mrb[44].mxu1  ;;  %2277 = vmatmul.mubr.bf16.gmra.mrb[32].mxu0 %v6769_v63  ;;  %v1899_v18 = vrot.slane %v1897_v8, 1  ;;  %v1895_v26 = vor.u32 %v1894_v10, %v1890_v9 }
 0x153   : > { %v1433_v19 = vld [vmem:[#allocation2 + $0x9c] sm:$0x1]  ;;  %v1486_v21 = vld [vmem:[#allocation2 + $0x98] sm:$0x1]  ;;  %v902_v3 = vmul.f32 %v6846_v39, %v5564_v17  ;;  %v841_v16 = vpop.f32.mrb[45].mxu1  ;;  %2284 = vmatprep.mubr.bf16.mxu0 %v6851_v35  ;;  %v1906_v42 = vrot.slane %v1904_v11, 1 }
 0x154   : > { %v1434_v27 = vsel %vm6507_vm3, 0, %v1433_v19  ;;  %v1487_v51 = vsel %vm6512_vm4, 0, %v1486_v21  ;;  %4993 = vst [vmem:[#allocation2 + $0xa8] sm:$0xff] %v4952_v7   ;;  %v4957_v28 = vpack.c.bf16 %v4484_v62, %v4483_v14  ;;  %v900_v63 = vmul.f32 %v6846_v39, %v841_v16  ;;  %v5565_v29 = vpop.f32.mrb[46].mxu1  ;;  %v6891_v41 = vld [vmem:[#allocation2 + $0x8c] ss:$0 sps:$4 sm:$0xff]  }
 0x155   : > { %1435 = vst [vmem:[#allocation2 + $0x9c] sm:$0x1] %v1434_v27  ;;  %1488 = vst [vmem:[#allocation2 + $0x98] sm:$0x1] %v1487_v51  ;;  %v903_v36 = vmul.f32 %v6846_v39, %v5565_v29  ;;  %v844_v31 = vpop.f32.mrb[47].mxu1  ;;  %v6889_v40 = vsel %vm1768_vm5, %v1895_v26, %v1899_v18  ;;  %v950_v45 = vadd.f32 %v6840_v52, %v902_v3  ;;  %v1909_v56 = vshll.u32 %v6891_v41, 16 }
 0x156   : > { %v1489_v34 = vld [vmem:[#allocation2 + $0xa4] sm:$0x1]  ;;  %4994 = vst [vmem:[#allocation2 + $0xb0] sm:$0xff] %v4957_v28   ;;  %v948_v46 = vadd.f32 %v6840_v52, %v900_v63  ;;  %v901_v47 = vmul.f32 %v6846_v39, %v844_v31  ;;  %5618 = vmatprep.mubr.bf16.mxu1 %v6889_v40  ;;  %v6899_v50 = vld [vmem:[#allocation2 + $0x90] sm:$0xff]   ;;  %v1907_v4 = vor.u32 %v1906_v42, %v1902_v54 }
 0x157   : > { %v1490_v44 = vsel %vm6512_vm4, 0, %v1489_v34  ;;  %v951_v53 = vadd.f32 %v6840_v52, %v903_v36  ;;  %v1916_v2 = vshll.u32 %v6899_v50, 16  ;;  %v1911_v39 = vrot.slane %v1909_v56, 1 }
 0x158   : > { %1491 = vst [vmem:[#allocation2 + $0xa4] sm:$0x1] %v1490_v44  ;;  %v4486_v57 = vclamps-f32 %v948_v46, 1.0  ;;  %v949_v1 = vadd.f32 %v6840_v52, %v901_v47  ;;  %v4488_v6 = vclamps-f32 %v950_v45, 1.0  ;;  %v1914_v3 = vshrl.u32 %v6899_v50, 16 }
 0x159   : > { %v4489_v24 = vclamps-f32 %v951_v53, 1.0  ;;  %v6909_v62 = vsel %vm1768_vm5, %v1907_v4, %v1911_v39  ;;  %v1918_v7 = vrot.slane %v1916_v2, 1  ;;  %v6953_v2 = vld [vmem:[#allocation2 + $0xcc] sm:$0xff]  }
 0x15a   : > { %v4962_v8 = vpack.c.bf16 %v4486_v57, %v4485_v12  ;;  %v4487_v9 = vclamps-f32 %v949_v1, 1.0  ;;  %2285 = vmatmul.mubr.bf16.gmra.mrb[36].mxu0 %v6799_v55  ;;  %5619 = vmatmul.mubr.bf16.gmra.mrb[64].mxu1 %v6909_v62 }
 0x15b   : > { %v1436_v10 = vld [vmem:[#allocation2 + $0xa8] sm:$0x1]  ;;  %v4845_v11 = vpack.c.bf16 %v4489_v24, %v4489_v24  ;;  %2292 = vmatprep.mubr.bf16.mxu0 %v6865_v58  ;;  %v1919_v51 = vor.u32 %v1918_v7, %v1914_v3 }
 0x15c   : > { %v1437_v52 = vsel %vm6507_vm3, 0, %v1436_v10  ;;  %4995 = vst [vmem:[#allocation2 + $0xb8] sm:$0xff] %v4962_v8   ;;  %v4967_v14 = vpack.c.bf16 %v4488_v6, %v4487_v9  ;;  %v6914_v17 = vld [vmem:[#allocation2 + $0x98] ss:$0 sps:$4 sm:$0xff]   ;;  %v6916_v18 = vld [vmem:[#allocation2 + $0x9c] sm:$0xff]   ;;  %v1976_v10 = vshll.u32 %v6953_v2, 16 }
 0x15d   : > { %1438 = vst [vmem:[#allocation2 + $0xa8] sm:$0x1] %v1437_v52  ;;  %v1439_v55 = vld [vmem:[#allocation2 + $0xb4] sm:$0x1]  ;;  %v1492_v19 = vld [vmem:[#allocation2 + $0xb0] sm:$0x1] }
 0x15e   : > { %1304 = vst [vmem:[#allocation2 + $0xc8] sm:$0xf] %v4845_v11  ;;  %v1440_v21 = vsel %vm6507_vm3, 0, %v1439_v55  ;;  %v1493_v23 = vsel %vm6512_vm4, 0, %v1492_v19  ;;  %4996 = vst [vmem:[#allocation2 + $0xc0] sm:$0xff] %v4967_v14   ;;  %v1921_v16 = vshll.u32 %v6914_v17, 16 }
 0x15f   : > { %1441 = vst [vmem:[#allocation2 + $0xb4] sm:$0x1] %v1440_v21  ;;  %1494 = vst [vmem:[#allocation2 + $0xb0] sm:$0x1] %v1493_v23  ;;  %v6924_v26 = vld [vmem:[#allocation2 + $0xa4] ss:$0 sps:$4 sm:$0xff]  }
 0x160   : > { %v1928_v27 = vshll.u32 %v6916_v18, 16  ;;  %v1923_v28 = vrot.slane %v1921_v16, 1  ;;  %v1926_v63 = vshrl.u32 %v6916_v18, 16  ;;  %v1933_v34 = vshll.u32 %v6924_v26, 16  ;;  %v6965_v52 = vld [vmem:[#allocation2 + $0xd4] ss:$0 sps:$4 sm:$0xff]  }
 0x161   : > { %v1974_v16 = vshrl.u32 %v6953_v2, 16 }
 0x162   : > { %v1930_v29 = vrot.slane %v1928_v27, 1  ;;  %2293 = vmatmul.mubr.bf16.gmra.mrb[40].mxu0 %v6851_v35  ;;  %v6931_v36 = vsel %vm1768_vm5, %v1919_v51, %v1923_v28  ;;  %v1935_v44 = vrot.slane %v1933_v34, 1  ;;  %v1978_v27 = vrot.slane %v1976_v10, 1 }
 0x163   : > { %v1495_v31 = vld [vmem:[#allocation2 + $0xbc] sm:$0x1]  ;;  %2300 = vmatprep.mubr.bf16.mxu0 %v6889_v40  ;;  %5622 = vmatprep.mubr.bf16.mxu1 %v6931_v36 }
 0x164   : > { %v1931_v42 = vor.u32 %v1930_v29, %v1926_v63  ;;  %v1496_v45 = vsel %vm6512_vm4, 0, %v1495_v31  ;;  %v6937_v47 = vld [vmem:[#allocation2 + $0xa8] sm:$0xff]   ;;  %v1981_v29 = vshll.u32 %v6965_v52, 16 }
 0x165   : > { %v1498_v46 = vld [vmem:[#allocation2 + $0xc8] sm:$0x1]  ;;  %1497 = vst [vmem:[#allocation2 + $0xbc] sm:$0x1] %v1496_v45  ;;  %v1442_v53 = vld [vmem:[#allocation2 + $0xc0] sm:$0x1] }
 0x166   : > { %v1499_v35 = vsel %vm6512_vm4, 0, %v1498_v46  ;;  %v6942_v54 = vsel %vm1768_vm5, %v1931_v42, %v1935_v44  ;;  %v1443_v56 = vsel %vm6507_vm3, 0, %v1442_v53  ;;  %v6947_v12 = vld [vmem:[#allocation2 + $0xb0] ss:$0 sps:$4 sm:$0xff]   ;;  %v1940_v57 = vshll.u32 %v6937_v47, 16  ;;  %v6950_v1 = vld [vmem:[#allocation2 + $0xb4] sm:$0xff]  }
 0x167   : > { %1500 = vst [vmem:[#allocation2 + $0xc8] sm:$0x1] %v1499_v35  ;;  %5623 = vmatmul.mubr.bf16.gmra.mrb[68].mxu1 %v6942_v54  ;;  %1444 = vst [vmem:[#allocation2 + $0xc0] sm:$0x1] %v1443_v56  ;;  %v1945_v43 = vshll.u32 %v6947_v12, 16  ;;  %v1938_v24 = vshrl.u32 %v6937_v47, 16  ;;  %v1979_v44 = vor.u32 %v1978_v27, %v1974_v16 }
 0x168   : > { %v1942_v4 = vrot.slane %v1940_v57, 1  ;;  %v1952_v39 = vshll.u32 %v6950_v1, 16  ;;  %v1950_v14 = vshrl.u32 %v6950_v1, 16  ;;  %v1983_v45 = vrot.slane %v1981_v29, 1  ;;  %v6090_v46 = vld [vmem:[#allocation2 + $0xc] sm:$0xff]   ;;  %v6091_v53 = vld [vmem:[#allocation2] sm:$0xff]  }
 0x169   : > { %v1947_v38 = vrot.slane %v1945_v43, 1  ;;  %v6058_v35 = vld [vmem:[%s7868_s4 + $0x88] sm:$0xff]   ;;  %v6988_v56 = vld [vmem:[#allocation2 + $0x18] sm:$0xff]   ;;  %v6068_v57 = vld [vmem:[%s7868_s4 + $0xa0] sm:$0xff]  }
 0x16a   : > { %2301 = vmatmul.mubr.bf16.gmra.mrb[44].mxu0 %v6865_v58  ;;  %v1943_v6 = vor.u32 %v1942_v4, %v1938_v24  ;;  %v1954_v9 = vrot.slane %v1952_v39, 1  ;;  %v6069_v43 = vld [vmem:[%s7868_s4 + $0xa8] sm:$0xff]   ;;  %v6094_v24 = vld [vmem:[#allocation2 + $0x14] ss:$0 sps:$4 sm:$0xff]   ;;  %v2988_v39 = vrot.slane %v6090_v46, 1 }
 0x16b   : > { %2308 = vmatprep.mubr.bf16.mxu0 %v6909_v62  ;;  %v2989_v4 = vrot.slane %v6094_v24, 1  ;;  %v6098_v16 = vld [vmem:[#allocation2 + $0x2c] ss:$0 sps:$4 sm:$0xff]  }
 0x16c   : > { %v6959_v8 = vld [vmem:[#allocation2 + $0xbc] ss:$0 sps:$4 sm:$0xff]   ;;  %v1948_v11 = vsel %vm1768_vm5, %v1943_v6, %v1947_v38  ;;  %v1955_v19 = vor.u32 %v1954_v9, %v1950_v14  ;;  %v6095_v9 = vld [vmem:[#allocation2 + $0x8] ss:$0 sps:$4 sm:$0xff]   ;;  %v6096_v14 = vld [vmem:[#allocation2 + $0x20] ss:$0 sps:$4 sm:$0xff]  }
 0x16d   : > { %5626 = vmatprep.mubr.bf16.mxu1 %v1948_v11  ;;  %v1957_v58 = vshll.u32 %v6959_v8, 16  ;;  %v6071_v38 = vld [vmem:[%s7868_s4 + $0xb8] sm:$0xff]   ;;  %v2990_v6 = vsel %vm2984_vm6, %v2988_v39, %v2989_v4  ;;  %v2986_v10 = vrot.slane %v6095_v9, 1  ;;  %v2995_v27 = vrot.slane %v6098_v16, 1 }
 0x16e   : > { %v6963_v7 = vld [vmem:[#allocation2 + $0xc8] ss:$0 sps:$4 sm:$0xff]   ;;  %v6969_v55 = vld [vmem:[#allocation2 + $0xc0] sm:$0xff]   ;;  %v3025_v39 = vrot.slane %v6924_v26, 1 }
 0x16f   : > { %v1959_v21 = vrot.slane %v1957_v58, 1  ;;  %v1964_v23 = vshll.u32 %v6969_v55, 16  ;;  %v1969_v3 = vshll.u32 %v6963_v7, 16  ;;  %v1962_v28 = vshrl.u32 %v6969_v55, 16 }
 0x170   : > { %v2992_v58 = vrot.slane %v6096_v14, 1 }
 0x171   : > { %v1960_v51 = vsel %vm1768_vm5, %v1955_v19, %v1959_v21  ;;  %v1966_v63 = vrot.slane %v1964_v23, 1  ;;  %v1971_v31 = vrot.slane %v1969_v3, 1  ;;  %v2991_v19 = vrot.slane %v6988_v56, 1  ;;  %v7030_v3 = vld [vmem:[#allocation2 + $0x30] sm:$0xff]  }
 0x172   : > { %2309 = vmatmul.mubr.bf16.gmra.mrb[48].mxu0 %v6889_v40  ;;  %5627 = vmatmul.mubr.bf16.gmra.mrb[72].mxu1 %v1960_v51  ;;  %v1984_v40 = vsel %vm1768_vm5, %v1979_v44, %v1983_v45  ;;  %v2997_v29 = vrot.slane %v7030_v3, 1  ;;  %v3004_v44 = vrot.slane %v6726_v32, 1  ;;  %v3003_v45 = vrot.slane %v6710_v20, 1 }
 0x173   : > { %2316 = vmatprep.mubr.bf16.mxu0 %v6931_v36  ;;  %v1967_v34 = vor.u32 %v1966_v63, %v1962_v28  ;;  %v7027_v23 = vsel %vm2984_vm6, %v2991_v19, %v2992_v58  ;;  %v2998_v63 = vrot.slane %v6656_v30, 1  ;;  %v3028_v58 = vrot.slane %v6947_v12, 1 }
 0x175   : > { %v1972_v42 = vsel %vm1768_vm5, %v1967_v34, %v1971_v31  ;;  %v7045_v34 = vsel %vm2984_vm6, %v2997_v29, %v2998_v63  ;;  %v3001_v31 = vrot.slane %v6673_v48, 1  ;;  %v7063_v48 = vsel %vm2984_vm6, %v3003_v45, %v3004_v44  ;;  %v6073_v63 = vld [vmem:[%s7868_s4 + $0x208] sm:$0xff]   ;;  %v6074_v29 = vld [vmem:[%s7868_s4 + $0x210] sm:$0xff]  }
 0x176   : > { %5630 = vmatprep.mubr.bf16.mxu1 %v1972_v42 }
 0x17a   : > { %2317 = vmatmul.mubr.bf16.gmra.mrb[52].mxu0 %v6909_v62  ;;  %5631 = vmatmul.mubr.bf16.gmra.mrb[76].mxu1 %v1984_v40  ;;  %v6066_v62 = vld [vmem:[%s7868_s4 + $0x90] sm:$0xff]   ;;  %v3006_v40 = vrot.slane %v6728_v33, 1 }
 0x17b   : > { %2324 = vmatprep.mubr.bf16.mxu0 %v6942_v54  ;;  %2694 = vmatprep.mubr.bf16.mxu1 %v6090_v46 }
 0x182   : > { %2325 = vmatmul.mubr.bf16.gmra.mrb[56].mxu0 %v6931_v36  ;;  %2695 = vmatmul.mubr.bf16.vlgmr.msra.gmra.mrb[80].mxu1 %v6091_v53  ;;  %v6067_v36 = vld [vmem:[%s7868_s4 + $0x98] sm:$0xff]  }
 0x183   : > { %2332 = vmatprep.mubr.bf16.mxu0 %v1948_v11  ;;  %5635 = vmatpush3.bf16.msra.mxu1 %v6815_v0  ;;  %v6998_v0 = vld [vmem:[#allocation2 + $0x24] sm:$0xff]  }
 0x184   : > { %2702 = vmatprep.mubr.bf16.mxu1 %v6988_v56  ;;  %5636 = vmatprep.subr.bf16.mxu1 %v6058_v35 }
 0x187   : > { %5637 = vmatpush3.bf16.msra.mxu1 %v6058_v35  ;;  %v3012_v35 = vrot.slane %v6818_v5, 1 }
 0x188   : > { %5638 = vmatprep.subr.bf16.mxu1 %v6066_v62 }
 0x18a   : > { %2333 = vmatmul.mubr.bf16.gmra.mrb[60].mxu0 %v6942_v54  ;;  %2703 = vmatmul.mubr.bf16.gmra.mrb[84].mxu1 %v6090_v46  ;;  %v6070_v54 = vld [vmem:[%s7868_s4 + $0xb0] sm:$0xff]   ;;  %v3009_v46 = vrot.slane %v6779_v22, 1 }
 0x18b   : > { %2340 = vmatprep.mubr.bf16.mxu0 %v1960_v51  ;;  %2710 = vmatprep.mubr.bf16.mxu1 %v6998_v0 }
 0x18c   : > { %5639 = vmatpush3.bf16.msra.mxu1 %v6066_v62  ;;  %v3015_v62 = vrot.slane %v6857_v49, 1 }
 0x18d   : > { %5640 = vmatprep.subr.bf16.mxu1 %v6067_v36 }
 0x190   : > { %5641 = vmatpush3.bf16.msra.mxu1 %v6067_v36  ;;  %v3019_v36 = vrot.slane %v6891_v41, 1 }
 0x191   : > { %5642 = vmatprep.subr.bf16.mxu1 %v6068_v57 }
 0x192   : > { %2341 = vmatmul.mubr.bf16.gmra.mrb[64].mxu0 %v1948_v11  ;;  %2711 = vmatmul.mubr.bf16.gmra.mrb[88].mxu1 %v6988_v56  ;;  %v7021_v11 = vld [vmem:[%s7868_s4 + $0x200] sm:$0xff]  }
 0x193   : > { %2348 = vmatprep.mubr.bf16.mxu0 %v1972_v42  ;;  %2718 = vmatprep.mubr.bf16.mxu1 %v6603_v59  ;;  %v2985_v59 = vrot.slane %v6091_v53, 1  ;;  %v3000_v42 = vrot.slane %v6662_v37, 1  ;;  %v3016_v53 = vrot.slane %v6867_v60, 1 }
 0x194   : > { %5643 = vmatpush3.bf16.msra.mxu1 %v6068_v57  ;;  %v3018_v57 = vrot.slane %v6869_v61, 1 }
 0x195   : > { %5644 = vmatprep.subr.bf16.mxu1 %v6069_v43  ;;  %v2987_v21 = vsel %vm2984_vm6, %v2985_v59, %v2986_v10  ;;  %v7054_v30 = vsel %vm2984_vm6, %v3000_v42, %v3001_v31  ;;  %v3031_v42 = vrot.slane %v6959_v8, 1  ;;  %v6099_v8 = vld [vmem:[#allocation2 + $0x3c] sm:$0xff]  }
 0x196   : > { %v7108_v60 = vsel %vm2984_vm6, %v3018_v57, %v3019_v36 }
 0x198   : > { %5645 = vmatpush3.bf16.msra.mxu1 %v6069_v43  ;;  %v3022_v43 = vrot.slane %v6914_v17, 1 }
 0x199   : > { %5646 = vmatprep.subr.bf16.mxu1 %v6070_v54 }
 0x19a   : > { %2349 = vmatmul.mubr.bf16.gmra.mrb[68].mxu0 %v1960_v51  ;;  %2719 = vmatmul.mubr.bf16.gmra.mrb[92].mxu1 %v6998_v0  ;;  %v2994_v51 = vrot.slane %v6998_v0, 1 }
 0x19b   : > { %3282 = vmatprep.mubr.bf16.mxu0 %v2990_v6  ;;  %2726 = vmatprep.mubr.bf16.mxu1 %v6662_v37 }
 0x19c   : > { %5647 = vmatpush3.bf16.msra.mxu1 %v6070_v54  ;;  %v7036_v28 = vsel %vm2984_vm6, %v2994_v51, %v2995_v27  ;;  %v3021_v54 = vrot.slane %v6899_v50, 1  ;;  %v3027_v27 = vrot.slane %v6937_v47, 1 }
 0x19d   : > { %5648 = vmatprep.subr.bf16.mxu1 %v6071_v38 }
 0x19e   : > { %v7117_v41 = vsel %vm2984_vm6, %v3021_v54, %v3022_v43 }
 0x1a0   : > { %5649 = vmatpush3.bf16.msra.mxu1 %v6071_v38 }
 0x1a1   : > { %5682 = vmatprep.subr.bf16.mxu1 %v7021_v11 }
 0x1a2   : > { %3283 = vmatmul.mubr.bf16.vlgmr.msra.gmra.mrb[72].mxu0 %v2987_v21  ;;  %2727 = vmatmul.mubr.bf16.gmra.mrb[96].mxu1 %v7030_v3 }
 0x1a3   : > { %3290 = vmatprep.mubr.bf16.mxu0 %v7027_v23  ;;  %2734 = vmatprep.mubr.bf16.mxu1 %v6710_v20 }
 0x1aa   : > { %3291 = vmatmul.mubr.bf16.gmra.mrb[76].mxu0 %v2990_v6  ;;  %2735 = vmatmul.mubr.bf16.gmra.mrb[100].mxu1 %v6662_v37  ;;  %v3007_v37 = vrot.slane %v6771_v13, 1  ;;  %v3024_v6 = vrot.slane %v6916_v18, 1 }
 0x1ab   : > { %3298 = vmatprep.mubr.bf16.mxu0 %v7036_v28  ;;  %2742 = vmatprep.mubr.bf16.mxu1 %v6728_v33 }
 0x1ac   : > { %v7072_v32 = vsel %vm2984_vm6, %v3006_v40, %v3007_v37  ;;  %v7130_v10 = vsel %vm2984_vm6, %v3024_v6, %v3025_v39  ;;  %v3030_v40 = vrot.slane %v6950_v1, 1 }
 0x1b2   : > { %3299 = vmatmul.mubr.bf16.gmra.mrb[80].mxu0 %v7027_v23  ;;  %2743 = vmatmul.mubr.bf16.gmra.mrb[104].mxu1 %v6710_v20  ;;  %v3010_v20 = vrot.slane %v6810_v25, 1 }
 0x1b3   : > { %3306 = vmatprep.mubr.bf16.mxu0 %v7045_v34  ;;  %2750 = vmatprep.mubr.bf16.mxu1 %v6779_v22 }
 0x1b4   : > { %v7081_v13 = vsel %vm2984_vm6, %v3009_v46, %v3010_v20  ;;  %v6100_v20 = vld [vmem:[#allocation2 + $0x48] sm:$0xff]  }
 0x1ba   : > { %3307 = vmatmul.mubr.bf16.gmra.mrb[84].mxu0 %v7036_v28  ;;  %2751 = vmatmul.mubr.bf16.gmra.mrb[108].mxu1 %v6728_v33  ;;  %v3013_v33 = vrot.slane %v6829_v15, 1  ;;  %v7099_v15 = vsel %vm2984_vm6, %v3015_v62, %v3016_v53  ;;  %v3033_v53 = vrot.slane %v6969_v55, 1  ;;  %v3034_v62 = vrot.slane %v6963_v7, 1  ;;  %v6101_v7 = vld [vmem:[#allocation2 + $0x54] sm:$0xff]  }
 0x1bb   : > { %3314 = vmatprep.mubr.bf16.mxu0 %v7054_v30  ;;  %2758 = vmatprep.mubr.bf16.mxu1 %v6818_v5 }
 0x1bc   : > { %v7090_v25 = vsel %vm2984_vm6, %v3012_v35, %v3013_v33  ;;  %v6076_v33 = vld [vmem:[%s7868_s4 + $0x220] sm:$0xff]  }
 0x1c2   : > { %3315 = vmatmul.mubr.bf16.gmra.mrb[88].mxu0 %v7045_v34  ;;  %2759 = vmatmul.mubr.bf16.gmra.mrb[112].mxu1 %v6779_v22 }
 0x1c3   : > { %3322 = vmatprep.mubr.bf16.mxu0 %v7063_v48  ;;  %2766 = vmatprep.mubr.bf16.mxu1 %v6857_v49 }
 0x1ca   : > { %3323 = vmatmul.mubr.bf16.gmra.mrb[92].mxu0 %v7054_v30  ;;  %2767 = vmatmul.mubr.bf16.gmra.mrb[116].mxu1 %v6818_v5 }
 0x1cb   : > { %3330 = vmatprep.mubr.bf16.mxu0 %v7072_v32  ;;  %2774 = vmatprep.mubr.bf16.mxu1 %v6869_v61 }
 0x1d2   : > { %3331 = vmatmul.mubr.bf16.gmra.mrb[96].mxu0 %v7063_v48  ;;  %2775 = vmatmul.mubr.bf16.gmra.mrb[120].mxu1 %v6857_v49 }
 0x1d3   : > { %3338 = vmatprep.mubr.bf16.mxu0 %v7081_v13  ;;  %2782 = vmatprep.mubr.bf16.mxu1 %v6899_v50 }
 0x1da   : > { %3339 = vmatmul.mubr.bf16.gmra.mrb[100].mxu0 %v7072_v32  ;;  %2783 = vmatmul.mubr.bf16.gmra.mrb[124].mxu1 %v6869_v61 }
 0x1db   : > { %3346 = vmatprep.mubr.bf16.mxu0 %v7090_v25  ;;  %2790 = vmatprep.mubr.bf16.mxu1 %v6916_v18 }
 0x1e2   : > { %3347 = vmatmul.mubr.bf16.gmra.mrb[104].mxu0 %v7081_v13  ;;  %2791 = vmatmul.mubr.bf16.gmra.mrb[128].mxu1 %v6899_v50 }
 0x1e3   : > { %3354 = vmatprep.mubr.bf16.mxu0 %v7099_v15  ;;  %2798 = vmatprep.mubr.bf16.mxu1 %v6937_v47 }
 0x1ea   : > { %3355 = vmatmul.mubr.bf16.gmra.mrb[108].mxu0 %v7090_v25  ;;  %2799 = vmatmul.mubr.bf16.gmra.mrb[132].mxu1 %v6916_v18 }
 0x1eb   : > { %3362 = vmatprep.mubr.bf16.mxu0 %v7108_v60  ;;  %2806 = vmatprep.mubr.bf16.mxu1 %v6950_v1 }
 0x1f2   : > { %3363 = vmatmul.mubr.bf16.gmra.mrb[112].mxu0 %v7099_v15  ;;  %2807 = vmatmul.mubr.bf16.gmra.mrb[136].mxu1 %v6937_v47 }
 0x1f3   : > { %3370 = vmatprep.mubr.bf16.mxu0 %v7117_v41  ;;  %2814 = vmatprep.mubr.bf16.mxu1 %v6969_v55 }
 0x1f5   : > { %v5066_v24 = vpop.f32.mrb[8].mxu0 }
 0x1f6   : > { %v5067_v4 = vpop.f32.mrb[9].mxu0 }
 0x1f7   : > { %v7123_v38 = vadd.f32 %v5067_v4, %v5066_v24  ;;  %v5069_v17 = vpop.f32.mrb[10].mxu0  ;;  %v6077_v24 = vld [vmem:[%s7868_s4 + $0x228] sm:$0xff]   ;;  %v7183_v4 = vsel %vm2984_vm6, %v3033_v53, %v3034_v62 }
 0x1f8   : > { %v5070_v59 = vpop.f32.mrb[11].mxu0 }
 0x1f9   : > { %v7126_v9 = vadd.f32 %v5070_v59, %v5069_v17  ;;  %v6078_v17 = vld [vmem:[%s7868_s4 + $0x230] sm:$0xff]  }
 0x1fa   : > { %3371 = vmatmul.mubr.bf16.gmra.mrb[116].mxu0 %v7108_v60  ;;  %2815 = vmatmul.mubr.bf16.gmra.mrb[140].mxu1 %v6950_v1 }
 0x1fb   : > { %3378 = vmatprep.mubr.bf16.mxu0 %v7130_v10  ;;  %5650 = vmatprep.mubr.bf16.mxu1 %v6988_v56  ;;  %v7146_v56 = vsel %vm2984_vm6, %v3027_v27, %v3028_v58 }
 0x1fd   : > { %v5072_v26 = vpop.f32.mrb[12].mxu0 }
 0x1fe   : > { %v5073_v14 = vpop.f32.mrb[13].mxu0 }
 0x1ff   : > { %v7136_v19 = vadd.f32 %v5073_v14, %v5072_v26  ;;  %v5075_v21 = vpop.f32.mrb[14].mxu0 }
 0x200   : > { %v5076_v16 = vpop.f32.mrb[15].mxu0 }
 0x201   : > { %v7139_v51 = vadd.f32 %v5076_v16, %v5075_v21 }
 0x202   : > { %3379 = vmatmul.mubr.bf16.gmra.mrb[120].mxu0 %v7117_v41  ;;  %5651 = vmatmul.mubr.bf16.vlgmr.msra.gmra.mrb[48].mxu1 %v6998_v0 }
 0x203   : > { %3386 = vmatprep.mubr.bf16.mxu0 %v7146_v56  ;;  %5683 = vmatpush3.bf16.msra.mxu1 %v7021_v11  ;;  %v6075_v11 = vld [vmem:[%s7868_s4 + $0x218] sm:$0xff]  }
 0x204   : > { %5654 = vmatprep.mubr.bf16.mxu1 %v7030_v3  ;;  %5684 = vmatprep.subr.bf16.mxu1 %v6073_v63  ;;  %v7166_v3 = vsel %vm2984_vm6, %v3030_v40, %v3031_v42 }
 0x205   : > { %v5078_v12 = vpop.f32.mrb[16].mxu0 }
 0x206   : > { %v5079_v31 = vpop.f32.mrb[17].mxu0 }
 0x207   : > { %v7156_v44 = vadd.f32 %v5079_v31, %v5078_v12  ;;  %v5081_v45 = vpop.f32.mrb[18].mxu0  ;;  %5685 = vmatpush3.bf16.msra.mxu1 %v6073_v63 }
 0x208   : > { %v5082_v37 = vpop.f32.mrb[19].mxu0  ;;  %5686 = vmatprep.subr.bf16.mxu1 %v6074_v29 }
 0x209   : > { %v7159_v0 = vadd.f32 %v5082_v37, %v5081_v45 }
 0x20a   : > { %3387 = vmatmul.mubr.bf16.gmra.mrb[124].mxu0 %v7130_v10  ;;  %5655 = vmatmul.mubr.bf16.gmra.mrb[52].mxu1 %v6099_v8 }
 0x20b   : > { %3394 = vmatprep.mubr.bf16.mxu0 %v7166_v3  ;;  %5658 = vmatprep.mubr.bf16.mxu1 %v6100_v20 }
 0x20c   : > { %5687 = vmatpush3.bf16.msra.mxu1 %v6074_v29 }
 0x20d   : > { %v5084_v46 = vpop.f32.mrb[20].mxu0  ;;  %5688 = vmatprep.subr.bf16.mxu1 %v6075_v11 }
 0x20e   : > { %v5085_v35 = vpop.f32.mrb[21].mxu0 }
 0x20f   : > { %v7174_v36 = vadd.f32 %v5085_v35, %v5084_v46  ;;  %v5087_v57 = vpop.f32.mrb[22].mxu0  ;;  %v6081_v35 = vld [vmem:[%s7869_s5 + $0x8] sm:$0xff]  }
 0x210   : > { %v5088_v43 = vpop.f32.mrb[23].mxu0  ;;  %5689 = vmatpush3.bf16.msra.mxu1 %v6075_v11 }
 0x211   : > { %v7176_v54 = vadd.f32 %v5088_v43, %v5087_v57  ;;  %5690 = vmatprep.subr.bf16.mxu1 %v6076_v33 }
 0x212   : > { %3395 = vmatmul.mubr.bf16.gmra.mrb[128].mxu0 %v7146_v56  ;;  %5659 = vmatmul.mubr.bf16.gmra.mrb[56].mxu1 %v6101_v7 }
 0x213   : > { %3402 = vmatprep.mubr.bf16.mxu0 %v7183_v4  ;;  %5662 = vmatprep.mubr.bf16.mxu1 %v6779_v22  ;;  %v6079_v22 = vld [vmem:[%s7868_s4 + $0x238] sm:$0xff]  }
 0x214   : > { %5691 = vmatpush3.bf16.msra.mxu1 %v6076_v33 }
 0x215   : > { %v5090_v39 = vpop.f32.mrb[24].mxu0  ;;  %5692 = vmatprep.subr.bf16.mxu1 %v6077_v24 }
 0x216   : > { %v5091_v6 = vpop.f32.mrb[25].mxu0 }
 0x217   : > { %v7190_v59 = vadd.f32 %v5091_v6, %v5090_v39  ;;  %v5093_v26 = vpop.f32.mrb[26].mxu0  ;;  %v6082_v6 = vld [vmem:[%s7869_s5 + $0x10] sm:$0xff]  }
 0x218   : > { %v5094_v14 = vpop.f32.mrb[27].mxu0  ;;  %5693 = vmatpush3.bf16.msra.mxu1 %v6077_v24 }
 0x219   : > { %v7192_v58 = vadd.f32 %v5094_v14, %v5093_v26  ;;  %5694 = vmatprep.subr.bf16.mxu1 %v6078_v17 }
 0x21a   : > { %3403 = vmatmul.mubr.bf16.gmra.mrb[132].mxu0 %v7166_v3  ;;  %5663 = vmatmul.mubr.bf16.gmra.mrb[60].mxu1 %v6818_v5  ;;  %v6080_v5 = vld [vmem:[%s7869_s5] sm:$0xff]  }
 0x21b   : > { %5666 = vmatprep.mubr.bf16.mxu1 %v6857_v49  ;;  %5730 = vmatprep.subr.bf16.mxu0 %v6080_v5 }
 0x21c   : > { %5695 = vmatpush3.bf16.msra.mxu1 %v6078_v17  ;;  %5731 = vmatpush3.bf16.msra.mxu0 %v6080_v5 }
 0x21d   : > { %v5096_v21 = vpop.f32.mrb[28].mxu0  ;;  %5696 = vmatprep.subr.bf16.mxu1 %v6079_v22  ;;  %5732 = vmatprep.subr.bf16.mxu0 %v6081_v35 }
 0x21e   : > { %v5097_v16 = vpop.f32.mrb[29].mxu0 }
 0x21f   : > { %v7200_v27 = vadd.f32 %v5097_v16, %v5096_v21  ;;  %v5099_v63 = vpop.f32.mrb[30].mxu0 }
 0x220   : > { %v5100_v12 = vpop.f32.mrb[31].mxu0  ;;  %5697 = vmatpush3.bf16.msra.mxu1 %v6079_v22  ;;  %5733 = vmatpush3.bf16.msra.mxu0 %v6081_v35 }
 0x221   : > { %v7202_v29 = vadd.f32 %v5100_v12, %v5099_v63  ;;  %5734 = vmatprep.subr.bf16.mxu0 %v6082_v6 }
 0x222   : > { %5667 = vmatmul.mubr.bf16.gmra.mrb[64].mxu1 %v6869_v61 }
 0x223   : > { %5670 = vmatprep.mubr.bf16.mxu1 %v6899_v50 }
 0x224   : > { %5735 = vmatpush3.bf16.msra.mxu0 %v6082_v6 }
 0x225   : > { %v5102_v31 = vpop.f32.mrb[32].mxu0 }
 0x226   : > { %v5103_v49 = vpop.f32.mrb[33].mxu0 }
 0x227   : > { %v7209_v42 = vadd.f32 %v5103_v49, %v5102_v31  ;;  %v5105_v45 = vpop.f32.mrb[34].mxu0  ;;  %v6083_v49 = vld [vmem:[%s7869_s5 + $0x18] sm:$0xff]  }
 0x228   : > { %v5106_v37 = vpop.f32.mrb[35].mxu0  ;;  %5736 = vmatprep.subr.bf16.mxu0 %v6083_v49 }
 0x229   : > { %v7211_v40 = vadd.f32 %v5106_v37, %v5105_v45  ;;  %5737 = vmatpush3.bf16.msra.mxu0 %v6083_v49 }
 0x22a   : > { %5671 = vmatmul.mubr.bf16.gmra.mrb[68].mxu1 %v6916_v18 }
 0x22b   : > { %5674 = vmatprep.mubr.bf16.mxu1 %v6937_v47 }
 0x22d   : > { %v5108_v61 = vpop.f32.mrb[36].mxu0 }
 0x22e   : > { %v5109_v50 = vpop.f32.mrb[37].mxu0 }
 0x22f   : > { %v7215_v11 = vadd.f32 %v5109_v50, %v5108_v61  ;;  %v5111_v8 = vpop.f32.mrb[38].mxu0 }
 0x230   : > { %v5112_v20 = vpop.f32.mrb[39].mxu0 }
 0x231   : > { %v7217_v46 = vadd.f32 %v5112_v20, %v5111_v8 }
 0x232   : > { %5675 = vmatmul.mubr.bf16.gmra.mrb[72].mxu1 %v6950_v1 }
 0x233   : > { %5678 = vmatprep.mubr.bf16.mxu1 %v6969_v55 }
 0x235   : > { %v5114_v33 = vpop.f32.mrb[40].mxu0 }
 0x236   : > { %v5115_v18 = vpop.f32.mrb[41].mxu0 }
 0x237   : > { %v7224_v53 = vadd.f32 %v5115_v18, %v5114_v33  ;;  %v5117_v47 = vpop.f32.mrb[42].mxu0 }
 0x238   : > { %v5118_v62 = vpop.f32.mrb[43].mxu0 }
 0x239   : > { %v7226_v57 = vadd.f32 %v5118_v62, %v5117_v47 }
 0x23a   : > { %5679 = vmatmul.mubr.bf16.gmra.mrb[76].mxu1 %v6953_v2 }
 0x23b   : > { %5698 = vmatprep.mubr.bf16.mxu1 %v7027_v23 }
 0x23d   : > { %v5120_v1 = vpop.f32.mrb[44].mxu0 }
 0x23e   : > { %v5121_v55 = vpop.f32.mrb[45].mxu0 }
 0x23f   : > { %v7230_v43 = vadd.f32 %v5121_v55, %v5120_v1  ;;  %v5123_v24 = vpop.f32.mrb[46].mxu0 }
 0x240   : > { %v5124_v7 = vpop.f32.mrb[47].mxu0 }
 0x241   : > { %v7232_v39 = vadd.f32 %v5124_v7, %v5123_v24 }
 0x242   : > { %5699 = vmatmul.mubr.bf16.vlgmr.msra.gmra.mrb[48].mxu1 %v7036_v28 }
 0x243   : > { %5702 = vmatprep.mubr.bf16.mxu1 %v7045_v34 }
 0x245   : > { %v5126_v17 = vpop.f32.mrb[48].mxu0 }
 0x246   : > { %v5127_v26 = vpop.f32.mrb[49].mxu0 }
 0x247   : > { %v7239_v14 = vadd.f32 %v5127_v26, %v5126_v17  ;;  %v5129_v23 = vpop.f32.mrb[50].mxu0 }
 0x248   : > { %v5130_v22 = vpop.f32.mrb[51].mxu0 }
 0x249   : > { %v7241_v21 = vadd.f32 %v5130_v22, %v5129_v23 }
 0x24a   : > { %5703 = vmatmul.mubr.bf16.gmra.mrb[52].mxu1 %v7054_v30 }
 0x24b   : > { %5706 = vmatprep.mubr.bf16.mxu1 %v7063_v48 }
 0x24d   : > { %v5132_v28 = vpop.f32.mrb[52].mxu0 }
 0x24e   : > { %v5133_v34 = vpop.f32.mrb[53].mxu0 }
 0x24f   : > { %v7245_v16 = vadd.f32 %v5133_v34, %v5132_v28  ;;  %v5135_v63 = vpop.f32.mrb[54].mxu0  ;;  %v6084_v28 = vld [vmem:[%s7869_s5 + $0x20] sm:$0xff]  }
 0x250   : > { %v5136_v12 = vpop.f32.mrb[55].mxu0  ;;  %5738 = vmatprep.subr.bf16.mxu0 %v6084_v28 }
 0x251   : > { %v7247_v31 = vadd.f32 %v5136_v12, %v5135_v63  ;;  %5739 = vmatpush3.bf16.msra.mxu0 %v6084_v28  ;;  %v3037_v28 = vrot.slane %v6965_v52, 1 }
 0x252   : > { %5707 = vmatmul.mubr.bf16.gmra.mrb[56].mxu1 %v7072_v32 }
 0x253   : > { %5710 = vmatprep.mubr.bf16.mxu1 %v7081_v13 }
 0x255   : > { %v5138_v5 = vpop.f32.mrb[56].mxu0  ;;  %v5202_v45 = vpop.f32.mrb[80].mxu1 }
 0x256   : > { %v5139_v30 = vpop.f32.mrb[57].mxu0  ;;  %v5203_v61 = vpop.f32.mrb[81].mxu1 }
 0x257   : > { %v7254_v48 = vadd.f32 %v5139_v30, %v5138_v5  ;;  %v5141_v37 = vpop.f32.mrb[58].mxu0  ;;  %v5204_v8 = vadd.f32 %v5203_v61, %v5202_v45  ;;  %v5205_v20 = vpop.f32.mrb[82].mxu1 }
 0x258   : > { %v5142_v50 = vpop.f32.mrb[59].mxu0  ;;  %v5206_v32 = vpop.f32.mrb[83].mxu1 }
 0x259   : > { %v7256_v33 = vadd.f32 %v5142_v50, %v5141_v37  ;;  %v7259_v13 = vadd.f32 %v5204_v8, %v7123_v38  ;;  %v5207_v35 = vadd.f32 %v5206_v32, %v5205_v20 }
 0x25a   : > { %5711 = vmatmul.mubr.bf16.gmra.mrb[60].mxu1 %v7090_v25 }
 0x25b   : > { %v7263_v18 = vadd.f32 %v5207_v35, %v7126_v9  ;;  %5714 = vmatprep.mubr.bf16.mxu1 %v7099_v15 }
 0x25d   : > { %v5144_v47 = vpop.f32.mrb[60].mxu0  ;;  %v5208_v1 = vpop.f32.mrb[84].mxu1 }
 0x25e   : > { %v5145_v62 = vpop.f32.mrb[61].mxu0  ;;  %v5209_v7 = vpop.f32.mrb[85].mxu1 }
 0x25f   : > { %v7266_v55 = vadd.f32 %v5145_v62, %v5144_v47  ;;  %v5147_v24 = vpop.f32.mrb[62].mxu0  ;;  %v5210_v6 = vadd.f32 %v5209_v7, %v5208_v1  ;;  %v5211_v26 = vpop.f32.mrb[86].mxu1 }
 0x260   : > { %v5148_v17 = vpop.f32.mrb[63].mxu0  ;;  %v5212_v23 = vpop.f32.mrb[87].mxu1 }
 0x261   : > { %v7268_v38 = vadd.f32 %v5148_v17, %v5147_v24  ;;  %v7271_v25 = vadd.f32 %v5210_v6, %v7136_v19  ;;  %v5213_v9 = vadd.f32 %v5212_v23, %v5211_v26  ;;  %v6087_v23 = vld [vmem:[%s7869_s5 + $0x38] sm:$0xff]  }
 0x262   : > { %5715 = vmatmul.mubr.bf16.gmra.mrb[64].mxu1 %v7108_v60 }
 0x263   : > { %v7275_v15 = vadd.f32 %v5213_v9, %v7139_v51  ;;  %5718 = vmatprep.mubr.bf16.mxu1 %v7117_v41 }
 0x265   : > { %v5150_v22 = vpop.f32.mrb[64].mxu0  ;;  %v5214_v63 = vpop.f32.mrb[88].mxu1 }
 0x266   : > { %v5151_v34 = vpop.f32.mrb[65].mxu0  ;;  %v5215_v19 = vpop.f32.mrb[89].mxu1 }
 0x267   : > { %v7281_v12 = vadd.f32 %v5151_v34, %v5150_v22  ;;  %v5153_v5 = vpop.f32.mrb[66].mxu0  ;;  %v5216_v30 = vadd.f32 %v5215_v19, %v5214_v63  ;;  %v5217_v60 = vpop.f32.mrb[90].mxu1 }
 0x268   : > { %v5154_v49 = vpop.f32.mrb[67].mxu0  ;;  %v5218_v45 = vpop.f32.mrb[91].mxu1 }
 0x269   : > { %v7283_v51 = vadd.f32 %v5154_v49, %v5153_v5  ;;  %v7286_v41 = vadd.f32 %v5216_v30, %v7156_v44  ;;  %v5219_v37 = vadd.f32 %v5218_v45, %v5217_v60 }
 0x26a   : > { %5719 = vmatmul.mubr.bf16.gmra.mrb[68].mxu1 %v7130_v10  ;;  %v6085_v10 = vld [vmem:[%s7869_s5 + $0x28] sm:$0xff]  }
 0x26b   : > { %v7290_v61 = vadd.f32 %v5219_v37, %v7159_v0  ;;  %5722 = vmatprep.mubr.bf16.mxu1 %v7146_v56  ;;  %v6086_v56 = vld [vmem:[%s7869_s5 + $0x30] sm:$0xff]   ;;  %5740 = vmatprep.subr.bf16.mxu0 %v6085_v10 }
 0x26c   : > { %5741 = vmatpush3.bf16.msra.mxu0 %v6085_v10 }
 0x26d   : > { %v5156_v50 = vpop.f32.mrb[68].mxu0  ;;  %v5220_v20 = vpop.f32.mrb[92].mxu1  ;;  %5742 = vmatprep.subr.bf16.mxu0 %v6086_v56 }
 0x26e   : > { %v5157_v8 = vpop.f32.mrb[69].mxu0  ;;  %v5221_v47 = vpop.f32.mrb[93].mxu1 }
 0x26f   : > { %v7293_v32 = vadd.f32 %v5157_v8, %v5156_v50  ;;  %v5159_v35 = vpop.f32.mrb[70].mxu0  ;;  %v5222_v1 = vadd.f32 %v5221_v47, %v5220_v20  ;;  %v5223_v24 = vpop.f32.mrb[94].mxu1 }
 0x270   : > { %v5160_v62 = vpop.f32.mrb[71].mxu0  ;;  %v5224_v7 = vpop.f32.mrb[95].mxu1  ;;  %5743 = vmatpush3.bf16.msra.mxu0 %v6086_v56 }
 0x271   : > { %v7295_v44 = vadd.f32 %v5160_v62, %v5159_v35  ;;  %v7304_v0 = vadd.f32 %v5222_v1, %v7174_v36  ;;  %v5225_v17 = vadd.f32 %v5224_v7, %v5223_v24  ;;  %v3036_v36 = vrot.slane %v6953_v2, 1  ;;  %5744 = vmatprep.subr.bf16.mxu0 %v6087_v23 }
 0x272   : > { %5723 = vmatmul.mubr.bf16.gmra.mrb[72].mxu1 %v7166_v3 }
 0x273   : > { %v7308_v6 = vadd.f32 %v5225_v17, %v7176_v54  ;;  %5726 = vmatprep.mubr.bf16.mxu1 %v7183_v4  ;;  %v3038_v2 = vsel %vm2984_vm6, %v3036_v36, %v3037_v28 }
 0x274   : > { %5745 = vmatpush3.bf16.msra.mxu0 %v6087_v23 }
 0x275   : > { %v5338_v26 = vpop.f32.mrb[72].mxu0  ;;  %v5226_v22 = vpop.f32.mrb[96].mxu1 }
 0x276   : > { %v5339_v9 = vpop.f32.mrb[73].mxu0  ;;  %v5227_v63 = vpop.f32.mrb[97].mxu1 }
 0x277   : > { %v5340_v3 = vadd.f32 %v5339_v9, %v5338_v26  ;;  %v5341_v34 = vpop.f32.mrb[74].mxu0  ;;  %v5228_v54 = vadd.f32 %v5227_v63, %v5226_v22  ;;  %v5229_v19 = vpop.f32.mrb[98].mxu1 }
 0x278   : > { %v5342_v5 = vpop.f32.mrb[75].mxu0  ;;  %v5230_v49 = vpop.f32.mrb[99].mxu1 }
 0x279   : > { %v5343_v4 = vadd.f32 %v5342_v5, %v5341_v34  ;;  %v7317_v30 = vadd.f32 %v7259_v13, %v5340_v3  ;;  %v7320_v60 = vadd.f32 %v5228_v54, %v7190_v59  ;;  %v5231_v45 = vadd.f32 %v5230_v49, %v5229_v19 }
 0x27a   : > { %5727 = vmatmul.mubr.bf16.gmra.mrb[76].mxu1 %v3038_v2 }
 0x27b   : > { %v7324_v52 = vadd.f32 %v7263_v18, %v5343_v4  ;;  %v7327_v37 = vadd.f32 %v5231_v45, %v7192_v58 }
 0x27d   : > { %v5344_v50 = vpop.f32.mrb[76].mxu0  ;;  %v5232_v20 = vpop.f32.mrb[100].mxu1 }
 0x27e   : > { %v5345_v8 = vpop.f32.mrb[77].mxu0  ;;  %v5233_v47 = vpop.f32.mrb[101].mxu1 }
 0x27f   : > { %v5346_v35 = vadd.f32 %v5345_v8, %v5344_v50  ;;  %v5347_v13 = vpop.f32.mrb[78].mxu0  ;;  %v5234_v62 = vadd.f32 %v5233_v47, %v5232_v20  ;;  %v5235_v1 = vpop.f32.mrb[102].mxu1 }
 0x280   : > { %v5348_v59 = vpop.f32.mrb[79].mxu0  ;;  %v5236_v7 = vpop.f32.mrb[103].mxu1 }
 0x281   : > { %v5349_v24 = vadd.f32 %v5348_v59, %v5347_v13  ;;  %v7330_v10 = vadd.f32 %v7271_v25, %v5346_v35  ;;  %v7333_v18 = vadd.f32 %v5234_v62, %v7200_v27  ;;  %v5237_v58 = vadd.f32 %v5236_v7, %v5235_v1 }
 0x283   : > { %v7336_v56 = vadd.f32 %v7275_v15, %v5349_v24  ;;  %v7339_v17 = vadd.f32 %v5237_v58, %v7202_v29 }
 0x285   : > { %v5350_v26 = vpop.f32.mrb[80].mxu0  ;;  %v5238_v9 = vpop.f32.mrb[104].mxu1 }
 0x286   : > { %v5351_v23 = vpop.f32.mrb[81].mxu0  ;;  %v5239_v28 = vpop.f32.mrb[105].mxu1 }
 0x287   : > { %v5352_v22 = vadd.f32 %v5351_v23, %v5350_v26  ;;  %v5353_v36 = vpop.f32.mrb[82].mxu0  ;;  %v5240_v3 = vadd.f32 %v5239_v28, %v5238_v9  ;;  %v5241_v25 = vpop.f32.mrb[106].mxu1 }
 0x288   : > { %v5354_v34 = vpop.f32.mrb[83].mxu0  ;;  %v5242_v54 = vpop.f32.mrb[107].mxu1 }
 0x289   : > { %v5355_v63 = vadd.f32 %v5354_v34, %v5353_v36  ;;  %v7342_v27 = vadd.f32 %v7286_v41, %v5352_v22  ;;  %v7345_v15 = vadd.f32 %v5240_v3, %v7209_v42  ;;  %v5243_v5 = vadd.f32 %v5242_v54, %v5241_v25 }
 0x28b   : > { %v7348_v29 = vadd.f32 %v7290_v61, %v5355_v63  ;;  %v7351_v19 = vadd.f32 %v5243_v5, %v7211_v40 }
 0x28d   : > { %v5356_v4 = vpop.f32.mrb[84].mxu0  ;;  %v5244_v45 = vpop.f32.mrb[108].mxu1 }
 0x28e   : > { %v5357_v49 = vpop.f32.mrb[85].mxu0  ;;  %v5245_v8 = vpop.f32.mrb[109].mxu1 }
 0x28f   : > { %v5358_v2 = vadd.f32 %v5357_v49, %v5356_v4  ;;  %v5359_v50 = vpop.f32.mrb[86].mxu0  ;;  %v5246_v20 = vadd.f32 %v5245_v8, %v5244_v45  ;;  %v5247_v41 = vpop.f32.mrb[110].mxu1 }
 0x290   : > { %v5360_v35 = vpop.f32.mrb[87].mxu0  ;;  %v5248_v47 = vpop.f32.mrb[111].mxu1 }
 0x291   : > { %v5361_v13 = vadd.f32 %v5360_v35, %v5359_v50  ;;  %v7354_v42 = vadd.f32 %v7304_v0, %v5358_v2  ;;  %v7357_v61 = vadd.f32 %v5246_v20, %v7215_v11  ;;  %v5249_v62 = vadd.f32 %v5248_v47, %v5247_v41 }
 0x293   : > { %v7360_v40 = vadd.f32 %v7308_v6, %v5361_v13  ;;  %v7363_v59 = vadd.f32 %v5249_v62, %v7217_v46 }
 0x295   : > { %v5362_v1 = vpop.f32.mrb[88].mxu0  ;;  %v5250_v7 = vpop.f32.mrb[112].mxu1 }
 0x296   : > { %v5363_v24 = vpop.f32.mrb[89].mxu0  ;;  %v5251_v23 = vpop.f32.mrb[113].mxu1 }
 0x297   : > { %v5364_v58 = vadd.f32 %v5363_v24, %v5362_v1  ;;  %v5365_v26 = vpop.f32.mrb[90].mxu0  ;;  %v5252_v9 = vadd.f32 %v5251_v23, %v5250_v7  ;;  %v5253_v0 = vpop.f32.mrb[114].mxu1 }
 0x298   : > { %v5366_v22 = vpop.f32.mrb[91].mxu0  ;;  %v5254_v28 = vpop.f32.mrb[115].mxu1 }
 0x299   : > { %v5367_v36 = vadd.f32 %v5366_v22, %v5365_v26  ;;  %v7366_v11 = vadd.f32 %v7320_v60, %v5364_v58  ;;  %v7369_v6 = vadd.f32 %v5252_v9, %v7224_v53  ;;  %v5255_v3 = vadd.f32 %v5254_v28, %v5253_v0 }
 0x29b   : > { %v7372_v46 = vadd.f32 %v7327_v37, %v5367_v36  ;;  %v7375_v34 = vadd.f32 %v5255_v3, %v7226_v57 }
 0x29d   : > { %v5368_v25 = vpop.f32.mrb[92].mxu0  ;;  %v5256_v54 = vpop.f32.mrb[116].mxu1 }
 0x29e   : > { %v5369_v63 = vpop.f32.mrb[93].mxu0  ;;  %v5257_v49 = vpop.f32.mrb[117].mxu1 }
 0x29f   : > { %v5370_v5 = vadd.f32 %v5369_v63, %v5368_v25  ;;  %v5371_v4 = vpop.f32.mrb[94].mxu0  ;;  %v5258_v45 = vadd.f32 %v5257_v49, %v5256_v54  ;;  %v5259_v60 = vpop.f32.mrb[118].mxu1 }
 0x2a0   : > { %v5372_v2 = vpop.f32.mrb[95].mxu0  ;;  %v5260_v8 = vpop.f32.mrb[119].mxu1 }
 0x2a1   : > { %v5373_v50 = vadd.f32 %v5372_v2, %v5371_v4  ;;  %v7378_v53 = vadd.f32 %v7333_v18, %v5370_v5  ;;  %v7381_v37 = vadd.f32 %v5258_v45, %v7230_v43  ;;  %v5261_v20 = vadd.f32 %v5260_v8, %v5259_v60 }
 0x2a3   : > { %v7384_v57 = vadd.f32 %v7339_v17, %v5373_v50  ;;  %v7387_v35 = vadd.f32 %v5261_v20, %v7232_v39 }
 0x2a5   : > { %v5374_v41 = vpop.f32.mrb[96].mxu0  ;;  %v5262_v47 = vpop.f32.mrb[120].mxu1 }
 0x2a6   : > { %v5375_v13 = vpop.f32.mrb[97].mxu0  ;;  %v5263_v24 = vpop.f32.mrb[121].mxu1 }
 0x2a7   : > { %v5376_v62 = vadd.f32 %v5375_v13, %v5374_v41  ;;  %v5377_v1 = vpop.f32.mrb[98].mxu0  ;;  %v5264_v7 = vadd.f32 %v5263_v24, %v5262_v47  ;;  %v5265_v18 = vpop.f32.mrb[122].mxu1 }
 0x2a8   : > { %v5378_v58 = vpop.f32.mrb[99].mxu0  ;;  %v5266_v23 = vpop.f32.mrb[123].mxu1 }
 0x2a9   : > { %v5379_v26 = vadd.f32 %v5378_v58, %v5377_v1  ;;  %v7390_v43 = vadd.f32 %v7345_v15, %v5376_v62  ;;  %v7393_v17 = vadd.f32 %v5264_v7, %v7239_v14  ;;  %v5267_v9 = vadd.f32 %v5266_v23, %v5265_v18 }
 0x2ab   : > { %v7396_v39 = vadd.f32 %v7351_v19, %v5379_v26  ;;  %v7399_v22 = vadd.f32 %v5267_v9, %v7241_v21 }
 0x2ad   : > { %v5380_v0 = vpop.f32.mrb[100].mxu0  ;;  %v5268_v28 = vpop.f32.mrb[124].mxu1 }
 0x2ae   : > { %v5381_v36 = vpop.f32.mrb[101].mxu0  ;;  %v5269_v63 = vpop.f32.mrb[125].mxu1 }
 0x2af   : > { %v5382_v3 = vadd.f32 %v5381_v36, %v5380_v0  ;;  %v5383_v25 = vpop.f32.mrb[102].mxu0  ;;  %v5270_v54 = vadd.f32 %v5269_v63, %v5268_v28  ;;  %v5271_v15 = vpop.f32.mrb[126].mxu1 }
 0x2b0   : > { %v5384_v5 = vpop.f32.mrb[103].mxu0  ;;  %v5272_v49 = vpop.f32.mrb[127].mxu1 }
 0x2b1   : > { %v5385_v4 = vadd.f32 %v5384_v5, %v5383_v25  ;;  %v7402_v14 = vadd.f32 %v7357_v61, %v5382_v3  ;;  %v7405_v19 = vadd.f32 %v5270_v54, %v7245_v16  ;;  %v5273_v45 = vadd.f32 %v5272_v49, %v5271_v15 }
 0x2b3   : > { %v7408_v21 = vadd.f32 %v7363_v59, %v5385_v4  ;;  %v7411_v2 = vadd.f32 %v5273_v45, %v7247_v31 }
 0x2b5   : > { %v5386_v60 = vpop.f32.mrb[104].mxu0  ;;  %v5274_v8 = vpop.f32.mrb[128].mxu1 }
 0x2b6   : > { %v5387_v50 = vpop.f32.mrb[105].mxu0  ;;  %v5275_v13 = vpop.f32.mrb[129].mxu1 }
 0x2b7   : > { %v5388_v20 = vadd.f32 %v5387_v50, %v5386_v60  ;;  %v5389_v41 = vpop.f32.mrb[106].mxu0  ;;  %v5276_v47 = vadd.f32 %v5275_v13, %v5274_v8  ;;  %v5277_v61 = vpop.f32.mrb[130].mxu1 }
 0x2b8   : > { %v5390_v62 = vpop.f32.mrb[107].mxu0  ;;  %v5278_v24 = vpop.f32.mrb[131].mxu1 }
 0x2b9   : > { %v5391_v1 = vadd.f32 %v5390_v62, %v5389_v41  ;;  %v7414_v16 = vadd.f32 %v7369_v6, %v5388_v20  ;;  %v5853_v59 = vadd.f32 %v5276_v47, %v7254_v48  ;;  %v5279_v7 = vadd.f32 %v5278_v24, %v5277_v61 }
 0x2bb   : > { %v7418_v31 = vadd.f32 %v7375_v34, %v5391_v1  ;;  %v5859_v58 = vadd.f32 %v5279_v7, %v7256_v33 }
 0x2bd   : > { %v5392_v18 = vpop.f32.mrb[108].mxu0  ;;  %v5280_v23 = vpop.f32.mrb[132].mxu1 }
 0x2be   : > { %v5393_v26 = vpop.f32.mrb[109].mxu0  ;;  %v5281_v36 = vpop.f32.mrb[133].mxu1 }
 0x2bf   : > { %v5394_v9 = vadd.f32 %v5393_v26, %v5392_v18  ;;  %v5395_v0 = vpop.f32.mrb[110].mxu0  ;;  %v5282_v28 = vadd.f32 %v5281_v36, %v5280_v23  ;;  %v5283_v25 = vpop.f32.mrb[134].mxu1 }
 0x2c0   : > { %v5396_v3 = vpop.f32.mrb[111].mxu0  ;;  %v5284_v6 = vpop.f32.mrb[135].mxu1 }
 0x2c1   : > { %v5397_v63 = vadd.f32 %v5396_v3, %v5395_v0  ;;  %v7422_v54 = vadd.f32 %v7381_v37, %v5394_v9  ;;  %v5850_v48 = vadd.f32 %v5282_v28, %v7266_v55  ;;  %v5285_v34 = vadd.f32 %v5284_v6, %v5283_v25 }
 0x2c3   : > { %v7426_v5 = vadd.f32 %v7387_v35, %v5397_v63  ;;  %v5856_v33 = vadd.f32 %v5285_v34, %v7268_v38 }
 0x2c5   : > { %v5398_v15 = vpop.f32.mrb[112].mxu0  ;;  %v5286_v49 = vpop.f32.mrb[136].mxu1 }
 0x2c6   : > { %v5399_v4 = vpop.f32.mrb[113].mxu0  ;;  %v5287_v50 = vpop.f32.mrb[137].mxu1 }
 0x2c7   : > { %v5400_v45 = vadd.f32 %v5399_v4, %v5398_v15  ;;  %v5401_v60 = vpop.f32.mrb[114].mxu0  ;;  %v5288_v8 = vadd.f32 %v5287_v50, %v5286_v49  ;;  %v5289_v41 = vpop.f32.mrb[138].mxu1 }
 0x2c8   : > { %v5402_v20 = vpop.f32.mrb[115].mxu0  ;;  %v5290_v37 = vpop.f32.mrb[139].mxu1 }
 0x2c9   : > { %v5403_v13 = vadd.f32 %v5402_v20, %v5401_v60  ;;  %v7430_v47 = vadd.f32 %v7393_v17, %v5400_v45  ;;  %v5865_v55 = vadd.f32 %v5288_v8, %v7281_v12  ;;  %v5291_v35 = vadd.f32 %v5290_v37, %v5289_v41 }
 0x2cb   : > { %v7434_v62 = vadd.f32 %v7399_v22, %v5403_v13  ;;  %v5871_v38 = vadd.f32 %v5291_v35, %v7283_v51 }
 0x2cd   : > { %v5404_v61 = vpop.f32.mrb[116].mxu0  ;;  %v5292_v24 = vpop.f32.mrb[140].mxu1 }
 0x2ce   : > { %v5405_v1 = vpop.f32.mrb[117].mxu0  ;;  %v5293_v26 = vpop.f32.mrb[141].mxu1 }
 0x2cf   : > { %v5406_v7 = vadd.f32 %v5405_v1, %v5404_v61  ;;  %v5407_v18 = vpop.f32.mrb[118].mxu0  ;;  %v5294_v23 = vadd.f32 %v5293_v26, %v5292_v24  ;;  %v5295_v0 = vpop.f32.mrb[142].mxu1 }
 0x2d0   : > { %v5408_v9 = vpop.f32.mrb[119].mxu0  ;;  %v5296_v17 = vpop.f32.mrb[143].mxu1 }
 0x2d1   : > { %v5409_v36 = vadd.f32 %v5408_v9, %v5407_v18  ;;  %v7438_v28 = vadd.f32 %v7405_v19, %v5406_v7  ;;  %v5862_v12 = vadd.f32 %v5294_v23, %v7293_v32  ;;  %v5297_v22 = vadd.f32 %v5296_v17, %v5295_v0  ;;  %v7464_v0 = vld [vmem:[%s7870_s6 + $0x2] ss:$0 sm:$0xff]  ;;  %v7470_v17 = vld [vmem:[%s7870_s6 + $0x3] ss:$0 sm:$0xff] }
 0x2d3   : > { %v7442_v3 = vadd.f32 %v7411_v2, %v5409_v36  ;;  %v5868_v51 = vadd.f32 %v5297_v22, %v7295_v44 }
 0x2d5   : > { %v5410_v25 = vpop.f32.mrb[120].mxu0 }
 0x2d6   : > { %v5411_v63 = vpop.f32.mrb[121].mxu0 }
 0x2d7   : > { %v5412_v6 = vadd.f32 %v5411_v63, %v5410_v25  ;;  %v5413_v34 = vpop.f32.mrb[122].mxu0 }
 0x2d8   : > { %v5414_v15 = vpop.f32.mrb[123].mxu0 }
 0x2d9   : > { %v5415_v4 = vadd.f32 %v5414_v15, %v5413_v34  ;;  %v7445_v49 = vadd.f32 %v5853_v59, %v5412_v6 }
 0x2db   : > { %v7447_v45 = vadd.f32 %v5859_v58, %v5415_v4 }
 0x2dd   : > { %v5416_v19 = vpop.f32.mrb[124].mxu0 }
 0x2de   : > { %v5417_v60 = vpop.f32.mrb[125].mxu0 }
 0x2df   : > { %v5418_v50 = vadd.f32 %v5417_v60, %v5416_v19  ;;  %v5419_v32 = vpop.f32.mrb[126].mxu0 }
 0x2e0   : > { %v5420_v8 = vpop.f32.mrb[127].mxu0 }
 0x2e1   : > { %v5421_v20 = vadd.f32 %v5420_v8, %v5419_v32  ;;  %v7449_v2 = vadd.f32 %v5850_v48, %v5418_v50 }
 0x2e3   : > { %v7451_v41 = vadd.f32 %v5856_v33, %v5421_v20 }
 0x2e5   : > { %v5422_v44 = vpop.f32.mrb[128].mxu0 }
 0x2e6   : > { %v5423_v13 = vpop.f32.mrb[129].mxu0 }
 0x2e7   : > { %v5424_v37 = vadd.f32 %v5423_v13, %v5422_v44  ;;  %v5425_v35 = vpop.f32.mrb[130].mxu0 }
 0x2e8   : > { %v5426_v61 = vpop.f32.mrb[131].mxu0 }
 0x2e9   : > { %v5427_v1 = vadd.f32 %v5426_v61, %v5425_v35  ;;  %v7453_v59 = vadd.f32 %v5865_v55, %v5424_v37 }
 0x2eb   : > { %v7455_v58 = vadd.f32 %v5871_v38, %v5427_v1 }
 0x2ed   : > { %v5428_v24 = vpop.f32.mrb[132].mxu0 }
 0x2ee   : > { %v5429_v7 = vpop.f32.mrb[133].mxu0 }
 0x2ef   : > { %v5430_v18 = vadd.f32 %v5429_v7, %v5428_v24  ;;  %v5431_v26 = vpop.f32.mrb[134].mxu0 }
 0x2f0   : > { %v5432_v23 = vpop.f32.mrb[135].mxu0 }
 0x2f1   : > { %v5433_v9 = vadd.f32 %v5432_v23, %v5431_v26  ;;  %v7457_v48 = vadd.f32 %v5862_v12, %v5430_v18 }
 0x2f3   : > { %v7459_v33 = vadd.f32 %v5868_v51, %v5433_v9 }
 0x315   : > { %v5700_v36 = vpop.f32.mrb[48].mxu1 }
 0x316   : > { %v5780_v55 = vadd.f32 %v7330_v10, %v5700_v36  ;;  %v3445_v38 = vpop.f32.mrb[49].mxu1 }
 0x317   : > { %v5783_v22 = vadd.f32 %v7317_v30, %v3445_v38  ;;  %v5701_v12 = vpop.f32.mrb[50].mxu1 }
 0x318   : > { %v3610_v51 = vmul.f32 %v5780_v55, %v7464_v0  ;;  %v5786_v25 = vadd.f32 %v7336_v56, %v5701_v12  ;;  %v3448_v63 = vpop.f32.mrb[51].mxu1 }
 0x319   : > { %v3608_v6 = vmul.f32 %v5783_v22, %v7464_v0  ;;  %v5789_v34 = vadd.f32 %v7324_v52, %v3448_v63 }
 0x31a   : > { %v3646_v10 = vadd.f32 %v7470_v17, %v3610_v51  ;;  %v3611_v15 = vmul.f32 %v5786_v25, %v7464_v0 }
 0x31b   : > { %v3644_v4 = vadd.f32 %v7470_v17, %v3608_v6  ;;  %v3609_v19 = vmul.f32 %v5789_v34, %v7464_v0 }
 0x31c   : > { %v3647_v30 = vadd.f32 %v7470_v17, %v3611_v15  ;;  %v4752_v32 = vclamps-f32 %v3646_v10, 1.0 }
 0x31d   : > { %v3645_v60 = vadd.f32 %v7470_v17, %v3609_v19  ;;  %v5704_v50 = vpop.f32.mrb[52].mxu1  ;;  %v4750_v44 = vclamps-f32 %v3644_v4, 1.0 }
 0x31e   : > { %v4753_v56 = vclamps-f32 %v3647_v30, 1.0  ;;  %v5792_v8 = vadd.f32 %v7354_v42, %v5704_v50  ;;  %v3461_v20 = vpop.f32.mrb[53].mxu1 }
 0x31f   : > { %v4751_v52 = vclamps-f32 %v3645_v60, 1.0  ;;  %v5795_v13 = vadd.f32 %v7342_v27, %v3461_v20  ;;  %v5705_v37 = vpop.f32.mrb[54].mxu1 }
 0x320   : > { %v3741_v35 = vpack.c.bf16 %v4753_v56, %v4752_v32  ;;  %v3614_v61 = vmul.f32 %v5792_v8, %v7464_v0  ;;  %v5798_v1 = vadd.f32 %v7360_v40, %v5705_v37  ;;  %v3464_v24 = vpop.f32.mrb[55].mxu1 }
 0x321   : > { %v3612_v7 = vmul.f32 %v5795_v13, %v7464_v0  ;;  %v5801_v18 = vadd.f32 %v7348_v29, %v3464_v24  ;;  %v3740_v26 = vpack.c.bf16 %v4751_v52, %v4750_v44 }
 0x322   : > { %v3650_v23 = vadd.f32 %v7470_v17, %v3614_v61  ;;  %v3615_v42 = vmul.f32 %v5798_v1, %v7464_v0 }
 0x323   : > { %v3648_v9 = vadd.f32 %v7470_v17, %v3612_v7  ;;  %v3613_v27 = vmul.f32 %v5801_v18, %v7464_v0  ;;  %5746 = vmatprep.mubr.bf16.mxu0 %v3740_v26 }
 0x324   : > { %v3651_v36 = vadd.f32 %v7470_v17, %v3615_v42  ;;  %5747 = vmatmul.mubr.bf16.vlgmr.msra.gmra.mrb[136].mxu0 %v3741_v35  ;;  %v4756_v38 = vclamps-f32 %v3650_v23, 1.0 }
 0x325   : > { %v3649_v40 = vadd.f32 %v7470_v17, %v3613_v27  ;;  %v5708_v55 = vpop.f32.mrb[56].mxu1  ;;  %v4754_v51 = vclamps-f32 %v3648_v9, 1.0 }
 0x326   : > { %v4757_v22 = vclamps-f32 %v3651_v36, 1.0  ;;  %v5804_v29 = vadd.f32 %v7378_v53, %v5708_v55  ;;  %v3477_v12 = vpop.f32.mrb[57].mxu1 }
 0x327   : > { %v4755_v25 = vclamps-f32 %v3649_v40, 1.0  ;;  %v5807_v63 = vadd.f32 %v7366_v11, %v3477_v12  ;;  %v5709_v6 = vpop.f32.mrb[58].mxu1 }
 0x328   : > { %v3618_v34 = vmul.f32 %v5804_v29, %v7464_v0  ;;  %v5810_v10 = vadd.f32 %v7384_v57, %v5709_v6  ;;  %v3480_v15 = vpop.f32.mrb[59].mxu1  ;;  %v3743_v4 = vpack.c.bf16 %v4757_v22, %v4756_v38 }
 0x329   : > { %v3616_v19 = vmul.f32 %v5807_v63, %v7464_v0  ;;  %v5813_v30 = vadd.f32 %v7372_v46, %v3480_v15  ;;  %v3742_v60 = vpack.c.bf16 %v4755_v25, %v4754_v51 }
 0x32a   : > { %v3654_v50 = vadd.f32 %v7470_v17, %v3618_v34  ;;  %v3619_v53 = vmul.f32 %v5810_v10, %v7464_v0 }
 0x32b   : > { %v3652_v32 = vadd.f32 %v7470_v17, %v3616_v19  ;;  %v3617_v11 = vmul.f32 %v5813_v30, %v7464_v0  ;;  %5750 = vmatprep.mubr.bf16.mxu0 %v3742_v60 }
 0x32c   : > { %v3655_v56 = vadd.f32 %v7470_v17, %v3619_v53  ;;  %5751 = vmatmul.mubr.bf16.gmra.mrb[140].mxu0 %v3743_v4  ;;  %v4760_v20 = vclamps-f32 %v3654_v50, 1.0 }
 0x32d   : > { %v3653_v57 = vadd.f32 %v7470_v17, %v3617_v11  ;;  %v5712_v8 = vpop.f32.mrb[60].mxu1  ;;  %v4758_v13 = vclamps-f32 %v3652_v32, 1.0 }
 0x32e   : > { %v4761_v44 = vclamps-f32 %v3655_v56, 1.0  ;;  %v5816_v46 = vadd.f32 %v7402_v14, %v5712_v8  ;;  %v3493_v52 = vpop.f32.mrb[61].mxu1 }
 0x32f   : > { %v4759_v37 = vclamps-f32 %v3653_v57, 1.0  ;;  %v5819_v35 = vadd.f32 %v7390_v43, %v3493_v52  ;;  %v5713_v61 = vpop.f32.mrb[62].mxu1 }
 0x330   : > { %v3622_v1 = vmul.f32 %v5816_v46, %v7464_v0  ;;  %v5822_v24 = vadd.f32 %v7408_v21, %v5713_v61  ;;  %v3496_v7 = vpop.f32.mrb[63].mxu1  ;;  %v3745_v18 = vpack.c.bf16 %v4761_v44, %v4760_v20 }
 0x331   : > { %v3620_v26 = vmul.f32 %v5819_v35, %v7464_v0  ;;  %v5825_v23 = vadd.f32 %v7396_v39, %v3496_v7  ;;  %v3744_v42 = vpack.c.bf16 %v4759_v37, %v4758_v13 }
 0x332   : > { %v3658_v9 = vadd.f32 %v7470_v17, %v3622_v1  ;;  %v3623_v14 = vmul.f32 %v5822_v24, %v7464_v0 }
 0x333   : > { %v3656_v27 = vadd.f32 %v7470_v17, %v3620_v26  ;;  %v3621_v43 = vmul.f32 %v5825_v23, %v7464_v0  ;;  %5754 = vmatprep.mubr.bf16.mxu0 %v3744_v42 }
 0x334   : > { %v3659_v36 = vadd.f32 %v7470_v17, %v3623_v14  ;;  %5755 = vmatmul.mubr.bf16.gmra.mrb[144].mxu0 %v3745_v18  ;;  %v4764_v55 = vclamps-f32 %v3658_v9, 1.0 }
 0x335   : > { %v3657_v21 = vadd.f32 %v7470_v17, %v3621_v43  ;;  %v5716_v40 = vpop.f32.mrb[64].mxu1  ;;  %v4762_v29 = vclamps-f32 %v3656_v27, 1.0 }
 0x336   : > { %v4765_v38 = vclamps-f32 %v3659_v36, 1.0  ;;  %v5828_v39 = vadd.f32 %v7422_v54, %v5716_v40  ;;  %v3509_v22 = vpop.f32.mrb[65].mxu1 }
 0x337   : > { %v4763_v12 = vclamps-f32 %v3657_v21, 1.0  ;;  %v5831_v51 = vadd.f32 %v7414_v16, %v3509_v22  ;;  %v5717_v25 = vpop.f32.mrb[66].mxu1 }
 0x338   : > { %v3626_v63 = vmul.f32 %v5828_v39, %v7464_v0  ;;  %v5834_v6 = vadd.f32 %v7426_v5, %v5717_v25  ;;  %v3512_v34 = vpop.f32.mrb[67].mxu1  ;;  %v3747_v10 = vpack.c.bf16 %v4765_v38, %v4764_v55 }
 0x339   : > { %v3624_v15 = vmul.f32 %v5831_v51, %v7464_v0  ;;  %v5837_v4 = vadd.f32 %v7418_v31, %v3512_v34  ;;  %v3746_v19 = vpack.c.bf16 %v4763_v12, %v4762_v29 }
 0x33a   : > { %v3662_v30 = vadd.f32 %v7470_v17, %v3626_v63  ;;  %v3627_v54 = vmul.f32 %v5834_v6, %v7464_v0 }
 0x33b   : > { %v3660_v60 = vadd.f32 %v7470_v17, %v3624_v15  ;;  %v3625_v16 = vmul.f32 %v5837_v4, %v7464_v0  ;;  %5758 = vmatprep.mubr.bf16.mxu0 %v3746_v19 }
 0x33c   : > { %v3663_v50 = vadd.f32 %v7470_v17, %v3627_v54  ;;  %5759 = vmatmul.mubr.bf16.gmra.mrb[148].mxu0 %v3747_v10  ;;  %v4768_v32 = vclamps-f32 %v3662_v30, 1.0 }
 0x33d   : > { %v3661_v5 = vadd.f32 %v7470_v17, %v3625_v16  ;;  %v5720_v53 = vpop.f32.mrb[68].mxu1  ;;  %v4766_v57 = vclamps-f32 %v3660_v60, 1.0 }
 0x33e   : > { %v4769_v11 = vclamps-f32 %v3663_v50, 1.0  ;;  %v5840_v31 = vadd.f32 %v7438_v28, %v5720_v53  ;;  %v3525_v56 = vpop.f32.mrb[69].mxu1 }
 0x33f   : > { %v4767_v8 = vclamps-f32 %v3661_v5, 1.0  ;;  %v5843_v20 = vadd.f32 %v7430_v47, %v3525_v56  ;;  %v5721_v44 = vpop.f32.mrb[70].mxu1 }
 0x340   : > { %v3630_v46 = vmul.f32 %v5840_v31, %v7464_v0  ;;  %v5846_v52 = vadd.f32 %v7442_v3, %v5721_v44  ;;  %v3528_v13 = vpop.f32.mrb[71].mxu1  ;;  %v3749_v37 = vpack.c.bf16 %v4769_v11, %v4768_v32 }
 0x341   : > { %v3628_v35 = vmul.f32 %v5843_v20, %v7464_v0  ;;  %v5849_v61 = vadd.f32 %v7434_v62, %v3528_v13  ;;  %v3748_v1 = vpack.c.bf16 %v4767_v8, %v4766_v57  ;;  %v6103_v13 = vld [vmem:[%s6260_s15 + $0x20] sm:$0xff] }
 0x342   : > { %v3666_v24 = vadd.f32 %v7470_v17, %v3630_v46  ;;  %v3631_v28 = vmul.f32 %v5846_v52, %v7464_v0 }
 0x343   : > { %v3664_v7 = vadd.f32 %v7470_v17, %v3628_v35  ;;  %v3629_v47 = vmul.f32 %v5849_v61, %v7464_v0  ;;  %5762 = vmatprep.mubr.bf16.mxu0 %v3748_v1  ;;  %v6105_v1 = vld [vmem:[%s6260_s15 + $0x8] sm:$0xff] }
 0x344   : > { %v3667_v18 = vadd.f32 %v7470_v17, %v3631_v28  ;;  %5763 = vmatmul.mubr.bf16.gmra.mrb[152].mxu0 %v3749_v37  ;;  %v4772_v23 = vclamps-f32 %v3666_v24, 1.0  ;;  %v4036_v37 = vrot.slane %v6103_v13, 1  ;;  %v4031_v24 = vrot.slane %v6105_v1, 1  ;;  %v6106_v28 = vld [vmem:[%s6260_s15 + $0x28] sm:$0xff] }
 0x345   : > { %v3665_v3 = vadd.f32 %v7470_v17, %v3629_v47  ;;  %v5724_v26 = vpop.f32.mrb[72].mxu1  ;;  %v4770_v14 = vclamps-f32 %v3664_v7, 1.0  ;;  %v4038_v7 = vrot.slane %v6106_v28, 1  ;;  %v6107_v47 = vld [vmem:[%s6260_s15 + $0x10] sm:$0xff] }
 0x346   : > { %v4773_v42 = vclamps-f32 %v3667_v18, 1.0  ;;  %v5852_v62 = vadd.f32 %v7449_v2, %v5724_v26  ;;  %v3541_v9 = vpop.f32.mrb[73].mxu1  ;;  %v4033_v18 = vrot.slane %v6107_v47, 1 }
 0x347   : > { %v4771_v27 = vclamps-f32 %v3665_v3, 1.0  ;;  %v5855_v43 = vadd.f32 %v7445_v49, %v3541_v9  ;;  %v5725_v36 = vpop.f32.mrb[74].mxu1  ;;  %v6108_v3 = vld [vmem:[%s6260_s15 + $0x48] sm:$0xff]  ;;  %v7582_v9 = vsel %vm2984_vm6, %v4036_v37, %v4038_v7 }
 0x348   : > { %v3634_v21 = vmul.f32 %v5852_v62, %v7464_v0  ;;  %v5858_v40 = vadd.f32 %v7451_v41, %v5725_v36  ;;  %v3544_v55 = vpop.f32.mrb[75].mxu1  ;;  %v3751_v38 = vpack.c.bf16 %v4773_v42, %v4772_v23  ;;  %v4045_v26 = vrot.slane %v6108_v3, 1  ;;  %v6109_v23 = vld [vmem:[%s6260_s15 + $0x50] sm:$0xff]  ;;  %v6130_v7 = vld [vmem:[%s6260_s15 + $0xe8] sm:$0xff] }
 0x349   : > { %v3632_v39 = vmul.f32 %v5855_v43, %v7464_v0  ;;  %v5861_v22 = vadd.f32 %v7447_v45, %v3544_v55  ;;  %v3750_v29 = vpack.c.bf16 %v4771_v27, %v4770_v14  ;;  %v4046_v42 = vrot.slane %v6109_v23, 1  ;;  %v6110_v43 = vld [vmem:[%s6260_s15 + $0x30] sm:$0xff]  ;;  %v6112_v55 = vld [vmem:[%s6260_s15 + $0x58] sm:$0xff] }
 0x34a   : > { %v3670_v12 = vadd.f32 %v7470_v17, %v3634_v21  ;;  %v3635_v2 = vmul.f32 %v5858_v40, %v7464_v0  ;;  %v7585_v14 = vsel %vm2984_vm6, %v4031_v24, %v4033_v18  ;;  %v4040_v36 = vrot.slane %v6110_v43, 1  ;;  %v6111_v21 = vld [vmem:[%s6260_s15 + $0x38] sm:$0xff]  ;;  %v6131_v18 = vld [vmem:[%s6260_s15 + $0xd0] sm:$0xff] }
 0x34b   : > { %v3668_v51 = vadd.f32 %v7470_v17, %v3632_v39  ;;  %v3633_v49 = vmul.f32 %v5861_v22, %v7464_v0  ;;  %5766 = vmatprep.mubr.bf16.mxu0 %v3750_v29  ;;  %v7588_v27 = vsel %vm2984_vm6, %v4045_v26, %v4046_v42  ;;  %v4041_v40 = vrot.slane %v6111_v21, 1  ;;  %v6113_v39 = vld [vmem:[%s6260_s15 + $0x40] sm:$0xff]  ;;  %v6114_v29 = vld [vmem:[%s6260_s15 + $0x78] sm:$0xff]  ;;  %v6132_v26 = vld [vmem:[%s6260_s15 + $0x108] sm:$0xff] }
 0x34c   : > { %v3671_v25 = vadd.f32 %v7470_v17, %v3635_v2  ;;  %5767 = vmatmul.mubr.bf16.gmra.mrb[156].mxu0 %v3751_v38  ;;  %v4776_v6 = vclamps-f32 %v3670_v12, 1.0  ;;  %v4048_v38 = vrot.slane %v6112_v55, 1  ;;  %v4043_v22 = vrot.slane %v6113_v39, 1  ;;  %v6115_v2 = vld [vmem:[%s6260_s15 + $0x80] sm:$0xff] }
 0x34d   : > { %v3669_v41 = vadd.f32 %v7470_v17, %v3633_v49  ;;  %v5728_v63 = vpop.f32.mrb[76].mxu1  ;;  %v4774_v15 = vclamps-f32 %v3668_v51, 1.0  ;;  %v4055_v12 = vrot.slane %v6114_v29, 1  ;;  %v4056_v51 = vrot.slane %v6115_v2, 1 }
 0x34e   : > { %v4777_v34 = vclamps-f32 %v3671_v25, 1.0  ;;  %v5864_v45 = vadd.f32 %v7457_v48, %v5728_v63  ;;  %v3557_v10 = vpop.f32.mrb[77].mxu1  ;;  %v7597_v49 = vsel %vm2984_vm6, %v4040_v36, %v4041_v40  ;;  %v7600_v25 = vsel %vm2984_vm6, %v4046_v42, %v4048_v38  ;;  %v6133_v42 = vld [vmem:[%s6260_s15 + $0x110] sm:$0xff] }
 0x34f   : > { %v4775_v4 = vclamps-f32 %v3669_v41, 1.0  ;;  %v5867_v19 = vadd.f32 %v7453_v59, %v3557_v10  ;;  %v5729_v30 = vpop.f32.mrb[78].mxu1  ;;  %v7603_v41 = vsel %vm2984_vm6, %v4041_v40, %v4043_v22  ;;  %v7606_v63 = vsel %vm2984_vm6, %v4055_v12, %v4056_v51  ;;  %v6134_v38 = vld [vmem:[%s6260_s15 + $0xf0] sm:$0xff]  ;;  %v6135_v22 = vld [vmem:[%s6260_s15 + $0xf8] sm:$0xff] }
 0x350   : > { %v3638_v54 = vmul.f32 %v5864_v45, %v7464_v0  ;;  %v5870_v60 = vadd.f32 %v7459_v33, %v5729_v30  ;;  %v3560_v16 = vpop.f32.mrb[79].mxu1  ;;  %v3753_v50 = vpack.c.bf16 %v4777_v34, %v4776_v6  ;;  %v6116_v6 = vld [vmem:[%s6260_s15 + $0x60] sm:$0xff]  ;;  %v6117_v45 = vld [vmem:[%s6260_s15 + $0x68] sm:$0xff]  ;;  %v4078_v47 = vrot.slane %v6130_v7, 1  ;;  %v6136_v12 = vld [vmem:[%s6260_s15 + $0x118] sm:$0xff] }
 0x351   : > { %v3636_v5 = vmul.f32 %v5867_v19, %v7464_v0  ;;  %v5873_v53 = vadd.f32 %v7455_v58, %v3560_v16  ;;  %v3752_v32 = vpack.c.bf16 %v4775_v4, %v4774_v15  ;;  %v4050_v34 = vrot.slane %v6116_v6, 1  ;;  %v6118_v15 = vld [vmem:[%s6260_s15 + $0x88] sm:$0xff]  ;;  %v6119_v19 = vld [vmem:[%s6260_s15 + $0x70] sm:$0xff] }
 0x352   : > { %v3674_v11 = vadd.f32 %v7470_v17, %v3638_v54  ;;  %v3639_v48 = vmul.f32 %v5870_v60, %v7464_v0  ;;  %v4051_v10 = vrot.slane %v6117_v45, 1  ;;  %v4058_v4 = vrot.slane %v6118_v15, 1  ;;  %v6120_v54 = vld [vmem:[%s6260_s15 + $0xa8] sm:$0xff]  ;;  %v6121_v16 = vld [vmem:[%s6260_s15 + $0xb0] sm:$0xff] }
 0x353   : > { %v3672_v31 = vadd.f32 %v7470_v17, %v3636_v5  ;;  %v3637_v59 = vmul.f32 %v5873_v53, %v7464_v0  ;;  %5770 = vmatprep.mubr.bf16.mxu0 %v3752_v32  ;;  %v6102_v0 = vld [vmem:[%s6260_s15 + $0x18] sm:$0xff]  ;;  %v4053_v30 = vrot.slane %v6119_v19, 1  ;;  %v4065_v60 = vrot.slane %v6120_v54, 1 }
 0x354   : > { %v3675_v33 = vadd.f32 %v7470_v17, %v3639_v48  ;;  %5771 = vmatmul.mubr.bf16.gmra.mrb[160].mxu0 %v3753_v50  ;;  %v4780_v58 = vclamps-f32 %v3674_v11, 1.0  ;;  %v4035_v52 = vrot.slane %v6102_v0, 1  ;;  %v4066_v50 = vrot.slane %v6121_v16, 1  ;;  %v6122_v48 = vld [vmem:[%s6260_s15 + $0x90] sm:$0xff] }
 0x355   : > { %v3673_v56 = vadd.f32 %v7470_v17, %v3637_v59  ;;  %v4778_v8 = vclamps-f32 %v3672_v31, 1.0  ;;  %v6104_v17 = vld [vmem:[%s6260_s15] sm:$0xff]  ;;  %v7615_v5 = vsel %vm2984_vm6, %v4050_v34, %v4051_v10  ;;  %v7618_v53 = vsel %vm2984_vm6, %v4056_v51, %v4058_v4  ;;  %v6123_v59 = vld [vmem:[%s6260_s15 + $0x98] sm:$0xff] }
 0x356   : > { %v4781_v57 = vclamps-f32 %v3675_v33, 1.0  ;;  %v7570_v35 = vsel %vm2984_vm6, %v4035_v52, %v4036_v37  ;;  %v4030_v61 = vrot.slane %v6104_v17, 1  ;;  %v7621_v32 = vsel %vm2984_vm6, %v4051_v10, %v4053_v30  ;;  %v6137_v51 = vld [vmem:[%s6260_s15 + $0x100] sm:$0xff]  ;;  %v6138_v34 = vld [vmem:[%s6260_s15 + $0x138] sm:$0xff] }
 0x357   : > { %v4779_v20 = vclamps-f32 %v3673_v56, 1.0  ;;  %v7624_v11 = vsel %vm2984_vm6, %v4065_v60, %v4066_v50  ;;  %v4060_v31 = vrot.slane %v6122_v48, 1  ;;  %v4061_v33 = vrot.slane %v6123_v59, 1  ;;  %v6124_v56 = vld [vmem:[%s6260_s15 + $0xb8] sm:$0xff]  ;;  %v6139_v10 = vld [vmem:[%s6260_s15 + $0x140] sm:$0xff] }
 0x358   : > { %v3755_v44 = vpack.c.bf16 %v4781_v57, %v4780_v58  ;;  %v7579_v62 = vsel %vm2984_vm6, %v4030_v61, %v4031_v24  ;;  %v4068_v58 = vrot.slane %v6124_v56, 1  ;;  %v6125_v57 = vld [vmem:[%s6260_s15 + $0xa0] sm:$0xff]  ;;  %v6129_v24 = vld [vmem:[%s6260_s15 + $0xc8] sm:$0xff]  ;;  %v4073_v3 = vrot.slane %v6131_v18, 1 }
 0x359   : > { %v3754_v46 = vpack.c.bf16 %v4779_v20, %v4778_v8  ;;  %v4063_v8 = vrot.slane %v6125_v57, 1  ;;  %v6126_v20 = vld [vmem:[%s6260_s15 + $0xd8] sm:$0xff]  ;;  %v7633_v52 = vsel %vm2984_vm6, %v4060_v31, %v4061_v33  ;;  %v6128_v61 = vld [vmem:[%s6260_s15 + $0xc0] sm:$0xff]  ;;  %v4071_v28 = vrot.slane %v6129_v24, 1  ;;  %v6142_v31 = vld [vmem:[%s6260_s15 + $0x148] sm:$0xff] }
 0x35a   : > { %v7636_v13 = vsel %vm2984_vm6, %v4066_v50, %v4068_v58  ;;  %v4070_v1 = vrot.slane %v6128_v61, 1  ;;  %v4085_v23 = vrot.slane %v6132_v26, 1  ;;  %v4086_v43 = vrot.slane %v6133_v42, 1  ;;  %v6140_v60 = vld [vmem:[%s6260_s15 + $0x120] sm:$0xff]  ;;  %v6141_v50 = vld [vmem:[%s6260_s15 + $0x128] sm:$0xff] }
 0x35b   : > { %5774 = vmatprep.mubr.bf16.mxu0 %v3754_v46  ;;  %v6127_v46 = vld [vmem:[%s6260_s15 + $0xe0] sm:$0xff]  ;;  %v7639_v37 = vsel %vm2984_vm6, %v4061_v33, %v4063_v8  ;;  %v7657_v40 = vsel %vm2984_vm6, %v4071_v28, %v4073_v3  ;;  %v4080_v39 = vrot.slane %v6134_v38, 1  ;;  %v4081_v29 = vrot.slane %v6135_v22, 1  ;;  %v6143_v33 = vld [vmem:[%s6260_s15 + $0x130] sm:$0xff]  ;;  %v6144_v58 = vld [vmem:[%s6260_s15 + $0x168] sm:$0xff] }
 0x35c   : > { %5775 = vmatmul.mubr.bf16.gmra.mrb[164].mxu0 %v3755_v44  ;;  %v4075_v44 = vrot.slane %v6126_v20, 1  ;;  %v4076_v0 = vrot.slane %v6127_v46, 1  ;;  %v7651_v36 = vsel %vm2984_vm6, %v4070_v1, %v4071_v28  ;;  %v7660_v55 = vsel %vm2984_vm6, %v4085_v23, %v4086_v43  ;;  %v6145_v8 = vld [vmem:[%s6260_s15 + $0x170] sm:$0xff]  ;;  %v6147_v28 = vld [vmem:[%s6260_s15 + $0x158] sm:$0xff]  ;;  %v6149_v3 = vld [vmem:[%s6260_s15 + $0x160] sm:$0xff] }
 0x35d   : > { %v4088_v2 = vrot.slane %v6136_v12, 1  ;;  %v4083_v6 = vrot.slane %v6137_v51, 1  ;;  %v4095_v45 = vrot.slane %v6138_v34, 1  ;;  %v4096_v15 = vrot.slane %v6139_v10, 1  ;;  %v6146_v1 = vld [vmem:[%s6260_s15 + $0x150] sm:$0xff] }
 0x35e   : > { %v7642_v17 = vsel %vm2984_vm6, %v4075_v44, %v4076_v0  ;;  %v7654_v21 = vsel %vm2984_vm6, %v4076_v0, %v4078_v47  ;;  %v7669_v4 = vsel %vm2984_vm6, %v4080_v39, %v4081_v29  ;;  %v4090_v16 = vrot.slane %v6140_v60, 1  ;;  %v6148_v47 = vld [vmem:[%s6260_s15 + $0x178] sm:$0xff]  ;;  %v7714_v38 = vld [vmem:[%s7870_s6 + $0x4] ss:$0 sm:$0xff]  ;;  %v7719_v39 = vld [vmem:[%s7870_s6 + $0x5] ss:$0 sm:$0xff] }
 0x35f   : > { %v7672_v19 = vsel %vm2984_vm6, %v4086_v43, %v4088_v2  ;;  %v7675_v30 = vsel %vm2984_vm6, %v4081_v29, %v4083_v6  ;;  %v7678_v54 = vsel %vm2984_vm6, %v4095_v45, %v4096_v15  ;;  %v4091_v48 = vrot.slane %v6141_v50, 1  ;;  %s4794_s15 = sshll.u32 %s7881_s24, 8 }
 0x360   : > { %v4098_v59 = vrot.slane %v6142_v31, 1  ;;  %v4093_v56 = vrot.slane %v6143_v33, 1  ;;  %v4105_v57 = vrot.slane %v6144_v58, 1  ;;  %v4106_v20 = vrot.slane %v6145_v8, 1  ;;  %s7729_s11 = scalar_lea.vmem %s7871_s7, %s4794_s15 }
 0x361   : > { %v7687_v44 = vsel %vm2984_vm6, %v4090_v16, %v4091_v48  ;;  %v4100_v24 = vrot.slane %v6146_v1, 1  ;;  %v4101_v7 = vrot.slane %v6147_v28, 1  ;;  %v4108_v18 = vrot.slane %v6148_v47, 1 }
 0x362   : > { %v7690_v46 = vsel %vm2984_vm6, %v4096_v15, %v4098_v59  ;;  %v7693_v0 = vsel %vm2984_vm6, %v4091_v48, %v4093_v56  ;;  %v7696_v61 = vsel %vm2984_vm6, %v4105_v57, %v4106_v20  ;;  %v4103_v26 = vrot.slane %v6149_v3, 1 }
 0x363   : > { %v7703_v23 = vsel %vm2984_vm6, %v4100_v24, %v4101_v7  ;;  %v7706_v42 = vsel %vm2984_vm6, %v4106_v20, %v4108_v18 }
 0x364   : > { %v7709_v43 = vsel %vm2984_vm6, %v4101_v7, %v4103_v26 }
 0x3f7   : > { %v5748_v22 = vpop.f32.mrb[136].mxu0 }
 0x3f8   : > { %v4148_v29 = vmul.f32 %v5748_v22, %v7714_v38  ;;  %v3854_v12 = vpop.f32.mrb[137].mxu0 }
 0x3f9   : > { %v4146_v2 = vmul.f32 %v7714_v38, %v3854_v12  ;;  %v5749_v51 = vpop.f32.mrb[138].mxu0 }
 0x3fa   : > { %v4184_v6 = vadd.f32 %v7719_v39, %v4148_v29  ;;  %v4149_v34 = vmul.f32 %v5749_v51, %v7714_v38  ;;  %v3857_v45 = vpop.f32.mrb[139].mxu0 }
 0x3fb   : > { %v4182_v10 = vadd.f32 %v7719_v39, %v4146_v2  ;;  %v4147_v15 = vmul.f32 %v7714_v38, %v3857_v45 }
 0x3fc   : > { %v4216_v60 = vadd.f32 %v4184_v6, %v7570_v35  ;;  %v4185_v16 = vadd.f32 %v7719_v39, %v4149_v34 }
 0x3fd   : > { %v4214_v50 = vadd.f32 %v4182_v10, %v7579_v62  ;;  %v4183_v48 = vadd.f32 %v7719_v39, %v4147_v15 }
 0x3fe   : > { %4248 = vst [vmem:[%s7729_s11 + $0x10] sm:$0xff] %v4216_v60  ;;  %v4217_v31 = vadd.f32 %v4185_v16, %v7582_v9 }
 0x3ff   : > { %4246 = vst [vmem:[%s7729_s11] sm:$0xff] %v4214_v50  ;;  %v4215_v59 = vadd.f32 %v4183_v48, %v7585_v14  ;;  %v5752_v33 = vpop.f32.mrb[140].mxu0 }
 0x400   : > { %4249 = vst [vmem:[%s7729_s11 + $0x18] sm:$0xff] %v4217_v31  ;;  %v4152_v56 = vmul.f32 %v5752_v33, %v7714_v38  ;;  %v3870_v58 = vpop.f32.mrb[141].mxu0 }
 0x401   : > { %4247 = vst [vmem:[%s7729_s11 + $0x8] sm:$0xff] %v4215_v59  ;;  %v4150_v35 = vmul.f32 %v7714_v38, %v3870_v58  ;;  %v5753_v62 = vpop.f32.mrb[142].mxu0 }
 0x402   : > { %v4188_v57 = vadd.f32 %v7719_v39, %v4152_v56  ;;  %v4153_v8 = vmul.f32 %v5753_v62, %v7714_v38  ;;  %v3873_v9 = vpop.f32.mrb[143].mxu0 }
 0x403   : > { %v4186_v14 = vadd.f32 %v7719_v39, %v4150_v35  ;;  %v4151_v20 = vmul.f32 %v7714_v38, %v3873_v9 }
 0x404   : > { %v4220_v1 = vadd.f32 %v4188_v57, %v7588_v27  ;;  %v4189_v24 = vadd.f32 %v7719_v39, %v4153_v8 }
 0x405   : > { %v4218_v28 = vadd.f32 %v4186_v14, %v7597_v49  ;;  %v4187_v7 = vadd.f32 %v7719_v39, %v4151_v20 }
 0x406   : > { %4252 = vst [vmem:[%s7729_s11 + $0x30] sm:$0xff] %v4220_v1  ;;  %v4221_v47 = vadd.f32 %v4189_v24, %v7600_v25 }
 0x407   : > { %4250 = vst [vmem:[%s7729_s11 + $0x20] sm:$0xff] %v4218_v28  ;;  %v4219_v18 = vadd.f32 %v4187_v7, %v7603_v41  ;;  %v5756_v3 = vpop.f32.mrb[144].mxu0 }
 0x408   : > { %4253 = vst [vmem:[%s7729_s11 + $0x38] sm:$0xff] %v4221_v47  ;;  %v4156_v26 = vmul.f32 %v5756_v3, %v7714_v38  ;;  %v3886_v22 = vpop.f32.mrb[145].mxu0 }
 0x409   : > { %4251 = vst [vmem:[%s7729_s11 + $0x28] sm:$0xff] %v4219_v18  ;;  %v4154_v27 = vmul.f32 %v7714_v38, %v3886_v22  ;;  %v5757_v49 = vpop.f32.mrb[146].mxu0 }
 0x40a   : > { %v4192_v29 = vadd.f32 %v7719_v39, %v4156_v26  ;;  %v4157_v12 = vmul.f32 %v5757_v49, %v7714_v38  ;;  %v3889_v25 = vpop.f32.mrb[147].mxu0 }
 0x40b   : > { %v4190_v41 = vadd.f32 %v7719_v39, %v4154_v27  ;;  %v4155_v2 = vmul.f32 %v7714_v38, %v3889_v25 }
 0x40c   : > { %v4224_v51 = vadd.f32 %v4192_v29, %v7606_v63  ;;  %v4193_v6 = vadd.f32 %v7719_v39, %v4157_v12 }
 0x40d   : > { %v4222_v34 = vadd.f32 %v4190_v41, %v7615_v5  ;;  %v4191_v45 = vadd.f32 %v7719_v39, %v4155_v2 }
 0x40e   : > { %4256 = vst [vmem:[%s7729_s11 + $0x50] sm:$0xff] %v4224_v51  ;;  %v4225_v10 = vadd.f32 %v4193_v6, %v7618_v53 }
 0x40f   : > { %4254 = vst [vmem:[%s7729_s11 + $0x40] sm:$0xff] %v4222_v34  ;;  %v4223_v15 = vadd.f32 %v4191_v45, %v7621_v32  ;;  %v5760_v60 = vpop.f32.mrb[148].mxu0 }
 0x410   : > { %4257 = vst [vmem:[%s7729_s11 + $0x58] sm:$0xff] %v4225_v10  ;;  %v4160_v16 = vmul.f32 %v5760_v60, %v7714_v38  ;;  %v3902_v50 = vpop.f32.mrb[149].mxu0 }
 0x411   : > { %4255 = vst [vmem:[%s7729_s11 + $0x48] sm:$0xff] %v4223_v15  ;;  %v4158_v63 = vmul.f32 %v7714_v38, %v3902_v50  ;;  %v5761_v5 = vpop.f32.mrb[150].mxu0 }
 0x412   : > { %v4196_v48 = vadd.f32 %v7719_v39, %v4160_v16  ;;  %v4161_v31 = vmul.f32 %v5761_v5, %v7714_v38  ;;  %v3905_v53 = vpop.f32.mrb[151].mxu0 }
 0x413   : > { %v4194_v32 = vadd.f32 %v7719_v39, %v4158_v63  ;;  %v4159_v59 = vmul.f32 %v7714_v38, %v3905_v53 }
 0x414   : > { %v4228_v33 = vadd.f32 %v4196_v48, %v7624_v11  ;;  %v4197_v56 = vadd.f32 %v7719_v39, %v4161_v31 }
 0x415   : > { %v4226_v58 = vadd.f32 %v4194_v32, %v7633_v52  ;;  %v4195_v35 = vadd.f32 %v7719_v39, %v4159_v59 }
 0x416   : > { %4260 = vst [vmem:[%s7729_s11 + $0x70] sm:$0xff] %v4228_v33  ;;  %v4229_v62 = vadd.f32 %v4197_v56, %v7636_v13 }
 0x417   : > { %4258 = vst [vmem:[%s7729_s11 + $0x60] sm:$0xff] %v4226_v58  ;;  %v4227_v57 = vadd.f32 %v4195_v35, %v7639_v37  ;;  %v5764_v8 = vpop.f32.mrb[152].mxu0 }
 0x418   : > { %4261 = vst [vmem:[%s7729_s11 + $0x78] sm:$0xff] %v4229_v62  ;;  %v4164_v9 = vmul.f32 %v5764_v8, %v7714_v38  ;;  %v3918_v14 = vpop.f32.mrb[153].mxu0 }
 0x419   : > { %4259 = vst [vmem:[%s7729_s11 + $0x68] sm:$0xff] %v4227_v57  ;;  %v4162_v11 = vmul.f32 %v7714_v38, %v3918_v14  ;;  %v5765_v52 = vpop.f32.mrb[154].mxu0 }
 0x41a   : > { %v4200_v20 = vadd.f32 %v7719_v39, %v4164_v9  ;;  %v4165_v1 = vmul.f32 %v5765_v52, %v7714_v38  ;;  %v3921_v13 = vpop.f32.mrb[155].mxu0 }
 0x41b   : > { %v4198_v37 = vadd.f32 %v7719_v39, %v4162_v11  ;;  %v4163_v24 = vmul.f32 %v7714_v38, %v3921_v13 }
 0x41c   : > { %v4232_v28 = vadd.f32 %v4200_v20, %v7642_v17  ;;  %v4201_v7 = vadd.f32 %v7719_v39, %v4165_v1 }
 0x41d   : > { %v4230_v47 = vadd.f32 %v4198_v37, %v7651_v36  ;;  %v4199_v18 = vadd.f32 %v7719_v39, %v4163_v24 }
 0x41e   : > { %4264 = vst [vmem:[%s7729_s11 + $0x90] sm:$0xff] %v4232_v28  ;;  %v4233_v3 = vadd.f32 %v4201_v7, %v7654_v21 }
 0x41f   : > { %4262 = vst [vmem:[%s7729_s11 + $0x80] sm:$0xff] %v4230_v47  ;;  %v4231_v26 = vadd.f32 %v4199_v18, %v7657_v40  ;;  %v5768_v22 = vpop.f32.mrb[156].mxu0 }
 0x420   : > { %4265 = vst [vmem:[%s7729_s11 + $0x98] sm:$0xff] %v4233_v3  ;;  %v4168_v27 = vmul.f32 %v5768_v22, %v7714_v38  ;;  %v3934_v49 = vpop.f32.mrb[157].mxu0 }
 0x421   : > { %4263 = vst [vmem:[%s7729_s11 + $0x88] sm:$0xff] %v4231_v26  ;;  %v4166_v17 = vmul.f32 %v7714_v38, %v3934_v49  ;;  %v5769_v36 = vpop.f32.mrb[158].mxu0 }
 0x422   : > { %v4204_v29 = vadd.f32 %v7719_v39, %v4168_v27  ;;  %v4169_v12 = vmul.f32 %v5769_v36, %v7714_v38  ;;  %v3937_v21 = vpop.f32.mrb[159].mxu0 }
 0x423   : > { %v4202_v40 = vadd.f32 %v7719_v39, %v4166_v17  ;;  %v4167_v25 = vmul.f32 %v7714_v38, %v3937_v21 }
 0x424   : > { %v4236_v41 = vadd.f32 %v4204_v29, %v7660_v55  ;;  %v4205_v2 = vadd.f32 %v7719_v39, %v4169_v12 }
 0x425   : > { %v4234_v51 = vadd.f32 %v4202_v40, %v7669_v4  ;;  %v4203_v6 = vadd.f32 %v7719_v39, %v4167_v25 }
 0x426   : > { %4268 = vst [vmem:[%s7729_s11 + $0xb0] sm:$0xff] %v4236_v41  ;;  %v4237_v34 = vadd.f32 %v4205_v2, %v7672_v19 }
 0x427   : > { %4266 = vst [vmem:[%s7729_s11 + $0xa0] sm:$0xff] %v4234_v51  ;;  %v4235_v45 = vadd.f32 %v4203_v6, %v7675_v30  ;;  %v5772_v10 = vpop.f32.mrb[160].mxu0 }
 0x428   : > { %4269 = vst [vmem:[%s7729_s11 + $0xb8] sm:$0xff] %v4237_v34  ;;  %v4172_v15 = vmul.f32 %v5772_v10, %v7714_v38  ;;  %v3950_v60 = vpop.f32.mrb[161].mxu0 }
 0x429   : > { %4267 = vst [vmem:[%s7729_s11 + $0xa8] sm:$0xff] %v4235_v45  ;;  %v4170_v55 = vmul.f32 %v7714_v38, %v3950_v60  ;;  %v5773_v4 = vpop.f32.mrb[162].mxu0 }
 0x42a   : > { %v4208_v16 = vadd.f32 %v7719_v39, %v4172_v15  ;;  %v4173_v50 = vmul.f32 %v5773_v4, %v7714_v38  ;;  %v3953_v19 = vpop.f32.mrb[163].mxu0 }
 0x42b   : > { %v4206_v30 = vadd.f32 %v7719_v39, %v4170_v55  ;;  %v4171_v63 = vmul.f32 %v7714_v38, %v3953_v19 }
 0x42c   : > { %v4240_v5 = vadd.f32 %v4208_v16, %v7678_v54  ;;  %v4209_v48 = vadd.f32 %v7719_v39, %v4173_v50 }
 0x42d   : > { %v4238_v31 = vadd.f32 %v4206_v30, %v7687_v44  ;;  %v4207_v53 = vadd.f32 %v7719_v39, %v4171_v63 }
 0x42e   : > { %4272 = vst [vmem:[%s7729_s11 + $0xd0] sm:$0xff] %v4240_v5  ;;  %v4241_v32 = vadd.f32 %v4209_v48, %v7690_v46 }
 0x42f   : > { %4270 = vst [vmem:[%s7729_s11 + $0xc0] sm:$0xff] %v4238_v31  ;;  %v4239_v59 = vadd.f32 %v4207_v53, %v7693_v0  ;;  %v5776_v33 = vpop.f32.mrb[164].mxu0 }
 0x430   : > { %4273 = vst [vmem:[%s7729_s11 + $0xd8] sm:$0xff] %v4241_v32  ;;  %v4176_v56 = vmul.f32 %v5776_v33, %v7714_v38  ;;  %v3966_v58 = vpop.f32.mrb[165].mxu0 }
 0x431   : > { %4271 = vst [vmem:[%s7729_s11 + $0xc8] sm:$0xff] %v4239_v59  ;;  %v4174_v54 = vmul.f32 %v7714_v38, %v3966_v58  ;;  %v5777_v44 = vpop.f32.mrb[166].mxu0 }
 0x432   : > { %v4212_v35 = vadd.f32 %v7719_v39, %v4176_v56  ;;  %v4177_v46 = vmul.f32 %v5777_v44, %v7714_v38  ;;  %v3969_v62 = vpop.f32.mrb[167].mxu0 }
 0x433   : > { %v4210_v0 = vadd.f32 %v7719_v39, %v4174_v54  ;;  %v4175_v57 = vmul.f32 %v7714_v38, %v3969_v62 }
 0x434   : > { %v4244_v8 = vadd.f32 %v4212_v35, %v7696_v61  ;;  %v4213_v9 = vadd.f32 %v7719_v39, %v4177_v46 }
 0x435   : > { %v4242_v14 = vadd.f32 %v4210_v0, %v7703_v23  ;;  %v4211_v11 = vadd.f32 %v7719_v39, %v4175_v57 }
 0x436   : > { %4276 = vst [vmem:[%s7729_s11 + $0xf0] sm:$0xff] %v4244_v8  ;;  %v4245_v52 = vadd.f32 %v4213_v9, %v7706_v42 }
 0x437   : > { %4274 = vst [vmem:[%s7729_s11 + $0xe0] sm:$0xff] %v4242_v14  ;;  %v4243_v20 = vadd.f32 %v4211_v11, %v7709_v43 }
 0x438   : > { %4277 = vst [vmem:[%s7729_s11 + $0xf8] sm:$0xff] %v4245_v52 }
 0x439   : > { %4275 = vst [vmem:[%s7729_s11 + $0xe8] sm:$0xff] %v4243_v20 }
 0x43a PF: > { %s17_s26 = sadd.s32 1, %s6172_s26   ;;  %s7876_s24 = smov %s6168_s25 }
 0x43b   : > { %p14_p5 = scmp.ge.s32.totalorder %s17_s26, 4   ;;  %s7877_s25 = smov %s7879_s27 }
 0x43d   :  { %16 = sbr.rel (!%p14_p5) target bundleno = 2 (0x2), region = 88 }

</bundles_post_ra>
